<compile_context>
chip_gen: v6e
topology: v6e:2x2x1
jax: 0.10.0
libtpu: 0.0.40
codegen_flags: <defaults>
</compile_context>

<pallas_src>
import jax
import jax.numpy as jnp
from jax.experimental import pallas as pl
from jax.experimental.pallas import tpu as pltpu

T = 22          # sequence length (fixed by the module's .view(-1, 22, 400))
IN = 400        # input feature size
H = 64          # LSTM hidden size
G = 4 * H       # 256 = stacked gates, PyTorch order [i | f | g | o]


def _bilstm_kernel(x_ref,                      # (T, TB, IN)
                   wih_f_ref, whh_f_ref, b_f_ref,    # (IN,G), (H,G), (1,G)
                   wih_b_ref, whh_b_ref, b_b_ref,    # reverse direction
                   wfc_ref, bfc_ref,           # (H, Cpad), (1, Cpad)
                   logits_ref,                 # (TB, Cpad)  out
                   hn_ref,                     # (2, TB, H)  out (mirrors torch ht)
                   xp_f_ref, xp_b_ref):        # VMEM scratch (T*TB, G) each
    tb = x_ref.shape[1]

    # ---- 1) Batched input projection for every timestep of this batch tile:
    #         one big MXU matmul per direction (M = T*TB, K = 400, N = 256).
    #         (T, TB, 400) -> (T*TB, 400) is a pure leading-dim merge and
    #         TB % 8 == 0, so no (8,128) tile is split.
    # TODO(synk): optionally cast x / W_ih to bf16 (f32 accumulation) for
    # v6e/v7x MXU peak once the accuracy budget is confirmed.
    x_all = x_ref[...].reshape(T * tb, IN)
    xp_f_ref[...] = (jnp.dot(x_all, wih_f_ref[...],
                             preferred_element_type=jnp.float32) + b_f_ref[...])
    xp_b_ref[...] = (jnp.dot(x_all, wih_b_ref[...],
                             preferred_element_type=jnp.float32) + b_b_ref[...])

    whh_f = whh_f_ref[...]
    whh_b = whh_b_ref[...]

    def lstm_step(xp_ref, whh, t, h, c):
        # gates: (TB, 4H) = precomputed x-projection + recurrent projection
        gates = (xp_ref[pl.ds(t * tb, tb), :]
                 + jnp.dot(h, whh, preferred_element_type=jnp.float32))
        i = jax.nn.sigmoid(gates[:, 0 * H:1 * H])
        f = jax.nn.sigmoid(gates[:, 1 * H:2 * H])
        g = jnp.tanh(gates[:, 2 * H:3 * H])
        o = jax.nn.sigmoid(gates[:, 3 * H:4 * H])
        c = f * c + i * g
        h = o * jnp.tanh(c)
        return h, c

    zeros = jnp.zeros((tb, H), jnp.float32)

    # ---- 2) forward direction: t = 0 .. T-1  (statically unrolled, T = 22)
    h_f, c_f = zeros, zeros
    for t in range(T):
        h_f, c_f = lstm_step(xp_f_ref, whh_f, t, h_f, c_f)

    # ---- 3) reverse direction: t = T-1 .. 0
    h_b, c_b = zeros, zeros
    for t in range(T - 1, -1, -1):
        h_b, c_b = lstm_step(xp_b_ref, whh_b, t, h_b, c_b)

    # ---- 4) h_n (mirrors torch ht) + fused classifier on ht[-1] (= reverse dir)
    hn_ref[0, :, :] = h_f
    hn_ref[1, :, :] = h_b
    logits_ref[...] = (jnp.dot(h_b, wfc_ref[...],
                               preferred_element_type=jnp.float32)
                       + bfc_ref[...]).astype(logits_ref.dtype)


def _round_up(n, m):
    return ((n + m - 1) // m) * m


def widar_bilstm_forward(x, params, num_classes, *, block_b=64):
    """Fused Pallas forward of Widar_BiLSTM.  Returns (logits, h_n).

    x:      anything reshapeable to (B, 22, 400)  (mirrors torch .view)
    params: (wih_f, whh_f, b_f, wih_b, whh_b, b_b, wfc, bfc) with
            wih_*: (400, 256) = weight_ih_l0{,_reverse}.T
            whh_*: (64, 256)  = weight_hh_l0{,_reverse}.T
            b_*:   (1, 256)   = bias_ih + bias_hh
            wfc:   (64, C)    = fc.weight.T ;  bfc: (1, C) = fc.bias
    """
    wih_f, whh_f, b_f, wih_b, whh_b, b_b, wfc, bfc = params

    x = x.reshape(-1, T, IN).astype(jnp.float32)       # torch .view(-1, 22, 400)
    batch = x.shape[0]

    # Batch tile: sublane-aligned (multiple of 8), capped so the double-buffered
    # x tile + xp scratch + resident weights stay inside the tightest scoped
    # VMEM budgets (v5e 16 MiB default scoped, v7x 64 MiB physical).
    tb = min(block_b, _round_up(batch, 8))
    b_pad = _round_up(batch, tb)

    # time-major (T, B_pad, 400), like the module's permute(1, 0, 2)
    x_tm = jnp.transpose(jnp.pad(x, ((0, b_pad - batch), (0, 0), (0, 0))),
                         (1, 0, 2))

    # Lane-dense logits: pad num_classes to a multiple of 128 so the output
    # store is a full-width vst; sliced back below.
    c_pad = _round_up(num_classes, 128)
    wfc_p = jnp.pad(wfc.astype(jnp.float32), ((0, 0), (0, c_pad - num_classes)))
    bfc_p = jnp.pad(bfc.reshape(1, -1).astype(jnp.float32),
                    ((0, 0), (0, c_pad - num_classes)))

    grid = (b_pad // tb,)

    flops = (2 * 2 * b_pad * T * IN * G        # input projections (both dirs)
             + 2 * 2 * b_pad * T * H * G       # recurrent projections
             + 2 * b_pad * H * c_pad)          # classifier
    transcendentals = 2 * b_pad * T * H * 5    # 3 sigmoid + 2 tanh per step
    bytes_accessed = 4 * (b_pad * T * IN
                          + 2 * (IN * G + H * G + G)
                          + H * c_pad + c_pad
                          + b_pad * c_pad + 2 * b_pad * H)

    logits_p, h_n = pl.pallas_call(
        _bilstm_kernel,
        out_shape=(jax.ShapeDtypeStruct((b_pad, c_pad), jnp.float32),
                   jax.ShapeDtypeStruct((2, b_pad, H), jnp.float32)),
        grid_spec=pltpu.PrefetchScalarGridSpec(
            num_scalar_prefetch=0,
            grid=grid,
            in_specs=[
                pl.BlockSpec((T, tb, IN), lambda i: (0, i, 0)),   # x (batch-tiled)
                pl.BlockSpec((IN, G), lambda i: (0, 0)),          # W_ih fwd (resident)
                pl.BlockSpec((H, G), lambda i: (0, 0)),           # W_hh fwd
                pl.BlockSpec((1, G), lambda i: (0, 0)),           # bias fwd
                pl.BlockSpec((IN, G), lambda i: (0, 0)),          # W_ih bwd
                pl.BlockSpec((H, G), lambda i: (0, 0)),           # W_hh bwd
                pl.BlockSpec((1, G), lambda i: (0, 0)),           # bias bwd
                pl.BlockSpec((H, c_pad), lambda i: (0, 0)),       # fc weight
                pl.BlockSpec((1, c_pad), lambda i: (0, 0)),       # fc bias
            ],
            out_specs=[
                pl.BlockSpec((tb, c_pad), lambda i: (i, 0)),      # logits (lane-dense)
                pl.BlockSpec((2, tb, H), lambda i: (0, i, 0)),    # h_n (diagnostic)
            ],
            scratch_shapes=[
                pltpu.VMEM((T * tb, G), jnp.float32),             # x-proj fwd
                pltpu.VMEM((T * tb, G), jnp.float32),             # x-proj bwd
            ],
        ),
        compiler_params=pltpu.CompilerParams(
            dimension_semantics=("parallel",),       # batch tiles are independent
            vmem_limit_bytes=32 * 1024 * 1024,       # safe across v5e..v7x budgets
        ),
        cost_estimate=pl.CostEstimate(flops=flops,
                                      transcendentals=transcendentals,
                                      bytes_accessed=bytes_accessed),
    )(x_tm, wih_f, whh_f, b_f, wih_b, whh_b, b_b, wfc_p, bfc_p)

    return logits_p[:batch, :num_classes], h_n[:, :batch, :]


# ---------------- pure-JAX reference (identical semantics) ----------------
def _lstm_dir_ref(x_tm, wih, whh, b, reverse):
    n = x_tm.shape[1]
    h = jnp.zeros((n, H), jnp.float32)
    c = jnp.zeros((n, H), jnp.float32)
    steps = range(T - 1, -1, -1) if reverse else range(T)
    for t in steps:
        gates = x_tm[t] @ wih + h @ whh + b
        i = jax.nn.sigmoid(gates[:, :H])
        f = jax.nn.sigmoid(gates[:, H:2 * H])
        g = jnp.tanh(gates[:, 2 * H:3 * H])
        o = jax.nn.sigmoid(gates[:, 3 * H:])
        c = f * c + i * g
        h = o * jnp.tanh(c)
    return h


if __name__ == "__main__":
    key = jax.random.PRNGKey(0)
    ks = jax.random.split(key, 9)

    num_classes = 6
    batch = 2
    # Widar CSI-style input: (batch, 22, 20, 20); the module views it as (-1, 22, 400).
    x = jax.random.normal(ks[0], (batch, T, 20, 20), dtype=jnp.float32)

    s = 1.0 / (H ** 0.5)    # torch default init scale for LSTM / Linear

    def uni(k, shape):
        return jax.random.uniform(k, shape, jnp.float32, -s, s)

    wih_f, whh_f, b_f = uni(ks[1], (IN, G)), uni(ks[2], (H, G)), uni(ks[3], (1, G))
    wih_b, whh_b, b_b = uni(ks[4], (IN, G)), uni(ks[5], (H, G)), uni(ks[6], (1, G))
    wfc, bfc = uni(ks[7], (H, num_classes)), uni(ks[8], (1, num_classes))
    params = (wih_f, whh_f, b_f, wih_b, whh_b, b_b, wfc, bfc)

    logits, h_n = widar_bilstm_forward(x, params, num_classes)
    jax.block_until_ready((logits, h_n))

    # Reference: same gate order (i|f|g|o), ht[-1] = reverse-direction final state.
    with jax.default_matmul_precision("highest"):
        x_tm = jnp.transpose(x.reshape(-1, T, IN), (1, 0, 2))
        h_f_ref = _lstm_dir_ref(x_tm, wih_f, whh_f, b_f, reverse=False)
        h_b_ref = _lstm_dir_ref(x_tm, wih_b, whh_b, b_b, reverse=True)
        logits_ref = h_b_ref @ wfc + bfc

    assert logits.shape == (batch, num_classes)
    # tolerance covers MXU pass-precision / transcendental implementation
    # differences between in-kernel math and the XLA reference
    assert jnp.allclose(h_n[0], h_f_ref, atol=2e-2, rtol=2e-2), "fwd hidden mismatch"
    assert jnp.allclose(h_n[1], h_b_ref, atol=2e-2, rtol=2e-2), "bwd hidden mismatch"
    assert jnp.allclose(logits, logits_ref, atol=2e-2, rtol=2e-2), "logits mismatch"
    print("KERNEL_OK")
</pallas_src>

<mosaic_0001>
module attributes {stable_mosaic.version = 11 : i64} {
  func.func @_bilstm_kernel(%arg0: i32, %arg1: memref<22x8x400xf32, #tpu.memory_space<vmem>>, %arg2: memref<400x256xf32, #tpu.memory_space<vmem>>, %arg3: memref<64x256xf32, #tpu.memory_space<vmem>>, %arg4: memref<1x256xf32, #tpu.memory_space<vmem>>, %arg5: memref<400x256xf32, #tpu.memory_space<vmem>>, %arg6: memref<64x256xf32, #tpu.memory_space<vmem>>, %arg7: memref<1x256xf32, #tpu.memory_space<vmem>>, %arg8: memref<64x128xf32, #tpu.memory_space<vmem>>, %arg9: memref<1x128xf32, #tpu.memory_space<vmem>>, %arg10: memref<8x128xf32, #tpu.memory_space<vmem>>, %arg11: memref<2x8x64xf32, #tpu.memory_space<vmem>>, %arg12: memref<176x256xf32, #tpu.memory_space<vmem>>, %arg13: memref<176x256xf32, #tpu.memory_space<vmem>>) attributes {dimension_semantics = [#tpu.dimension_semantics<parallel>], iteration_bounds = array<i64: 1>, scalar_prefetch = 0 : i64, scratch_operands = 2 : i64, tpu.core_type = #tpu.core_type<tc>, window_params = [{transform_indices = @transform_0, window_bounds = array<i64: 22, 8, 400>}, {pipeline_mode = #tpu.pipeline_mode<synchronous>, transform_indices = @transform_1, window_bounds = array<i64: 400, 256>}, {pipeline_mode = #tpu.pipeline_mode<synchronous>, transform_indices = @transform_2, window_bounds = array<i64: 64, 256>}, {pipeline_mode = #tpu.pipeline_mode<synchronous>, transform_indices = @transform_3, window_bounds = array<i64: 1, 256>}, {pipeline_mode = #tpu.pipeline_mode<synchronous>, transform_indices = @transform_4, window_bounds = array<i64: 400, 256>}, {pipeline_mode = #tpu.pipeline_mode<synchronous>, transform_indices = @transform_5, window_bounds = array<i64: 64, 256>}, {pipeline_mode = #tpu.pipeline_mode<synchronous>, transform_indices = @transform_6, window_bounds = array<i64: 1, 256>}, {pipeline_mode = #tpu.pipeline_mode<synchronous>, transform_indices = @transform_7, window_bounds = array<i64: 64, 128>}, {pipeline_mode = #tpu.pipeline_mode<synchronous>, transform_indices = @transform_8, window_bounds = array<i64: 1, 128>}, {transform_indices = @transform_9, window_bounds = array<i64: 8, 128>}, {transform_indices = @transform_10, window_bounds = array<i64: 2, 8, 64>}]} {
    %c0 = arith.constant 0 : index
    %c0_0 = arith.constant 0 : index
    %c0_1 = arith.constant 0 : index
    %0 = vector.load %arg1[%c0, %c0_0, %c0_1] : memref<22x8x400xf32, #tpu.memory_space<vmem>>, vector<22x8x400xf32>
    %1 = vector.shape_cast %0 : vector<22x8x400xf32> to vector<176x400xf32>
    %c0_2 = arith.constant 0 : index
    %c0_3 = arith.constant 0 : index
    %2 = vector.load %arg2[%c0_2, %c0_3] : memref<400x256xf32, #tpu.memory_space<vmem>>, vector<400x256xf32>
    %cst = arith.constant dense<0.000000e+00> : vector<176x256xf32>
    %3 = tpu.matmul %1, %2, %cst {dimension_numbers = #tpu.dot_dimension_numbers<[1], [0], [0], [1], [0, 0, 1, 1], [], []>} : vector<176x400xf32>, vector<400x256xf32>, vector<176x256xf32> -> vector<176x256xf32>
    %c0_4 = arith.constant 0 : index
    %c0_5 = arith.constant 0 : index
    %4 = vector.load %arg4[%c0_4, %c0_5] : memref<1x256xf32, #tpu.memory_space<vmem>>, vector<1x256xf32>
    %5 = vector.broadcast %4 : vector<1x256xf32> to vector<176x256xf32>
    %6 = arith.addf %3, %5 : vector<176x256xf32>
    %c0_6 = arith.constant 0 : index
    %c0_7 = arith.constant 0 : index
    %7 = vector.load %arg12[%c0_6, %c0_7] : memref<176x256xf32, #tpu.memory_space<vmem>>, vector<176x256xf32>
    tpu.vector_store %arg12[%c0_6, %c0_7], %6 {strides = array<i32>} : memref<176x256xf32, #tpu.memory_space<vmem>>, vector<176x256xf32>,
    %c0_8 = arith.constant 0 : index
    %c0_9 = arith.constant 0 : index
    %8 = vector.load %arg5[%c0_8, %c0_9] : memref<400x256xf32, #tpu.memory_space<vmem>>, vector<400x256xf32>
    %cst_10 = arith.constant dense<0.000000e+00> : vector<176x256xf32>
    %9 = tpu.matmul %1, %8, %cst_10 {dimension_numbers = #tpu.dot_dimension_numbers<[1], [0], [0], [1], [0, 0, 1, 1], [], []>} : vector<176x400xf32>, vector<400x256xf32>, vector<176x256xf32> -> vector<176x256xf32>
    %c0_11 = arith.constant 0 : index
    %c0_12 = arith.constant 0 : index
    %10 = vector.load %arg7[%c0_11, %c0_12] : memref<1x256xf32, #tpu.memory_space<vmem>>, vector<1x256xf32>
    %11 = vector.broadcast %10 : vector<1x256xf32> to vector<176x256xf32>
    %12 = arith.addf %9, %11 : vector<176x256xf32>
    %c0_13 = arith.constant 0 : index
    %c0_14 = arith.constant 0 : index
    %13 = vector.load %arg13[%c0_13, %c0_14] : memref<176x256xf32, #tpu.memory_space<vmem>>, vector<176x256xf32>
    tpu.vector_store %arg13[%c0_13, %c0_14], %12 {strides = array<i32>} : memref<176x256xf32, #tpu.memory_space<vmem>>, vector<176x256xf32>,
    %c0_15 = arith.constant 0 : index
    %c0_16 = arith.constant 0 : index
    %14 = vector.load %arg3[%c0_15, %c0_16] : memref<64x256xf32, #tpu.memory_space<vmem>>, vector<64x256xf32>
    %c0_17 = arith.constant 0 : index
    %c0_18 = arith.constant 0 : index
    %15 = vector.load %arg6[%c0_17, %c0_18] : memref<64x256xf32, #tpu.memory_space<vmem>>, vector<64x256xf32>
    %cst_19 = arith.constant 0.000000e+00 : f32
    %16 = vector.broadcast %cst_19 : f32 to vector<8x64xf32>
    %c0_20 = arith.constant 0 : index
    %c0_21 = arith.constant 0 : index
    %17 = vector.load %arg12[%c0_20, %c0_21] : memref<176x256xf32, #tpu.memory_space<vmem>>, vector<8x256xf32>
    %cst_22 = arith.constant dense<0.000000e+00> : vector<8x256xf32>
    %18 = tpu.matmul %16, %14, %cst_22 {dimension_numbers = #tpu.dot_dimension_numbers<[1], [0], [0], [1], [0, 0, 1, 1], [], []>} : vector<8x64xf32>, vector<64x256xf32>, vector<8x256xf32> -> vector<8x256xf32>
    %19 = arith.addf %17, %18 : vector<8x256xf32>
    %20 = vector.extract_strided_slice %19 {offsets = [0, 0], sizes = [8, 64], strides = [1, 1]} : vector<8x256xf32> to vector<8x64xf32>
    %21 = arith.negf %20 : vector<8x64xf32>
    %22 = math.exp %21 : vector<8x64xf32>
    %cst_23 = arith.constant 1.000000e+00 : f32
    %23 = vector.broadcast %cst_23 : f32 to vector<8x64xf32>
    %24 = arith.addf %23, %22 : vector<8x64xf32>
    %25 = arith.divf %23, %24 : vector<8x64xf32>
    %26 = vector.extract_strided_slice %19 {offsets = [0, 64], sizes = [8, 64], strides = [1, 1]} : vector<8x256xf32> to vector<8x64xf32>
    %27 = arith.negf %26 : vector<8x64xf32>
    %28 = math.exp %27 : vector<8x64xf32>
    %cst_24 = arith.constant 1.000000e+00 : f32
    %29 = vector.broadcast %cst_24 : f32 to vector<8x64xf32>
    %30 = arith.addf %29, %28 : vector<8x64xf32>
    %31 = arith.divf %29, %30 : vector<8x64xf32>
    %32 = vector.extract_strided_slice %19 {offsets = [0, 128], sizes = [8, 64], strides = [1, 1]} : vector<8x256xf32> to vector<8x64xf32>
    %33 = math.tanh %32 : vector<8x64xf32>
    %34 = vector.extract_strided_slice %19 {offsets = [0, 192], sizes = [8, 64], strides = [1, 1]} : vector<8x256xf32> to vector<8x64xf32>
    %35 = arith.negf %34 : vector<8x64xf32>
    %36 = math.exp %35 : vector<8x64xf32>
    %cst_25 = arith.constant 1.000000e+00 : f32
    %37 = vector.broadcast %cst_25 : f32 to vector<8x64xf32>
    %38 = arith.addf %37, %36 : vector<8x64xf32>
    %39 = arith.divf %37, %38 : vector<8x64xf32>
    %40 = arith.mulf %31, %16 : vector<8x64xf32>
    %41 = arith.mulf %25, %33 : vector<8x64xf32>
    %42 = arith.addf %40, %41 : vector<8x64xf32>
    %43 = math.tanh %42 : vector<8x64xf32>
    %44 = arith.mulf %39, %43 : vector<8x64xf32>
    %c8 = arith.constant 8 : index
    %c0_26 = arith.constant 0 : index
    %45 = vector.load %arg12[%c8, %c0_26] : memref<176x256xf32, #tpu.memory_space<vmem>>, vector<8x256xf32>
    %cst_27 = arith.constant dense<0.000000e+00> : vector<8x256xf32>
    %46 = tpu.matmul %44, %14, %cst_27 {dimension_numbers = #tpu.dot_dimension_numbers<[1], [0], [0], [1], [0, 0, 1, 1], [], []>} : vector<8x64xf32>, vector<64x256xf32>, vector<8x256xf32> -> vector<8x256xf32>
    %47 = arith.addf %45, %46 : vector<8x256xf32>
    %48 = vector.extract_strided_slice %47 {offsets = [0, 0], sizes = [8, 64], strides = [1, 1]} : vector<8x256xf32> to vector<8x64xf32>
    %49 = arith.negf %48 : vector<8x64xf32>
    %50 = math.exp %49 : vector<8x64xf32>
    %cst_28 = arith.constant 1.000000e+00 : f32
    %51 = vector.broadcast %cst_28 : f32 to vector<8x64xf32>
    %52 = arith.addf %51, %50 : vector<8x64xf32>
    %53 = arith.divf %51, %52 : vector<8x64xf32>
    %54 = vector.extract_strided_slice %47 {offsets = [0, 64], sizes = [8, 64], strides = [1, 1]} : vector<8x256xf32> to vector<8x64xf32>
    %55 = arith.negf %54 : vector<8x64xf32>
    %56 = math.exp %55 : vector<8x64xf32>
    %cst_29 = arith.constant 1.000000e+00 : f32
    %57 = vector.broadcast %cst_29 : f32 to vector<8x64xf32>
    %58 = arith.addf %57, %56 : vector<8x64xf32>
    %59 = arith.divf %57, %58 : vector<8x64xf32>
    %60 = vector.extract_strided_slice %47 {offsets = [0, 128], sizes = [8, 64], strides = [1, 1]} : vector<8x256xf32> to vector<8x64xf32>
    %61 = math.tanh %60 : vector<8x64xf32>
    %62 = vector.extract_strided_slice %47 {offsets = [0, 192], sizes = [8, 64], strides = [1, 1]} : vector<8x256xf32> to vector<8x64xf32>
    %63 = arith.negf %62 : vector<8x64xf32>
    %64 = math.exp %63 : vector<8x64xf32>
    %cst_30 = arith.constant 1.000000e+00 : f32
    %65 = vector.broadcast %cst_30 : f32 to vector<8x64xf32>
    %66 = arith.addf %65, %64 : vector<8x64xf32>
    %67 = arith.divf %65, %66 : vector<8x64xf32>
    %68 = arith.mulf %59, %42 : vector<8x64xf32>
    %69 = arith.mulf %53, %61 : vector<8x64xf32>
    %70 = arith.addf %68, %69 : vector<8x64xf32>
    %71 = math.tanh %70 : vector<8x64xf32>
    %72 = arith.mulf %67, %71 : vector<8x64xf32>
    %c16 = arith.constant 16 : index
    %c0_31 = arith.constant 0 : index
    %73 = vector.load %arg12[%c16, %c0_31] : memref<176x256xf32, #tpu.memory_space<vmem>>, vector<8x256xf32>
    %cst_32 = arith.constant dense<0.000000e+00> : vector<8x256xf32>
    %74 = tpu.matmul %72, %14, %cst_32 {dimension_numbers = #tpu.dot_dimension_numbers<[1], [0], [0], [1], [0, 0, 1, 1], [], []>} : vector<8x64xf32>, vector<64x256xf32>, vector<8x256xf32> -> vector<8x256xf32>
    %75 = arith.addf %73, %74 : vector<8x256xf32>
    %76 = vector.extract_strided_slice %75 {offsets = [0, 0], sizes = [8, 64], strides = [1, 1]} : vector<8x256xf32> to vector<8x64xf32>
    %77 = arith.negf %76 : vector<8x64xf32>
    %78 = math.exp %77 : vector<8x64xf32>
    %cst_33 = arith.constant 1.000000e+00 : f32
    %79 = vector.broadcast %cst_33 : f32 to vector<8x64xf32>
    %80 = arith.addf %79, %78 : vector<8x64xf32>
    %81 = arith.divf %79, %80 : vector<8x64xf32>
    %82 = vector.extract_strided_slice %75 {offsets = [0, 64], sizes = [8, 64], strides = [1, 1]} : vector<8x256xf32> to vector<8x64xf32>
    %83 = arith.negf %82 : vector<8x64xf32>
    %84 = math.exp %83 : vector<8x64xf32>
    %cst_34 = arith.constant 1.000000e+00 : f32
    %85 = vector.broadcast %cst_34 : f32 to vector<8x64xf32>
    %86 = arith.addf %85, %84 : vector<8x64xf32>
    %87 = arith.divf %85, %86 : vector<8x64xf32>
    %88 = vector.extract_strided_slice %75 {offsets = [0, 128], sizes = [8, 64], strides = [1, 1]} : vector<8x256xf32> to vector<8x64xf32>
    %89 = math.tanh %88 : vector<8x64xf32>
    %90 = vector.extract_strided_slice %75 {offsets = [0, 192], sizes = [8, 64], strides = [1, 1]} : vector<8x256xf32> to vector<8x64xf32>
    %91 = arith.negf %90 : vector<8x64xf32>
    %92 = math.exp %91 : vector<8x64xf32>
    %cst_35 = arith.constant 1.000000e+00 : f32
    %93 = vector.broadcast %cst_35 : f32 to vector<8x64xf32>
    %94 = arith.addf %93, %92 : vector<8x64xf32>
    %95 = arith.divf %93, %94 : vector<8x64xf32>
    %96 = arith.mulf %87, %70 : vector<8x64xf32>
    %97 = arith.mulf %81, %89 : vector<8x64xf32>
    %98 = arith.addf %96, %97 : vector<8x64xf32>
    %99 = math.tanh %98 : vector<8x64xf32>
    %100 = arith.mulf %95, %99 : vector<8x64xf32>
    %c24 = arith.constant 24 : index
    %c0_36 = arith.constant 0 : index
    %101 = vector.load %arg12[%c24, %c0_36] : memref<176x256xf32, #tpu.memory_space<vmem>>, vector<8x256xf32>
    %cst_37 = arith.constant dense<0.000000e+00> : vector<8x256xf32>
    %102 = tpu.matmul %100, %14, %cst_37 {dimension_numbers = #tpu.dot_dimension_numbers<[1], [0], [0], [1], [0, 0, 1, 1], [], []>} : vector<8x64xf32>, vector<64x256xf32>, vector<8x256xf32> -> vector<8x256xf32>
    %103 = arith.addf %101, %102 : vector<8x256xf32>
    %104 = vector.extract_strided_slice %103 {offsets = [0, 0], sizes = [8, 64], strides = [1, 1]} : vector<8x256xf32> to vector<8x64xf32>
    %105 = arith.negf %104 : vector<8x64xf32>
    %106 = math.exp %105 : vector<8x64xf32>
    %cst_38 = arith.constant 1.000000e+00 : f32
    %107 = vector.broadcast %cst_38 : f32 to vector<8x64xf32>
    %108 = arith.addf %107, %106 : vector<8x64xf32>
    %109 = arith.divf %107, %108 : vector<8x64xf32>
    %110 = vector.extract_strided_slice %103 {offsets = [0, 64], sizes = [8, 64], strides = [1, 1]} : vector<8x256xf32> to vector<8x64xf32>
    %111 = arith.negf %110 : vector<8x64xf32>
    %112 = math.exp %111 : vector<8x64xf32>
    %cst_39 = arith.constant 1.000000e+00 : f32
    %113 = vector.broadcast %cst_39 : f32 to vector<8x64xf32>
    %114 = arith.addf %113, %112 : vector<8x64xf32>
    %115 = arith.divf %113, %114 : vector<8x64xf32>
    %116 = vector.extract_strided_slice %103 {offsets = [0, 128], sizes = [8, 64], strides = [1, 1]} : vector<8x256xf32> to vector<8x64xf32>
    %117 = math.tanh %116 : vector<8x64xf32>
    %118 = vector.extract_strided_slice %103 {offsets = [0, 192], sizes = [8, 64], strides = [1, 1]} : vector<8x256xf32> to vector<8x64xf32>
    %119 = arith.negf %118 : vector<8x64xf32>
    %120 = math.exp %119 : vector<8x64xf32>
    %cst_40 = arith.constant 1.000000e+00 : f32
    %121 = vector.broadcast %cst_40 : f32 to vector<8x64xf32>
    %122 = arith.addf %121, %120 : vector<8x64xf32>
    %123 = arith.divf %121, %122 : vector<8x64xf32>
    %124 = arith.mulf %115, %98 : vector<8x64xf32>
    %125 = arith.mulf %109, %117 : vector<8x64xf32>
    %126 = arith.addf %124, %125 : vector<8x64xf32>
    %127 = math.tanh %126 : vector<8x64xf32>
    %128 = arith.mulf %123, %127 : vector<8x64xf32>
    %c32 = arith.constant 32 : index
    %c0_41 = arith.constant 0 : index
    %129 = vector.load %arg12[%c32, %c0_41] : memref<176x256xf32, #tpu.memory_space<vmem>>, vector<8x256xf32>
    %cst_42 = arith.constant dense<0.000000e+00> : vector<8x256xf32>
    %130 = tpu.matmul %128, %14, %cst_42 {dimension_numbers = #tpu.dot_dimension_numbers<[1], [0], [0], [1], [0, 0, 1, 1], [], []>} : vector<8x64xf32>, vector<64x256xf32>, vector<8x256xf32> -> vector<8x256xf32>
    %131 = arith.addf %129, %130 : vector<8x256xf32>
    %132 = vector.extract_strided_slice %131 {offsets = [0, 0], sizes = [8, 64], strides = [1, 1]} : vector<8x256xf32> to vector<8x64xf32>
    %133 = arith.negf %132 : vector<8x64xf32>
    %134 = math.exp %133 : vector<8x64xf32>
    %cst_43 = arith.constant 1.000000e+00 : f32
    %135 = vector.broadcast %cst_43 : f32 to vector<8x64xf32>
    %136 = arith.addf %135, %134 : vector<8x64xf32>
    %137 = arith.divf %135, %136 : vector<8x64xf32>
    %138 = vector.extract_strided_slice %131 {offsets = [0, 64], sizes = [8, 64], strides = [1, 1]} : vector<8x256xf32> to vector<8x64xf32>
    %139 = arith.negf %138 : vector<8x64xf32>
    %140 = math.exp %139 : vector<8x64xf32>
    %cst_44 = arith.constant 1.000000e+00 : f32
    %141 = vector.broadcast %cst_44 : f32 to vector<8x64xf32>
    %142 = arith.addf %141, %140 : vector<8x64xf32>
    %143 = arith.divf %141, %142 : vector<8x64xf32>
    %144 = vector.extract_strided_slice %131 {offsets = [0, 128], sizes = [8, 64], strides = [1, 1]} : vector<8x256xf32> to vector<8x64xf32>
    %145 = math.tanh %144 : vector<8x64xf32>
    %146 = vector.extract_strided_slice %131 {offsets = [0, 192], sizes = [8, 64], strides = [1, 1]} : vector<8x256xf32> to vector<8x64xf32>
    %147 = arith.negf %146 : vector<8x64xf32>
    %148 = math.exp %147 : vector<8x64xf32>
    %cst_45 = arith.constant 1.000000e+00 : f32
    %149 = vector.broadcast %cst_45 : f32 to vector<8x64xf32>
    %150 = arith.addf %149, %148 : vector<8x64xf32>
    %151 = arith.divf %149, %150 : vector<8x64xf32>
    %152 = arith.mulf %143, %126 : vector<8x64xf32>
    %153 = arith.mulf %137, %145 : vector<8x64xf32>
    %154 = arith.addf %152, %153 : vector<8x64xf32>
    %155 = math.tanh %154 : vector<8x64xf32>
    %156 = arith.mulf %151, %155 : vector<8x64xf32>
    %c40 = arith.constant 40 : index
    %c0_46 = arith.constant 0 : index
    %157 = vector.load %arg12[%c40, %c0_46] : memref<176x256xf32, #tpu.memory_space<vmem>>, vector<8x256xf32>
    %cst_47 = arith.constant dense<0.000000e+00> : vector<8x256xf32>
    %158 = tpu.matmul %156, %14, %cst_47 {dimension_numbers = #tpu.dot_dimension_numbers<[1], [0], [0], [1], [0, 0, 1, 1], [], []>} : vector<8x64xf32>, vector<64x256xf32>, vector<8x256xf32> -> vector<8x256xf32>
    %159 = arith.addf %157, %158 : vector<8x256xf32>
    %160 = vector.extract_strided_slice %159 {offsets = [0, 0], sizes = [8, 64], strides = [1, 1]} : vector<8x256xf32> to vector<8x64xf32>
    %161 = arith.negf %160 : vector<8x64xf32>
    %162 = math.exp %161 : vector<8x64xf32>
    %cst_48 = arith.constant 1.000000e+00 : f32
    %163 = vector.broadcast %cst_48 : f32 to vector<8x64xf32>
    %164 = arith.addf %163, %162 : vector<8x64xf32>
    %165 = arith.divf %163, %164 : vector<8x64xf32>
    %166 = vector.extract_strided_slice %159 {offsets = [0, 64], sizes = [8, 64], strides = [1, 1]} : vector<8x256xf32> to vector<8x64xf32>
    %167 = arith.negf %166 : vector<8x64xf32>
    %168 = math.exp %167 : vector<8x64xf32>
    %cst_49 = arith.constant 1.000000e+00 : f32
    %169 = vector.broadcast %cst_49 : f32 to vector<8x64xf32>
    %170 = arith.addf %169, %168 : vector<8x64xf32>
    %171 = arith.divf %169, %170 : vector<8x64xf32>
    %172 = vector.extract_strided_slice %159 {offsets = [0, 128], sizes = [8, 64], strides = [1, 1]} : vector<8x256xf32> to vector<8x64xf32>
    %173 = math.tanh %172 : vector<8x64xf32>
    %174 = vector.extract_strided_slice %159 {offsets = [0, 192], sizes = [8, 64], strides = [1, 1]} : vector<8x256xf32> to vector<8x64xf32>
    %175 = arith.negf %174 : vector<8x64xf32>
    %176 = math.exp %175 : vector<8x64xf32>
    %cst_50 = arith.constant 1.000000e+00 : f32
    %177 = vector.broadcast %cst_50 : f32 to vector<8x64xf32>
    %178 = arith.addf %177, %176 : vector<8x64xf32>
    %179 = arith.divf %177, %178 : vector<8x64xf32>
    %180 = arith.mulf %171, %154 : vector<8x64xf32>
    %181 = arith.mulf %165, %173 : vector<8x64xf32>
    %182 = arith.addf %180, %181 : vector<8x64xf32>
    %183 = math.tanh %182 : vector<8x64xf32>
    %184 = arith.mulf %179, %183 : vector<8x64xf32>
    %c48 = arith.constant 48 : index
    %c0_51 = arith.constant 0 : index
    %185 = vector.load %arg12[%c48, %c0_51] : memref<176x256xf32, #tpu.memory_space<vmem>>, vector<8x256xf32>
    %cst_52 = arith.constant dense<0.000000e+00> : vector<8x256xf32>
    %186 = tpu.matmul %184, %14, %cst_52 {dimension_numbers = #tpu.dot_dimension_numbers<[1], [0], [0], [1], [0, 0, 1, 1], [], []>} : vector<8x64xf32>, vector<64x256xf32>, vector<8x256xf32> -> vector<8x256xf32>
    %187 = arith.addf %185, %186 : vector<8x256xf32>
    %188 = vector.extract_strided_slice %187 {offsets = [0, 0], sizes = [8, 64], strides = [1, 1]} : vector<8x256xf32> to vector<8x64xf32>
    %189 = arith.negf %188 : vector<8x64xf32>
    %190 = math.exp %189 : vector<8x64xf32>
    %cst_53 = arith.constant 1.000000e+00 : f32
    %191 = vector.broadcast %cst_53 : f32 to vector<8x64xf32>
    %192 = arith.addf %191, %190 : vector<8x64xf32>
    %193 = arith.divf %191, %192 : vector<8x64xf32>
    %194 = vector.extract_strided_slice %187 {offsets = [0, 64], sizes = [8, 64], strides = [1, 1]} : vector<8x256xf32> to vector<8x64xf32>
    %195 = arith.negf %194 : vector<8x64xf32>
    %196 = math.exp %195 : vector<8x64xf32>
    %cst_54 = arith.constant 1.000000e+00 : f32
    %197 = vector.broadcast %cst_54 : f32 to vector<8x64xf32>
    %198 = arith.addf %197, %196 : vector<8x64xf32>
    %199 = arith.divf %197, %198 : vector<8x64xf32>
    %200 = vector.extract_strided_slice %187 {offsets = [0, 128], sizes = [8, 64], strides = [1, 1]} : vector<8x256xf32> to vector<8x64xf32>
    %201 = math.tanh %200 : vector<8x64xf32>
    %202 = vector.extract_strided_slice %187 {offsets = [0, 192], sizes = [8, 64], strides = [1, 1]} : vector<8x256xf32> to vector<8x64xf32>
    %203 = arith.negf %202 : vector<8x64xf32>
    %204 = math.exp %203 : vector<8x64xf32>
    %cst_55 = arith.constant 1.000000e+00 : f32
    %205 = vector.broadcast %cst_55 : f32 to vector<8x64xf32>
    %206 = arith.addf %205, %204 : vector<8x64xf32>
    %207 = arith.divf %205, %206 : vector<8x64xf32>
    %208 = arith.mulf %199, %182 : vector<8x64xf32>
    %209 = arith.mulf %193, %201 : vector<8x64xf32>
    %210 = arith.addf %208, %209 : vector<8x64xf32>
    %211 = math.tanh %210 : vector<8x64xf32>
    %212 = arith.mulf %207, %211 : vector<8x64xf32>
    %c56 = arith.constant 56 : index
    %c0_56 = arith.constant 0 : index
    %213 = vector.load %arg12[%c56, %c0_56] : memref<176x256xf32, #tpu.memory_space<vmem>>, vector<8x256xf32>
    %cst_57 = arith.constant dense<0.000000e+00> : vector<8x256xf32>
    %214 = tpu.matmul %212, %14, %cst_57 {dimension_numbers = #tpu.dot_dimension_numbers<[1], [0], [0], [1], [0, 0, 1, 1], [], []>} : vector<8x64xf32>, vector<64x256xf32>, vector<8x256xf32> -> vector<8x256xf32>
    %215 = arith.addf %213, %214 : vector<8x256xf32>
    %216 = vector.extract_strided_slice %215 {offsets = [0, 0], sizes = [8, 64], strides = [1, 1]} : vector<8x256xf32> to vector<8x64xf32>
    %217 = arith.negf %216 : vector<8x64xf32>
    %218 = math.exp %217 : vector<8x64xf32>
    %cst_58 = arith.constant 1.000000e+00 : f32
    %219 = vector.broadcast %cst_58 : f32 to vector<8x64xf32>
    %220 = arith.addf %219, %218 : vector<8x64xf32>
    %221 = arith.divf %219, %220 : vector<8x64xf32>
    %222 = vector.extract_strided_slice %215 {offsets = [0, 64], sizes = [8, 64], strides = [1, 1]} : vector<8x256xf32> to vector<8x64xf32>
    %223 = arith.negf %222 : vector<8x64xf32>
    %224 = math.exp %223 : vector<8x64xf32>
    %cst_59 = arith.constant 1.000000e+00 : f32
    %225 = vector.broadcast %cst_59 : f32 to vector<8x64xf32>
    %226 = arith.addf %225, %224 : vector<8x64xf32>
    %227 = arith.divf %225, %226 : vector<8x64xf32>
    %228 = vector.extract_strided_slice %215 {offsets = [0, 128], sizes = [8, 64], strides = [1, 1]} : vector<8x256xf32> to vector<8x64xf32>
    %229 = math.tanh %228 : vector<8x64xf32>
    %230 = vector.extract_strided_slice %215 {offsets = [0, 192], sizes = [8, 64], strides = [1, 1]} : vector<8x256xf32> to vector<8x64xf32>
    %231 = arith.negf %230 : vector<8x64xf32>
    %232 = math.exp %231 : vector<8x64xf32>
    %cst_60 = arith.constant 1.000000e+00 : f32
    %233 = vector.broadcast %cst_60 : f32 to vector<8x64xf32>
    %234 = arith.addf %233, %232 : vector<8x64xf32>
    %235 = arith.divf %233, %234 : vector<8x64xf32>
    %236 = arith.mulf %227, %210 : vector<8x64xf32>
    %237 = arith.mulf %221, %229 : vector<8x64xf32>
    %238 = arith.addf %236, %237 : vector<8x64xf32>
    %239 = math.tanh %238 : vector<8x64xf32>
    %240 = arith.mulf %235, %239 : vector<8x64xf32>
    %c64 = arith.constant 64 : index
    %c0_61 = arith.constant 0 : index
    %241 = vector.load %arg12[%c64, %c0_61] : memref<176x256xf32, #tpu.memory_space<vmem>>, vector<8x256xf32>
    %cst_62 = arith.constant dense<0.000000e+00> : vector<8x256xf32>
    %242 = tpu.matmul %240, %14, %cst_62 {dimension_numbers = #tpu.dot_dimension_numbers<[1], [0], [0], [1], [0, 0, 1, 1], [], []>} : vector<8x64xf32>, vector<64x256xf32>, vector<8x256xf32> -> vector<8x256xf32>
    %243 = arith.addf %241, %242 : vector<8x256xf32>
    %244 = vector.extract_strided_slice %243 {offsets = [0, 0], sizes = [8, 64], strides = [1, 1]} : vector<8x256xf32> to vector<8x64xf32>
    %245 = arith.negf %244 : vector<8x64xf32>
    %246 = math.exp %245 : vector<8x64xf32>
    %cst_63 = arith.constant 1.000000e+00 : f32
    %247 = vector.broadcast %cst_63 : f32 to vector<8x64xf32>
    %248 = arith.addf %247, %246 : vector<8x64xf32>
    %249 = arith.divf %247, %248 : vector<8x64xf32>
    %250 = vector.extract_strided_slice %243 {offsets = [0, 64], sizes = [8, 64], strides = [1, 1]} : vector<8x256xf32> to vector<8x64xf32>
    %251 = arith.negf %250 : vector<8x64xf32>
    %252 = math.exp %251 : vector<8x64xf32>
    %cst_64 = arith.constant 1.000000e+00 : f32
    %253 = vector.broadcast %cst_64 : f32 to vector<8x64xf32>
    %254 = arith.addf %253, %252 : vector<8x64xf32>
    %255 = arith.divf %253, %254 : vector<8x64xf32>
    %256 = vector.extract_strided_slice %243 {offsets = [0, 128], sizes = [8, 64], strides = [1, 1]} : vector<8x256xf32> to vector<8x64xf32>
    %257 = math.tanh %256 : vector<8x64xf32>
    %258 = vector.extract_strided_slice %243 {offsets = [0, 192], sizes = [8, 64], strides = [1, 1]} : vector<8x256xf32> to vector<8x64xf32>
    %259 = arith.negf %258 : vector<8x64xf32>
    %260 = math.exp %259 : vector<8x64xf32>
    %cst_65 = arith.constant 1.000000e+00 : f32
    %261 = vector.broadcast %cst_65 : f32 to vector<8x64xf32>
    %262 = arith.addf %261, %260 : vector<8x64xf32>
    %263 = arith.divf %261, %262 : vector<8x64xf32>
    %264 = arith.mulf %255, %238 : vector<8x64xf32>
    %265 = arith.mulf %249, %257 : vector<8x64xf32>
    %266 = arith.addf %264, %265 : vector<8x64xf32>
    %267 = math.tanh %266 : vector<8x64xf32>
    %268 = arith.mulf %263, %267 : vector<8x64xf32>
    %c72 = arith.constant 72 : index
    %c0_66 = arith.constant 0 : index
    %269 = vector.load %arg12[%c72, %c0_66] : memref<176x256xf32, #tpu.memory_space<vmem>>, vector<8x256xf32>
    %cst_67 = arith.constant dense<0.000000e+00> : vector<8x256xf32>
    %270 = tpu.matmul %268, %14, %cst_67 {dimension_numbers = #tpu.dot_dimension_numbers<[1], [0], [0], [1], [0, 0, 1, 1], [], []>} : vector<8x64xf32>, vector<64x256xf32>, vector<8x256xf32> -> vector<8x256xf32>
    %271 = arith.addf %269, %270 : vector<8x256xf32>
    %272 = vector.extract_strided_slice %271 {offsets = [0, 0], sizes = [8, 64], strides = [1, 1]} : vector<8x256xf32> to vector<8x64xf32>
    %273 = arith.negf %272 : vector<8x64xf32>
    %274 = math.exp %273 : vector<8x64xf32>
    %cst_68 = arith.constant 1.000000e+00 : f32
    %275 = vector.broadcast %cst_68 : f32 to vector<8x64xf32>
    %276 = arith.addf %275, %274 : vector<8x64xf32>
    %277 = arith.divf %275, %276 : vector<8x64xf32>
    %278 = vector.extract_strided_slice %271 {offsets = [0, 64], sizes = [8, 64], strides = [1, 1]} : vector<8x256xf32> to vector<8x64xf32>
    %279 = arith.negf %278 : vector<8x64xf32>
    %280 = math.exp %279 : vector<8x64xf32>
    %cst_69 = arith.constant 1.000000e+00 : f32
    %281 = vector.broadcast %cst_69 : f32 to vector<8x64xf32>
    %282 = arith.addf %281, %280 : vector<8x64xf32>
    %283 = arith.divf %281, %282 : vector<8x64xf32>
    %284 = vector.extract_strided_slice %271 {offsets = [0, 128], sizes = [8, 64], strides = [1, 1]} : vector<8x256xf32> to vector<8x64xf32>
    %285 = math.tanh %284 : vector<8x64xf32>
    %286 = vector.extract_strided_slice %271 {offsets = [0, 192], sizes = [8, 64], strides = [1, 1]} : vector<8x256xf32> to vector<8x64xf32>
    %287 = arith.negf %286 : vector<8x64xf32>
    %288 = math.exp %287 : vector<8x64xf32>
    %cst_70 = arith.constant 1.000000e+00 : f32
    %289 = vector.broadcast %cst_70 : f32 to vector<8x64xf32>
    %290 = arith.addf %289, %288 : vector<8x64xf32>
    %291 = arith.divf %289, %290 : vector<8x64xf32>
    %292 = arith.mulf %283, %266 : vector<8x64xf32>
    %293 = arith.mulf %277, %285 : vector<8x64xf32>
    %294 = arith.addf %292, %293 : vector<8x64xf32>
    %295 = math.tanh %294 : vector<8x64xf32>
    %296 = arith.mulf %291, %295 : vector<8x64xf32>
    %c80 = arith.constant 80 : index
    %c0_71 = arith.constant 0 : index
    %297 = vector.load %arg12[%c80, %c0_71] : memref<176x256xf32, #tpu.memory_space<vmem>>, vector<8x256xf32>
    %cst_72 = arith.constant dense<0.000000e+00> : vector<8x256xf32>
    %298 = tpu.matmul %296, %14, %cst_72 {dimension_numbers = #tpu.dot_dimension_numbers<[1], [0], [0], [1], [0, 0, 1, 1], [], []>} : vector<8x64xf32>, vector<64x256xf32>, vector<8x256xf32> -> vector<8x256xf32>
    %299 = arith.addf %297, %298 : vector<8x256xf32>
    %300 = vector.extract_strided_slice %299 {offsets = [0, 0], sizes = [8, 64], strides = [1, 1]} : vector<8x256xf32> to vector<8x64xf32>
    %301 = arith.negf %300 : vector<8x64xf32>
    %302 = math.exp %301 : vector<8x64xf32>
    %cst_73 = arith.constant 1.000000e+00 : f32
    %303 = vector.broadcast %cst_73 : f32 to vector<8x64xf32>
    %304 = arith.addf %303, %302 : vector<8x64xf32>
    %305 = arith.divf %303, %304 : vector<8x64xf32>
    %306 = vector.extract_strided_slice %299 {offsets = [0, 64], sizes = [8, 64], strides = [1, 1]} : vector<8x256xf32> to vector<8x64xf32>
    %307 = arith.negf %306 : vector<8x64xf32>
    %308 = math.exp %307 : vector<8x64xf32>
    %cst_74 = arith.constant 1.000000e+00 : f32
    %309 = vector.broadcast %cst_74 : f32 to vector<8x64xf32>
    %310 = arith.addf %309, %308 : vector<8x64xf32>
    %311 = arith.divf %309, %310 : vector<8x64xf32>
    %312 = vector.extract_strided_slice %299 {offsets = [0, 128], sizes = [8, 64], strides = [1, 1]} : vector<8x256xf32> to vector<8x64xf32>
    %313 = math.tanh %312 : vector<8x64xf32>
    %314 = vector.extract_strided_slice %299 {offsets = [0, 192], sizes = [8, 64], strides = [1, 1]} : vector<8x256xf32> to vector<8x64xf32>
    %315 = arith.negf %314 : vector<8x64xf32>
    %316 = math.exp %315 : vector<8x64xf32>
    %cst_75 = arith.constant 1.000000e+00 : f32
    %317 = vector.broadcast %cst_75 : f32 to vector<8x64xf32>
    %318 = arith.addf %317, %316 : vector<8x64xf32>
    %319 = arith.divf %317, %318 : vector<8x64xf32>
    %320 = arith.mulf %311, %294 : vector<8x64xf32>
    %321 = arith.mulf %305, %313 : vector<8x64xf32>
    %322 = arith.addf %320, %321 : vector<8x64xf32>
    %323 = math.tanh %322 : vector<8x64xf32>
    %324 = arith.mulf %319, %323 : vector<8x64xf32>
    %c88 = arith.constant 88 : index
    %c0_76 = arith.constant 0 : index
    %325 = vector.load %arg12[%c88, %c0_76] : memref<176x256xf32, #tpu.memory_space<vmem>>, vector<8x256xf32>
    %cst_77 = arith.constant dense<0.000000e+00> : vector<8x256xf32>
    %326 = tpu.matmul %324, %14, %cst_77 {dimension_numbers = #tpu.dot_dimension_numbers<[1], [0], [0], [1], [0, 0, 1, 1], [], []>} : vector<8x64xf32>, vector<64x256xf32>, vector<8x256xf32> -> vector<8x256xf32>
    %327 = arith.addf %325, %326 : vector<8x256xf32>
    %328 = vector.extract_strided_slice %327 {offsets = [0, 0], sizes = [8, 64], strides = [1, 1]} : vector<8x256xf32> to vector<8x64xf32>
    %329 = arith.negf %328 : vector<8x64xf32>
    %330 = math.exp %329 : vector<8x64xf32>
    %cst_78 = arith.constant 1.000000e+00 : f32
    %331 = vector.broadcast %cst_78 : f32 to vector<8x64xf32>
    %332 = arith.addf %331, %330 : vector<8x64xf32>
    %333 = arith.divf %331, %332 : vector<8x64xf32>
    %334 = vector.extract_strided_slice %327 {offsets = [0, 64], sizes = [8, 64], strides = [1, 1]} : vector<8x256xf32> to vector<8x64xf32>
    %335 = arith.negf %334 : vector<8x64xf32>
    %336 = math.exp %335 : vector<8x64xf32>
    %cst_79 = arith.constant 1.000000e+00 : f32
    %337 = vector.broadcast %cst_79 : f32 to vector<8x64xf32>
    %338 = arith.addf %337, %336 : vector<8x64xf32>
    %339 = arith.divf %337, %338 : vector<8x64xf32>
    %340 = vector.extract_strided_slice %327 {offsets = [0, 128], sizes = [8, 64], strides = [1, 1]} : vector<8x256xf32> to vector<8x64xf32>
    %341 = math.tanh %340 : vector<8x64xf32>
    %342 = vector.extract_strided_slice %327 {offsets = [0, 192], sizes = [8, 64], strides = [1, 1]} : vector<8x256xf32> to vector<8x64xf32>
    %343 = arith.negf %342 : vector<8x64xf32>
    %344 = math.exp %343 : vector<8x64xf32>
    %cst_80 = arith.constant 1.000000e+00 : f32
    %345 = vector.broadcast %cst_80 : f32 to vector<8x64xf32>
    %346 = arith.addf %345, %344 : vector<8x64xf32>
    %347 = arith.divf %345, %346 : vector<8x64xf32>
    %348 = arith.mulf %339, %322 : vector<8x64xf32>
    %349 = arith.mulf %333, %341 : vector<8x64xf32>
    %350 = arith.addf %348, %349 : vector<8x64xf32>
    %351 = math.tanh %350 : vector<8x64xf32>
    %352 = arith.mulf %347, %351 : vector<8x64xf32>
    %c96 = arith.constant 96 : index
    %c0_81 = arith.constant 0 : index
    %353 = vector.load %arg12[%c96, %c0_81] : memref<176x256xf32, #tpu.memory_space<vmem>>, vector<8x256xf32>
    %cst_82 = arith.constant dense<0.000000e+00> : vector<8x256xf32>
    %354 = tpu.matmul %352, %14, %cst_82 {dimension_numbers = #tpu.dot_dimension_numbers<[1], [0], [0], [1], [0, 0, 1, 1], [], []>} : vector<8x64xf32>, vector<64x256xf32>, vector<8x256xf32> -> vector<8x256xf32>
    %355 = arith.addf %353, %354 : vector<8x256xf32>
    %356 = vector.extract_strided_slice %355 {offsets = [0, 0], sizes = [8, 64], strides = [1, 1]} : vector<8x256xf32> to vector<8x64xf32>
    %357 = arith.negf %356 : vector<8x64xf32>
    %358 = math.exp %357 : vector<8x64xf32>
    %cst_83 = arith.constant 1.000000e+00 : f32
    %359 = vector.broadcast %cst_83 : f32 to vector<8x64xf32>
    %360 = arith.addf %359, %358 : vector<8x64xf32>
    %361 = arith.divf %359, %360 : vector<8x64xf32>
    %362 = vector.extract_strided_slice %355 {offsets = [0, 64], sizes = [8, 64], strides = [1, 1]} : vector<8x256xf32> to vector<8x64xf32>
    %363 = arith.negf %362 : vector<8x64xf32>
    %364 = math.exp %363 : vector<8x64xf32>
    %cst_84 = arith.constant 1.000000e+00 : f32
    %365 = vector.broadcast %cst_84 : f32 to vector<8x64xf32>
    %366 = arith.addf %365, %364 : vector<8x64xf32>
    %367 = arith.divf %365, %366 : vector<8x64xf32>
    %368 = vector.extract_strided_slice %355 {offsets = [0, 128], sizes = [8, 64], strides = [1, 1]} : vector<8x256xf32> to vector<8x64xf32>
    %369 = math.tanh %368 : vector<8x64xf32>
    %370 = vector.extract_strided_slice %355 {offsets = [0, 192], sizes = [8, 64], strides = [1, 1]} : vector<8x256xf32> to vector<8x64xf32>
    %371 = arith.negf %370 : vector<8x64xf32>
    %372 = math.exp %371 : vector<8x64xf32>
    %cst_85 = arith.constant 1.000000e+00 : f32
    %373 = vector.broadcast %cst_85 : f32 to vector<8x64xf32>
    %374 = arith.addf %373, %372 : vector<8x64xf32>
    %375 = arith.divf %373, %374 : vector<8x64xf32>
    %376 = arith.mulf %367, %350 : vector<8x64xf32>
    %377 = arith.mulf %361, %369 : vector<8x64xf32>
    %378 = arith.addf %376, %377 : vector<8x64xf32>
    %379 = math.tanh %378 : vector<8x64xf32>
    %380 = arith.mulf %375, %379 : vector<8x64xf32>
    %c104 = arith.constant 104 : index
    %c0_86 = arith.constant 0 : index
    %381 = vector.load %arg12[%c104, %c0_86] : memref<176x256xf32, #tpu.memory_space<vmem>>, vector<8x256xf32>
    %cst_87 = arith.constant dense<0.000000e+00> : vector<8x256xf32>
    %382 = tpu.matmul %380, %14, %cst_87 {dimension_numbers = #tpu.dot_dimension_numbers<[1], [0], [0], [1], [0, 0, 1, 1], [], []>} : vector<8x64xf32>, vector<64x256xf32>, vector<8x256xf32> -> vector<8x256xf32>
    %383 = arith.addf %381, %382 : vector<8x256xf32>
    %384 = vector.extract_strided_slice %383 {offsets = [0, 0], sizes = [8, 64], strides = [1, 1]} : vector<8x256xf32> to vector<8x64xf32>
    %385 = arith.negf %384 : vector<8x64xf32>
    %386 = math.exp %385 : vector<8x64xf32>
    %cst_88 = arith.constant 1.000000e+00 : f32
    %387 = vector.broadcast %cst_88 : f32 to vector<8x64xf32>
    %388 = arith.addf %387, %386 : vector<8x64xf32>
    %389 = arith.divf %387, %388 : vector<8x64xf32>
    %390 = vector.extract_strided_slice %383 {offsets = [0, 64], sizes = [8, 64], strides = [1, 1]} : vector<8x256xf32> to vector<8x64xf32>
    %391 = arith.negf %390 : vector<8x64xf32>
    %392 = math.exp %391 : vector<8x64xf32>
    %cst_89 = arith.constant 1.000000e+00 : f32
    %393 = vector.broadcast %cst_89 : f32 to vector<8x64xf32>
    %394 = arith.addf %393, %392 : vector<8x64xf32>
    %395 = arith.divf %393, %394 : vector<8x64xf32>
    %396 = vector.extract_strided_slice %383 {offsets = [0, 128], sizes = [8, 64], strides = [1, 1]} : vector<8x256xf32> to vector<8x64xf32>
    %397 = math.tanh %396 : vector<8x64xf32>
    %398 = vector.extract_strided_slice %383 {offsets = [0, 192], sizes = [8, 64], strides = [1, 1]} : vector<8x256xf32> to vector<8x64xf32>
    %399 = arith.negf %398 : vector<8x64xf32>
    %400 = math.exp %399 : vector<8x64xf32>
    %cst_90 = arith.constant 1.000000e+00 : f32
    %401 = vector.broadcast %cst_90 : f32 to vector<8x64xf32>
    %402 = arith.addf %401, %400 : vector<8x64xf32>
    %403 = arith.divf %401, %402 : vector<8x64xf32>
    %404 = arith.mulf %395, %378 : vector<8x64xf32>
    %405 = arith.mulf %389, %397 : vector<8x64xf32>
    %406 = arith.addf %404, %405 : vector<8x64xf32>
    %407 = math.tanh %406 : vector<8x64xf32>
    %408 = arith.mulf %403, %407 : vector<8x64xf32>
    %c112 = arith.constant 112 : index
    %c0_91 = arith.constant 0 : index
    %409 = vector.load %arg12[%c112, %c0_91] : memref<176x256xf32, #tpu.memory_space<vmem>>, vector<8x256xf32>
    %cst_92 = arith.constant dense<0.000000e+00> : vector<8x256xf32>
    %410 = tpu.matmul %408, %14, %cst_92 {dimension_numbers = #tpu.dot_dimension_numbers<[1], [0], [0], [1], [0, 0, 1, 1], [], []>} : vector<8x64xf32>, vector<64x256xf32>, vector<8x256xf32> -> vector<8x256xf32>
    %411 = arith.addf %409, %410 : vector<8x256xf32>
    %412 = vector.extract_strided_slice %411 {offsets = [0, 0], sizes = [8, 64], strides = [1, 1]} : vector<8x256xf32> to vector<8x64xf32>
    %413 = arith.negf %412 : vector<8x64xf32>
    %414 = math.exp %413 : vector<8x64xf32>
    %cst_93 = arith.constant 1.000000e+00 : f32
    %415 = vector.broadcast %cst_93 : f32 to vector<8x64xf32>
    %416 = arith.addf %415, %414 : vector<8x64xf32>
    %417 = arith.divf %415, %416 : vector<8x64xf32>
    %418 = vector.extract_strided_slice %411 {offsets = [0, 64], sizes = [8, 64], strides = [1, 1]} : vector<8x256xf32> to vector<8x64xf32>
    %419 = arith.negf %418 : vector<8x64xf32>
    %420 = math.exp %419 : vector<8x64xf32>
    %cst_94 = arith.constant 1.000000e+00 : f32
    %421 = vector.broadcast %cst_94 : f32 to vector<8x64xf32>
    %422 = arith.addf %421, %420 : vector<8x64xf32>
    %423 = arith.divf %421, %422 : vector<8x64xf32>
    %424 = vector.extract_strided_slice %411 {offsets = [0, 128], sizes = [8, 64], strides = [1, 1]} : vector<8x256xf32> to vector<8x64xf32>
    %425 = math.tanh %424 : vector<8x64xf32>
    %426 = vector.extract_strided_slice %411 {offsets = [0, 192], sizes = [8, 64], strides = [1, 1]} : vector<8x256xf32> to vector<8x64xf32>
    %427 = arith.negf %426 : vector<8x64xf32>
    %428 = math.exp %427 : vector<8x64xf32>
    %cst_95 = arith.constant 1.000000e+00 : f32
    %429 = vector.broadcast %cst_95 : f32 to vector<8x64xf32>
    %430 = arith.addf %429, %428 : vector<8x64xf32>
    %431 = arith.divf %429, %430 : vector<8x64xf32>
    %432 = arith.mulf %423, %406 : vector<8x64xf32>
    %433 = arith.mulf %417, %425 : vector<8x64xf32>
    %434 = arith.addf %432, %433 : vector<8x64xf32>
    %435 = math.tanh %434 : vector<8x64xf32>
    %436 = arith.mulf %431, %435 : vector<8x64xf32>
    %c120 = arith.constant 120 : index
    %c0_96 = arith.constant 0 : index
    %437 = vector.load %arg12[%c120, %c0_96] : memref<176x256xf32, #tpu.memory_space<vmem>>, vector<8x256xf32>
    %cst_97 = arith.constant dense<0.000000e+00> : vector<8x256xf32>
    %438 = tpu.matmul %436, %14, %cst_97 {dimension_numbers = #tpu.dot_dimension_numbers<[1], [0], [0], [1], [0, 0, 1, 1], [], []>} : vector<8x64xf32>, vector<64x256xf32>, vector<8x256xf32> -> vector<8x256xf32>
    %439 = arith.addf %437, %438 : vector<8x256xf32>
    %440 = vector.extract_strided_slice %439 {offsets = [0, 0], sizes = [8, 64], strides = [1, 1]} : vector<8x256xf32> to vector<8x64xf32>
    %441 = arith.negf %440 : vector<8x64xf32>
    %442 = math.exp %441 : vector<8x64xf32>
    %cst_98 = arith.constant 1.000000e+00 : f32
    %443 = vector.broadcast %cst_98 : f32 to vector<8x64xf32>
    %444 = arith.addf %443, %442 : vector<8x64xf32>
    %445 = arith.divf %443, %444 : vector<8x64xf32>
    %446 = vector.extract_strided_slice %439 {offsets = [0, 64], sizes = [8, 64], strides = [1, 1]} : vector<8x256xf32> to vector<8x64xf32>
    %447 = arith.negf %446 : vector<8x64xf32>
    %448 = math.exp %447 : vector<8x64xf32>
    %cst_99 = arith.constant 1.000000e+00 : f32
    %449 = vector.broadcast %cst_99 : f32 to vector<8x64xf32>
    %450 = arith.addf %449, %448 : vector<8x64xf32>
    %451 = arith.divf %449, %450 : vector<8x64xf32>
    %452 = vector.extract_strided_slice %439 {offsets = [0, 128], sizes = [8, 64], strides = [1, 1]} : vector<8x256xf32> to vector<8x64xf32>
    %453 = math.tanh %452 : vector<8x64xf32>
    %454 = vector.extract_strided_slice %439 {offsets = [0, 192], sizes = [8, 64], strides = [1, 1]} : vector<8x256xf32> to vector<8x64xf32>
    %455 = arith.negf %454 : vector<8x64xf32>
    %456 = math.exp %455 : vector<8x64xf32>
    %cst_100 = arith.constant 1.000000e+00 : f32
    %457 = vector.broadcast %cst_100 : f32 to vector<8x64xf32>
    %458 = arith.addf %457, %456 : vector<8x64xf32>
    %459 = arith.divf %457, %458 : vector<8x64xf32>
    %460 = arith.mulf %451, %434 : vector<8x64xf32>
    %461 = arith.mulf %445, %453 : vector<8x64xf32>
    %462 = arith.addf %460, %461 : vector<8x64xf32>
    %463 = math.tanh %462 : vector<8x64xf32>
    %464 = arith.mulf %459, %463 : vector<8x64xf32>
    %c128 = arith.constant 128 : index
    %c0_101 = arith.constant 0 : index
    %465 = vector.load %arg12[%c128, %c0_101] : memref<176x256xf32, #tpu.memory_space<vmem>>, vector<8x256xf32>
    %cst_102 = arith.constant dense<0.000000e+00> : vector<8x256xf32>
    %466 = tpu.matmul %464, %14, %cst_102 {dimension_numbers = #tpu.dot_dimension_numbers<[1], [0], [0], [1], [0, 0, 1, 1], [], []>} : vector<8x64xf32>, vector<64x256xf32>, vector<8x256xf32> -> vector<8x256xf32>
    %467 = arith.addf %465, %466 : vector<8x256xf32>
    %468 = vector.extract_strided_slice %467 {offsets = [0, 0], sizes = [8, 64], strides = [1, 1]} : vector<8x256xf32> to vector<8x64xf32>
    %469 = arith.negf %468 : vector<8x64xf32>
    %470 = math.exp %469 : vector<8x64xf32>
    %cst_103 = arith.constant 1.000000e+00 : f32
    %471 = vector.broadcast %cst_103 : f32 to vector<8x64xf32>
    %472 = arith.addf %471, %470 : vector<8x64xf32>
    %473 = arith.divf %471, %472 : vector<8x64xf32>
    %474 = vector.extract_strided_slice %467 {offsets = [0, 64], sizes = [8, 64], strides = [1, 1]} : vector<8x256xf32> to vector<8x64xf32>
    %475 = arith.negf %474 : vector<8x64xf32>
    %476 = math.exp %475 : vector<8x64xf32>
    %cst_104 = arith.constant 1.000000e+00 : f32
    %477 = vector.broadcast %cst_104 : f32 to vector<8x64xf32>
    %478 = arith.addf %477, %476 : vector<8x64xf32>
    %479 = arith.divf %477, %478 : vector<8x64xf32>
    %480 = vector.extract_strided_slice %467 {offsets = [0, 128], sizes = [8, 64], strides = [1, 1]} : vector<8x256xf32> to vector<8x64xf32>
    %481 = math.tanh %480 : vector<8x64xf32>
    %482 = vector.extract_strided_slice %467 {offsets = [0, 192], sizes = [8, 64], strides = [1, 1]} : vector<8x256xf32> to vector<8x64xf32>
    %483 = arith.negf %482 : vector<8x64xf32>
    %484 = math.exp %483 : vector<8x64xf32>
    %cst_105 = arith.constant 1.000000e+00 : f32
    %485 = vector.broadcast %cst_105 : f32 to vector<8x64xf32>
    %486 = arith.addf %485, %484 : vector<8x64xf32>
    %487 = arith.divf %485, %486 : vector<8x64xf32>
    %488 = arith.mulf %479, %462 : vector<8x64xf32>
    %489 = arith.mulf %473, %481 : vector<8x64xf32>
    %490 = arith.addf %488, %489 : vector<8x64xf32>
    %491 = math.tanh %490 : vector<8x64xf32>
    %492 = arith.mulf %487, %491 : vector<8x64xf32>
    %c136 = arith.constant 136 : index
    %c0_106 = arith.constant 0 : index
    %493 = vector.load %arg12[%c136, %c0_106] : memref<176x256xf32, #tpu.memory_space<vmem>>, vector<8x256xf32>
    %cst_107 = arith.constant dense<0.000000e+00> : vector<8x256xf32>
    %494 = tpu.matmul %492, %14, %cst_107 {dimension_numbers = #tpu.dot_dimension_numbers<[1], [0], [0], [1], [0, 0, 1, 1], [], []>} : vector<8x64xf32>, vector<64x256xf32>, vector<8x256xf32> -> vector<8x256xf32>
    %495 = arith.addf %493, %494 : vector<8x256xf32>
    %496 = vector.extract_strided_slice %495 {offsets = [0, 0], sizes = [8, 64], strides = [1, 1]} : vector<8x256xf32> to vector<8x64xf32>
    %497 = arith.negf %496 : vector<8x64xf32>
    %498 = math.exp %497 : vector<8x64xf32>
    %cst_108 = arith.constant 1.000000e+00 : f32
    %499 = vector.broadcast %cst_108 : f32 to vector<8x64xf32>
    %500 = arith.addf %499, %498 : vector<8x64xf32>
    %501 = arith.divf %499, %500 : vector<8x64xf32>
    %502 = vector.extract_strided_slice %495 {offsets = [0, 64], sizes = [8, 64], strides = [1, 1]} : vector<8x256xf32> to vector<8x64xf32>
    %503 = arith.negf %502 : vector<8x64xf32>
    %504 = math.exp %503 : vector<8x64xf32>
    %cst_109 = arith.constant 1.000000e+00 : f32
    %505 = vector.broadcast %cst_109 : f32 to vector<8x64xf32>
    %506 = arith.addf %505, %504 : vector<8x64xf32>
    %507 = arith.divf %505, %506 : vector<8x64xf32>
    %508 = vector.extract_strided_slice %495 {offsets = [0, 128], sizes = [8, 64], strides = [1, 1]} : vector<8x256xf32> to vector<8x64xf32>
    %509 = math.tanh %508 : vector<8x64xf32>
    %510 = vector.extract_strided_slice %495 {offsets = [0, 192], sizes = [8, 64], strides = [1, 1]} : vector<8x256xf32> to vector<8x64xf32>
    %511 = arith.negf %510 : vector<8x64xf32>
    %512 = math.exp %511 : vector<8x64xf32>
    %cst_110 = arith.constant 1.000000e+00 : f32
    %513 = vector.broadcast %cst_110 : f32 to vector<8x64xf32>
    %514 = arith.addf %513, %512 : vector<8x64xf32>
    %515 = arith.divf %513, %514 : vector<8x64xf32>
    %516 = arith.mulf %507, %490 : vector<8x64xf32>
    %517 = arith.mulf %501, %509 : vector<8x64xf32>
    %518 = arith.addf %516, %517 : vector<8x64xf32>
    %519 = math.tanh %518 : vector<8x64xf32>
    %520 = arith.mulf %515, %519 : vector<8x64xf32>
    %c144 = arith.constant 144 : index
    %c0_111 = arith.constant 0 : index
    %521 = vector.load %arg12[%c144, %c0_111] : memref<176x256xf32, #tpu.memory_space<vmem>>, vector<8x256xf32>
    %cst_112 = arith.constant dense<0.000000e+00> : vector<8x256xf32>
    %522 = tpu.matmul %520, %14, %cst_112 {dimension_numbers = #tpu.dot_dimension_numbers<[1], [0], [0], [1], [0, 0, 1, 1], [], []>} : vector<8x64xf32>, vector<64x256xf32>, vector<8x256xf32> -> vector<8x256xf32>
    %523 = arith.addf %521, %522 : vector<8x256xf32>
    %524 = vector.extract_strided_slice %523 {offsets = [0, 0], sizes = [8, 64], strides = [1, 1]} : vector<8x256xf32> to vector<8x64xf32>
    %525 = arith.negf %524 : vector<8x64xf32>
    %526 = math.exp %525 : vector<8x64xf32>
    %cst_113 = arith.constant 1.000000e+00 : f32
    %527 = vector.broadcast %cst_113 : f32 to vector<8x64xf32>
    %528 = arith.addf %527, %526 : vector<8x64xf32>
    %529 = arith.divf %527, %528 : vector<8x64xf32>
    %530 = vector.extract_strided_slice %523 {offsets = [0, 64], sizes = [8, 64], strides = [1, 1]} : vector<8x256xf32> to vector<8x64xf32>
    %531 = arith.negf %530 : vector<8x64xf32>
    %532 = math.exp %531 : vector<8x64xf32>
    %cst_114 = arith.constant 1.000000e+00 : f32
    %533 = vector.broadcast %cst_114 : f32 to vector<8x64xf32>
    %534 = arith.addf %533, %532 : vector<8x64xf32>
    %535 = arith.divf %533, %534 : vector<8x64xf32>
    %536 = vector.extract_strided_slice %523 {offsets = [0, 128], sizes = [8, 64], strides = [1, 1]} : vector<8x256xf32> to vector<8x64xf32>
    %537 = math.tanh %536 : vector<8x64xf32>
    %538 = vector.extract_strided_slice %523 {offsets = [0, 192], sizes = [8, 64], strides = [1, 1]} : vector<8x256xf32> to vector<8x64xf32>
    %539 = arith.negf %538 : vector<8x64xf32>
    %540 = math.exp %539 : vector<8x64xf32>
    %cst_115 = arith.constant 1.000000e+00 : f32
    %541 = vector.broadcast %cst_115 : f32 to vector<8x64xf32>
    %542 = arith.addf %541, %540 : vector<8x64xf32>
    %543 = arith.divf %541, %542 : vector<8x64xf32>
    %544 = arith.mulf %535, %518 : vector<8x64xf32>
    %545 = arith.mulf %529, %537 : vector<8x64xf32>
    %546 = arith.addf %544, %545 : vector<8x64xf32>
    %547 = math.tanh %546 : vector<8x64xf32>
    %548 = arith.mulf %543, %547 : vector<8x64xf32>
    %c152 = arith.constant 152 : index
    %c0_116 = arith.constant 0 : index
    %549 = vector.load %arg12[%c152, %c0_116] : memref<176x256xf32, #tpu.memory_space<vmem>>, vector<8x256xf32>
    %cst_117 = arith.constant dense<0.000000e+00> : vector<8x256xf32>
    %550 = tpu.matmul %548, %14, %cst_117 {dimension_numbers = #tpu.dot_dimension_numbers<[1], [0], [0], [1], [0, 0, 1, 1], [], []>} : vector<8x64xf32>, vector<64x256xf32>, vector<8x256xf32> -> vector<8x256xf32>
    %551 = arith.addf %549, %550 : vector<8x256xf32>
    %552 = vector.extract_strided_slice %551 {offsets = [0, 0], sizes = [8, 64], strides = [1, 1]} : vector<8x256xf32> to vector<8x64xf32>
    %553 = arith.negf %552 : vector<8x64xf32>
    %554 = math.exp %553 : vector<8x64xf32>
    %cst_118 = arith.constant 1.000000e+00 : f32
    %555 = vector.broadcast %cst_118 : f32 to vector<8x64xf32>
    %556 = arith.addf %555, %554 : vector<8x64xf32>
    %557 = arith.divf %555, %556 : vector<8x64xf32>
    %558 = vector.extract_strided_slice %551 {offsets = [0, 64], sizes = [8, 64], strides = [1, 1]} : vector<8x256xf32> to vector<8x64xf32>
    %559 = arith.negf %558 : vector<8x64xf32>
    %560 = math.exp %559 : vector<8x64xf32>
    %cst_119 = arith.constant 1.000000e+00 : f32
    %561 = vector.broadcast %cst_119 : f32 to vector<8x64xf32>
    %562 = arith.addf %561, %560 : vector<8x64xf32>
    %563 = arith.divf %561, %562 : vector<8x64xf32>
    %564 = vector.extract_strided_slice %551 {offsets = [0, 128], sizes = [8, 64], strides = [1, 1]} : vector<8x256xf32> to vector<8x64xf32>
    %565 = math.tanh %564 : vector<8x64xf32>
    %566 = vector.extract_strided_slice %551 {offsets = [0, 192], sizes = [8, 64], strides = [1, 1]} : vector<8x256xf32> to vector<8x64xf32>
    %567 = arith.negf %566 : vector<8x64xf32>
    %568 = math.exp %567 : vector<8x64xf32>
    %cst_120 = arith.constant 1.000000e+00 : f32
    %569 = vector.broadcast %cst_120 : f32 to vector<8x64xf32>
    %570 = arith.addf %569, %568 : vector<8x64xf32>
    %571 = arith.divf %569, %570 : vector<8x64xf32>
    %572 = arith.mulf %563, %546 : vector<8x64xf32>
    %573 = arith.mulf %557, %565 : vector<8x64xf32>
    %574 = arith.addf %572, %573 : vector<8x64xf32>
    %575 = math.tanh %574 : vector<8x64xf32>
    %576 = arith.mulf %571, %575 : vector<8x64xf32>
    %c160 = arith.constant 160 : index
    %c0_121 = arith.constant 0 : index
    %577 = vector.load %arg12[%c160, %c0_121] : memref<176x256xf32, #tpu.memory_space<vmem>>, vector<8x256xf32>
    %cst_122 = arith.constant dense<0.000000e+00> : vector<8x256xf32>
    %578 = tpu.matmul %576, %14, %cst_122 {dimension_numbers = #tpu.dot_dimension_numbers<[1], [0], [0], [1], [0, 0, 1, 1], [], []>} : vector<8x64xf32>, vector<64x256xf32>, vector<8x256xf32> -> vector<8x256xf32>
    %579 = arith.addf %577, %578 : vector<8x256xf32>
    %580 = vector.extract_strided_slice %579 {offsets = [0, 0], sizes = [8, 64], strides = [1, 1]} : vector<8x256xf32> to vector<8x64xf32>
    %581 = arith.negf %580 : vector<8x64xf32>
    %582 = math.exp %581 : vector<8x64xf32>
    %cst_123 = arith.constant 1.000000e+00 : f32
    %583 = vector.broadcast %cst_123 : f32 to vector<8x64xf32>
    %584 = arith.addf %583, %582 : vector<8x64xf32>
    %585 = arith.divf %583, %584 : vector<8x64xf32>
    %586 = vector.extract_strided_slice %579 {offsets = [0, 64], sizes = [8, 64], strides = [1, 1]} : vector<8x256xf32> to vector<8x64xf32>
    %587 = arith.negf %586 : vector<8x64xf32>
    %588 = math.exp %587 : vector<8x64xf32>
    %cst_124 = arith.constant 1.000000e+00 : f32
    %589 = vector.broadcast %cst_124 : f32 to vector<8x64xf32>
    %590 = arith.addf %589, %588 : vector<8x64xf32>
    %591 = arith.divf %589, %590 : vector<8x64xf32>
    %592 = vector.extract_strided_slice %579 {offsets = [0, 128], sizes = [8, 64], strides = [1, 1]} : vector<8x256xf32> to vector<8x64xf32>
    %593 = math.tanh %592 : vector<8x64xf32>
    %594 = vector.extract_strided_slice %579 {offsets = [0, 192], sizes = [8, 64], strides = [1, 1]} : vector<8x256xf32> to vector<8x64xf32>
    %595 = arith.negf %594 : vector<8x64xf32>
    %596 = math.exp %595 : vector<8x64xf32>
    %cst_125 = arith.constant 1.000000e+00 : f32
    %597 = vector.broadcast %cst_125 : f32 to vector<8x64xf32>
    %598 = arith.addf %597, %596 : vector<8x64xf32>
    %599 = arith.divf %597, %598 : vector<8x64xf32>
    %600 = arith.mulf %591, %574 : vector<8x64xf32>
    %601 = arith.mulf %585, %593 : vector<8x64xf32>
    %602 = arith.addf %600, %601 : vector<8x64xf32>
    %603 = math.tanh %602 : vector<8x64xf32>
    %604 = arith.mulf %599, %603 : vector<8x64xf32>
    %c168 = arith.constant 168 : index
    %c0_126 = arith.constant 0 : index
    %605 = vector.load %arg12[%c168, %c0_126] : memref<176x256xf32, #tpu.memory_space<vmem>>, vector<8x256xf32>
    %cst_127 = arith.constant dense<0.000000e+00> : vector<8x256xf32>
    %606 = tpu.matmul %604, %14, %cst_127 {dimension_numbers = #tpu.dot_dimension_numbers<[1], [0], [0], [1], [0, 0, 1, 1], [], []>} : vector<8x64xf32>, vector<64x256xf32>, vector<8x256xf32> -> vector<8x256xf32>
    %607 = arith.addf %605, %606 : vector<8x256xf32>
    %608 = vector.extract_strided_slice %607 {offsets = [0, 0], sizes = [8, 64], strides = [1, 1]} : vector<8x256xf32> to vector<8x64xf32>
    %609 = arith.negf %608 : vector<8x64xf32>
    %610 = math.exp %609 : vector<8x64xf32>
    %cst_128 = arith.constant 1.000000e+00 : f32
    %611 = vector.broadcast %cst_128 : f32 to vector<8x64xf32>
    %612 = arith.addf %611, %610 : vector<8x64xf32>
    %613 = arith.divf %611, %612 : vector<8x64xf32>
    %614 = vector.extract_strided_slice %607 {offsets = [0, 64], sizes = [8, 64], strides = [1, 1]} : vector<8x256xf32> to vector<8x64xf32>
    %615 = arith.negf %614 : vector<8x64xf32>
    %616 = math.exp %615 : vector<8x64xf32>
    %cst_129 = arith.constant 1.000000e+00 : f32
    %617 = vector.broadcast %cst_129 : f32 to vector<8x64xf32>
    %618 = arith.addf %617, %616 : vector<8x64xf32>
    %619 = arith.divf %617, %618 : vector<8x64xf32>
    %620 = vector.extract_strided_slice %607 {offsets = [0, 128], sizes = [8, 64], strides = [1, 1]} : vector<8x256xf32> to vector<8x64xf32>
    %621 = math.tanh %620 : vector<8x64xf32>
    %622 = vector.extract_strided_slice %607 {offsets = [0, 192], sizes = [8, 64], strides = [1, 1]} : vector<8x256xf32> to vector<8x64xf32>
    %623 = arith.negf %622 : vector<8x64xf32>
    %624 = math.exp %623 : vector<8x64xf32>
    %cst_130 = arith.constant 1.000000e+00 : f32
    %625 = vector.broadcast %cst_130 : f32 to vector<8x64xf32>
    %626 = arith.addf %625, %624 : vector<8x64xf32>
    %627 = arith.divf %625, %626 : vector<8x64xf32>
    %628 = arith.mulf %619, %602 : vector<8x64xf32>
    %629 = arith.mulf %613, %621 : vector<8x64xf32>
    %630 = arith.addf %628, %629 : vector<8x64xf32>
    %631 = math.tanh %630 : vector<8x64xf32>
    %632 = arith.mulf %627, %631 : vector<8x64xf32>
    %c168_131 = arith.constant 168 : index
    %c0_132 = arith.constant 0 : index
    %633 = vector.load %arg13[%c168_131, %c0_132] : memref<176x256xf32, #tpu.memory_space<vmem>>, vector<8x256xf32>
    %cst_133 = arith.constant dense<0.000000e+00> : vector<8x256xf32>
    %634 = tpu.matmul %16, %15, %cst_133 {dimension_numbers = #tpu.dot_dimension_numbers<[1], [0], [0], [1], [0, 0, 1, 1], [], []>} : vector<8x64xf32>, vector<64x256xf32>, vector<8x256xf32> -> vector<8x256xf32>
    %635 = arith.addf %633, %634 : vector<8x256xf32>
    %636 = vector.extract_strided_slice %635 {offsets = [0, 0], sizes = [8, 64], strides = [1, 1]} : vector<8x256xf32> to vector<8x64xf32>
    %637 = arith.negf %636 : vector<8x64xf32>
    %638 = math.exp %637 : vector<8x64xf32>
    %cst_134 = arith.constant 1.000000e+00 : f32
    %639 = vector.broadcast %cst_134 : f32 to vector<8x64xf32>
    %640 = arith.addf %639, %638 : vector<8x64xf32>
    %641 = arith.divf %639, %640 : vector<8x64xf32>
    %642 = vector.extract_strided_slice %635 {offsets = [0, 64], sizes = [8, 64], strides = [1, 1]} : vector<8x256xf32> to vector<8x64xf32>
    %643 = arith.negf %642 : vector<8x64xf32>
    %644 = math.exp %643 : vector<8x64xf32>
    %cst_135 = arith.constant 1.000000e+00 : f32
    %645 = vector.broadcast %cst_135 : f32 to vector<8x64xf32>
    %646 = arith.addf %645, %644 : vector<8x64xf32>
    %647 = arith.divf %645, %646 : vector<8x64xf32>
    %648 = vector.extract_strided_slice %635 {offsets = [0, 128], sizes = [8, 64], strides = [1, 1]} : vector<8x256xf32> to vector<8x64xf32>
    %649 = math.tanh %648 : vector<8x64xf32>
    %650 = vector.extract_strided_slice %635 {offsets = [0, 192], sizes = [8, 64], strides = [1, 1]} : vector<8x256xf32> to vector<8x64xf32>
    %651 = arith.negf %650 : vector<8x64xf32>
    %652 = math.exp %651 : vector<8x64xf32>
    %cst_136 = arith.constant 1.000000e+00 : f32
    %653 = vector.broadcast %cst_136 : f32 to vector<8x64xf32>
    %654 = arith.addf %653, %652 : vector<8x64xf32>
    %655 = arith.divf %653, %654 : vector<8x64xf32>
    %656 = arith.mulf %647, %16 : vector<8x64xf32>
    %657 = arith.mulf %641, %649 : vector<8x64xf32>
    %658 = arith.addf %656, %657 : vector<8x64xf32>
    %659 = math.tanh %658 : vector<8x64xf32>
    %660 = arith.mulf %655, %659 : vector<8x64xf32>
    %c160_137 = arith.constant 160 : index
    %c0_138 = arith.constant 0 : index
    %661 = vector.load %arg13[%c160_137, %c0_138] : memref<176x256xf32, #tpu.memory_space<vmem>>, vector<8x256xf32>
    %cst_139 = arith.constant dense<0.000000e+00> : vector<8x256xf32>
    %662 = tpu.matmul %660, %15, %cst_139 {dimension_numbers = #tpu.dot_dimension_numbers<[1], [0], [0], [1], [0, 0, 1, 1], [], []>} : vector<8x64xf32>, vector<64x256xf32>, vector<8x256xf32> -> vector<8x256xf32>
    %663 = arith.addf %661, %662 : vector<8x256xf32>
    %664 = vector.extract_strided_slice %663 {offsets = [0, 0], sizes = [8, 64], strides = [1, 1]} : vector<8x256xf32> to vector<8x64xf32>
    %665 = arith.negf %664 : vector<8x64xf32>
    %666 = math.exp %665 : vector<8x64xf32>
    %cst_140 = arith.constant 1.000000e+00 : f32
    %667 = vector.broadcast %cst_140 : f32 to vector<8x64xf32>
    %668 = arith.addf %667, %666 : vector<8x64xf32>
    %669 = arith.divf %667, %668 : vector<8x64xf32>
    %670 = vector.extract_strided_slice %663 {offsets = [0, 64], sizes = [8, 64], strides = [1, 1]} : vector<8x256xf32> to vector<8x64xf32>
    %671 = arith.negf %670 : vector<8x64xf32>
    %672 = math.exp %671 : vector<8x64xf32>
    %cst_141 = arith.constant 1.000000e+00 : f32
    %673 = vector.broadcast %cst_141 : f32 to vector<8x64xf32>
    %674 = arith.addf %673, %672 : vector<8x64xf32>
    %675 = arith.divf %673, %674 : vector<8x64xf32>
    %676 = vector.extract_strided_slice %663 {offsets = [0, 128], sizes = [8, 64], strides = [1, 1]} : vector<8x256xf32> to vector<8x64xf32>
    %677 = math.tanh %676 : vector<8x64xf32>
    %678 = vector.extract_strided_slice %663 {offsets = [0, 192], sizes = [8, 64], strides = [1, 1]} : vector<8x256xf32> to vector<8x64xf32>
    %679 = arith.negf %678 : vector<8x64xf32>
    %680 = math.exp %679 : vector<8x64xf32>
    %cst_142 = arith.constant 1.000000e+00 : f32
    %681 = vector.broadcast %cst_142 : f32 to vector<8x64xf32>
    %682 = arith.addf %681, %680 : vector<8x64xf32>
    %683 = arith.divf %681, %682 : vector<8x64xf32>
    %684 = arith.mulf %675, %658 : vector<8x64xf32>
    %685 = arith.mulf %669, %677 : vector<8x64xf32>
    %686 = arith.addf %684, %685 : vector<8x64xf32>
    %687 = math.tanh %686 : vector<8x64xf32>
    %688 = arith.mulf %683, %687 : vector<8x64xf32>
    %c152_143 = arith.constant 152 : index
    %c0_144 = arith.constant 0 : index
    %689 = vector.load %arg13[%c152_143, %c0_144] : memref<176x256xf32, #tpu.memory_space<vmem>>, vector<8x256xf32>
    %cst_145 = arith.constant dense<0.000000e+00> : vector<8x256xf32>
    %690 = tpu.matmul %688, %15, %cst_145 {dimension_numbers = #tpu.dot_dimension_numbers<[1], [0], [0], [1], [0, 0, 1, 1], [], []>} : vector<8x64xf32>, vector<64x256xf32>, vector<8x256xf32> -> vector<8x256xf32>
    %691 = arith.addf %689, %690 : vector<8x256xf32>
    %692 = vector.extract_strided_slice %691 {offsets = [0, 0], sizes = [8, 64], strides = [1, 1]} : vector<8x256xf32> to vector<8x64xf32>
    %693 = arith.negf %692 : vector<8x64xf32>
    %694 = math.exp %693 : vector<8x64xf32>
    %cst_146 = arith.constant 1.000000e+00 : f32
    %695 = vector.broadcast %cst_146 : f32 to vector<8x64xf32>
    %696 = arith.addf %695, %694 : vector<8x64xf32>
    %697 = arith.divf %695, %696 : vector<8x64xf32>
    %698 = vector.extract_strided_slice %691 {offsets = [0, 64], sizes = [8, 64], strides = [1, 1]} : vector<8x256xf32> to vector<8x64xf32>
    %699 = arith.negf %698 : vector<8x64xf32>
    %700 = math.exp %699 : vector<8x64xf32>
    %cst_147 = arith.constant 1.000000e+00 : f32
    %701 = vector.broadcast %cst_147 : f32 to vector<8x64xf32>
    %702 = arith.addf %701, %700 : vector<8x64xf32>
    %703 = arith.divf %701, %702 : vector<8x64xf32>
    %704 = vector.extract_strided_slice %691 {offsets = [0, 128], sizes = [8, 64], strides = [1, 1]} : vector<8x256xf32> to vector<8x64xf32>
    %705 = math.tanh %704 : vector<8x64xf32>
    %706 = vector.extract_strided_slice %691 {offsets = [0, 192], sizes = [8, 64], strides = [1, 1]} : vector<8x256xf32> to vector<8x64xf32>
    %707 = arith.negf %706 : vector<8x64xf32>
    %708 = math.exp %707 : vector<8x64xf32>
    %cst_148 = arith.constant 1.000000e+00 : f32
    %709 = vector.broadcast %cst_148 : f32 to vector<8x64xf32>
    %710 = arith.addf %709, %708 : vector<8x64xf32>
    %711 = arith.divf %709, %710 : vector<8x64xf32>
    %712 = arith.mulf %703, %686 : vector<8x64xf32>
    %713 = arith.mulf %697, %705 : vector<8x64xf32>
    %714 = arith.addf %712, %713 : vector<8x64xf32>
    %715 = math.tanh %714 : vector<8x64xf32>
    %716 = arith.mulf %711, %715 : vector<8x64xf32>
    %c144_149 = arith.constant 144 : index
    %c0_150 = arith.constant 0 : index
    %717 = vector.load %arg13[%c144_149, %c0_150] : memref<176x256xf32, #tpu.memory_space<vmem>>, vector<8x256xf32>
    %cst_151 = arith.constant dense<0.000000e+00> : vector<8x256xf32>
    %718 = tpu.matmul %716, %15, %cst_151 {dimension_numbers = #tpu.dot_dimension_numbers<[1], [0], [0], [1], [0, 0, 1, 1], [], []>} : vector<8x64xf32>, vector<64x256xf32>, vector<8x256xf32> -> vector<8x256xf32>
    %719 = arith.addf %717, %718 : vector<8x256xf32>
    %720 = vector.extract_strided_slice %719 {offsets = [0, 0], sizes = [8, 64], strides = [1, 1]} : vector<8x256xf32> to vector<8x64xf32>
    %721 = arith.negf %720 : vector<8x64xf32>
    %722 = math.exp %721 : vector<8x64xf32>
    %cst_152 = arith.constant 1.000000e+00 : f32
    %723 = vector.broadcast %cst_152 : f32 to vector<8x64xf32>
    %724 = arith.addf %723, %722 : vector<8x64xf32>
    %725 = arith.divf %723, %724 : vector<8x64xf32>
    %726 = vector.extract_strided_slice %719 {offsets = [0, 64], sizes = [8, 64], strides = [1, 1]} : vector<8x256xf32> to vector<8x64xf32>
    %727 = arith.negf %726 : vector<8x64xf32>
    %728 = math.exp %727 : vector<8x64xf32>
    %cst_153 = arith.constant 1.000000e+00 : f32
    %729 = vector.broadcast %cst_153 : f32 to vector<8x64xf32>
    %730 = arith.addf %729, %728 : vector<8x64xf32>
    %731 = arith.divf %729, %730 : vector<8x64xf32>
    %732 = vector.extract_strided_slice %719 {offsets = [0, 128], sizes = [8, 64], strides = [1, 1]} : vector<8x256xf32> to vector<8x64xf32>
    %733 = math.tanh %732 : vector<8x64xf32>
    %734 = vector.extract_strided_slice %719 {offsets = [0, 192], sizes = [8, 64], strides = [1, 1]} : vector<8x256xf32> to vector<8x64xf32>
    %735 = arith.negf %734 : vector<8x64xf32>
    %736 = math.exp %735 : vector<8x64xf32>
    %cst_154 = arith.constant 1.000000e+00 : f32
    %737 = vector.broadcast %cst_154 : f32 to vector<8x64xf32>
    %738 = arith.addf %737, %736 : vector<8x64xf32>
    %739 = arith.divf %737, %738 : vector<8x64xf32>
    %740 = arith.mulf %731, %714 : vector<8x64xf32>
    %741 = arith.mulf %725, %733 : vector<8x64xf32>
    %742 = arith.addf %740, %741 : vector<8x64xf32>
    %743 = math.tanh %742 : vector<8x64xf32>
    %744 = arith.mulf %739, %743 : vector<8x64xf32>
    %c136_155 = arith.constant 136 : index
    %c0_156 = arith.constant 0 : index
    %745 = vector.load %arg13[%c136_155, %c0_156] : memref<176x256xf32, #tpu.memory_space<vmem>>, vector<8x256xf32>
    %cst_157 = arith.constant dense<0.000000e+00> : vector<8x256xf32>
    %746 = tpu.matmul %744, %15, %cst_157 {dimension_numbers = #tpu.dot_dimension_numbers<[1], [0], [0], [1], [0, 0, 1, 1], [], []>} : vector<8x64xf32>, vector<64x256xf32>, vector<8x256xf32> -> vector<8x256xf32>
    %747 = arith.addf %745, %746 : vector<8x256xf32>
    %748 = vector.extract_strided_slice %747 {offsets = [0, 0], sizes = [8, 64], strides = [1, 1]} : vector<8x256xf32> to vector<8x64xf32>
    %749 = arith.negf %748 : vector<8x64xf32>
    %750 = math.exp %749 : vector<8x64xf32>
    %cst_158 = arith.constant 1.000000e+00 : f32
    %751 = vector.broadcast %cst_158 : f32 to vector<8x64xf32>
    %752 = arith.addf %751, %750 : vector<8x64xf32>
    %753 = arith.divf %751, %752 : vector<8x64xf32>
    %754 = vector.extract_strided_slice %747 {offsets = [0, 64], sizes = [8, 64], strides = [1, 1]} : vector<8x256xf32> to vector<8x64xf32>
    %755 = arith.negf %754 : vector<8x64xf32>
    %756 = math.exp %755 : vector<8x64xf32>
    %cst_159 = arith.constant 1.000000e+00 : f32
    %757 = vector.broadcast %cst_159 : f32 to vector<8x64xf32>
    %758 = arith.addf %757, %756 : vector<8x64xf32>
    %759 = arith.divf %757, %758 : vector<8x64xf32>
    %760 = vector.extract_strided_slice %747 {offsets = [0, 128], sizes = [8, 64], strides = [1, 1]} : vector<8x256xf32> to vector<8x64xf32>
    %761 = math.tanh %760 : vector<8x64xf32>
    %762 = vector.extract_strided_slice %747 {offsets = [0, 192], sizes = [8, 64], strides = [1, 1]} : vector<8x256xf32> to vector<8x64xf32>
    %763 = arith.negf %762 : vector<8x64xf32>
    %764 = math.exp %763 : vector<8x64xf32>
    %cst_160 = arith.constant 1.000000e+00 : f32
    %765 = vector.broadcast %cst_160 : f32 to vector<8x64xf32>
    %766 = arith.addf %765, %764 : vector<8x64xf32>
    %767 = arith.divf %765, %766 : vector<8x64xf32>
    %768 = arith.mulf %759, %742 : vector<8x64xf32>
    %769 = arith.mulf %753, %761 : vector<8x64xf32>
    %770 = arith.addf %768, %769 : vector<8x64xf32>
    %771 = math.tanh %770 : vector<8x64xf32>
    %772 = arith.mulf %767, %771 : vector<8x64xf32>
    %c128_161 = arith.constant 128 : index
    %c0_162 = arith.constant 0 : index
    %773 = vector.load %arg13[%c128_161, %c0_162] : memref<176x256xf32, #tpu.memory_space<vmem>>, vector<8x256xf32>
    %cst_163 = arith.constant dense<0.000000e+00> : vector<8x256xf32>
    %774 = tpu.matmul %772, %15, %cst_163 {dimension_numbers = #tpu.dot_dimension_numbers<[1], [0], [0], [1], [0, 0, 1, 1], [], []>} : vector<8x64xf32>, vector<64x256xf32>, vector<8x256xf32> -> vector<8x256xf32>
    %775 = arith.addf %773, %774 : vector<8x256xf32>
    %776 = vector.extract_strided_slice %775 {offsets = [0, 0], sizes = [8, 64], strides = [1, 1]} : vector<8x256xf32> to vector<8x64xf32>
    %777 = arith.negf %776 : vector<8x64xf32>
    %778 = math.exp %777 : vector<8x64xf32>
    %cst_164 = arith.constant 1.000000e+00 : f32
    %779 = vector.broadcast %cst_164 : f32 to vector<8x64xf32>
    %780 = arith.addf %779, %778 : vector<8x64xf32>
    %781 = arith.divf %779, %780 : vector<8x64xf32>
    %782 = vector.extract_strided_slice %775 {offsets = [0, 64], sizes = [8, 64], strides = [1, 1]} : vector<8x256xf32> to vector<8x64xf32>
    %783 = arith.negf %782 : vector<8x64xf32>
    %784 = math.exp %783 : vector<8x64xf32>
    %cst_165 = arith.constant 1.000000e+00 : f32
    %785 = vector.broadcast %cst_165 : f32 to vector<8x64xf32>
    %786 = arith.addf %785, %784 : vector<8x64xf32>
    %787 = arith.divf %785, %786 : vector<8x64xf32>
    %788 = vector.extract_strided_slice %775 {offsets = [0, 128], sizes = [8, 64], strides = [1, 1]} : vector<8x256xf32> to vector<8x64xf32>
    %789 = math.tanh %788 : vector<8x64xf32>
    %790 = vector.extract_strided_slice %775 {offsets = [0, 192], sizes = [8, 64], strides = [1, 1]} : vector<8x256xf32> to vector<8x64xf32>
    %791 = arith.negf %790 : vector<8x64xf32>
    %792 = math.exp %791 : vector<8x64xf32>
    %cst_166 = arith.constant 1.000000e+00 : f32
    %793 = vector.broadcast %cst_166 : f32 to vector<8x64xf32>
    %794 = arith.addf %793, %792 : vector<8x64xf32>
    %795 = arith.divf %793, %794 : vector<8x64xf32>
    %796 = arith.mulf %787, %770 : vector<8x64xf32>
    %797 = arith.mulf %781, %789 : vector<8x64xf32>
    %798 = arith.addf %796, %797 : vector<8x64xf32>
    %799 = math.tanh %798 : vector<8x64xf32>
    %800 = arith.mulf %795, %799 : vector<8x64xf32>
    %c120_167 = arith.constant 120 : index
    %c0_168 = arith.constant 0 : index
    %801 = vector.load %arg13[%c120_167, %c0_168] : memref<176x256xf32, #tpu.memory_space<vmem>>, vector<8x256xf32>
    %cst_169 = arith.constant dense<0.000000e+00> : vector<8x256xf32>
    %802 = tpu.matmul %800, %15, %cst_169 {dimension_numbers = #tpu.dot_dimension_numbers<[1], [0], [0], [1], [0, 0, 1, 1], [], []>} : vector<8x64xf32>, vector<64x256xf32>, vector<8x256xf32> -> vector<8x256xf32>
    %803 = arith.addf %801, %802 : vector<8x256xf32>
    %804 = vector.extract_strided_slice %803 {offsets = [0, 0], sizes = [8, 64], strides = [1, 1]} : vector<8x256xf32> to vector<8x64xf32>
    %805 = arith.negf %804 : vector<8x64xf32>
    %806 = math.exp %805 : vector<8x64xf32>
    %cst_170 = arith.constant 1.000000e+00 : f32
    %807 = vector.broadcast %cst_170 : f32 to vector<8x64xf32>
    %808 = arith.addf %807, %806 : vector<8x64xf32>
    %809 = arith.divf %807, %808 : vector<8x64xf32>
    %810 = vector.extract_strided_slice %803 {offsets = [0, 64], sizes = [8, 64], strides = [1, 1]} : vector<8x256xf32> to vector<8x64xf32>
    %811 = arith.negf %810 : vector<8x64xf32>
    %812 = math.exp %811 : vector<8x64xf32>
    %cst_171 = arith.constant 1.000000e+00 : f32
    %813 = vector.broadcast %cst_171 : f32 to vector<8x64xf32>
    %814 = arith.addf %813, %812 : vector<8x64xf32>
    %815 = arith.divf %813, %814 : vector<8x64xf32>
    %816 = vector.extract_strided_slice %803 {offsets = [0, 128], sizes = [8, 64], strides = [1, 1]} : vector<8x256xf32> to vector<8x64xf32>
    %817 = math.tanh %816 : vector<8x64xf32>
    %818 = vector.extract_strided_slice %803 {offsets = [0, 192], sizes = [8, 64], strides = [1, 1]} : vector<8x256xf32> to vector<8x64xf32>
    %819 = arith.negf %818 : vector<8x64xf32>
    %820 = math.exp %819 : vector<8x64xf32>
    %cst_172 = arith.constant 1.000000e+00 : f32
    %821 = vector.broadcast %cst_172 : f32 to vector<8x64xf32>
    %822 = arith.addf %821, %820 : vector<8x64xf32>
    %823 = arith.divf %821, %822 : vector<8x64xf32>
    %824 = arith.mulf %815, %798 : vector<8x64xf32>
    %825 = arith.mulf %809, %817 : vector<8x64xf32>
    %826 = arith.addf %824, %825 : vector<8x64xf32>
    %827 = math.tanh %826 : vector<8x64xf32>
    %828 = arith.mulf %823, %827 : vector<8x64xf32>
    %c112_173 = arith.constant 112 : index
    %c0_174 = arith.constant 0 : index
    %829 = vector.load %arg13[%c112_173, %c0_174] : memref<176x256xf32, #tpu.memory_space<vmem>>, vector<8x256xf32>
    %cst_175 = arith.constant dense<0.000000e+00> : vector<8x256xf32>
    %830 = tpu.matmul %828, %15, %cst_175 {dimension_numbers = #tpu.dot_dimension_numbers<[1], [0], [0], [1], [0, 0, 1, 1], [], []>} : vector<8x64xf32>, vector<64x256xf32>, vector<8x256xf32> -> vector<8x256xf32>
    %831 = arith.addf %829, %830 : vector<8x256xf32>
    %832 = vector.extract_strided_slice %831 {offsets = [0, 0], sizes = [8, 64], strides = [1, 1]} : vector<8x256xf32> to vector<8x64xf32>
    %833 = arith.negf %832 : vector<8x64xf32>
    %834 = math.exp %833 : vector<8x64xf32>
    %cst_176 = arith.constant 1.000000e+00 : f32
    %835 = vector.broadcast %cst_176 : f32 to vector<8x64xf32>
    %836 = arith.addf %835, %834 : vector<8x64xf32>
    %837 = arith.divf %835, %836 : vector<8x64xf32>
    %838 = vector.extract_strided_slice %831 {offsets = [0, 64], sizes = [8, 64], strides = [1, 1]} : vector<8x256xf32> to vector<8x64xf32>
    %839 = arith.negf %838 : vector<8x64xf32>
    %840 = math.exp %839 : vector<8x64xf32>
    %cst_177 = arith.constant 1.000000e+00 : f32
    %841 = vector.broadcast %cst_177 : f32 to vector<8x64xf32>
    %842 = arith.addf %841, %840 : vector<8x64xf32>
    %843 = arith.divf %841, %842 : vector<8x64xf32>
    %844 = vector.extract_strided_slice %831 {offsets = [0, 128], sizes = [8, 64], strides = [1, 1]} : vector<8x256xf32> to vector<8x64xf32>
    %845 = math.tanh %844 : vector<8x64xf32>
    %846 = vector.extract_strided_slice %831 {offsets = [0, 192], sizes = [8, 64], strides = [1, 1]} : vector<8x256xf32> to vector<8x64xf32>
    %847 = arith.negf %846 : vector<8x64xf32>
    %848 = math.exp %847 : vector<8x64xf32>
    %cst_178 = arith.constant 1.000000e+00 : f32
    %849 = vector.broadcast %cst_178 : f32 to vector<8x64xf32>
    %850 = arith.addf %849, %848 : vector<8x64xf32>
    %851 = arith.divf %849, %850 : vector<8x64xf32>
    %852 = arith.mulf %843, %826 : vector<8x64xf32>
    %853 = arith.mulf %837, %845 : vector<8x64xf32>
    %854 = arith.addf %852, %853 : vector<8x64xf32>
    %855 = math.tanh %854 : vector<8x64xf32>
    %856 = arith.mulf %851, %855 : vector<8x64xf32>
    %c104_179 = arith.constant 104 : index
    %c0_180 = arith.constant 0 : index
    %857 = vector.load %arg13[%c104_179, %c0_180] : memref<176x256xf32, #tpu.memory_space<vmem>>, vector<8x256xf32>
    %cst_181 = arith.constant dense<0.000000e+00> : vector<8x256xf32>
    %858 = tpu.matmul %856, %15, %cst_181 {dimension_numbers = #tpu.dot_dimension_numbers<[1], [0], [0], [1], [0, 0, 1, 1], [], []>} : vector<8x64xf32>, vector<64x256xf32>, vector<8x256xf32> -> vector<8x256xf32>
    %859 = arith.addf %857, %858 : vector<8x256xf32>
    %860 = vector.extract_strided_slice %859 {offsets = [0, 0], sizes = [8, 64], strides = [1, 1]} : vector<8x256xf32> to vector<8x64xf32>
    %861 = arith.negf %860 : vector<8x64xf32>
    %862 = math.exp %861 : vector<8x64xf32>
    %cst_182 = arith.constant 1.000000e+00 : f32
    %863 = vector.broadcast %cst_182 : f32 to vector<8x64xf32>
    %864 = arith.addf %863, %862 : vector<8x64xf32>
    %865 = arith.divf %863, %864 : vector<8x64xf32>
    %866 = vector.extract_strided_slice %859 {offsets = [0, 64], sizes = [8, 64], strides = [1, 1]} : vector<8x256xf32> to vector<8x64xf32>
    %867 = arith.negf %866 : vector<8x64xf32>
    %868 = math.exp %867 : vector<8x64xf32>
    %cst_183 = arith.constant 1.000000e+00 : f32
    %869 = vector.broadcast %cst_183 : f32 to vector<8x64xf32>
    %870 = arith.addf %869, %868 : vector<8x64xf32>
    %871 = arith.divf %869, %870 : vector<8x64xf32>
    %872 = vector.extract_strided_slice %859 {offsets = [0, 128], sizes = [8, 64], strides = [1, 1]} : vector<8x256xf32> to vector<8x64xf32>
    %873 = math.tanh %872 : vector<8x64xf32>
    %874 = vector.extract_strided_slice %859 {offsets = [0, 192], sizes = [8, 64], strides = [1, 1]} : vector<8x256xf32> to vector<8x64xf32>
    %875 = arith.negf %874 : vector<8x64xf32>
    %876 = math.exp %875 : vector<8x64xf32>
    %cst_184 = arith.constant 1.000000e+00 : f32
    %877 = vector.broadcast %cst_184 : f32 to vector<8x64xf32>
    %878 = arith.addf %877, %876 : vector<8x64xf32>
    %879 = arith.divf %877, %878 : vector<8x64xf32>
    %880 = arith.mulf %871, %854 : vector<8x64xf32>
    %881 = arith.mulf %865, %873 : vector<8x64xf32>
    %882 = arith.addf %880, %881 : vector<8x64xf32>
    %883 = math.tanh %882 : vector<8x64xf32>
    %884 = arith.mulf %879, %883 : vector<8x64xf32>
    %c96_185 = arith.constant 96 : index
    %c0_186 = arith.constant 0 : index
    %885 = vector.load %arg13[%c96_185, %c0_186] : memref<176x256xf32, #tpu.memory_space<vmem>>, vector<8x256xf32>
    %cst_187 = arith.constant dense<0.000000e+00> : vector<8x256xf32>
    %886 = tpu.matmul %884, %15, %cst_187 {dimension_numbers = #tpu.dot_dimension_numbers<[1], [0], [0], [1], [0, 0, 1, 1], [], []>} : vector<8x64xf32>, vector<64x256xf32>, vector<8x256xf32> -> vector<8x256xf32>
    %887 = arith.addf %885, %886 : vector<8x256xf32>
    %888 = vector.extract_strided_slice %887 {offsets = [0, 0], sizes = [8, 64], strides = [1, 1]} : vector<8x256xf32> to vector<8x64xf32>
    %889 = arith.negf %888 : vector<8x64xf32>
    %890 = math.exp %889 : vector<8x64xf32>
    %cst_188 = arith.constant 1.000000e+00 : f32
    %891 = vector.broadcast %cst_188 : f32 to vector<8x64xf32>
    %892 = arith.addf %891, %890 : vector<8x64xf32>
    %893 = arith.divf %891, %892 : vector<8x64xf32>
    %894 = vector.extract_strided_slice %887 {offsets = [0, 64], sizes = [8, 64], strides = [1, 1]} : vector<8x256xf32> to vector<8x64xf32>
    %895 = arith.negf %894 : vector<8x64xf32>
    %896 = math.exp %895 : vector<8x64xf32>
    %cst_189 = arith.constant 1.000000e+00 : f32
    %897 = vector.broadcast %cst_189 : f32 to vector<8x64xf32>
    %898 = arith.addf %897, %896 : vector<8x64xf32>
    %899 = arith.divf %897, %898 : vector<8x64xf32>
    %900 = vector.extract_strided_slice %887 {offsets = [0, 128], sizes = [8, 64], strides = [1, 1]} : vector<8x256xf32> to vector<8x64xf32>
    %901 = math.tanh %900 : vector<8x64xf32>
    %902 = vector.extract_strided_slice %887 {offsets = [0, 192], sizes = [8, 64], strides = [1, 1]} : vector<8x256xf32> to vector<8x64xf32>
    %903 = arith.negf %902 : vector<8x64xf32>
    %904 = math.exp %903 : vector<8x64xf32>
    %cst_190 = arith.constant 1.000000e+00 : f32
    %905 = vector.broadcast %cst_190 : f32 to vector<8x64xf32>
    %906 = arith.addf %905, %904 : vector<8x64xf32>
    %907 = arith.divf %905, %906 : vector<8x64xf32>
    %908 = arith.mulf %899, %882 : vector<8x64xf32>
    %909 = arith.mulf %893, %901 : vector<8x64xf32>
    %910 = arith.addf %908, %909 : vector<8x64xf32>
    %911 = math.tanh %910 : vector<8x64xf32>
    %912 = arith.mulf %907, %911 : vector<8x64xf32>
    %c88_191 = arith.constant 88 : index
    %c0_192 = arith.constant 0 : index
    %913 = vector.load %arg13[%c88_191, %c0_192] : memref<176x256xf32, #tpu.memory_space<vmem>>, vector<8x256xf32>
    %cst_193 = arith.constant dense<0.000000e+00> : vector<8x256xf32>
    %914 = tpu.matmul %912, %15, %cst_193 {dimension_numbers = #tpu.dot_dimension_numbers<[1], [0], [0], [1], [0, 0, 1, 1], [], []>} : vector<8x64xf32>, vector<64x256xf32>, vector<8x256xf32> -> vector<8x256xf32>
    %915 = arith.addf %913, %914 : vector<8x256xf32>
    %916 = vector.extract_strided_slice %915 {offsets = [0, 0], sizes = [8, 64], strides = [1, 1]} : vector<8x256xf32> to vector<8x64xf32>
    %917 = arith.negf %916 : vector<8x64xf32>
    %918 = math.exp %917 : vector<8x64xf32>
    %cst_194 = arith.constant 1.000000e+00 : f32
    %919 = vector.broadcast %cst_194 : f32 to vector<8x64xf32>
    %920 = arith.addf %919, %918 : vector<8x64xf32>
    %921 = arith.divf %919, %920 : vector<8x64xf32>
    %922 = vector.extract_strided_slice %915 {offsets = [0, 64], sizes = [8, 64], strides = [1, 1]} : vector<8x256xf32> to vector<8x64xf32>
    %923 = arith.negf %922 : vector<8x64xf32>
    %924 = math.exp %923 : vector<8x64xf32>
    %cst_195 = arith.constant 1.000000e+00 : f32
    %925 = vector.broadcast %cst_195 : f32 to vector<8x64xf32>
    %926 = arith.addf %925, %924 : vector<8x64xf32>
    %927 = arith.divf %925, %926 : vector<8x64xf32>
    %928 = vector.extract_strided_slice %915 {offsets = [0, 128], sizes = [8, 64], strides = [1, 1]} : vector<8x256xf32> to vector<8x64xf32>
    %929 = math.tanh %928 : vector<8x64xf32>
    %930 = vector.extract_strided_slice %915 {offsets = [0, 192], sizes = [8, 64], strides = [1, 1]} : vector<8x256xf32> to vector<8x64xf32>
    %931 = arith.negf %930 : vector<8x64xf32>
    %932 = math.exp %931 : vector<8x64xf32>
    %cst_196 = arith.constant 1.000000e+00 : f32
    %933 = vector.broadcast %cst_196 : f32 to vector<8x64xf32>
    %934 = arith.addf %933, %932 : vector<8x64xf32>
    %935 = arith.divf %933, %934 : vector<8x64xf32>
    %936 = arith.mulf %927, %910 : vector<8x64xf32>
    %937 = arith.mulf %921, %929 : vector<8x64xf32>
    %938 = arith.addf %936, %937 : vector<8x64xf32>
    %939 = math.tanh %938 : vector<8x64xf32>
    %940 = arith.mulf %935, %939 : vector<8x64xf32>
    %c80_197 = arith.constant 80 : index
    %c0_198 = arith.constant 0 : index
    %941 = vector.load %arg13[%c80_197, %c0_198] : memref<176x256xf32, #tpu.memory_space<vmem>>, vector<8x256xf32>
    %cst_199 = arith.constant dense<0.000000e+00> : vector<8x256xf32>
    %942 = tpu.matmul %940, %15, %cst_199 {dimension_numbers = #tpu.dot_dimension_numbers<[1], [0], [0], [1], [0, 0, 1, 1], [], []>} : vector<8x64xf32>, vector<64x256xf32>, vector<8x256xf32> -> vector<8x256xf32>
    %943 = arith.addf %941, %942 : vector<8x256xf32>
    %944 = vector.extract_strided_slice %943 {offsets = [0, 0], sizes = [8, 64], strides = [1, 1]} : vector<8x256xf32> to vector<8x64xf32>
    %945 = arith.negf %944 : vector<8x64xf32>
    %946 = math.exp %945 : vector<8x64xf32>
    %cst_200 = arith.constant 1.000000e+00 : f32
    %947 = vector.broadcast %cst_200 : f32 to vector<8x64xf32>
    %948 = arith.addf %947, %946 : vector<8x64xf32>
    %949 = arith.divf %947, %948 : vector<8x64xf32>
    %950 = vector.extract_strided_slice %943 {offsets = [0, 64], sizes = [8, 64], strides = [1, 1]} : vector<8x256xf32> to vector<8x64xf32>
    %951 = arith.negf %950 : vector<8x64xf32>
    %952 = math.exp %951 : vector<8x64xf32>
    %cst_201 = arith.constant 1.000000e+00 : f32
    %953 = vector.broadcast %cst_201 : f32 to vector<8x64xf32>
    %954 = arith.addf %953, %952 : vector<8x64xf32>
    %955 = arith.divf %953, %954 : vector<8x64xf32>
    %956 = vector.extract_strided_slice %943 {offsets = [0, 128], sizes = [8, 64], strides = [1, 1]} : vector<8x256xf32> to vector<8x64xf32>
    %957 = math.tanh %956 : vector<8x64xf32>
    %958 = vector.extract_strided_slice %943 {offsets = [0, 192], sizes = [8, 64], strides = [1, 1]} : vector<8x256xf32> to vector<8x64xf32>
    %959 = arith.negf %958 : vector<8x64xf32>
    %960 = math.exp %959 : vector<8x64xf32>
    %cst_202 = arith.constant 1.000000e+00 : f32
    %961 = vector.broadcast %cst_202 : f32 to vector<8x64xf32>
    %962 = arith.addf %961, %960 : vector<8x64xf32>
    %963 = arith.divf %961, %962 : vector<8x64xf32>
    %964 = arith.mulf %955, %938 : vector<8x64xf32>
    %965 = arith.mulf %949, %957 : vector<8x64xf32>
    %966 = arith.addf %964, %965 : vector<8x64xf32>
    %967 = math.tanh %966 : vector<8x64xf32>
    %968 = arith.mulf %963, %967 : vector<8x64xf32>
    %c72_203 = arith.constant 72 : index
    %c0_204 = arith.constant 0 : index
    %969 = vector.load %arg13[%c72_203, %c0_204] : memref<176x256xf32, #tpu.memory_space<vmem>>, vector<8x256xf32>
    %cst_205 = arith.constant dense<0.000000e+00> : vector<8x256xf32>
    %970 = tpu.matmul %968, %15, %cst_205 {dimension_numbers = #tpu.dot_dimension_numbers<[1], [0], [0], [1], [0, 0, 1, 1], [], []>} : vector<8x64xf32>, vector<64x256xf32>, vector<8x256xf32> -> vector<8x256xf32>
    %971 = arith.addf %969, %970 : vector<8x256xf32>
    %972 = vector.extract_strided_slice %971 {offsets = [0, 0], sizes = [8, 64], strides = [1, 1]} : vector<8x256xf32> to vector<8x64xf32>
    %973 = arith.negf %972 : vector<8x64xf32>
    %974 = math.exp %973 : vector<8x64xf32>
    %cst_206 = arith.constant 1.000000e+00 : f32
    %975 = vector.broadcast %cst_206 : f32 to vector<8x64xf32>
    %976 = arith.addf %975, %974 : vector<8x64xf32>
    %977 = arith.divf %975, %976 : vector<8x64xf32>
    %978 = vector.extract_strided_slice %971 {offsets = [0, 64], sizes = [8, 64], strides = [1, 1]} : vector<8x256xf32> to vector<8x64xf32>
    %979 = arith.negf %978 : vector<8x64xf32>
    %980 = math.exp %979 : vector<8x64xf32>
    %cst_207 = arith.constant 1.000000e+00 : f32
    %981 = vector.broadcast %cst_207 : f32 to vector<8x64xf32>
    %982 = arith.addf %981, %980 : vector<8x64xf32>
    %983 = arith.divf %981, %982 : vector<8x64xf32>
    %984 = vector.extract_strided_slice %971 {offsets = [0, 128], sizes = [8, 64], strides = [1, 1]} : vector<8x256xf32> to vector<8x64xf32>
    %985 = math.tanh %984 : vector<8x64xf32>
    %986 = vector.extract_strided_slice %971 {offsets = [0, 192], sizes = [8, 64], strides = [1, 1]} : vector<8x256xf32> to vector<8x64xf32>
    %987 = arith.negf %986 : vector<8x64xf32>
    %988 = math.exp %987 : vector<8x64xf32>
    %cst_208 = arith.constant 1.000000e+00 : f32
    %989 = vector.broadcast %cst_208 : f32 to vector<8x64xf32>
    %990 = arith.addf %989, %988 : vector<8x64xf32>
    %991 = arith.divf %989, %990 : vector<8x64xf32>
    %992 = arith.mulf %983, %966 : vector<8x64xf32>
    %993 = arith.mulf %977, %985 : vector<8x64xf32>
    %994 = arith.addf %992, %993 : vector<8x64xf32>
    %995 = math.tanh %994 : vector<8x64xf32>
    %996 = arith.mulf %991, %995 : vector<8x64xf32>
    %c64_209 = arith.constant 64 : index
    %c0_210 = arith.constant 0 : index
    %997 = vector.load %arg13[%c64_209, %c0_210] : memref<176x256xf32, #tpu.memory_space<vmem>>, vector<8x256xf32>
    %cst_211 = arith.constant dense<0.000000e+00> : vector<8x256xf32>
    %998 = tpu.matmul %996, %15, %cst_211 {dimension_numbers = #tpu.dot_dimension_numbers<[1], [0], [0], [1], [0, 0, 1, 1], [], []>} : vector<8x64xf32>, vector<64x256xf32>, vector<8x256xf32> -> vector<8x256xf32>
    %999 = arith.addf %997, %998 : vector<8x256xf32>
    %1000 = vector.extract_strided_slice %999 {offsets = [0, 0], sizes = [8, 64], strides = [1, 1]} : vector<8x256xf32> to vector<8x64xf32>
    %1001 = arith.negf %1000 : vector<8x64xf32>
    %1002 = math.exp %1001 : vector<8x64xf32>
    %cst_212 = arith.constant 1.000000e+00 : f32
    %1003 = vector.broadcast %cst_212 : f32 to vector<8x64xf32>
    %1004 = arith.addf %1003, %1002 : vector<8x64xf32>
    %1005 = arith.divf %1003, %1004 : vector<8x64xf32>
    %1006 = vector.extract_strided_slice %999 {offsets = [0, 64], sizes = [8, 64], strides = [1, 1]} : vector<8x256xf32> to vector<8x64xf32>
    %1007 = arith.negf %1006 : vector<8x64xf32>
    %1008 = math.exp %1007 : vector<8x64xf32>
    %cst_213 = arith.constant 1.000000e+00 : f32
    %1009 = vector.broadcast %cst_213 : f32 to vector<8x64xf32>
    %1010 = arith.addf %1009, %1008 : vector<8x64xf32>
    %1011 = arith.divf %1009, %1010 : vector<8x64xf32>
    %1012 = vector.extract_strided_slice %999 {offsets = [0, 128], sizes = [8, 64], strides = [1, 1]} : vector<8x256xf32> to vector<8x64xf32>
    %1013 = math.tanh %1012 : vector<8x64xf32>
    %1014 = vector.extract_strided_slice %999 {offsets = [0, 192], sizes = [8, 64], strides = [1, 1]} : vector<8x256xf32> to vector<8x64xf32>
    %1015 = arith.negf %1014 : vector<8x64xf32>
    %1016 = math.exp %1015 : vector<8x64xf32>
    %cst_214 = arith.constant 1.000000e+00 : f32
    %1017 = vector.broadcast %cst_214 : f32 to vector<8x64xf32>
    %1018 = arith.addf %1017, %1016 : vector<8x64xf32>
    %1019 = arith.divf %1017, %1018 : vector<8x64xf32>
    %1020 = arith.mulf %1011, %994 : vector<8x64xf32>
    %1021 = arith.mulf %1005, %1013 : vector<8x64xf32>
    %1022 = arith.addf %1020, %1021 : vector<8x64xf32>
    %1023 = math.tanh %1022 : vector<8x64xf32>
    %1024 = arith.mulf %1019, %1023 : vector<8x64xf32>
    %c56_215 = arith.constant 56 : index
    %c0_216 = arith.constant 0 : index
    %1025 = vector.load %arg13[%c56_215, %c0_216] : memref<176x256xf32, #tpu.memory_space<vmem>>, vector<8x256xf32>
    %cst_217 = arith.constant dense<0.000000e+00> : vector<8x256xf32>
    %1026 = tpu.matmul %1024, %15, %cst_217 {dimension_numbers = #tpu.dot_dimension_numbers<[1], [0], [0], [1], [0, 0, 1, 1], [], []>} : vector<8x64xf32>, vector<64x256xf32>, vector<8x256xf32> -> vector<8x256xf32>
    %1027 = arith.addf %1025, %1026 : vector<8x256xf32>
    %1028 = vector.extract_strided_slice %1027 {offsets = [0, 0], sizes = [8, 64], strides = [1, 1]} : vector<8x256xf32> to vector<8x64xf32>
    %1029 = arith.negf %1028 : vector<8x64xf32>
    %1030 = math.exp %1029 : vector<8x64xf32>
    %cst_218 = arith.constant 1.000000e+00 : f32
    %1031 = vector.broadcast %cst_218 : f32 to vector<8x64xf32>
    %1032 = arith.addf %1031, %1030 : vector<8x64xf32>
    %1033 = arith.divf %1031, %1032 : vector<8x64xf32>
    %1034 = vector.extract_strided_slice %1027 {offsets = [0, 64], sizes = [8, 64], strides = [1, 1]} : vector<8x256xf32> to vector<8x64xf32>
    %1035 = arith.negf %1034 : vector<8x64xf32>
    %1036 = math.exp %1035 : vector<8x64xf32>
    %cst_219 = arith.constant 1.000000e+00 : f32
    %1037 = vector.broadcast %cst_219 : f32 to vector<8x64xf32>
    %1038 = arith.addf %1037, %1036 : vector<8x64xf32>
    %1039 = arith.divf %1037, %1038 : vector<8x64xf32>
    %1040 = vector.extract_strided_slice %1027 {offsets = [0, 128], sizes = [8, 64], strides = [1, 1]} : vector<8x256xf32> to vector<8x64xf32>
    %1041 = math.tanh %1040 : vector<8x64xf32>
    %1042 = vector.extract_strided_slice %1027 {offsets = [0, 192], sizes = [8, 64], strides = [1, 1]} : vector<8x256xf32> to vector<8x64xf32>
    %1043 = arith.negf %1042 : vector<8x64xf32>
    %1044 = math.exp %1043 : vector<8x64xf32>
    %cst_220 = arith.constant 1.000000e+00 : f32
    %1045 = vector.broadcast %cst_220 : f32 to vector<8x64xf32>
    %1046 = arith.addf %1045, %1044 : vector<8x64xf32>
    %1047 = arith.divf %1045, %1046 : vector<8x64xf32>
    %1048 = arith.mulf %1039, %1022 : vector<8x64xf32>
    %1049 = arith.mulf %1033, %1041 : vector<8x64xf32>
    %1050 = arith.addf %1048, %1049 : vector<8x64xf32>
    %1051 = math.tanh %1050 : vector<8x64xf32>
    %1052 = arith.mulf %1047, %1051 : vector<8x64xf32>
    %c48_221 = arith.constant 48 : index
    %c0_222 = arith.constant 0 : index
    %1053 = vector.load %arg13[%c48_221, %c0_222] : memref<176x256xf32, #tpu.memory_space<vmem>>, vector<8x256xf32>
    %cst_223 = arith.constant dense<0.000000e+00> : vector<8x256xf32>
    %1054 = tpu.matmul %1052, %15, %cst_223 {dimension_numbers = #tpu.dot_dimension_numbers<[1], [0], [0], [1], [0, 0, 1, 1], [], []>} : vector<8x64xf32>, vector<64x256xf32>, vector<8x256xf32> -> vector<8x256xf32>
    %1055 = arith.addf %1053, %1054 : vector<8x256xf32>
    %1056 = vector.extract_strided_slice %1055 {offsets = [0, 0], sizes = [8, 64], strides = [1, 1]} : vector<8x256xf32> to vector<8x64xf32>
    %1057 = arith.negf %1056 : vector<8x64xf32>
    %1058 = math.exp %1057 : vector<8x64xf32>
    %cst_224 = arith.constant 1.000000e+00 : f32
    %1059 = vector.broadcast %cst_224 : f32 to vector<8x64xf32>
    %1060 = arith.addf %1059, %1058 : vector<8x64xf32>
    %1061 = arith.divf %1059, %1060 : vector<8x64xf32>
    %1062 = vector.extract_strided_slice %1055 {offsets = [0, 64], sizes = [8, 64], strides = [1, 1]} : vector<8x256xf32> to vector<8x64xf32>
    %1063 = arith.negf %1062 : vector<8x64xf32>
    %1064 = math.exp %1063 : vector<8x64xf32>
    %cst_225 = arith.constant 1.000000e+00 : f32
    %1065 = vector.broadcast %cst_225 : f32 to vector<8x64xf32>
    %1066 = arith.addf %1065, %1064 : vector<8x64xf32>
    %1067 = arith.divf %1065, %1066 : vector<8x64xf32>
    %1068 = vector.extract_strided_slice %1055 {offsets = [0, 128], sizes = [8, 64], strides = [1, 1]} : vector<8x256xf32> to vector<8x64xf32>
    %1069 = math.tanh %1068 : vector<8x64xf32>
    %1070 = vector.extract_strided_slice %1055 {offsets = [0, 192], sizes = [8, 64], strides = [1, 1]} : vector<8x256xf32> to vector<8x64xf32>
    %1071 = arith.negf %1070 : vector<8x64xf32>
    %1072 = math.exp %1071 : vector<8x64xf32>
    %cst_226 = arith.constant 1.000000e+00 : f32
    %1073 = vector.broadcast %cst_226 : f32 to vector<8x64xf32>
    %1074 = arith.addf %1073, %1072 : vector<8x64xf32>
    %1075 = arith.divf %1073, %1074 : vector<8x64xf32>
    %1076 = arith.mulf %1067, %1050 : vector<8x64xf32>
    %1077 = arith.mulf %1061, %1069 : vector<8x64xf32>
    %1078 = arith.addf %1076, %1077 : vector<8x64xf32>
    %1079 = math.tanh %1078 : vector<8x64xf32>
    %1080 = arith.mulf %1075, %1079 : vector<8x64xf32>
    %c40_227 = arith.constant 40 : index
    %c0_228 = arith.constant 0 : index
    %1081 = vector.load %arg13[%c40_227, %c0_228] : memref<176x256xf32, #tpu.memory_space<vmem>>, vector<8x256xf32>
    %cst_229 = arith.constant dense<0.000000e+00> : vector<8x256xf32>
    %1082 = tpu.matmul %1080, %15, %cst_229 {dimension_numbers = #tpu.dot_dimension_numbers<[1], [0], [0], [1], [0, 0, 1, 1], [], []>} : vector<8x64xf32>, vector<64x256xf32>, vector<8x256xf32> -> vector<8x256xf32>
    %1083 = arith.addf %1081, %1082 : vector<8x256xf32>
    %1084 = vector.extract_strided_slice %1083 {offsets = [0, 0], sizes = [8, 64], strides = [1, 1]} : vector<8x256xf32> to vector<8x64xf32>
    %1085 = arith.negf %1084 : vector<8x64xf32>
    %1086 = math.exp %1085 : vector<8x64xf32>
    %cst_230 = arith.constant 1.000000e+00 : f32
    %1087 = vector.broadcast %cst_230 : f32 to vector<8x64xf32>
    %1088 = arith.addf %1087, %1086 : vector<8x64xf32>
    %1089 = arith.divf %1087, %1088 : vector<8x64xf32>
    %1090 = vector.extract_strided_slice %1083 {offsets = [0, 64], sizes = [8, 64], strides = [1, 1]} : vector<8x256xf32> to vector<8x64xf32>
    %1091 = arith.negf %1090 : vector<8x64xf32>
    %1092 = math.exp %1091 : vector<8x64xf32>
    %cst_231 = arith.constant 1.000000e+00 : f32
    %1093 = vector.broadcast %cst_231 : f32 to vector<8x64xf32>
    %1094 = arith.addf %1093, %1092 : vector<8x64xf32>
    %1095 = arith.divf %1093, %1094 : vector<8x64xf32>
    %1096 = vector.extract_strided_slice %1083 {offsets = [0, 128], sizes = [8, 64], strides = [1, 1]} : vector<8x256xf32> to vector<8x64xf32>
    %1097 = math.tanh %1096 : vector<8x64xf32>
    %1098 = vector.extract_strided_slice %1083 {offsets = [0, 192], sizes = [8, 64], strides = [1, 1]} : vector<8x256xf32> to vector<8x64xf32>
    %1099 = arith.negf %1098 : vector<8x64xf32>
    %1100 = math.exp %1099 : vector<8x64xf32>
    %cst_232 = arith.constant 1.000000e+00 : f32
    %1101 = vector.broadcast %cst_232 : f32 to vector<8x64xf32>
    %1102 = arith.addf %1101, %1100 : vector<8x64xf32>
    %1103 = arith.divf %1101, %1102 : vector<8x64xf32>
    %1104 = arith.mulf %1095, %1078 : vector<8x64xf32>
    %1105 = arith.mulf %1089, %1097 : vector<8x64xf32>
    %1106 = arith.addf %1104, %1105 : vector<8x64xf32>
    %1107 = math.tanh %1106 : vector<8x64xf32>
    %1108 = arith.mulf %1103, %1107 : vector<8x64xf32>
    %c32_233 = arith.constant 32 : index
    %c0_234 = arith.constant 0 : index
    %1109 = vector.load %arg13[%c32_233, %c0_234] : memref<176x256xf32, #tpu.memory_space<vmem>>, vector<8x256xf32>
    %cst_235 = arith.constant dense<0.000000e+00> : vector<8x256xf32>
    %1110 = tpu.matmul %1108, %15, %cst_235 {dimension_numbers = #tpu.dot_dimension_numbers<[1], [0], [0], [1], [0, 0, 1, 1], [], []>} : vector<8x64xf32>, vector<64x256xf32>, vector<8x256xf32> -> vector<8x256xf32>
    %1111 = arith.addf %1109, %1110 : vector<8x256xf32>
    %1112 = vector.extract_strided_slice %1111 {offsets = [0, 0], sizes = [8, 64], strides = [1, 1]} : vector<8x256xf32> to vector<8x64xf32>
    %1113 = arith.negf %1112 : vector<8x64xf32>
    %1114 = math.exp %1113 : vector<8x64xf32>
    %cst_236 = arith.constant 1.000000e+00 : f32
    %1115 = vector.broadcast %cst_236 : f32 to vector<8x64xf32>
    %1116 = arith.addf %1115, %1114 : vector<8x64xf32>
    %1117 = arith.divf %1115, %1116 : vector<8x64xf32>
    %1118 = vector.extract_strided_slice %1111 {offsets = [0, 64], sizes = [8, 64], strides = [1, 1]} : vector<8x256xf32> to vector<8x64xf32>
    %1119 = arith.negf %1118 : vector<8x64xf32>
    %1120 = math.exp %1119 : vector<8x64xf32>
    %cst_237 = arith.constant 1.000000e+00 : f32
    %1121 = vector.broadcast %cst_237 : f32 to vector<8x64xf32>
    %1122 = arith.addf %1121, %1120 : vector<8x64xf32>
    %1123 = arith.divf %1121, %1122 : vector<8x64xf32>
    %1124 = vector.extract_strided_slice %1111 {offsets = [0, 128], sizes = [8, 64], strides = [1, 1]} : vector<8x256xf32> to vector<8x64xf32>
    %1125 = math.tanh %1124 : vector<8x64xf32>
    %1126 = vector.extract_strided_slice %1111 {offsets = [0, 192], sizes = [8, 64], strides = [1, 1]} : vector<8x256xf32> to vector<8x64xf32>
    %1127 = arith.negf %1126 : vector<8x64xf32>
    %1128 = math.exp %1127 : vector<8x64xf32>
    %cst_238 = arith.constant 1.000000e+00 : f32
    %1129 = vector.broadcast %cst_238 : f32 to vector<8x64xf32>
    %1130 = arith.addf %1129, %1128 : vector<8x64xf32>
    %1131 = arith.divf %1129, %1130 : vector<8x64xf32>
    %1132 = arith.mulf %1123, %1106 : vector<8x64xf32>
    %1133 = arith.mulf %1117, %1125 : vector<8x64xf32>
    %1134 = arith.addf %1132, %1133 : vector<8x64xf32>
    %1135 = math.tanh %1134 : vector<8x64xf32>
    %1136 = arith.mulf %1131, %1135 : vector<8x64xf32>
    %c24_239 = arith.constant 24 : index
    %c0_240 = arith.constant 0 : index
    %1137 = vector.load %arg13[%c24_239, %c0_240] : memref<176x256xf32, #tpu.memory_space<vmem>>, vector<8x256xf32>
    %cst_241 = arith.constant dense<0.000000e+00> : vector<8x256xf32>
    %1138 = tpu.matmul %1136, %15, %cst_241 {dimension_numbers = #tpu.dot_dimension_numbers<[1], [0], [0], [1], [0, 0, 1, 1], [], []>} : vector<8x64xf32>, vector<64x256xf32>, vector<8x256xf32> -> vector<8x256xf32>
    %1139 = arith.addf %1137, %1138 : vector<8x256xf32>
    %1140 = vector.extract_strided_slice %1139 {offsets = [0, 0], sizes = [8, 64], strides = [1, 1]} : vector<8x256xf32> to vector<8x64xf32>
    %1141 = arith.negf %1140 : vector<8x64xf32>
    %1142 = math.exp %1141 : vector<8x64xf32>
    %cst_242 = arith.constant 1.000000e+00 : f32
    %1143 = vector.broadcast %cst_242 : f32 to vector<8x64xf32>
    %1144 = arith.addf %1143, %1142 : vector<8x64xf32>
    %1145 = arith.divf %1143, %1144 : vector<8x64xf32>
    %1146 = vector.extract_strided_slice %1139 {offsets = [0, 64], sizes = [8, 64], strides = [1, 1]} : vector<8x256xf32> to vector<8x64xf32>
    %1147 = arith.negf %1146 : vector<8x64xf32>
    %1148 = math.exp %1147 : vector<8x64xf32>
    %cst_243 = arith.constant 1.000000e+00 : f32
    %1149 = vector.broadcast %cst_243 : f32 to vector<8x64xf32>
    %1150 = arith.addf %1149, %1148 : vector<8x64xf32>
    %1151 = arith.divf %1149, %1150 : vector<8x64xf32>
    %1152 = vector.extract_strided_slice %1139 {offsets = [0, 128], sizes = [8, 64], strides = [1, 1]} : vector<8x256xf32> to vector<8x64xf32>
    %1153 = math.tanh %1152 : vector<8x64xf32>
    %1154 = vector.extract_strided_slice %1139 {offsets = [0, 192], sizes = [8, 64], strides = [1, 1]} : vector<8x256xf32> to vector<8x64xf32>
    %1155 = arith.negf %1154 : vector<8x64xf32>
    %1156 = math.exp %1155 : vector<8x64xf32>
    %cst_244 = arith.constant 1.000000e+00 : f32
    %1157 = vector.broadcast %cst_244 : f32 to vector<8x64xf32>
    %1158 = arith.addf %1157, %1156 : vector<8x64xf32>
    %1159 = arith.divf %1157, %1158 : vector<8x64xf32>
    %1160 = arith.mulf %1151, %1134 : vector<8x64xf32>
    %1161 = arith.mulf %1145, %1153 : vector<8x64xf32>
    %1162 = arith.addf %1160, %1161 : vector<8x64xf32>
    %1163 = math.tanh %1162 : vector<8x64xf32>
    %1164 = arith.mulf %1159, %1163 : vector<8x64xf32>
    %c16_245 = arith.constant 16 : index
    %c0_246 = arith.constant 0 : index
    %1165 = vector.load %arg13[%c16_245, %c0_246] : memref<176x256xf32, #tpu.memory_space<vmem>>, vector<8x256xf32>
    %cst_247 = arith.constant dense<0.000000e+00> : vector<8x256xf32>
    %1166 = tpu.matmul %1164, %15, %cst_247 {dimension_numbers = #tpu.dot_dimension_numbers<[1], [0], [0], [1], [0, 0, 1, 1], [], []>} : vector<8x64xf32>, vector<64x256xf32>, vector<8x256xf32> -> vector<8x256xf32>
    %1167 = arith.addf %1165, %1166 : vector<8x256xf32>
    %1168 = vector.extract_strided_slice %1167 {offsets = [0, 0], sizes = [8, 64], strides = [1, 1]} : vector<8x256xf32> to vector<8x64xf32>
    %1169 = arith.negf %1168 : vector<8x64xf32>
    %1170 = math.exp %1169 : vector<8x64xf32>
    %cst_248 = arith.constant 1.000000e+00 : f32
    %1171 = vector.broadcast %cst_248 : f32 to vector<8x64xf32>
    %1172 = arith.addf %1171, %1170 : vector<8x64xf32>
    %1173 = arith.divf %1171, %1172 : vector<8x64xf32>
    %1174 = vector.extract_strided_slice %1167 {offsets = [0, 64], sizes = [8, 64], strides = [1, 1]} : vector<8x256xf32> to vector<8x64xf32>
    %1175 = arith.negf %1174 : vector<8x64xf32>
    %1176 = math.exp %1175 : vector<8x64xf32>
    %cst_249 = arith.constant 1.000000e+00 : f32
    %1177 = vector.broadcast %cst_249 : f32 to vector<8x64xf32>
    %1178 = arith.addf %1177, %1176 : vector<8x64xf32>
    %1179 = arith.divf %1177, %1178 : vector<8x64xf32>
    %1180 = vector.extract_strided_slice %1167 {offsets = [0, 128], sizes = [8, 64], strides = [1, 1]} : vector<8x256xf32> to vector<8x64xf32>
    %1181 = math.tanh %1180 : vector<8x64xf32>
    %1182 = vector.extract_strided_slice %1167 {offsets = [0, 192], sizes = [8, 64], strides = [1, 1]} : vector<8x256xf32> to vector<8x64xf32>
    %1183 = arith.negf %1182 : vector<8x64xf32>
    %1184 = math.exp %1183 : vector<8x64xf32>
    %cst_250 = arith.constant 1.000000e+00 : f32
    %1185 = vector.broadcast %cst_250 : f32 to vector<8x64xf32>
    %1186 = arith.addf %1185, %1184 : vector<8x64xf32>
    %1187 = arith.divf %1185, %1186 : vector<8x64xf32>
    %1188 = arith.mulf %1179, %1162 : vector<8x64xf32>
    %1189 = arith.mulf %1173, %1181 : vector<8x64xf32>
    %1190 = arith.addf %1188, %1189 : vector<8x64xf32>
    %1191 = math.tanh %1190 : vector<8x64xf32>
    %1192 = arith.mulf %1187, %1191 : vector<8x64xf32>
    %c8_251 = arith.constant 8 : index
    %c0_252 = arith.constant 0 : index
    %1193 = vector.load %arg13[%c8_251, %c0_252] : memref<176x256xf32, #tpu.memory_space<vmem>>, vector<8x256xf32>
    %cst_253 = arith.constant dense<0.000000e+00> : vector<8x256xf32>
    %1194 = tpu.matmul %1192, %15, %cst_253 {dimension_numbers = #tpu.dot_dimension_numbers<[1], [0], [0], [1], [0, 0, 1, 1], [], []>} : vector<8x64xf32>, vector<64x256xf32>, vector<8x256xf32> -> vector<8x256xf32>
    %1195 = arith.addf %1193, %1194 : vector<8x256xf32>
    %1196 = vector.extract_strided_slice %1195 {offsets = [0, 0], sizes = [8, 64], strides = [1, 1]} : vector<8x256xf32> to vector<8x64xf32>
    %1197 = arith.negf %1196 : vector<8x64xf32>
    %1198 = math.exp %1197 : vector<8x64xf32>
    %cst_254 = arith.constant 1.000000e+00 : f32
    %1199 = vector.broadcast %cst_254 : f32 to vector<8x64xf32>
    %1200 = arith.addf %1199, %1198 : vector<8x64xf32>
    %1201 = arith.divf %1199, %1200 : vector<8x64xf32>
    %1202 = vector.extract_strided_slice %1195 {offsets = [0, 64], sizes = [8, 64], strides = [1, 1]} : vector<8x256xf32> to vector<8x64xf32>
    %1203 = arith.negf %1202 : vector<8x64xf32>
    %1204 = math.exp %1203 : vector<8x64xf32>
    %cst_255 = arith.constant 1.000000e+00 : f32
    %1205 = vector.broadcast %cst_255 : f32 to vector<8x64xf32>
    %1206 = arith.addf %1205, %1204 : vector<8x64xf32>
    %1207 = arith.divf %1205, %1206 : vector<8x64xf32>
    %1208 = vector.extract_strided_slice %1195 {offsets = [0, 128], sizes = [8, 64], strides = [1, 1]} : vector<8x256xf32> to vector<8x64xf32>
    %1209 = math.tanh %1208 : vector<8x64xf32>
    %1210 = vector.extract_strided_slice %1195 {offsets = [0, 192], sizes = [8, 64], strides = [1, 1]} : vector<8x256xf32> to vector<8x64xf32>
    %1211 = arith.negf %1210 : vector<8x64xf32>
    %1212 = math.exp %1211 : vector<8x64xf32>
    %cst_256 = arith.constant 1.000000e+00 : f32
    %1213 = vector.broadcast %cst_256 : f32 to vector<8x64xf32>
    %1214 = arith.addf %1213, %1212 : vector<8x64xf32>
    %1215 = arith.divf %1213, %1214 : vector<8x64xf32>
    %1216 = arith.mulf %1207, %1190 : vector<8x64xf32>
    %1217 = arith.mulf %1201, %1209 : vector<8x64xf32>
    %1218 = arith.addf %1216, %1217 : vector<8x64xf32>
    %1219 = math.tanh %1218 : vector<8x64xf32>
    %1220 = arith.mulf %1215, %1219 : vector<8x64xf32>
    %c0_257 = arith.constant 0 : index
    %c0_258 = arith.constant 0 : index
    %1221 = vector.load %arg13[%c0_257, %c0_258] : memref<176x256xf32, #tpu.memory_space<vmem>>, vector<8x256xf32>
    %cst_259 = arith.constant dense<0.000000e+00> : vector<8x256xf32>
    %1222 = tpu.matmul %1220, %15, %cst_259 {dimension_numbers = #tpu.dot_dimension_numbers<[1], [0], [0], [1], [0, 0, 1, 1], [], []>} : vector<8x64xf32>, vector<64x256xf32>, vector<8x256xf32> -> vector<8x256xf32>
    %1223 = arith.addf %1221, %1222 : vector<8x256xf32>
    %1224 = vector.extract_strided_slice %1223 {offsets = [0, 0], sizes = [8, 64], strides = [1, 1]} : vector<8x256xf32> to vector<8x64xf32>
    %1225 = arith.negf %1224 : vector<8x64xf32>
    %1226 = math.exp %1225 : vector<8x64xf32>
    %cst_260 = arith.constant 1.000000e+00 : f32
    %1227 = vector.broadcast %cst_260 : f32 to vector<8x64xf32>
    %1228 = arith.addf %1227, %1226 : vector<8x64xf32>
    %1229 = arith.divf %1227, %1228 : vector<8x64xf32>
    %1230 = vector.extract_strided_slice %1223 {offsets = [0, 64], sizes = [8, 64], strides = [1, 1]} : vector<8x256xf32> to vector<8x64xf32>
    %1231 = arith.negf %1230 : vector<8x64xf32>
    %1232 = math.exp %1231 : vector<8x64xf32>
    %cst_261 = arith.constant 1.000000e+00 : f32
    %1233 = vector.broadcast %cst_261 : f32 to vector<8x64xf32>
    %1234 = arith.addf %1233, %1232 : vector<8x64xf32>
    %1235 = arith.divf %1233, %1234 : vector<8x64xf32>
    %1236 = vector.extract_strided_slice %1223 {offsets = [0, 128], sizes = [8, 64], strides = [1, 1]} : vector<8x256xf32> to vector<8x64xf32>
    %1237 = math.tanh %1236 : vector<8x64xf32>
    %1238 = vector.extract_strided_slice %1223 {offsets = [0, 192], sizes = [8, 64], strides = [1, 1]} : vector<8x256xf32> to vector<8x64xf32>
    %1239 = arith.negf %1238 : vector<8x64xf32>
    %1240 = math.exp %1239 : vector<8x64xf32>
    %cst_262 = arith.constant 1.000000e+00 : f32
    %1241 = vector.broadcast %cst_262 : f32 to vector<8x64xf32>
    %1242 = arith.addf %1241, %1240 : vector<8x64xf32>
    %1243 = arith.divf %1241, %1242 : vector<8x64xf32>
    %1244 = arith.mulf %1235, %1218 : vector<8x64xf32>
    %1245 = arith.mulf %1229, %1237 : vector<8x64xf32>
    %1246 = arith.addf %1244, %1245 : vector<8x64xf32>
    %1247 = math.tanh %1246 : vector<8x64xf32>
    %1248 = arith.mulf %1243, %1247 : vector<8x64xf32>
    %c0_263 = arith.constant 0 : index
    %c0_264 = arith.constant 0 : index
    %c0_265 = arith.constant 0 : index
    %1249 = vector.load %arg11[%c0_263, %c0_264, %c0_265] : memref<2x8x64xf32, #tpu.memory_space<vmem>>, vector<1x8x64xf32>
    %1250 = vector.shape_cast %1249 : vector<1x8x64xf32> to vector<8x64xf32>
    %1251 = vector.shape_cast %632 : vector<8x64xf32> to vector<1x8x64xf32>
    tpu.vector_store %arg11[%c0_263, %c0_264, %c0_265], %1251 {strides = array<i32>} : memref<2x8x64xf32, #tpu.memory_space<vmem>>, vector<1x8x64xf32>,
    %c1 = arith.constant 1 : index
    %c0_266 = arith.constant 0 : index
    %c0_267 = arith.constant 0 : index
    %1252 = vector.load %arg11[%c1, %c0_266, %c0_267] : memref<2x8x64xf32, #tpu.memory_space<vmem>>, vector<1x8x64xf32>
    %1253 = vector.shape_cast %1252 : vector<1x8x64xf32> to vector<8x64xf32>
    %1254 = vector.shape_cast %1248 : vector<8x64xf32> to vector<1x8x64xf32>
    tpu.vector_store %arg11[%c1, %c0_266, %c0_267], %1254 {strides = array<i32>} : memref<2x8x64xf32, #tpu.memory_space<vmem>>, vector<1x8x64xf32>,
    %c0_268 = arith.constant 0 : index
    %c0_269 = arith.constant 0 : index
    %1255 = vector.load %arg8[%c0_268, %c0_269] : memref<64x128xf32, #tpu.memory_space<vmem>>, vector<64x128xf32>
    %cst_270 = arith.constant dense<0.000000e+00> : vector<8x128xf32>
    %1256 = tpu.matmul %1248, %1255, %cst_270 {dimension_numbers = #tpu.dot_dimension_numbers<[1], [0], [0], [1], [0, 0, 1, 1], [], []>} : vector<8x64xf32>, vector<64x128xf32>, vector<8x128xf32> -> vector<8x128xf32>
    %c0_271 = arith.constant 0 : index
    %c0_272 = arith.constant 0 : index
    %1257 = vector.load %arg9[%c0_271, %c0_272] : memref<1x128xf32, #tpu.memory_space<vmem>>, vector<1x128xf32>
    %1258 = vector.broadcast %1257 : vector<1x128xf32> to vector<8x128xf32>
    %1259 = arith.addf %1256, %1258 : vector<8x128xf32>
    %c0_273 = arith.constant 0 : index
    %c0_274 = arith.constant 0 : index
    %1260 = vector.load %arg10[%c0_273, %c0_274] : memref<8x128xf32, #tpu.memory_space<vmem>>, vector<8x128xf32>
    tpu.vector_store %arg10[%c0_273, %c0_274], %1259 {strides = array<i32>} : memref<8x128xf32, #tpu.memory_space<vmem>>, vector<8x128xf32>,
    return
  }
  func.func @transform_0(%arg0: i32) -> (i32, i32, i32) {
    %c0_i32 = arith.constant 0 : i32
    %c0_i32_0 = arith.constant 0 : i32
    %c0_i32_1 = arith.constant 0 : i32
    return %c0_i32, %arg0, %c0_i32_0 : i32, i32, i32
  }
  func.func @transform_1(%arg0: i32) -> (i32, i32) {
    %c0_i32 = arith.constant 0 : i32
    %c0_i32_0 = arith.constant 0 : i32
    %c0_i32_1 = arith.constant 0 : i32
    return %c0_i32, %c0_i32_0 : i32, i32
  }
  func.func @transform_2(%arg0: i32) -> (i32, i32) {
    %c0_i32 = arith.constant 0 : i32
    %c0_i32_0 = arith.constant 0 : i32
    %c0_i32_1 = arith.constant 0 : i32
    return %c0_i32, %c0_i32_0 : i32, i32
  }
  func.func @transform_3(%arg0: i32) -> (i32, i32) {
    %c0_i32 = arith.constant 0 : i32
    %c0_i32_0 = arith.constant 0 : i32
    %c0_i32_1 = arith.constant 0 : i32
    return %c0_i32, %c0_i32_0 : i32, i32
  }
  func.func @transform_4(%arg0: i32) -> (i32, i32) {
    %c0_i32 = arith.constant 0 : i32
    %c0_i32_0 = arith.constant 0 : i32
    %c0_i32_1 = arith.constant 0 : i32
    return %c0_i32, %c0_i32_0 : i32, i32
  }
  func.func @transform_5(%arg0: i32) -> (i32, i32) {
    %c0_i32 = arith.constant 0 : i32
    %c0_i32_0 = arith.constant 0 : i32
    %c0_i32_1 = arith.constant 0 : i32
    return %c0_i32, %c0_i32_0 : i32, i32
  }
  func.func @transform_6(%arg0: i32) -> (i32, i32) {
    %c0_i32 = arith.constant 0 : i32
    %c0_i32_0 = arith.constant 0 : i32
    %c0_i32_1 = arith.constant 0 : i32
    return %c0_i32, %c0_i32_0 : i32, i32
  }
  func.func @transform_7(%arg0: i32) -> (i32, i32) {
    %c0_i32 = arith.constant 0 : i32
    %c0_i32_0 = arith.constant 0 : i32
    %c0_i32_1 = arith.constant 0 : i32
    return %c0_i32, %c0_i32_0 : i32, i32
  }
  func.func @transform_8(%arg0: i32) -> (i32, i32) {
    %c0_i32 = arith.constant 0 : i32
    %c0_i32_0 = arith.constant 0 : i32
    %c0_i32_1 = arith.constant 0 : i32
    return %c0_i32, %c0_i32_0 : i32, i32
  }
  func.func @transform_9(%arg0: i32) -> (i32, i32) {
    %c0_i32 = arith.constant 0 : i32
    %c0_i32_0 = arith.constant 0 : i32
    return %arg0, %c0_i32 : i32, i32
  }
  func.func @transform_10(%arg0: i32) -> (i32, i32, i32) {
    %c0_i32 = arith.constant 0 : i32
    %c0_i32_0 = arith.constant 0 : i32
    %c0_i32_1 = arith.constant 0 : i32
    return %c0_i32, %arg0, %c0_i32_0 : i32, i32, i32
  }
}

</mosaic_0001>

<bundles_post_ra>
// kernel: tpu_custom_call.1
= control target key start
LH: loop header
LB: loop body
LE: loop exit
PB: predicated region body
PF: predicated region fallthrough
CT: control target
= control target key end

     0   :  { %16 = vsyncpa [#allocation5], 0  ;;  %s9019_s0 = inlined_call_operand.hbm [shape: f32[22,8,400], index: 0, kind: input, shape index: {}]   ;;  %s9020_s1 = inlined_call_operand.hbm [shape: f32[400,256], index: 1, kind: input, shape index: {}]   ;;  %s9021_s2 = inlined_call_operand.hbm [shape: f32[64,256], index: 2, kind: input, shape index: {}]   ;;  %s9022_s3 = inlined_call_operand.vmem [shape: f32[1,256], index: 3, kind: input, shape index: {}]   ;;  %s9023_s4 = inlined_call_operand.hbm [shape: f32[400,256], index: 4, kind: input, shape index: {}]   ;;  %s9024_s5 = inlined_call_operand.hbm [shape: f32[64,256], index: 5, kind: input, shape index: {}]   ;;  %s9025_s6 = inlined_call_operand.vmem [shape: f32[1,256], index: 6, kind: input, shape index: {}]   ;;  %s9026_s7 = inlined_call_operand.hbm [shape: f32[64,128], index: 7, kind: input, shape index: {}]   ;;  %s9027_s8 = inlined_call_operand.vmem [shape: f32[1,128], index: 8, kind: input, shape index: {}]   ;;  %s9028_s9 = inlined_call_operand.hbm [shape: f32[8,128], index: 9, kind: output, shape index: {0}]   ;;  %s9029_s10 = inlined_call_operand.hbm [shape: f32[2,8,64], index: 10, kind: output, shape index: {1}]  }
   0x1   :  { %17 = vsyncpa [#allocation8], 0 }
   0x2   :  { %18 = vsyncpa [#allocation11], 0 }
   0x3   :  { %19 = vsyncpa [#allocation14], 0 }
   0x4   :  { %20 = vsyncpa [#allocation6], 0 }
   0x5   :  { %21 = vsyncpa [#allocation17], 0  ;;  %s6989_s13 = smov [#allocation7]  }
   0x6   :  { %s39_s14 = sshll.u32 %s6989_s13, 4  ;;  %s40_s14 = int_to_ptr.vmem [resolvable:$true] %s39_s14 }
   0x7   :  { %s6825_s15 = scalar_lea.vmem %s40_s14, 12800  ;;  %p6830_p1 = scmp.lt.s32.totalorder %s40_s14, %s40_s14 }
   0x8   :  { %p6826_p0 = scmp.ne.s32.totalorder %s40_s14, %s6825_s15  ;;  %p6831_p2 = scmp.lt.s32.totalorder %s6825_s15, %s6825_s15 }
   0xa   :  { %p6832_p3 = por %p6831_p2, %p6830_p1 }
   0xc   :  { %p6833_p4 = pnand %p6832_p3, %p6826_p0 }
   0xe   :  { %6836 = shalt.err (!%p6833_p4)
}
   0xf   :  { %s6990_s16 = smov 256   ;;  %s6991_s17 = smov 16  }
  0x10   :  { %45 = dma.hbm_to_vmem [thread:$0]  %s9020_s1, 12800, %s40_s14, [#allocation8], %s6990_s16, %s6990_s16, %s6991_s17  }
  0x11   :  { %s6992_s20 = smov [#allocation10]   ;;  %s6993_s22 = smov [#allocation4]  }
  0x12   :  { %s65_s21 = sshll.u32 %s6992_s20, 4  ;;  %s27_s23 = sshll.u32 %s6993_s22, 4  ;;  %s66_s21 = int_to_ptr.vmem [resolvable:$true] %s65_s21  ;;  %s28_s23 = int_to_ptr.vmem [resolvable:$true] %s27_s23 }
  0x13   :  { %s6845_s24 = scalar_lea.vmem %s66_s21, 12800  ;;  %p6850_p6 = scmp.lt.s32.totalorder %s66_s21, %s66_s21 }
  0x14   :  { %p6846_p5 = scmp.ne.s32.totalorder %s66_s21, %s6845_s24  ;;  %p6851_p7 = scmp.lt.s32.totalorder %s6845_s24, %s6845_s24 }
  0x16   :  { %p6852_p8 = por %p6851_p7, %p6850_p6 }
  0x18   :  { %p6853_p9 = pnand %p6852_p8, %p6846_p5 }
  0x1a   :  { %6856 = shalt.err (!%p6853_p9)
}
  0x1b   :  { %71 = dma.hbm_to_vmem [thread:$0]  %s9023_s4, 12800, %s66_s21, [#allocation11], %s6990_s16, %s6990_s16, %s6991_s17  }
  0x1c   :  { %s6865_s1 = scalar_lea.vmem %s28_s23, 11264  ;;  %p6870_p11 = scmp.lt.s32.totalorder %s28_s23, %s28_s23 }
  0x1d   :  { %p6866_p10 = scmp.ne.s32.totalorder %s28_s23, %s6865_s1  ;;  %p6871_p12 = scmp.lt.s32.totalorder %s6865_s1, %s6865_s1 }
  0x1f   :  { %p6872_p13 = por %p6871_p12, %p6870_p11 }
  0x21   :  { %p6873_p0 = pnand %p6872_p13, %p6866_p10 }
  0x23   :  { %6876 = shalt.err (!%p6873_p0)
}
  0x24   :  { %s6994_s27 = smov 512   ;;  %s6995_s28 = smov 32  }
  0x25   :  { %33 = dma.hbm_to_vmem [thread:$0]  %s9019_s0, 11264, %s28_s23, [#allocation5], %s6994_s27, %s6994_s27, %s6995_s28  }
  0x26   :  { %s6996_s11 = smov [#allocation9]   ;;  %s6997_s13 = smov [#allocation12]  }
  0x27   :  { %s51_s12 = sshll.u32 %s6996_s11, 4  ;;  %s77_s14 = sshll.u32 %s6997_s13, 4  ;;  %s52_s12 = int_to_ptr.vmem [resolvable:$true] %s51_s12  ;;  %s78_s14 = int_to_ptr.vmem [resolvable:$true] %s77_s14 }
  0x28   :  { %s6885_s4 = scalar_lea.vmem %s52_s12, 2048  ;;  %p6890_p2 = scmp.lt.s32.totalorder %s52_s12, %s52_s12 }
  0x29   :  { %p6886_p1 = scmp.ne.s32.totalorder %s52_s12, %s6885_s4  ;;  %p6891_p3 = scmp.lt.s32.totalorder %s6885_s4, %s6885_s4 }
  0x2b   :  { %p6892_p4 = por %p6891_p3, %p6890_p2 }
  0x2d   :  { %p6893_p5 = pnand %p6892_p4, %p6886_p1 }
  0x2f   :  { %6896 = shalt.err (!%p6893_p5)
}
  0x30   :  { %57 = dma.hbm_to_vmem [thread:$0]  %s9021_s2, 2048, %s52_s12, [#allocation8], %s6990_s16, %s6990_s16, %s6991_s17  }
  0x31   :  { %s6905_s0 = scalar_lea.vmem %s78_s14, 2048  ;;  %p6910_p7 = scmp.lt.s32.totalorder %s78_s14, %s78_s14 }
  0x32   :  { %p6906_p6 = scmp.ne.s32.totalorder %s78_s14, %s6905_s0  ;;  %p6911_p8 = scmp.lt.s32.totalorder %s6905_s0, %s6905_s0 }
  0x34   :  { %p6912_p9 = por %p6911_p8, %p6910_p7 }
  0x36   :  { %p6913_p10 = pnand %p6912_p9, %p6906_p6 }
  0x38   :  { %6916 = shalt.err (!%p6913_p10)
}
  0x39   :  { %83 = dma.hbm_to_vmem [thread:$0]  %s9024_s5, 2048, %s78_s14, [#allocation11], %s6990_s16, %s6990_s16, %s6991_s17  }
  0x3a   :  { %s6998_s21 = smov [#allocation13]  }
  0x3b   :  { %s91_s22 = sshll.u32 %s6998_s21, 4  ;;  %s92_s22 = int_to_ptr.vmem [resolvable:$true] %s91_s22 }
  0x3c   :  { %s6925_s23 = scalar_lea.vmem %s92_s22, 1024  ;;  %p6930_p12 = scmp.lt.s32.totalorder %s92_s22, %s92_s22 }
  0x3d   :  { %p6926_p11 = scmp.ne.s32.totalorder %s92_s22, %s6925_s23  ;;  %p6931_p13 = scmp.lt.s32.totalorder %s6925_s23, %s6925_s23 }
  0x3f   :  { %p6932_p0 = por %p6931_p13, %p6930_p12 }
  0x41   :  { %p6933_p1 = pnand %p6932_p0, %p6926_p11 }
  0x43   :  { %6936 = shalt.err (!%p6933_p1)
}
  0x44   :  { %s6999_s2 = smov 128   ;;  %s7000_s24 = smov 8  }
  0x45   :  { %97 = dma.hbm_to_vmem [thread:$0]  %s9026_s7, 1024, %s92_s22, [#allocation14], %s6999_s2, %s6999_s2, %s7000_s24  }
  0x46   :  { %6977 = dma.done.wait [#allocation5], 11264  }
  0x47   :  { %6978 = vsyncadd [#allocation5], 4294956032 }
  0x48   :  { %6979 = dma.done.wait [#allocation8], 14848  }
  0x49   :  { %6980 = vsyncadd [#allocation8], 4294952448 }
  0x4a   :  { %6981 = dma.done.wait [#allocation11], 14848  }
  0x4b   :  { %6982 = vsyncadd [#allocation11], 4294952448 }
  0x4c   :  { %6983 = dma.done.wait [#allocation14], 1024  }
  0x4d   :  { %6984 = vsyncadd [#allocation14], 4294966272  ;;  %v237_v0 = vld [vmem:[#allocation7 + $0xf8] sm:$0xff]  ;;  %v236_v2 = vld [vmem:[#allocation7 + $0xf0] sm:$0xff]  ;;  %vm318_vm0 = vcmask 130048   ;;  %vm1407_vm1 = vcmask 523264  }
  0x4e   :  { %v301_v1 = vld [vmem:[#allocation7 + $0x2f8] sm:$0xff]  ;;  %385 = vmatprep.subr.mxu0 %v237_v0  ;;  %v300_v3 = vld [vmem:[#allocation7 + $0x2f0] sm:$0xff]  ;;  %v235_v4 = vld [vmem:[#allocation7 + $0xe8] sm:$0xff]  ;;  %vm7003_vm2 = vmmov 0   ;;  %s7004_s17 = smov [#allocation16]  }
  0x4f   :  { %582 = vmatprep.subr.mxu1 %v301_v1  ;;  %v299_v5 = vld [vmem:[#allocation7 + $0x2e8] sm:$0xff]  ;;  %386 = vmatpush1.msra.mxu0 %v236_v2  ;;  %v234_v6 = vld [vmem:[#allocation7 + $0xe0] sm:$0xff]  ;;  %v233_v8 = vld [vmem:[#allocation7 + $0xd8] sm:$0xff]  ;;  %s6001_s1 = sshll.u32 %s7004_s17, 4  ;;  %s6002_s1 = int_to_ptr.vmem [resolvable:$true] %s6001_s1 }
  0x50   :  { %583 = vmatpush1.msra.mxu1 %v300_v3  ;;  %v298_v7 = vld [vmem:[#allocation7 + $0x2e0] sm:$0xff]  ;;  %387 = vmatprep.subr.mxu0 %v235_v4  ;;  %v297_v9 = vld [vmem:[#allocation7 + $0x2d8] sm:$0xff]  ;;  %v232_v10 = vld [vmem:[#allocation7 + $0xd0] sm:$0xff]  ;;  %s6937_s27 = scalar_lea.vmem %s6002_s1, 256  ;;  %p6942_p3 = scmp.lt.s32.totalorder %s6002_s1, %s6002_s1 }
  0x51   :  { %584 = vmatprep.subr.mxu1 %v299_v5  ;;  %v296_v11 = vld [vmem:[#allocation7 + $0x2d0] sm:$0xff]  ;;  %388 = vmatpush1.msra.mxu0 %v234_v6  ;;  %v231_v12 = vld [vmem:[#allocation7 + $0xc8] sm:$0xff]  ;;  %v230_v14 = vld [vmem:[#allocation7 + $0xc0] sm:$0xff]  ;;  %p6938_p2 = scmp.ne.s32.totalorder %s6002_s1, %s6937_s27  ;;  %p6943_p4 = scmp.lt.s32.totalorder %s6937_s27, %s6937_s27 }
  0x52   :  { %585 = vmatpush1.msra.mxu1 %v298_v7  ;;  %v295_v13 = vld [vmem:[#allocation7 + $0x2c8] sm:$0xff]  ;;  %389 = vmatprep.subr.mxu0 %v233_v8  ;;  %v294_v15 = vld [vmem:[#allocation7 + $0x2c0] sm:$0xff]  ;;  %v229_v16 = vld [vmem:[#allocation7 + $0xb8] sm:$0xff] }
  0x53   :  { %586 = vmatprep.subr.mxu1 %v297_v9  ;;  %390 = vmatpush1.msra.mxu0 %v232_v10  ;;  %v293_v17 = vld [vmem:[#allocation7 + $0x2b8] sm:$0xff]  ;;  %v228_v18 = vld [vmem:[#allocation7 + $0xb0] sm:$0xff]  ;;  %v227_v20 = vld [vmem:[#allocation7 + $0xa8] sm:$0xff]  ;;  %p6944_p5 = por %p6943_p4, %p6942_p3 }
  0x54   :  { %587 = vmatpush1.msra.mxu1 %v296_v11  ;;  %391 = vmatprep.subr.mxu0 %v231_v12  ;;  %v292_v19 = vld [vmem:[#allocation7 + $0x2b0] sm:$0xff]  ;;  %v291_v21 = vld [vmem:[#allocation7 + $0x2a8] sm:$0xff]  ;;  %v226_v22 = vld [vmem:[#allocation7 + $0xa0] sm:$0xff] }
  0x55   :  { %588 = vmatprep.subr.mxu1 %v295_v13  ;;  %392 = vmatpush1.msra.mxu0 %v230_v14  ;;  %v290_v23 = vld [vmem:[#allocation7 + $0x2a0] sm:$0xff]  ;;  %v225_v24 = vld [vmem:[#allocation7 + $0x98] sm:$0xff]  ;;  %v224_v26 = vld [vmem:[#allocation7 + $0x90] sm:$0xff]  ;;  %p6945_p6 = pnand %p6944_p5, %p6938_p2 }
  0x56   :  { %589 = vmatpush1.msra.mxu1 %v294_v15  ;;  %393 = vmatprep.subr.mxu0 %v229_v16  ;;  %v289_v25 = vld [vmem:[#allocation7 + $0x298] sm:$0xff]  ;;  %v288_v27 = vld [vmem:[#allocation7 + $0x290] sm:$0xff]  ;;  %v223_v28 = vld [vmem:[#allocation7 + $0x88] sm:$0xff] }
  0x57   :  { %590 = vmatprep.subr.mxu1 %v293_v17  ;;  %394 = vmatpush1.msra.mxu0 %v228_v18  ;;  %v287_v29 = vld [vmem:[#allocation7 + $0x288] sm:$0xff]  ;;  %v222_v30 = vld [vmem:[#allocation7 + $0x80] sm:$0xff]  ;;  %v221_v32 = vld [vmem:[#allocation7 + $0x78] sm:$0xff] }
  0x58   :  { %591 = vmatpush1.msra.mxu1 %v292_v19  ;;  %395 = vmatprep.subr.mxu0 %v227_v20  ;;  %v286_v31 = vld [vmem:[#allocation7 + $0x280] sm:$0xff]  ;;  %v285_v33 = vld [vmem:[#allocation7 + $0x278] sm:$0xff]  ;;  %v220_v34 = vld [vmem:[#allocation7 + $0x70] sm:$0xff] }
  0x59   :  { %592 = vmatprep.subr.mxu1 %v291_v21  ;;  %396 = vmatpush1.msra.mxu0 %v226_v22  ;;  %v284_v35 = vld [vmem:[#allocation7 + $0x270] sm:$0xff]  ;;  %v219_v36 = vld [vmem:[#allocation7 + $0x68] sm:$0xff]  ;;  %v218_v38 = vld [vmem:[#allocation7 + $0x60] sm:$0xff] }
  0x5a   :  { %593 = vmatpush1.msra.mxu1 %v290_v23  ;;  %397 = vmatprep.subr.mxu0 %v225_v24  ;;  %v283_v37 = vld [vmem:[#allocation7 + $0x268] sm:$0xff]  ;;  %v282_v39 = vld [vmem:[#allocation7 + $0x260] sm:$0xff]  ;;  %v217_v40 = vld [vmem:[#allocation7 + $0x58] sm:$0xff] }
  0x5b   :  { %594 = vmatprep.subr.mxu1 %v289_v25  ;;  %398 = vmatpush1.msra.mxu0 %v224_v26  ;;  %v281_v41 = vld [vmem:[#allocation7 + $0x258] sm:$0xff]  ;;  %v216_v42 = vld [vmem:[#allocation7 + $0x50] sm:$0xff]  ;;  %v215_v44 = vld [vmem:[#allocation7 + $0x48] sm:$0xff] }
  0x5c   :  { %595 = vmatpush1.msra.mxu1 %v288_v27  ;;  %399 = vmatprep.subr.mxu0 %v223_v28  ;;  %v280_v43 = vld [vmem:[#allocation7 + $0x250] sm:$0xff]  ;;  %v279_v45 = vld [vmem:[#allocation7 + $0x248] sm:$0xff]  ;;  %v214_v46 = vld [vmem:[#allocation7 + $0x40] sm:$0xff] }
  0x5d   :  { %596 = vmatprep.subr.mxu1 %v287_v29  ;;  %400 = vmatpush1.msra.mxu0 %v222_v30  ;;  %v278_v47 = vld [vmem:[#allocation7 + $0x240] sm:$0xff]  ;;  %v213_v48 = vld [vmem:[#allocation7 + $0x38] sm:$0xff]  ;;  %v212_v50 = vld [vmem:[#allocation7 + $0x30] sm:$0xff] }
  0x5e   :  { %597 = vmatpush1.msra.mxu1 %v286_v31  ;;  %401 = vmatprep.subr.mxu0 %v221_v32  ;;  %v277_v49 = vld [vmem:[#allocation7 + $0x238] sm:$0xff]  ;;  %v276_v51 = vld [vmem:[#allocation7 + $0x230] sm:$0xff]  ;;  %v211_v52 = vld [vmem:[#allocation7 + $0x28] sm:$0xff] }
  0x5f   :  { %598 = vmatprep.subr.mxu1 %v285_v33  ;;  %402 = vmatpush1.msra.mxu0 %v220_v34  ;;  %v275_v53 = vld [vmem:[#allocation7 + $0x228] sm:$0xff]  ;;  %v210_v54 = vld [vmem:[#allocation7 + $0x20] sm:$0xff]  ;;  %v209_v56 = vld [vmem:[#allocation7 + $0x18] sm:$0xff] }
  0x60   :  { %599 = vmatpush1.msra.mxu1 %v284_v35  ;;  %403 = vmatprep.subr.mxu0 %v219_v36  ;;  %v274_v55 = vld [vmem:[#allocation7 + $0x220] sm:$0xff]  ;;  %v273_v57 = vld [vmem:[#allocation7 + $0x218] sm:$0xff]  ;;  %v208_v58 = vld [vmem:[#allocation7 + $0x10] sm:$0xff] }
  0x61   :  { %600 = vmatprep.subr.mxu1 %v283_v37  ;;  %404 = vmatpush1.msra.mxu0 %v218_v38  ;;  %v272_v59 = vld [vmem:[#allocation7 + $0x210] sm:$0xff]  ;;  %v207_v60 = vld [vmem:[#allocation7 + $0x8] sm:$0xff]  ;;  %v206_v62 = vld [vmem:[#allocation7] sm:$0xff] }
  0x62   :  { %601 = vmatpush1.msra.mxu1 %v282_v39  ;;  %405 = vmatprep.subr.mxu0 %v217_v40  ;;  %v271_v61 = vld [vmem:[#allocation7 + $0x208] sm:$0xff]  ;;  %v270_v63 = vld [vmem:[#allocation7 + $0x200] sm:$0xff]  ;;  %v269_v0 = vld [vmem:[#allocation7 + $0x1f8] sm:$0xff] }
  0x63   :  { %602 = vmatprep.subr.mxu1 %v281_v41  ;;  %406 = vmatpush1.msra.mxu0 %v216_v42  ;;  %v305_v1 = vld [vmem:[#allocation7 + $0x318] sm:$0xff]  ;;  %v268_v2 = vld [vmem:[#allocation7 + $0x1f0] sm:$0xff]  ;;  %v267_v4 = vld [vmem:[#allocation7 + $0x1e8] sm:$0xff] }
  0x64   :  { %603 = vmatpush1.msra.mxu1 %v280_v43  ;;  %407 = vmatprep.subr.mxu0 %v215_v44  ;;  %v304_v3 = vld [vmem:[#allocation7 + $0x310] sm:$0xff]  ;;  %v303_v5 = vld [vmem:[#allocation7 + $0x308] sm:$0xff]  ;;  %v266_v6 = vld [vmem:[#allocation7 + $0x1e0] sm:$0xff] }
  0x65   :  { %604 = vmatprep.subr.mxu1 %v279_v45  ;;  %408 = vmatpush1.msra.mxu0 %v214_v46  ;;  %v302_v7 = vld [vmem:[#allocation7 + $0x300] sm:$0xff]  ;;  %v7094_v8 = vld [vmem:[#allocation4 + $0x18] sm:$0xff]  ;;  %v7096_v10 = vld [vmem:[#allocation4 + $0x10] sm:$0xff] }
  0x66   :  { %605 = vmatpush1.msra.mxu1 %v278_v47  ;;  %409 = vmatprep.subr.mxu0 %v213_v48  ;;  %v265_v9 = vld [vmem:[#allocation7 + $0x1d8] sm:$0xff]  ;;  %v264_v12 = vld [vmem:[#allocation7 + $0x1d0] sm:$0xff]  ;;  %v263_v14 = vld [vmem:[#allocation7 + $0x1c8] sm:$0xff] }
  0x67   :  { %606 = vmatprep.subr.mxu1 %v277_v49  ;;  %410 = vmatpush1.msra.mxu0 %v212_v50  ;;  %v854_v11 = vld [vmem:[#allocation10 + $0xf8] sm:$0xff]  ;;  %v853_v13 = vld [vmem:[#allocation10 + $0xf0] sm:$0xff]  ;;  %v262_v16 = vld [vmem:[#allocation7 + $0x1c0] sm:$0xff] }
  0x68   :  { %607 = vmatpush1.msra.mxu1 %v276_v51  ;;  %411 = vmatprep.subr.mxu0 %v211_v52  ;;  %v7100_v15 = vld [vmem:[#allocation4 + $0x38] sm:$0xff]  ;;  %v852_v17 = vld [vmem:[#allocation10 + $0xe8] sm:$0xff]  ;;  %v7103_v19 = vld [vmem:[#allocation4 + $0x30] sm:$0xff] }
  0x69   :  { %608 = vmatprep.subr.mxu1 %v275_v53  ;;  %412 = vmatpush1.msra.mxu0 %v210_v54  ;;  %v261_v18 = vld [vmem:[#allocation7 + $0x1b8] sm:$0xff]  ;;  %v851_v20 = vld [vmem:[#allocation10 + $0xe0] sm:$0xff]  ;;  %v260_v21 = vld [vmem:[#allocation7 + $0x1b0] sm:$0xff] }
  0x6a   :  { %609 = vmatpush1.msra.mxu1 %v274_v55  ;;  %413 = vmatprep.subr.mxu0 %v209_v56  ;;  %v259_v22 = vld [vmem:[#allocation7 + $0x1a8] sm:$0xff]  ;;  %v850_v23 = vld [vmem:[#allocation10 + $0xd8] sm:$0xff]  ;;  %v258_v24 = vld [vmem:[#allocation7 + $0x1a0] sm:$0xff] }
  0x6b   :  { %610 = vmatprep.subr.mxu1 %v273_v57  ;;  %414 = vmatpush1.msra.mxu0 %v208_v58  ;;  %v7108_v25 = vld [vmem:[#allocation4 + $0x58] sm:$0xff]  ;;  %v849_v26 = vld [vmem:[#allocation10 + $0xd0] sm:$0xff]  ;;  %v848_v30 = vld [vmem:[#allocation10 + $0xc8] sm:$0xff] }
  0x6c   :  { %611 = vmatpush1.msra.mxu1 %v272_v59  ;;  %415 = vmatprep.subr.mxu0 %v207_v60  ;;  %v257_v27 = vld [vmem:[#allocation7 + $0x198] sm:$0xff]  ;;  %v7110_v28 = vld [vmem:[#allocation4 + $0x50] sm:$0xff]  ;;  %v255_v31 = vld [vmem:[#allocation7 + $0x188] sm:$0xff] }
  0x6d   :  { %612 = vmatprep.subr.mxu1 %v271_v61  ;;  %416 = vmatpush1.msra.mxu0 %v206_v62  ;;  %v256_v29 = vld [vmem:[#allocation7 + $0x190] sm:$0xff]  ;;  %v847_v32 = vld [vmem:[#allocation10 + $0xc0] sm:$0xff]  ;;  %v7115_v34 = vld [vmem:[#allocation4 + $0x78] sm:$0xff] }
  0x6e   :  { %613 = vmatpush1.msra.mxu1 %v270_v63  ;;  %417 = vmatprep.subr.mxu0 %v269_v0  ;;  %v254_v33 = vld [vmem:[#allocation7 + $0x180] sm:$0xff]  ;;  %v846_v35 = vld [vmem:[#allocation10 + $0xb8] sm:$0xff]  ;;  %v7117_v37 = vld [vmem:[#allocation4 + $0x70] sm:$0xff] }
  0x6f   :  { %642 = vmatprep.subr.mxu1 %v305_v1  ;;  %418 = vmatpush2.msra.mxu0 %v268_v2  ;;  %v253_v36 = vld [vmem:[#allocation7 + $0x178] sm:$0xff]  ;;  %v845_v38 = vld [vmem:[#allocation10 + $0xb0] sm:$0xff]  ;;  %v251_v40 = vld [vmem:[#allocation7 + $0x168] sm:$0xff] }
  0x70   :  { %643 = vmatpush2.msra.mxu1 %v304_v3  ;;  %419 = vmatprep.subr.mxu0 %v267_v4  ;;  %v252_v39 = vld [vmem:[#allocation7 + $0x170] sm:$0xff]  ;;  %v844_v41 = vld [vmem:[#allocation10 + $0xa8] sm:$0xff]  ;;  %v250_v42 = vld [vmem:[#allocation7 + $0x160] sm:$0xff] }
  0x71   :  { %644 = vmatprep.subr.mxu1 %v303_v5  ;;  %420 = vmatpush2.msra.mxu0 %v266_v6  ;;  %v7122_v43 = vld [vmem:[#allocation4 + $0x98] sm:$0xff]  ;;  %v843_v44 = vld [vmem:[#allocation10 + $0xa0] sm:$0xff]  ;;  %v7124_v46 = vld [vmem:[#allocation4 + $0x90] sm:$0xff] }
  0x72   :  { %645 = vmatpush2.msra.mxu1 %v302_v7  ;;  %6020 = vmatprep.mubr.msk.f32.mxu1 %vm318_vm0, %v7094_v8  ;;  %v249_v45 = vld [vmem:[#allocation7 + $0x158] sm:$0xff]  ;;  %v248_v47 = vld [vmem:[#allocation7 + $0x150] sm:$0xff]  ;;  %v247_v49 = vld [vmem:[#allocation7 + $0x148] sm:$0xff] }
  0x73   :  { %421 = vmatprep.subr.mxu0 %v265_v9  ;;  %647 = vmatmul.mubr.f32.vlgmr.msra.gmra.mxu1 %v7096_v10  ;;  %v842_v48 = vld [vmem:[#allocation10 + $0x98] sm:$0xff]  ;;  %v841_v50 = vld [vmem:[#allocation10 + $0x90] sm:$0xff]  ;;  %v246_v51 = vld [vmem:[#allocation7 + $0x140] sm:$0xff] }
  0x74   :  { %935 = vmatprep.subr.mxu1 %v854_v11  ;;  %422 = vmatpush2.msra.mxu0 %v264_v12  ;;  %v7129_v52 = vld [vmem:[#allocation4 + $0xb8] sm:$0xff]  ;;  %v7131_v54 = vld [vmem:[#allocation4 + $0xb0] sm:$0xff]  ;;  %v840_v55 = vld [vmem:[#allocation10 + $0x88] sm:$0xff] }
  0x75   :  { %936 = vmatpush1.msra.mxu1 %v853_v13  ;;  %423 = vmatprep.subr.mxu0 %v263_v14  ;;  %v245_v53 = vld [vmem:[#allocation7 + $0x138] sm:$0xff]  ;;  %v244_v56 = vld [vmem:[#allocation7 + $0x130] sm:$0xff]  ;;  %v839_v57 = vld [vmem:[#allocation10 + $0x80] sm:$0xff] }
  0x76   :  { %6021 = vmatprep.mubr.msk.f32.mxu1 %vm318_vm0, %v7100_v15  ;;  %424 = vmatpush2.msra.mxu0 %v262_v16  ;;  %v243_v58 = vld [vmem:[#allocation7 + $0x128] sm:$0xff]  ;;  %v838_v59 = vld [vmem:[#allocation10 + $0x78] sm:$0xff]  ;;  %v242_v60 = vld [vmem:[#allocation7 + $0x120] sm:$0xff] }
  0x77   :  { %937 = vmatprep.subr.mxu1 %v852_v17  ;;  %425 = vmatprep.subr.mxu0 %v261_v18  ;;  %v7136_v61 = vld [vmem:[#allocation4 + $0xd8] sm:$0xff]  ;;  %v837_v62 = vld [vmem:[#allocation10 + $0x70] sm:$0xff]  ;;  %v836_v2 = vld [vmem:[#allocation10 + $0x68] sm:$0xff] }
  0x78   :  { %653 = vmatmul.mubr.f32.gmra.mxu1 %v7103_v19  ;;  %426 = vmatpush2.msra.mxu0 %v260_v21  ;;  %v241_v63 = vld [vmem:[#allocation7 + $0x118] sm:$0xff]  ;;  %v7138_v0 = vld [vmem:[#allocation4 + $0xd0] sm:$0xff]  ;;  %v239_v3 = vld [vmem:[#allocation7 + $0x108] sm:$0xff] }
  0x79   :  { %938 = vmatpush1.msra.mxu1 %v851_v20  ;;  %427 = vmatprep.subr.mxu0 %v259_v22  ;;  %v240_v1 = vld [vmem:[#allocation7 + $0x110] sm:$0xff]  ;;  %v835_v4 = vld [vmem:[#allocation10 + $0x60] sm:$0xff]  ;;  %v7143_v6 = vld [vmem:[#allocation4 + $0x8] sm:$0xff] }
  0x7a   :  { %939 = vmatprep.subr.mxu1 %v850_v23  ;;  %428 = vmatpush2.msra.mxu0 %v258_v24  ;;  %v238_v5 = vld [vmem:[#allocation7 + $0x100] sm:$0xff]  ;;  %v7145_v7 = vld [vmem:[#allocation4 + $0xf8] sm:$0xff]  ;;  %v7149_v11 = vld [vmem:[#allocation4 + $0xf0] sm:$0xff] }
  0x7b   :  { %6022 = vmatprep.mubr.msk.f32.mxu1 %vm318_vm0, %v7108_v25  ;;  %940 = vmatpush1.msra.mxu1 %v849_v26  ;;  %v7147_v9 = vld [vmem:[#allocation4] sm:$0xff]  ;;  %v834_v12 = vld [vmem:[#allocation10 + $0x58] sm:$0xff]  ;;  %v7151_v13 = vld [vmem:[#allocation4 + $0x28] sm:$0xff] }
  0x7c   :  { %429 = vmatprep.subr.mxu0 %v257_v27  ;;  %659 = vmatmul.mubr.f32.gmra.mxu1 %v7110_v28  ;;  %v833_v14 = vld [vmem:[#allocation10 + $0x50] sm:$0xff]  ;;  %v7156_v16 = vld [vmem:[#allocation4 + $0x118] sm:$0xff]  ;;  %v832_v17 = vld [vmem:[#allocation10 + $0x48] sm:$0xff] }
  0x7d   :  { %430 = vmatpush2.msra.mxu0 %v256_v29  ;;  %941 = vmatprep.subr.mxu1 %v848_v30  ;;  %v7161_v18 = vld [vmem:[#allocation4 + $0x20] sm:$0xff]  ;;  %v7163_v20 = vld [vmem:[#allocation4 + $0x110] sm:$0xff]  ;;  %v7167_v22 = vld [vmem:[#allocation4 + $0x48] sm:$0xff] }
  0x7e   :  { %431 = vmatprep.subr.mxu0 %v255_v31  ;;  %942 = vmatpush1.msra.mxu1 %v847_v32  ;;  %v831_v21 = vld [vmem:[#allocation10 + $0x40] sm:$0xff]  ;;  %v830_v23 = vld [vmem:[#allocation10 + $0x38] sm:$0xff]  ;;  %v829_v26 = vld [vmem:[#allocation10 + $0x30] sm:$0xff] }
  0x7f   :  { %432 = vmatpush2.msra.mxu0 %v254_v33  ;;  %6023 = vmatprep.mubr.msk.f32.mxu1 %vm318_vm0, %v7115_v34  ;;  %v7169_v24 = vld [vmem:[#allocation4 + $0x138] sm:$0xff]  ;;  %v7174_v27 = vld [vmem:[#allocation4 + $0x40] sm:$0xff]  ;;  %v7176_v29 = vld [vmem:[#allocation4 + $0x130] sm:$0xff] }
  0x80   :  { %943 = vmatprep.subr.mxu1 %v846_v35  ;;  %433 = vmatprep.subr.mxu0 %v253_v36  ;;  %v828_v30 = vld [vmem:[#allocation10 + $0x28] sm:$0xff]  ;;  %v827_v32 = vld [vmem:[#allocation10 + $0x20] sm:$0xff]  ;;  %v7182_v33 = vld [vmem:[#allocation4 + $0x158] sm:$0xff] }
  0x81   :  { %665 = vmatmul.mubr.f32.gmra.mxu1 %v7117_v37  ;;  %434 = vmatpush2.msra.mxu0 %v252_v39  ;;  %v7180_v31 = vld [vmem:[#allocation4 + $0x68] sm:$0xff]  ;;  %9062 = vst [vmem:[#allocation24_spill] sm:$0xff] %v7182_v33  ;;  %v826_v35 = vld [vmem:[#allocation10 + $0x18] sm:$0xff]  ;;  %v7189_v39 = vld [vmem:[#allocation4 + $0x150] sm:$0xff] }
  0x82   :  { %944 = vmatpush1.msra.mxu1 %v845_v38  ;;  %435 = vmatprep.subr.mxu0 %v251_v40  ;;  %v918_v36 = vld [vmem:[#allocation10 + $0x2f8] sm:$0xff]  ;;  %v7187_v38 = vld [vmem:[#allocation4 + $0x60] sm:$0xff]  ;;  %9063 = vst [vmem:[#allocation25_spill] sm:$0xff] %v7189_v39  ;;  %v825_v40 = vld [vmem:[#allocation10 + $0x10] sm:$0xff] }
  0x83   :  { %945 = vmatprep.subr.mxu1 %v844_v41  ;;  %436 = vmatpush2.msra.mxu0 %v250_v42  ;;  %v7193_v41 = vld [vmem:[#allocation4 + $0x88] sm:$0xff] }
  0x84   :  { %6024 = vmatprep.mubr.msk.f32.mxu1 %vm318_vm0, %v7122_v43  ;;  %946 = vmatpush1.msra.mxu1 %v843_v44  ;;  %v824_v42 = vld [vmem:[#allocation10 + $0x8] sm:$0xff]  ;;  %v7195_v44 = vld [vmem:[#allocation4 + $0x178] sm:$0xff] }
  0x85   :  { %437 = vmatprep.subr.mxu0 %v249_v45  ;;  %671 = vmatmul.mubr.f32.gmra.mxu1 %v7124_v46  ;;  %9064 = vst [vmem:[#allocation26_spill] sm:$0xff] %v7195_v44  ;;  %v823_v45 = vld [vmem:[#allocation10] sm:$0xff] }
  0x86   :  { %438 = vmatpush2.msra.mxu0 %v248_v47  ;;  %947 = vmatprep.subr.mxu1 %v842_v48  ;;  %v917_v47 = vld [vmem:[#allocation10 + $0x2f0] sm:$0xff]  ;;  %v7200_v48 = vld [vmem:[#allocation4 + $0x80] sm:$0xff] }
  0x87   :  { %439 = vmatprep.subr.mxu0 %v247_v49  ;;  %948 = vmatpush1.msra.mxu1 %v841_v50  ;;  %v7202_v49 = vld [vmem:[#allocation4 + $0x170] sm:$0xff]  ;;  %v886_v50 = vld [vmem:[#allocation10 + $0x1f8] sm:$0xff] }
  0x88   :  { %440 = vmatpush2.msra.mxu0 %v246_v51  ;;  %6025 = vmatprep.mubr.msk.f32.mxu1 %vm318_vm0, %v7129_v52  ;;  %9065 = vst [vmem:[#allocation27_spill] sm:$0xff] %v7202_v49  ;;  %v7206_v51 = vld [vmem:[#allocation4 + $0xa8] sm:$0xff] }
  0x89   :  { %441 = vmatprep.subr.mxu0 %v245_v53  ;;  %677 = vmatmul.mubr.f32.gmra.mxu1 %v7131_v54  ;;  %v885_v53 = vld [vmem:[#allocation10 + $0x1f0] sm:$0xff] }
  0x8a   :  { %949 = vmatprep.subr.mxu1 %v840_v55  ;;  %442 = vmatpush2.msra.mxu0 %v244_v56  ;;  %v7208_v55 = vld [vmem:[#allocation4 + $0x198] sm:$0xff]  ;;  %v884_v56 = vld [vmem:[#allocation10 + $0x1e8] sm:$0xff] }
  0x8b   :  { %950 = vmatpush1.msra.mxu1 %v839_v57  ;;  %443 = vmatprep.subr.mxu0 %v243_v58  ;;  %9066 = vst [vmem:[#allocation28_spill] sm:$0xff] %v7208_v55  ;;  %v916_v57 = vld [vmem:[#allocation10 + $0x2e8] sm:$0xff]  ;;  %v7213_v58 = vld [vmem:[#allocation4 + $0xa0] sm:$0xff] }
  0x8c   :  { %951 = vmatprep.subr.mxu1 %v838_v59  ;;  %444 = vmatpush2.msra.mxu0 %v242_v60  ;;  %v7215_v59 = vld [vmem:[#allocation4 + $0x190] sm:$0xff]  ;;  %v883_v60 = vld [vmem:[#allocation10 + $0x1e0] sm:$0xff] }
  0x8d   :  { %6026 = vmatprep.mubr.msk.f32.mxu1 %vm318_vm0, %v7136_v61  ;;  %952 = vmatpush1.msra.mxu1 %v837_v62  ;;  %9067 = vst [vmem:[#allocation29_spill] sm:$0xff] %v7215_v59  ;;  %v7219_v62 = vld [vmem:[#allocation4 + $0xc8] sm:$0xff] }
  0x8e   :  { %445 = vmatprep.subr.mxu0 %v241_v63  ;;  %683 = vmatmul.mubr.f32.gmra.mxu1 %v7138_v0  ;;  %v882_v63 = vld [vmem:[#allocation10 + $0x1d8] sm:$0xff] }
  0x8f   :  { %446 = vmatpush2.msra.mxu0 %v240_v1  ;;  %953 = vmatprep.subr.mxu1 %v836_v2  ;;  %v7221_v1 = vld [vmem:[#allocation4 + $0x1b8] sm:$0xff]  ;;  %v881_v2 = vld [vmem:[#allocation10 + $0x1d0] sm:$0xff] }
  0x90   :  { %447 = vmatprep.subr.mxu0 %v239_v3  ;;  %954 = vmatpush1.msra.mxu1 %v835_v4  ;;  %9068 = vst [vmem:[#allocation30_spill] sm:$0xff] %v7221_v1  ;;  %v915_v3 = vld [vmem:[#allocation10 + $0x2e0] sm:$0xff] }
  0x91   :  { %448 = vmatpush2.msra.mxu0 %v238_v5  ;;  %449 = vmatprep.mubr.f32.mxu0 %v7143_v6  ;;  %v7226_v4 = vld [vmem:[#allocation4 + $0xc0] sm:$0xff]  ;;  %v7228_v5 = vld [vmem:[#allocation4 + $0x1b0] sm:$0xff] }
  0x92   :  { %6027 = vmatprep.mubr.msk.f32.mxu1 %vm318_vm0, %v7145_v7  ;;  %450 = vmatmul.mubr.f32.vlgmr.msra.gmra.mxu0 %v7147_v9  ;;  %9069 = vst [vmem:[#allocation31_spill] sm:$0xff] %v7228_v5 }
  0x93   :  { %689 = vmatmul.mubr.f32.gmra.mxu1 %v7149_v11  ;;  %955 = vmatprep.subr.mxu1 %v834_v12  ;;  %v880_v12 = vld [vmem:[#allocation10 + $0x1c8] sm:$0xff] }
  0x94   :  { %455 = vmatprep.mubr.f32.mxu0 %v7151_v13  ;;  %956 = vmatpush1.msra.mxu1 %v833_v14  ;;  %v7232_v14 = vld [vmem:[#allocation4 + $0xe8] sm:$0xff] }
  0x95   :  { %6028 = vmatprep.mubr.msk.f32.mxu1 %vm318_vm0, %v7156_v16  ;;  %957 = vmatprep.subr.mxu1 %v832_v17  ;;  %v879_v17 = vld [vmem:[#allocation10 + $0x1c0] sm:$0xff] }
  0x96   :  { %456 = vmatmul.mubr.f32.gmra.mxu0 %v7161_v18  ;;  %958 = vmatpush1.msra.mxu1 %v831_v21  ;;  %v7234_v21 = vld [vmem:[#allocation4 + $0x1d8] sm:$0xff] }
  0x97   :  { %695 = vmatmul.mubr.f32.gmra.mxu1 %v7163_v20  ;;  %461 = vmatprep.mubr.f32.mxu0 %v7167_v22  ;;  %9070 = vst [vmem:[#allocation32_spill] sm:$0xff] %v7234_v21 }
  0x98   :  { %959 = vmatprep.subr.mxu1 %v830_v23  ;;  %6029 = vmatprep.mubr.msk.f32.mxu1 %vm318_vm0, %v7169_v24  ;;  %v878_v23 = vld [vmem:[#allocation10 + $0x1b8] sm:$0xff] }
  0x99   :  { %960 = vmatpush1.msra.mxu1 %v829_v26  ;;  %1132 = vmatprep.subr.mxu0 %v918_v36  ;;  %v914_v26 = vld [vmem:[#allocation10 + $0x2d8] sm:$0xff]  ;;  %v7245_v36 = vld [vmem:[#allocation4 + $0x108] sm:$0xff] }
  0x9a   :  { %462 = vmatmul.mubr.f32.gmra.mxu0 %v7174_v27  ;;  %961 = vmatprep.subr.mxu1 %v828_v30  ;;  %v7239_v30 = vld [vmem:[#allocation4 + $0xe0] sm:$0xff] }
  0x9b   :  { %701 = vmatmul.mubr.f32.gmra.mxu1 %v7176_v29  ;;  %467 = vmatprep.mubr.f32.mxu0 %v7180_v31 }
  0x9c   :  { %962 = vmatpush1.msra.mxu1 %v827_v32  ;;  %6030 = vmatprep.mubr.msk.f32.mxu1 %vm318_vm0, %v7182_v33  ;;  %v7241_v32 = vld [vmem:[#allocation4 + $0x1d0] sm:$0xff] }
  0x9d   :  { %963 = vmatprep.subr.mxu1 %v826_v35  ;;  %1133 = vmatpush1.msra.mxu0 %v917_v47  ;;  %9071 = vst [vmem:[#allocation33_spill] sm:$0xff] %v7241_v32  ;;  %v877_v35 = vld [vmem:[#allocation10 + $0x1b0] sm:$0xff] }
  0x9e   :  { %468 = vmatmul.mubr.f32.gmra.mxu0 %v7187_v38  ;;  %964 = vmatpush1.msra.mxu1 %v825_v40  ;;  %v876_v40 = vld [vmem:[#allocation10 + $0x1a8] sm:$0xff]  ;;  %v913_v47 = vld [vmem:[#allocation10 + $0x2d0] sm:$0xff] }
  0x9f   :  { %707 = vmatmul.mubr.f32.gmra.mxu1 %v7189_v39  ;;  %473 = vmatprep.mubr.f32.mxu0 %v7193_v41  ;;  %v900_v39 = vld [vmem:[#allocation10 + $0x268] sm:$0xff]  ;;  %v7379_v33 = vld [vmem:[#allocation9 + $0x50] sm:$0xff] }
  0xa0   :  { %965 = vmatprep.subr.mxu1 %v824_v42  ;;  %6031 = vmatprep.mubr.msk.f32.mxu1 %vm318_vm0, %v7195_v44  ;;  %v7247_v42 = vld [vmem:[#allocation4 + $0x1f8] sm:$0xff] }
  0xa1   :  { %966 = vmatpush1.msra.mxu1 %v823_v45  ;;  %1134 = vmatprep.subr.mxu0 %v916_v57  ;;  %9072 = vst [vmem:[#allocation34_spill] sm:$0xff] %v7247_v42  ;;  %v875_v45 = vld [vmem:[#allocation10 + $0x1a0] sm:$0xff]  ;;  %v7258_v57 = vld [vmem:[#allocation4 + $0x128] sm:$0xff]  ;;  %v7367_v44 = vld [vmem:[#allocation9 + $0x58] sm:$0xff] }
  0xa2   :  { %474 = vmatmul.mubr.f32.gmra.mxu0 %v7200_v48  ;;  %967 = vmatprep.subr.mxu1 %v886_v50  ;;  %v7252_v50 = vld [vmem:[#allocation4 + $0x100] sm:$0xff] }
  0xa3   :  { %713 = vmatmul.mubr.f32.gmra.mxu1 %v7202_v49  ;;  %479 = vmatprep.mubr.f32.mxu0 %v7206_v51  ;;  %v7343_v49 = vld [vmem:[#allocation4 + $0x1e0] sm:$0xff] }
  0xa4   :  { %968 = vmatpush2.msra.mxu1 %v885_v53  ;;  %6032 = vmatprep.mubr.msk.f32.mxu1 %vm318_vm0, %v7208_v55  ;;  %v7254_v53 = vld [vmem:[#allocation4 + $0x1f0] sm:$0xff]  ;;  %v7336_v55 = vld [vmem:[#allocation4 + $0x1e8] sm:$0xff] }
  0xa5   :  { %969 = vmatprep.subr.mxu1 %v884_v56  ;;  %1135 = vmatpush1.msra.mxu0 %v915_v3  ;;  %9073 = vst [vmem:[#allocation35_spill] sm:$0xff] %v7254_v53  ;;  %v874_v56 = vld [vmem:[#allocation10 + $0x198] sm:$0xff]  ;;  %v912_v3 = vld [vmem:[#allocation10 + $0x2c8] sm:$0xff] }
  0xa6   :  { %480 = vmatmul.mubr.f32.gmra.mxu0 %v7213_v58  ;;  %970 = vmatpush2.msra.mxu1 %v883_v60  ;;  %v873_v60 = vld [vmem:[#allocation10 + $0x190] sm:$0xff] }
  0xa7   :  { %719 = vmatmul.mubr.f32.gmra.mxu1 %v7215_v59  ;;  %485 = vmatprep.mubr.f32.mxu0 %v7219_v62  ;;  %v907_v59 = vld [vmem:[#allocation10 + $0x2a0] sm:$0xff] }
  0xa8   :  { %971 = vmatprep.subr.mxu1 %v882_v63  ;;  %6033 = vmatprep.mubr.msk.f32.mxu1 %vm318_vm0, %v7221_v1  ;;  %v7260_v63 = vld [vmem:[#allocation4 + $0x218] sm:$0xff]  ;;  %v7317_v1 = vld [vmem:[#allocation4 + $0x1a0] sm:$0xff] }
  0xa9   :  { %972 = vmatpush2.msra.mxu1 %v881_v2  ;;  %1136 = vmatprep.subr.mxu0 %v914_v26  ;;  %9074 = vst [vmem:[#allocation36_spill] sm:$0xff] %v7260_v63  ;;  %v872_v2 = vld [vmem:[#allocation10 + $0x188] sm:$0xff] }
  0xaa   :  { %486 = vmatmul.mubr.f32.gmra.mxu0 %v7226_v4  ;;  %973 = vmatprep.subr.mxu1 %v880_v12  ;;  %v7265_v12 = vld [vmem:[#allocation4 + $0x120] sm:$0xff]  ;;  %v7271_v26 = vld [vmem:[#allocation4 + $0x148] sm:$0xff] }
  0xab   :  { %725 = vmatmul.mubr.f32.gmra.mxu1 %v7228_v5  ;;  %491 = vmatprep.mubr.f32.mxu0 %v7232_v14  ;;  %v7312_v5 = vld [vmem:[#allocation4 + $0x298] sm:$0xff] }
  0xac   :  { %974 = vmatpush2.msra.mxu1 %v879_v17  ;;  %6034 = vmatprep.mubr.msk.f32.mxu1 %vm318_vm0, %v7234_v21  ;;  %v7267_v17 = vld [vmem:[#allocation4 + $0x210] sm:$0xff]  ;;  %v7310_v21 = vld [vmem:[#allocation4 + $0x1a8] sm:$0xff]  ;;  %9082 = vst [vmem:[#allocation44_spill] sm:$0xff] %v7312_v5 }
  0xad   :  { %975 = vmatprep.subr.mxu1 %v878_v23  ;;  %1137 = vmatpush1.msra.mxu0 %v913_v47  ;;  %9075 = vst [vmem:[#allocation37_spill] sm:$0xff] %v7267_v17  ;;  %v871_v23 = vld [vmem:[#allocation10 + $0x180] sm:$0xff] }
  0xae   :  { %492 = vmatmul.mubr.f32.gmra.mxu0 %v7239_v30  ;;  %976 = vmatpush2.msra.mxu1 %v877_v35  ;;  %v870_v35 = vld [vmem:[#allocation10 + $0x178] sm:$0xff]  ;;  %v911_v47 = vld [vmem:[#allocation10 + $0x2c0] sm:$0xff] }
  0xaf   :  { %731 = vmatmul.mubr.f32.gmra.mxu1 %v7241_v32  ;;  %497 = vmatprep.mubr.f32.mxu0 %v7245_v36  ;;  %v909_v32 = vld [vmem:[#allocation10 + $0x2b0] sm:$0xff] }
  0xb0   :  { %977 = vmatprep.subr.mxu1 %v876_v40  ;;  %6035 = vmatprep.mubr.msk.f32.mxu1 %vm318_vm0, %v7247_v42  ;;  %v7273_v40 = vld [vmem:[#allocation4 + $0x238] sm:$0xff]  ;;  %v7297_v42 = vld [vmem:[#allocation4 + $0x188] sm:$0xff] }
  0xb1   :  { %978 = vmatpush2.msra.mxu1 %v875_v45  ;;  %9076 = vst [vmem:[#allocation38_spill] sm:$0xff] %v7273_v40  ;;  %1138 = vmatprep.subr.mxu0 %v912_v3  ;;  %v869_v45 = vld [vmem:[#allocation10 + $0x170] sm:$0xff]  ;;  %v867_v3 = vld [vmem:[#allocation10 + $0x160] sm:$0xff] }
  0xb2   :  { %498 = vmatmul.mubr.f32.gmra.mxu0 %v7252_v50  ;;  %979 = vmatprep.subr.mxu1 %v874_v56  ;;  %v7278_v56 = vld [vmem:[#allocation4 + $0x140] sm:$0xff] }
  0xb3   :  { %737 = vmatmul.mubr.f32.gmra.mxu1 %v7254_v53  ;;  %503 = vmatprep.mubr.f32.mxu0 %v7258_v57  ;;  %v7286_v53 = vld [vmem:[#allocation4 + $0x258] sm:$0xff] }
  0xb4   :  { %980 = vmatpush2.msra.mxu1 %v873_v60  ;;  %6036 = vmatprep.mubr.msk.f32.mxu1 %vm318_vm0, %v7260_v63  ;;  %v7280_v60 = vld [vmem:[#allocation4 + $0x230] sm:$0xff]  ;;  %v7284_v63 = vld [vmem:[#allocation4 + $0x168] sm:$0xff]  ;;  %9078 = vst [vmem:[#allocation40_spill] sm:$0xff] %v7286_v53 }
  0xb5   :  { %981 = vmatprep.subr.mxu1 %v872_v2  ;;  %9077 = vst [vmem:[#allocation39_spill] sm:$0xff] %v7280_v60  ;;  %v868_v2 = vld [vmem:[#allocation10 + $0x168] sm:$0xff]  ;;  %1139 = vmatpush1.msra.mxu0 %v911_v47  ;;  %v7299_v47 = vld [vmem:[#allocation4 + $0x278] sm:$0xff] }
  0xb6   :  { %504 = vmatmul.mubr.f32.gmra.mxu0 %v7265_v12  ;;  %982 = vmatpush2.msra.mxu1 %v871_v23  ;;  %v866_v23 = vld [vmem:[#allocation10 + $0x158] sm:$0xff]  ;;  %9080 = vst [vmem:[#allocation42_spill] sm:$0xff] %v7299_v47 }
  0xb7   :  { %743 = vmatmul.mubr.f32.gmra.mxu1 %v7267_v17  ;;  %509 = vmatprep.mubr.f32.mxu0 %v7271_v26  ;;  %v910_v17 = vld [vmem:[#allocation10 + $0x2b8] sm:$0xff] }
  0xb8   :  { %983 = vmatprep.subr.mxu1 %v870_v35  ;;  %6037 = vmatprep.mubr.msk.f32.mxu1 %vm318_vm0, %v7273_v40  ;;  %v7291_v35 = vld [vmem:[#allocation4 + $0x160] sm:$0xff]  ;;  %v7293_v40 = vld [vmem:[#allocation4 + $0x250] sm:$0xff] }
  0xb9   :  { %984 = vmatpush2.msra.mxu1 %v869_v45  ;;  %9079 = vst [vmem:[#allocation41_spill] sm:$0xff] %v7293_v40  ;;  %v865_v45 = vld [vmem:[#allocation10 + $0x150] sm:$0xff]  ;;  %1140 = vmatprep.subr.mxu0 %v910_v17 }
  0xba   :  { %510 = vmatmul.mubr.f32.gmra.mxu0 %v7278_v56  ;;  %985 = vmatprep.subr.mxu1 %v868_v2  ;;  %v863_v2 = vld [vmem:[#allocation10 + $0x140] sm:$0xff]  ;;  %v861_v17 = vld [vmem:[#allocation10 + $0x130] sm:$0xff] }
  0xbb   :  { %749 = vmatmul.mubr.f32.gmra.mxu1 %v7280_v60  ;;  %515 = vmatprep.mubr.f32.mxu0 %v7284_v63  ;;  %v864_v60 = vld [vmem:[#allocation10 + $0x148] sm:$0xff] }
  0xbc   :  { %986 = vmatpush2.msra.mxu1 %v867_v3  ;;  %6038 = vmatprep.mubr.msk.f32.mxu1 %vm318_vm0, %v7286_v53  ;;  %v7304_v3 = vld [vmem:[#allocation4 + $0x180] sm:$0xff]  ;;  %v7306_v53 = vld [vmem:[#allocation4 + $0x270] sm:$0xff] }
  0xbd   :  { %987 = vmatprep.subr.mxu1 %v866_v23  ;;  %9081 = vst [vmem:[#allocation43_spill] sm:$0xff] %v7306_v53  ;;  %v862_v23 = vld [vmem:[#allocation10 + $0x138] sm:$0xff]  ;;  %1141 = vmatpush1.msra.mxu0 %v909_v32 }
  0xbe   :  { %516 = vmatmul.mubr.f32.gmra.mxu0 %v7291_v35  ;;  %988 = vmatpush2.msra.mxu1 %v865_v45  ;;  %v860_v45 = vld [vmem:[#allocation10 + $0x128] sm:$0xff]  ;;  %v7325_v32 = vld [vmem:[#allocation4 + $0x2b8] sm:$0xff] }
  0xbf   :  { %755 = vmatmul.mubr.f32.gmra.mxu1 %v7293_v40  ;;  %521 = vmatprep.mubr.f32.mxu0 %v7297_v42  ;;  %v908_v40 = vld [vmem:[#allocation10 + $0x2a8] sm:$0xff]  ;;  %9084 = vst [vmem:[#allocation46_spill] sm:$0xff] %v7325_v32 }
  0xc0   :  { %6039 = vmatprep.mubr.msk.f32.mxu1 %vm318_vm0, %v7299_v47  ;;  %989 = vmatprep.subr.mxu1 %v864_v60  ;;  %v7319_v60 = vld [vmem:[#allocation4 + $0x290] sm:$0xff]  ;;  %v7323_v47 = vld [vmem:[#allocation4 + $0x1c8] sm:$0xff] }
  0xc1   :  { %990 = vmatpush2.msra.mxu1 %v863_v2  ;;  %9083 = vst [vmem:[#allocation45_spill] sm:$0xff] %v7319_v60  ;;  %v859_v2 = vld [vmem:[#allocation10 + $0x120] sm:$0xff]  ;;  %1142 = vmatprep.subr.mxu0 %v908_v40 }
  0xc2   :  { %522 = vmatmul.mubr.f32.gmra.mxu0 %v7304_v3  ;;  %991 = vmatprep.subr.mxu1 %v862_v23  ;;  %v857_v23 = vld [vmem:[#allocation10 + $0x110] sm:$0xff]  ;;  %v855_v40 = vld [vmem:[#allocation10 + $0x100] sm:$0xff] }
  0xc3   :  { %761 = vmatmul.mubr.f32.gmra.mxu1 %v7306_v53  ;;  %527 = vmatprep.mubr.f32.mxu0 %v7310_v21  ;;  %v858_v53 = vld [vmem:[#allocation10 + $0x118] sm:$0xff] }
  0xc4   :  { %992 = vmatpush2.msra.mxu1 %v861_v17  ;;  %6040 = vmatprep.mubr.msk.f32.mxu1 %vm318_vm0, %v7312_v5  ;;  %v7330_v17 = vld [vmem:[#allocation4 + $0x1c0] sm:$0xff]  ;;  %v7332_v5 = vld [vmem:[#allocation4 + $0x2b0] sm:$0xff] }
  0xc5   :  { %993 = vmatprep.subr.mxu1 %v860_v45  ;;  %9085 = vst [vmem:[#allocation47_spill] sm:$0xff] %v7332_v5  ;;  %v856_v45 = vld [vmem:[#allocation10 + $0x108] sm:$0xff]  ;;  %1143 = vmatpush1.msra.mxu0 %v907_v59  ;;  %v905_v59 = vld [vmem:[#allocation10 + $0x290] sm:$0xff] }
  0xc6   :  { %528 = vmatmul.mubr.f32.gmra.mxu0 %v7317_v1  ;;  %994 = vmatpush2.msra.mxu1 %v859_v2  ;;  %v7340_v2 = vld [vmem:[#allocation9 + $0x78] sm:$0xff] }
  0xc7   :  { %767 = vmatmul.mubr.f32.gmra.mxu1 %v7319_v60  ;;  %533 = vmatprep.mubr.f32.mxu0 %v7323_v47  ;;  %v906_v60 = vld [vmem:[#allocation10 + $0x298] sm:$0xff] }
  0xc8   :  { %6041 = vmatprep.mubr.msk.f32.mxu1 %vm318_vm0, %v7325_v32  ;;  %995 = vmatprep.subr.mxu1 %v858_v53  ;;  %v7346_v53 = vld [vmem:[#allocation9 + $0x70] sm:$0xff]  ;;  %v7363_v32 = vld [vmem:[#allocation9 + $0x60] sm:$0xff] }
  0xc9   :  { %996 = vmatpush2.msra.mxu1 %v857_v23  ;;  %v7348_v23 = vld [vmem:[#allocation4 + $0x208] sm:$0xff]  ;;  %1144 = vmatprep.subr.mxu0 %v906_v60  ;;  %v903_v60 = vld [vmem:[#allocation10 + $0x280] sm:$0xff] }
  0xca   :  { %534 = vmatmul.mubr.f32.gmra.mxu0 %v7330_v17  ;;  %997 = vmatprep.subr.mxu1 %v856_v45  ;;  %v904_v45 = vld [vmem:[#allocation10 + $0x288] sm:$0xff] }
  0xcb   :  { %773 = vmatmul.mubr.f32.gmra.mxu1 %v7332_v5  ;;  %539 = vmatprep.mubr.f32.mxu0 %v7336_v55  ;;  %v7353_v5 = vld [vmem:[#allocation9 + $0x68] sm:$0xff] }
  0xcc   :  { %998 = vmatpush2.msra.mxu1 %v855_v40  ;;  %999 = vmatprep.mubr.f32.mxu1 %v7143_v6  ;;  %v7357_v6 = vld [vmem:[#allocation4 + $0x200] sm:$0xff]  ;;  %v7360_v40 = vld [vmem:[#allocation4 + $0x228] sm:$0xff] }
  0xcd   :  { %1427 = vmatprep.subr.mxu1 %v7340_v2  ;;  %1145 = vmatpush1.msra.mxu0 %v905_v59  ;;  %9086 = vst [vmem:[#allocation48_spill] sm:$0xff] %v7360_v40  ;;  %v901_v59 = vld [vmem:[#allocation10 + $0x270] sm:$0xff] }
  0xce   :  { %540 = vmatmul.mubr.f32.gmra.mxu0 %v7343_v49  ;;  %1146 = vmatprep.subr.mxu0 %v904_v45  ;;  %v7373_v45 = vld [vmem:[#allocation4 + $0x248] sm:$0xff] }
  0xcf   :  { %1000 = vmatmul.mubr.f32.vlgmr.msra.gmra.mxu1 %v7147_v9  ;;  %545 = vmatprep.mubr.f32.mxu0 %v7348_v23  ;;  %v902_v9 = vld [vmem:[#allocation10 + $0x278] sm:$0xff]  ;;  %9088 = vst [vmem:[#allocation50_spill] sm:$0xff] %v7373_v45 }
  0xd0   :  { %1428 = vmatpush1.msra.mxu1 %v7346_v53  ;;  %1005 = vmatprep.mubr.f32.mxu1 %v7151_v13  ;;  %v7371_v13 = vld [vmem:[#allocation4 + $0x220] sm:$0xff] }
  0xd1   :  { %1429 = vmatprep.subr.mxu1 %v7353_v5  ;;  %9087 = vst [vmem:[#allocation49_spill] sm:$0xff] %v7371_v13  ;;  %1147 = vmatpush1.msra.mxu0 %v903_v60  ;;  %v898_v60 = vld [vmem:[#allocation10 + $0x258] sm:$0xff] }
  0xd2   :  { %546 = vmatmul.mubr.f32.gmra.mxu0 %v7357_v6  ;;  %1430 = vmatpush1.msra.mxu1 %v7363_v32 }
  0xd3   :  { %1006 = vmatmul.mubr.f32.gmra.mxu1 %v7161_v18  ;;  %551 = vmatprep.mubr.f32.mxu0 %v7360_v40  ;;  %v899_v18 = vld [vmem:[#allocation10 + $0x260] sm:$0xff]  ;;  %v897_v40 = vld [vmem:[#allocation10 + $0x250] sm:$0xff] }
  0xd4   :  { %1011 = vmatprep.mubr.f32.mxu1 %v7167_v22  ;;  %1148 = vmatprep.subr.mxu0 %v902_v9  ;;  %v7382_v22 = vld [vmem:[#allocation4 + $0x240] sm:$0xff]  ;;  %v7385_v9 = vld [vmem:[#allocation4 + $0x268] sm:$0xff] }
  0xd5   :  { %1431 = vmatprep.subr.mxu1 %v7367_v44  ;;  %1149 = vmatpush1.msra.mxu0 %v901_v59  ;;  %9089 = vst [vmem:[#allocation51_spill] sm:$0xff] %v7385_v9  ;;  %v7390_v59 = vld [vmem:[#allocation9 + $0x48] sm:$0xff] }
  0xd6   :  { %552 = vmatmul.mubr.f32.gmra.mxu0 %v7371_v13  ;;  %1150 = vmatprep.subr.mxu0 %v900_v39  ;;  %v895_v39 = vld [vmem:[#allocation10 + $0x240] sm:$0xff]  ;;  %v7396_v13 = vld [vmem:[#allocation4 + $0x288] sm:$0xff] }
  0xd7   :  { %1012 = vmatmul.mubr.f32.gmra.mxu1 %v7174_v27  ;;  %557 = vmatprep.mubr.f32.mxu0 %v7373_v45  ;;  %v896_v27 = vld [vmem:[#allocation10 + $0x248] sm:$0xff]  ;;  %v893_v45 = vld [vmem:[#allocation10 + $0x230] sm:$0xff] }
  0xd8   :  { %1017 = vmatprep.mubr.f32.mxu1 %v7180_v31  ;;  %1151 = vmatpush1.msra.mxu0 %v899_v18  ;;  %v7394_v31 = vld [vmem:[#allocation4 + $0x260] sm:$0xff]  ;;  %v894_v18 = vld [vmem:[#allocation10 + $0x238] sm:$0xff] }
  0xd9   :  { %1432 = vmatpush1.msra.mxu1 %v7379_v33  ;;  %1152 = vmatprep.subr.mxu0 %v898_v60  ;;  %v891_v60 = vld [vmem:[#allocation10 + $0x220] sm:$0xff] }
  0xda   :  { %558 = vmatmul.mubr.f32.gmra.mxu0 %v7382_v22  ;;  %1433 = vmatprep.subr.mxu1 %v7390_v59 }
  0xdb   :  { %1018 = vmatmul.mubr.f32.gmra.mxu1 %v7187_v38  ;;  %563 = vmatprep.mubr.f32.mxu0 %v7385_v9  ;;  %v892_v38 = vld [vmem:[#allocation10 + $0x228] sm:$0xff] }
  0xdc   :  { %1153 = vmatpush1.msra.mxu0 %v897_v40  ;;  %1023 = vmatprep.mubr.f32.mxu1 %v7193_v41  ;;  %v7402_v41 = vld [vmem:[#allocation4 + $0x280] sm:$0xff]  ;;  %v890_v40 = vld [vmem:[#allocation10 + $0x218] sm:$0xff]  ;;  %v7405_v9 = vld [vmem:[#allocation4 + $0x2a8] sm:$0xff] }
  0xdd   :  { %1154 = vmatprep.subr.mxu0 %v896_v27  ;;  %v889_v27 = vld [vmem:[#allocation10 + $0x210] sm:$0xff] }
  0xde   :  { %1155 = vmatpush1.msra.mxu0 %v895_v39  ;;  %v887_v39 = vld [vmem:[#allocation10 + $0x200] sm:$0xff] }
  0xdf   :  { %1024 = vmatmul.mubr.f32.gmra.mxu1 %v7200_v48  ;;  %564 = vmatmul.mubr.f32.gmra.mxu0 %v7394_v31  ;;  %v888_v48 = vld [vmem:[#allocation10 + $0x208] sm:$0xff] }
  0xe0   :  { %1156 = vmatprep.subr.mxu0 %v894_v18  ;;  %569 = vmatprep.mubr.f32.mxu0 %v7396_v13  ;;  %v922_v18 = vld [vmem:[#allocation10 + $0x318] sm:$0xff] }
  0xe1   :  { %1157 = vmatpush1.msra.mxu0 %v893_v45  ;;  %1029 = vmatprep.mubr.f32.mxu1 %v7206_v51  ;;  %v7410_v45 = vld [vmem:[#allocation4 + $0x2a0] sm:$0xff]  ;;  %v921_v51 = vld [vmem:[#allocation10 + $0x310] sm:$0xff] }
  0xe2   :  { %1158 = vmatprep.subr.mxu0 %v892_v38  ;;  %v920_v38 = vld [vmem:[#allocation10 + $0x308] sm:$0xff] }
  0xe3   :  { %1159 = vmatpush1.msra.mxu0 %v891_v60  ;;  %1030 = vmatmul.mubr.f32.gmra.mxu1 %v7213_v58  ;;  %v919_v58 = vld [vmem:[#allocation10 + $0x300] sm:$0xff] }
  0xe4   :  { %570 = vmatmul.mubr.f32.gmra.mxu0 %v7402_v41  ;;  %1160 = vmatprep.subr.mxu0 %v890_v40  ;;  %v7418_v60 = vld [vmem:[#allocation9 + $0x40] sm:$0xff] }
  0xe5   :  { %1161 = vmatpush1.msra.mxu0 %v889_v27  ;;  %575 = vmatprep.mubr.f32.mxu0 %v7405_v9 }
  0xe6   :  { %1162 = vmatprep.subr.mxu0 %v888_v48  ;;  %1035 = vmatprep.mubr.f32.mxu1 %v7219_v62  ;;  %v7421_v62 = vld [vmem:[#allocation9 + $0x38] sm:$0xff] }
  0xe7   :  { %1163 = vmatpush1.msra.mxu0 %v887_v39  ;;  %1036 = vmatmul.mubr.f32.gmra.mxu1 %v7226_v4  ;;  %v7429_v4 = vld [vmem:[#allocation9 + $0x30] sm:$0xff] }
  0xe8   :  { %576 = vmatmul.mubr.f32.gmra.mxu0 %v7410_v45  ;;  %1192 = vmatprep.subr.mxu0 %v922_v18 }
  0xe9   :  { %1193 = vmatpush2.msra.mxu0 %v921_v51  ;;  %1041 = vmatprep.mubr.f32.mxu1 %v7232_v14  ;;  %v9106_v14 = vld [vmem:[#allocation36_spill] sm:$0xff] }
  0xea   :  { %1194 = vmatprep.subr.mxu0 %v920_v38  ;;  %6042 = vmatprep.mubr.msk.f32.mxu0 %vm318_vm0, %v7094_v8  ;;  %v7433_v8 = vld [vmem:[#allocation9 + $0x28] sm:$0xff] }
  0xeb   :  { %1195 = vmatpush2.msra.mxu0 %v919_v58  ;;  %1042 = vmatmul.mubr.f32.gmra.mxu1 %v7239_v30  ;;  %v9108_v30 = vld [vmem:[#allocation38_spill] sm:$0xff] }
  0xec   :  { %1197 = vmatmul.mubr.f32.vlgmr.msra.gmra.mxu0 %v7096_v10  ;;  %1047 = vmatprep.mubr.f32.mxu1 %v7245_v36  ;;  %v7442_v10 = vld [vmem:[#allocation9 + $0x20] sm:$0xff]  ;;  %v9110_v36 = vld [vmem:[#allocation40_spill] sm:$0xff] }
  0xed   :  { %6043 = vmatprep.mubr.msk.f32.mxu0 %vm318_vm0, %v7100_v15  ;;  %1434 = vmatpush1.msra.mxu1 %v7418_v60  ;;  %v7446_v15 = vld [vmem:[#allocation9 + $0x18] sm:$0xff] }
  0xee   :  { %1435 = vmatprep.subr.mxu1 %v7421_v62  ;;  %1631 = vmatprep.subr.mxu0 %v7340_v2 }
  0xef   :  { %1048 = vmatmul.mubr.f32.gmra.mxu1 %v7252_v50  ;;  %1632 = vmatpush1.msra.mxu0 %v7346_v53 }
  0xf0   :  { %1203 = vmatmul.mubr.f32.gmra.mxu0 %v7103_v19  ;;  %1053 = vmatprep.mubr.f32.mxu1 %v7258_v57  ;;  %v7455_v19 = vld [vmem:[#allocation9 + $0x10] sm:$0xff] }
  0xf1   :  { %6044 = vmatprep.mubr.msk.f32.mxu0 %vm318_vm0, %v7108_v25  ;;  %1436 = vmatpush1.msra.mxu1 %v7429_v4  ;;  %v7459_v25 = vld [vmem:[#allocation9 + $0x8] sm:$0xff]  ;;  %v9113_v57 = vld [vmem:[#allocation43_spill] sm:$0xff] }
  0xf2   :  { %1437 = vmatprep.subr.mxu1 %v7433_v8  ;;  %1633 = vmatprep.subr.mxu0 %v7353_v5 }
  0xf3   :  { %1054 = vmatmul.mubr.f32.gmra.mxu1 %v7265_v12  ;;  %1634 = vmatpush1.msra.mxu0 %v7363_v32  ;;  %v9114_v12 = vld [vmem:[#allocation44_spill] sm:$0xff] }
  0xf4   :  { %1209 = vmatmul.mubr.f32.gmra.mxu0 %v7110_v28  ;;  %1059 = vmatprep.mubr.f32.mxu1 %v7271_v26  ;;  %v7468_v28 = vld [vmem:[#allocation9] sm:$0xff] }
  0xf5   :  { %6045 = vmatprep.mubr.msk.f32.mxu0 %vm318_vm0, %v7115_v34  ;;  %1438 = vmatpush1.msra.mxu1 %v7442_v10  ;;  %v9090_v34 = vld [vmem:[#allocation48_spill] sm:$0xff] }
  0xf6   :  { %1439 = vmatprep.subr.mxu1 %v7446_v15  ;;  %1635 = vmatprep.subr.mxu0 %v7367_v44 }
  0xf7   :  { %1060 = vmatmul.mubr.f32.gmra.mxu1 %v7278_v56  ;;  %1636 = vmatpush1.msra.mxu0 %v7379_v33  ;;  %v9115_v56 = vld [vmem:[#allocation45_spill] sm:$0xff] }
  0xf8   :  { %1215 = vmatmul.mubr.f32.gmra.mxu0 %v7117_v37  ;;  %1065 = vmatprep.mubr.f32.mxu1 %v7284_v63  ;;  %v9091_v37 = vld [vmem:[#allocation24_spill] sm:$0xff] }
  0xf9   :  { %6046 = vmatprep.mubr.msk.f32.mxu0 %vm318_vm0, %v7122_v43  ;;  %1440 = vmatpush1.msra.mxu1 %v7455_v19  ;;  %v9092_v43 = vld [vmem:[#allocation49_spill] sm:$0xff] }
  0xfa   :  { %1441 = vmatprep.subr.mxu1 %v7459_v25  ;;  %1637 = vmatprep.subr.mxu0 %v7390_v59 }
  0xfb   :  { %1066 = vmatmul.mubr.f32.gmra.mxu1 %v7291_v35  ;;  %1638 = vmatpush1.msra.mxu0 %v7418_v60  ;;  %v9116_v35 = vld [vmem:[#allocation46_spill] sm:$0xff] }
  0xfc   :  { %1221 = vmatmul.mubr.f32.gmra.mxu0 %v7124_v46  ;;  %1071 = vmatprep.mubr.f32.mxu1 %v7297_v42  ;;  %v9093_v46 = vld [vmem:[#allocation25_spill] sm:$0xff]  ;;  %v9112_v42 = vld [vmem:[#allocation42_spill] sm:$0xff] }
  0xfd   :  { %6047 = vmatprep.mubr.msk.f32.mxu0 %vm318_vm0, %v7129_v52  ;;  %1442 = vmatpush1.msra.mxu1 %v7468_v28  ;;  %v9094_v52 = vld [vmem:[#allocation50_spill] sm:$0xff] }
  0xfe   :  { %1529 = vmatprep.subr.mxu1 %v7340_v2  ;;  %1639 = vmatprep.subr.mxu0 %v7421_v62 }
  0xff   :  { %1072 = vmatmul.mubr.f32.gmra.mxu1 %v7304_v3  ;;  %1640 = vmatpush1.msra.mxu0 %v7429_v4 }
 0x100   :  { %1227 = vmatmul.mubr.f32.gmra.mxu0 %v7131_v54  ;;  %1077 = vmatprep.mubr.f32.mxu1 %v7310_v21  ;;  %v9095_v54 = vld [vmem:[#allocation26_spill] sm:$0xff]  ;;  %v9107_v21 = vld [vmem:[#allocation37_spill] sm:$0xff] }
 0x101   :  { %6048 = vmatprep.mubr.msk.f32.mxu0 %vm318_vm0, %v7136_v61  ;;  %1641 = vmatprep.subr.mxu0 %v7433_v8  ;;  %v9096_v61 = vld [vmem:[#allocation27_spill] sm:$0xff] }
 0x102   :  { %1642 = vmatpush1.msra.mxu0 %v7442_v10 }
 0x103   :  { %1078 = vmatmul.mubr.f32.gmra.mxu1 %v7317_v1  ;;  %1643 = vmatprep.subr.mxu0 %v7446_v15  ;;  %v9105_v1 = vld [vmem:[#allocation35_spill] sm:$0xff] }
 0x104   :  { %1233 = vmatmul.mubr.f32.gmra.mxu0 %v7138_v0  ;;  %1083 = vmatprep.mubr.f32.mxu1 %v7323_v47  ;;  %v9097_v0 = vld [vmem:[#allocation51_spill] sm:$0xff] }
 0x105   :  { %6049 = vmatprep.mubr.msk.f32.mxu0 %vm318_vm0, %v7145_v7  ;;  %1644 = vmatpush1.msra.mxu0 %v7455_v19  ;;  %v9098_v7 = vld [vmem:[#allocation28_spill] sm:$0xff] }
 0x106   :  { %1645 = vmatprep.subr.mxu0 %v7459_v25 }
 0x107   :  { %1084 = vmatmul.mubr.f32.gmra.mxu1 %v7330_v17  ;;  %1646 = vmatpush1.msra.mxu0 %v7468_v28 }
 0x108   :  { %1239 = vmatmul.mubr.f32.gmra.mxu0 %v7149_v11  ;;  %1089 = vmatprep.mubr.f32.mxu1 %v7336_v55  ;;  %v9099_v11 = vld [vmem:[#allocation29_spill] sm:$0xff]  ;;  %v9104_v55 = vld [vmem:[#allocation34_spill] sm:$0xff] }
 0x109   :  { %6050 = vmatprep.mubr.msk.f32.mxu0 %vm318_vm0, %v7156_v16  ;;  %1835 = vmatprep.subr.mxu0 %v7340_v2  ;;  %v9100_v16 = vld [vmem:[#allocation30_spill] sm:$0xff] }
 0x10b   :  { %1090 = vmatmul.mubr.f32.gmra.mxu1 %v7343_v49  ;;  %v9058_v49 = vmov 0.0  }
 0x10c   :  { %1245 = vmatmul.mubr.f32.gmra.mxu0 %v7163_v20  ;;  %1095 = vmatprep.mubr.f32.mxu1 %v7348_v23  ;;  %v9101_v20 = vld [vmem:[#allocation31_spill] sm:$0xff] }
 0x10d   :  { %6051 = vmatprep.mubr.msk.f32.mxu0 %vm318_vm0, %v7169_v24  ;;  %v9102_v24 = vld [vmem:[#allocation32_spill] sm:$0xff] }
 0x10f   :  { %1096 = vmatmul.mubr.f32.gmra.mxu1 %v7357_v6 }
 0x110   :  { %1251 = vmatmul.mubr.f32.gmra.mxu0 %v7176_v29  ;;  %1101 = vmatprep.mubr.f32.mxu1 %v9090_v34  ;;  %v9103_v29 = vld [vmem:[#allocation33_spill] sm:$0xff] }
 0x111   :  { %6052 = vmatprep.mubr.msk.f32.mxu0 %vm318_vm0, %v9091_v37 }
 0x113   :  { %1102 = vmatmul.mubr.f32.gmra.mxu1 %v9092_v43 }
 0x114   :  { %1257 = vmatmul.mubr.f32.gmra.mxu0 %v9093_v46  ;;  %1107 = vmatprep.mubr.f32.mxu1 %v9094_v52 }
 0x115   :  { %6053 = vmatprep.mubr.msk.f32.mxu0 %vm318_vm0, %v9095_v54 }
 0x117   :  { %1108 = vmatmul.mubr.f32.gmra.mxu1 %v7382_v22  ;;  %v308_v22 = vlaneseq }
 0x118   :  { %1263 = vmatmul.mubr.f32.gmra.mxu0 %v9096_v61  ;;  %1113 = vmatprep.mubr.f32.mxu1 %v9097_v0 }
 0x119   :  { %6054 = vmatprep.mubr.msk.f32.mxu0 %vm318_vm0, %v9098_v7 }
 0x11b   :  { %1114 = vmatmul.mubr.f32.gmra.mxu1 %v7394_v31  ;;  %v7594_v31 = vshrl.u32 %v308_v22, 7 }
 0x11c   :  { %1269 = vmatmul.mubr.f32.gmra.mxu0 %v9099_v11  ;;  %1119 = vmatprep.mubr.f32.mxu1 %v7396_v13 }
 0x11d   :  { %6055 = vmatprep.mubr.msk.f32.mxu0 %vm318_vm0, %v9100_v16  ;;  %v9060_v39 = vsub.s32 0, %v7594_v31 }
 0x11f   :  { %1120 = vmatmul.mubr.f32.gmra.mxu1 %v7402_v41 }
 0x120   :  { %1275 = vmatmul.mubr.f32.gmra.mxu0 %v9101_v20  ;;  %1125 = vmatprep.mubr.f32.mxu1 %v7405_v9 }
 0x121   :  { %6056 = vmatprep.mubr.msk.f32.mxu0 %vm318_vm0, %v9102_v24 }
 0x123   :  { %1126 = vmatmul.mubr.f32.gmra.mxu1 %v7410_v45  ;;  %v7606_v45 = vld [vmem:[%s9022_s3] sm:$0x3] }
 0x124   :  { %1281 = vmatmul.mubr.f32.gmra.mxu0 %v9103_v29  ;;  %1475 = vmatprep.mubr.f32.mxu1 %v9058_v49  ;;  %v7617_v34 = vrot.slane %v7606_v45, %v9060_v39 }
 0x125   :  { %6057 = vmatprep.mubr.msk.f32.mxu0 %vm318_vm0, %v9104_v55 }
 0x127   :  { %1476 = vmatmul.mubr.f32.vlgmr.msra.gmra.mxu1 %v9058_v49 }
 0x128   :  { %1287 = vmatmul.mubr.f32.gmra.mxu0 %v9105_v1  ;;  %1530 = vmatpush1.msra.mxu1 %v7346_v53 }
 0x129   :  { %6058 = vmatprep.mubr.msk.f32.mxu0 %vm318_vm0, %v9106_v14  ;;  %1531 = vmatprep.subr.mxu1 %v7353_v5  ;;  %v9109_v5 = vld [vmem:[#allocation39_spill] sm:$0xff] }
 0x12a   :  { %1532 = vmatpush1.msra.mxu1 %v7363_v32  ;;  %1577 = vmatprep.mubr.f32.mxu1 %v9058_v49  ;;  %v9117_v32 = vld [vmem:[#allocation47_spill] sm:$0xff] }
 0x12b   :  { %1533 = vmatprep.subr.mxu1 %v7367_v44 }
 0x12c   :  { %1293 = vmatmul.mubr.f32.gmra.mxu0 %v9107_v21  ;;  %1534 = vmatpush1.msra.mxu1 %v7379_v33  ;;  %v9111_v33 = vld [vmem:[#allocation41_spill] sm:$0xff] }
 0x12d   :  { %6059 = vmatprep.mubr.msk.f32.mxu0 %vm318_vm0, %v9108_v30  ;;  %1535 = vmatprep.subr.mxu1 %v7390_v59 }
 0x12e   :  { %1536 = vmatpush1.msra.mxu1 %v7418_v60 }
 0x12f   :  { %1537 = vmatprep.subr.mxu1 %v7421_v62 }
 0x130   :  { %1299 = vmatmul.mubr.f32.gmra.mxu0 %v9109_v5  ;;  %1538 = vmatpush1.msra.mxu1 %v7429_v4 }
 0x131   :  { %6060 = vmatprep.mubr.msk.f32.mxu0 %vm318_vm0, %v9110_v36  ;;  %1539 = vmatprep.subr.mxu1 %v7433_v8 }
 0x132   :  { %1540 = vmatpush1.msra.mxu1 %v7442_v10 }
 0x133   :  { %1541 = vmatprep.subr.mxu1 %v7446_v15  ;;  %v7562_v44 = vpop.f32.mrf.mxu1 }
 0x134   :  { %1305 = vmatmul.mubr.f32.gmra.mxu0 %v9111_v33  ;;  %1542 = vmatpush1.msra.mxu1 %v7455_v19 }
 0x135   :  { %6061 = vmatprep.mubr.msk.f32.mxu0 %vm318_vm0, %v9112_v42  ;;  %1543 = vmatprep.subr.mxu1 %v7459_v25  ;;  %v7568_v50 = vpop.f32.mrf.mxu1 }
 0x136   :  { %1544 = vmatpush1.msra.mxu1 %v7468_v28 }
 0x137   :  { %1733 = vmatprep.subr.mxu1 %v7340_v2 }
 0x138   :  { %1311 = vmatmul.mubr.f32.gmra.mxu0 %v9113_v57  ;;  %v7573_v63 = vpop.f32.mrf.mxu1 }
 0x139   :  { %6062 = vmatprep.mubr.msk.f32.mxu0 %vm318_vm0, %v9114_v12 }
 0x13a   :  { %v7577_v26 = vpop.f32.mrf.mxu1 }
 0x13c   :  { %1317 = vmatmul.mubr.f32.gmra.mxu0 %v9115_v56  ;;  %v660_v47 = vpop.f32.mrf.mxu1 }
 0x13d   :  { %6063 = vmatprep.mubr.msk.f32.mxu0 %vm318_vm0, %v9116_v35 }
 0x13e   :  { %v7582_v3 = vpop.f32.mrf.mxu1 }
 0x140   :  { %1323 = vmatmul.mubr.f32.gmra.mxu0 %v9117_v32 }
 0x141   :  { %v666_v17 = vpop.f32.mrf.mxu1  ;;  %1679 = vmatprep.mubr.f32.mxu0 %v9058_v49 }
 0x143   :  { %v7586_v2 = vpop.f32.mrf.mxu1 }
 0x145   :  { %v672_v53 = vpop.f32.mrf.mxu1 }
 0x147   :  { %v7588_v23 = vpop.f32.mrf.mxu1 }
 0x149   :  { %v678_v6 = vpop.f32.mrf.mxu1 }
 0x14b   :  { %v7590_v13 = vpop.f32.mrf.mxu1 }
 0x14e   :  { %v684_v9 = vpop.f32.mrf.mxu1 }
 0x150   :  { %v7592_v59 = vpop.f32.mrf.mxu1 }
 0x151   :  { %9118 = vst [vmem:[#allocation48_spill] sm:$0xff] %v7592_v59 }
 0x152   :  { %v7596_v41 = vpop.f32.mrf.mxu0 }
 0x153   :  { %v690_v40 = vpop.f32.mrf.mxu1 }
 0x154   :  { %v7598_v27 = vpop.f32.mrf.mxu0 }
 0x155   :  { %v7600_v48 = vpop.f32.mrf.mxu1 }
 0x156   :  { %9119 = vst [vmem:[#allocation24_spill] sm:$0xff] %v7600_v48  ;;  %v7608_v18 = vpop.f32.mrf.mxu0 }
 0x157   :  { %v696_v51 = vpop.f32.mrf.mxu1 }
 0x158   :  { %v7610_v38 = vpop.f32.mrf.mxu0 }
 0x159   :  { %v7612_v58 = vpop.f32.mrf.mxu1 }
 0x15a   :  { %9120 = vst [vmem:[#allocation49_spill] sm:$0xff] %v7612_v58  ;;  %v463_v37 = vpop.f32.mrf.mxu0  ;;  %v9061_v58 = vsub.s32 1, %v7594_v31 }
 0x15b   :  { %v702_v43 = vpop.f32.mrf.mxu1  ;;  %v464_v46 = vadd.f32 %v463_v37, %v7617_v34 }
 0x15c   :  { %v7620_v52 = vpop.f32.mrf.mxu0 }
 0x15d   :  { %v7622_v54 = vpop.f32.mrf.mxu1  ;;  %v7624_v61 = vadd.f32 %v660_v47, %v464_v46 }
 0x15e   :  { %9121 = vst [vmem:[#allocation25_spill] sm:$0xff] %v7622_v54  ;;  %v469_v0 = vpop.f32.mrf.mxu0 }
 0x15f   :  { %v708_v7 = vpop.f32.mrf.mxu1  ;;  %v470_v11 = vadd.f32 %v469_v0, %v7617_v34 }
 0x160   :  { %v7627_v16 = vpop.f32.mrf.mxu0 }
 0x161   :  { %v7629_v20 = vpop.f32.mrf.mxu1  ;;  %v7631_v24 = vadd.f32 %v666_v17, %v470_v11 }
 0x162   :  { %9122 = vst [vmem:[#allocation50_spill] sm:$0xff] %v7629_v20  ;;  %v475_v29 = vpop.f32.mrf.mxu0 }
 0x163   :  { %v714_v55 = vpop.f32.mrf.mxu1  ;;  %v476_v1 = vadd.f32 %v475_v29, %v7617_v34 }
 0x164   :  { %v7634_v14 = vpop.f32.mrf.mxu0 }
 0x165   :  { %v716_v21 = vpop.f32.mrf.mxu1  ;;  %v7636_v30 = vadd.f32 %v672_v53, %v476_v1 }
 0x166   :  { %v481_v5 = vpop.f32.mrf.mxu0 }
 0x167   :  { %v720_v36 = vpop.f32.mrf.mxu1  ;;  %v482_v33 = vadd.f32 %v481_v5, %v7617_v34 }
 0x168   :  { %v7639_v42 = vpop.f32.mrf.mxu0 }
 0x169   :  { %v722_v57 = vpop.f32.mrf.mxu1  ;;  %v7641_v12 = vadd.f32 %v678_v6, %v482_v33 }
 0x16a   :  { %v487_v56 = vpop.f32.mrf.mxu0 }
 0x16b   :  { %v726_v35 = vpop.f32.mrf.mxu1  ;;  %v488_v47 = vadd.f32 %v487_v56, %v7617_v34 }
 0x16c   :  { %v7644_v32 = vpop.f32.mrf.mxu0 }
 0x16d   :  { %9123 = vst [vmem:[#allocation26_spill] sm:$0xff] %v7644_v32  ;;  %v728_v17 = vpop.f32.mrf.mxu1  ;;  %v7646_v22 = vadd.f32 %v684_v9, %v488_v47 }
 0x16e   :  { %v493_v53 = vpop.f32.mrf.mxu0 }
 0x16f   :  { %9124 = vst [vmem:[#allocation27_spill] sm:$0xff] %v7646_v22  ;;  %v732_v37 = vpop.f32.mrf.mxu1  ;;  %v494_v46 = vadd.f32 %v493_v53, %v7617_v34 }
 0x170   :  { %v7649_v0 = vpop.f32.mrf.mxu0 }
 0x171   :  { %9125 = vst [vmem:[#allocation51_spill] sm:$0xff] %v7649_v0  ;;  %v734_v11 = vpop.f32.mrf.mxu1  ;;  %v7651_v29 = vadd.f32 %v690_v40, %v494_v46 }
 0x172   :  { %v499_v6 = vpop.f32.mrf.mxu0 }
 0x173   :  { %9126 = vst [vmem:[#allocation28_spill] sm:$0xff] %v7651_v29  ;;  %v738_v1 = vpop.f32.mrf.mxu1  ;;  %v500_v5 = vadd.f32 %v499_v6, %v7617_v34 }
 0x174   :  { %v7654_v33 = vpop.f32.mrf.mxu0 }
 0x175   :  { %9127 = vst [vmem:[#allocation29_spill] sm:$0xff] %v7654_v33  ;;  %v740_v56 = vpop.f32.mrf.mxu1  ;;  %v7656_v49 = vadd.f32 %v696_v51, %v500_v5 }
 0x176   :  { %v505_v9 = vpop.f32.mrf.mxu0 }
 0x177   :  { %9128 = vst [vmem:[#allocation30_spill] sm:$0xff] %v7656_v49  ;;  %v744_v47 = vpop.f32.mrf.mxu1  ;;  %v506_v39 = vadd.f32 %v505_v9, %v7617_v34  ;;  %v7672_v9 = vrot.slane %v7606_v45, %v9061_v58 }
 0x178   :  { %v7659_v20 = vpop.f32.mrf.mxu0 }
 0x179   :  { %9129 = vst [vmem:[#allocation31_spill] sm:$0xff] %v7659_v20  ;;  %v746_v53 = vpop.f32.mrf.mxu1  ;;  %v7661_v54 = vadd.f32 %v702_v43, %v506_v39 }
 0x17a   :  { %v511_v40 = vpop.f32.mrf.mxu0 }
 0x17b   :  { %9130 = vst [vmem:[#allocation32_spill] sm:$0xff] %v7661_v54  ;;  %v750_v46 = vpop.f32.mrf.mxu1  ;;  %v512_v6 = vadd.f32 %v511_v40, %v7617_v34 }
 0x17c   :  { %v7665_v48 = vpop.f32.mrf.mxu0 }
 0x17d   :  { %9131 = vst [vmem:[#allocation33_spill] sm:$0xff] %v7665_v48  ;;  %v752_v33 = vpop.f32.mrf.mxu1  ;;  %v7667_v51 = vadd.f32 %v708_v7, %v512_v6 }
 0x17e   :  { %v517_v5 = vpop.f32.mrf.mxu0 }
 0x17f   :  { %9132 = vst [vmem:[#allocation34_spill] sm:$0xff] %v7667_v51  ;;  %v756_v49 = vpop.f32.mrf.mxu1  ;;  %v518_v39 = vadd.f32 %v517_v5, %v7617_v34 }
 0x180   :  { %v519_v43 = vpop.f32.mrf.mxu0 }
 0x181   :  { %v758_v20 = vpop.f32.mrf.mxu1  ;;  %v520_v54 = vadd.f32 %v519_v43, %v7672_v9  ;;  %v7676_v0 = vadd.f32 %v714_v55, %v518_v39 }
 0x182   :  { %v523_v40 = vpop.f32.mrf.mxu0 }
 0x183   :  { %9133 = vst [vmem:[#allocation35_spill] sm:$0xff] %v7676_v0  ;;  %v7678_v48 = vpop.f32.mrf.mxu1  ;;  %v524_v7 = vadd.f32 %v523_v40, %v7617_v34  ;;  %v7681_v6 = vadd.f32 %v716_v21, %v520_v54 }
 0x184   :  { %v525_v51 = vpop.f32.mrf.mxu0 }
 0x185   :  { %9134 = vst [vmem:[#allocation36_spill] sm:$0xff] %v7681_v6  ;;  %v7683_v29 = vpop.f32.mrf.mxu1  ;;  %v526_v45 = vadd.f32 %v525_v51, %v7672_v9  ;;  %v7686_v58 = vadd.f32 %v720_v36, %v524_v7 }
 0x186   :  { %v529_v5 = vpop.f32.mrf.mxu0 }
 0x187   :  { %9135 = vst [vmem:[#allocation37_spill] sm:$0xff] %v7686_v58  ;;  %v7688_v59 = vpop.f32.mrf.mxu1  ;;  %v530_v55 = vadd.f32 %v529_v5, %v7617_v34  ;;  %v7691_v39 = vadd.f32 %v722_v57, %v526_v45 }
 0x188   :  { %v531_v43 = vpop.f32.mrf.mxu0 }
 0x189   :  { %9136 = vst [vmem:[#allocation38_spill] sm:$0xff] %v7691_v39  ;;  %v7693_v0 = vpop.f32.mrf.mxu1  ;;  %v532_v54 = vadd.f32 %v531_v43, %v7672_v9  ;;  %v7696_v21 = vadd.f32 %v726_v35, %v530_v55 }
 0x18a   :  { %v535_v40 = vpop.f32.mrf.mxu0 }
 0x18b   :  { %9137 = vst [vmem:[#allocation39_spill] sm:$0xff] %v7696_v21  ;;  %v7698_v6 = vpop.f32.mrf.mxu1  ;;  %v536_v36 = vadd.f32 %v535_v40, %v7617_v34  ;;  %v7701_v51 = vadd.f32 %v728_v17, %v532_v54 }
 0x18c   :  { %v537_v7 = vpop.f32.mrf.mxu0 }
 0x18d   :  { %9138 = vst [vmem:[#allocation40_spill] sm:$0xff] %v7701_v51  ;;  %v7703_v58 = vpop.f32.mrf.mxu1  ;;  %v538_v57 = vadd.f32 %v537_v7, %v7672_v9  ;;  %v7706_v45 = vadd.f32 %v732_v37, %v536_v36 }
 0x18e   :  { %v541_v5 = vpop.f32.mrf.mxu0 }
 0x18f   :  { %9139 = vst [vmem:[#allocation41_spill] sm:$0xff] %v7706_v45  ;;  %v1001_v39 = vpop.f32.mrf.mxu1  ;;  %v542_v43 = vadd.f32 %v541_v5, %v7617_v34  ;;  %v7709_v35 = vadd.f32 %v734_v11, %v538_v57 }
 0x190   :  { %v543_v55 = vpop.f32.mrf.mxu0 }
 0x191   :  { %9140 = vst [vmem:[#allocation42_spill] sm:$0xff] %v7709_v35  ;;  %v1003_v21 = vpop.f32.mrf.mxu1  ;;  %v544_v32 = vadd.f32 %v543_v55, %v7672_v9  ;;  %v7712_v40 = vadd.f32 %v738_v1, %v542_v43 }
 0x192   :  { %v547_v17 = vpop.f32.mrf.mxu0 }
 0x193   :  { %9141 = vst [vmem:[#allocation43_spill] sm:$0xff] %v7712_v40  ;;  %v1007_v54 = vpop.f32.mrf.mxu1  ;;  %v548_v51 = vadd.f32 %v547_v17, %v7617_v34  ;;  %v7715_v22 = vadd.f32 %v740_v56, %v544_v32 }
 0x194   :  { %v549_v37 = vpop.f32.mrf.mxu0 }
 0x195   :  { %9142 = vst [vmem:[#allocation44_spill] sm:$0xff] %v7715_v22  ;;  %v1009_v36 = vpop.f32.mrf.mxu1  ;;  %v550_v7 = vadd.f32 %v549_v37, %v7672_v9  ;;  %v7718_v45 = vadd.f32 %v744_v47, %v548_v51 }
 0x196   :  { %v553_v11 = vpop.f32.mrf.mxu0 }
 0x197   :  { %9143 = vst [vmem:[#allocation45_spill] sm:$0xff] %v7718_v45  ;;  %v1013_v57 = vpop.f32.mrf.mxu1  ;;  %v554_v5 = vadd.f32 %v553_v11, %v7617_v34  ;;  %v7721_v35 = vadd.f32 %v746_v53, %v550_v7 }
 0x198   :  { %v555_v1 = vpop.f32.mrf.mxu0 }
 0x199   :  { %9144 = vst [vmem:[#allocation46_spill] sm:$0xff] %v7721_v35  ;;  %v1015_v43 = vpop.f32.mrf.mxu1  ;;  %v556_v55 = vadd.f32 %v555_v1, %v7672_v9  ;;  %v7724_v40 = vadd.f32 %v750_v46, %v554_v5 }
 0x19a   :  { %v559_v32 = vpop.f32.mrf.mxu0 }
 0x19b   :  { %9145 = vst [vmem:[#allocation47_spill] sm:$0xff] %v7724_v40  ;;  %v1019_v56 = vpop.f32.mrf.mxu1  ;;  %v560_v17 = vadd.f32 %v559_v32, %v7617_v34  ;;  %v7727_v22 = vadd.f32 %v752_v33, %v556_v55  ;;  %v923_v55 = vld [vmem:[%s9025_s6] sm:$0x3]  ;;  %s7002_s6 = smov 64  }
 0x19c   :  { %v561_v47 = vpop.f32.mrf.mxu0 }
 0x19d   :  { %9146 = vst [vmem:[#allocation52_spill] sm:$0xff] %v7727_v22  ;;  %v1021_v51 = vpop.f32.mrf.mxu1  ;;  %v562_v37 = vadd.f32 %v561_v47, %v7672_v9  ;;  %v7730_v45 = vadd.f32 %v756_v49, %v560_v17 }
 0x19f   :  { %9147 = vst [vmem:[#allocation53_spill] sm:$0xff] %v7730_v45  ;;  %v1025_v53 = vpop.f32.mrf.mxu1  ;;  %v565_v7 = vpop.f32.mrf.mxu0  ;;  %v7732_v11 = vadd.f32 %v758_v20, %v562_v37  ;;  %v9151_v37 = vsub.s32 0, %v7594_v31 }
 0x1a0   :  { %v566_v1 = vadd.f32 %v565_v7, %v7617_v34 }
 0x1a1   :  { %9148 = vst [vmem:[#allocation54_spill] sm:$0xff] %v7732_v11  ;;  %v1027_v46 = vpop.f32.mrf.mxu1  ;;  %v567_v5 = vpop.f32.mrf.mxu0  ;;  %v7748_v7 = vrot.slane %v923_v55, %v9151_v37  ;;  %v9153_v11 = vsub.s32 1, %v7594_v31 }
 0x1a2   :  { %v568_v40 = vadd.f32 %v567_v5, %v7672_v9  ;;  %v7737_v33 = vadd.f32 %v7678_v48, %v566_v1 }
 0x1a3   :  { %v1031_v35 = vpop.f32.mrf.mxu1  ;;  %v7756_v45 = vrot.slane %v923_v55, %v9153_v11  ;;  %v1002_v37 = vadd.f32 %v1001_v39, %v7748_v7 }
 0x1a4   :  { %9149 = vst [vmem:[#allocation55_spill] sm:$0xff] %v7737_v33  ;;  %v571_v49 = vpop.f32.mrf.mxu0  ;;  %v7744_v20 = vadd.f32 %v7683_v29, %v568_v40 }
 0x1a5   :  { %v572_v32 = vadd.f32 %v571_v49, %v7617_v34  ;;  %v1033_v17 = vpop.f32.mrf.mxu1  ;;  %v1004_v31 = vadd.f32 %v1003_v21, %v7756_v45  ;;  %v1014_v21 = vadd.f32 %v1013_v57, %v7748_v7 }
 0x1a6   :  { %9150 = vst [vmem:[#allocation56_spill] sm:$0xff] %v7744_v20  ;;  %v573_v47 = vpop.f32.mrf.mxu0 }
 0x1a7   :  { %v574_v5 = vadd.f32 %v573_v47, %v7672_v9  ;;  %v1037_v48 = vpop.f32.mrf.mxu1  ;;  %v7752_v1 = vadd.f32 %v7688_v59, %v572_v32 }
 0x1a8   :  { %v577_v33 = vpop.f32.mrf.mxu0 }
 0x1a9   :  { %9152 = vst [vmem:[#allocation57_spill] sm:$0xff] %v7752_v1  ;;  %v578_v49 = vadd.f32 %v577_v33, %v7617_v34  ;;  %v1039_v29 = vpop.f32.mrf.mxu1  ;;  %v7760_v40 = vadd.f32 %v7693_v0, %v574_v5  ;;  %v1008_v5 = vadd.f32 %v1007_v54, %v7748_v7  ;;  %v1010_v1 = vadd.f32 %v1009_v36, %v7756_v45 }
 0x1aa   :  { %v579_v20 = vpop.f32.mrf.mxu0 }
 0x1ab   :  { %9154 = vst [vmem:[#allocation58_spill] sm:$0xff] %v7760_v40  ;;  %v580_v47 = vadd.f32 %v579_v20, %v7672_v9  ;;  %v1043_v22 = vpop.f32.mrf.mxu1  ;;  %v7765_v59 = vadd.f32 %v7698_v6, %v578_v49 }
 0x1ac   :  { %v1198_v32 = vpop.f32.mrf.mxu0 }
 0x1ad   :  { %9155 = vst [vmem:[#allocation59_spill] sm:$0xff] %v7765_v59  ;;  %v7768_v11 = vadd.f32 %v1198_v32, %v1002_v37  ;;  %v1045_v55 = vpop.f32.mrf.mxu1  ;;  %v7771_v33 = vadd.f32 %v7703_v58, %v580_v47  ;;  %v1016_v47 = vadd.f32 %v1015_v43, %v7756_v45 }
 0x1ae   :  { %v1200_v0 = vpop.f32.mrf.mxu0 }
 0x1af   :  { %9156 = vst [vmem:[#allocation60_spill] sm:$0xff] %v7768_v11  ;;  %v7774_v40 = vadd.f32 %v1200_v0, %v1004_v31  ;;  %v1049_v39 = vpop.f32.mrf.mxu1  ;;  %v1020_v0 = vadd.f32 %v1019_v56, %v7748_v7 }
 0x1b0   :  { %v1204_v20 = vpop.f32.mrf.mxu0 }
 0x1b1   :  { %9157 = vst [vmem:[#allocation61_spill] sm:$0xff] %v7774_v40  ;;  %v7777_v6 = vadd.f32 %v1204_v20, %v1008_v5  ;;  %v1051_v49 = vpop.f32.mrf.mxu1  ;;  %v1022_v20 = vadd.f32 %v1021_v51, %v7756_v45 }
 0x1b2   :  { %v1206_v59 = vpop.f32.mrf.mxu0 }
 0x1b3   :  { %9158 = vst [vmem:[#allocation62_spill] sm:$0xff] %v7777_v6  ;;  %v7780_v37 = vadd.f32 %v1206_v59, %v1010_v1  ;;  %v1055_v32 = vpop.f32.mrf.mxu1  ;;  %v1026_v59 = vadd.f32 %v1025_v53, %v7748_v7 }
 0x1b4   :  { %v1210_v58 = vpop.f32.mrf.mxu0 }
 0x1b5   :  { %9159 = vst [vmem:[#allocation63_spill] sm:$0xff] %v7780_v37  ;;  %v7783_v11 = vadd.f32 %v1210_v58, %v1014_v21  ;;  %v1057_v54 = vpop.f32.mrf.mxu1  ;;  %v1028_v58 = vadd.f32 %v1027_v46, %v7756_v45 }
 0x1b6   :  { %v1212_v31 = vpop.f32.mrf.mxu0 }
 0x1b7   :  { %9160 = vst [vmem:[#allocation64_spill] sm:$0xff] %v7783_v11  ;;  %v7786_v40 = vadd.f32 %v1212_v31, %v1016_v47  ;;  %v1061_v36 = vpop.f32.mrf.mxu1  ;;  %v1032_v31 = vadd.f32 %v1031_v35, %v7748_v7 }
 0x1b8   :  { %v1216_v5 = vpop.f32.mrf.mxu0 }
 0x1b9   :  { %9161 = vst [vmem:[#allocation65_spill] sm:$0xff] %v7786_v40  ;;  %v7789_v6 = vadd.f32 %v1216_v5, %v1020_v0  ;;  %v1063_v57 = vpop.f32.mrf.mxu1  ;;  %v1034_v5 = vadd.f32 %v1033_v17, %v7756_v45 }
 0x1ba   :  { %v1218_v1 = vpop.f32.mrf.mxu0 }
 0x1bb   :  { %9162 = vst [vmem:[#allocation66_spill] sm:$0xff] %v7789_v6  ;;  %v7792_v37 = vadd.f32 %v1218_v1, %v1022_v20  ;;  %v1067_v43 = vpop.f32.mrf.mxu1  ;;  %v1038_v1 = vadd.f32 %v1037_v48, %v7748_v7 }
 0x1bc   :  { %v1222_v21 = vpop.f32.mrf.mxu0 }
 0x1bd   :  { %9163 = vst [vmem:[#allocation67_spill] sm:$0xff] %v7792_v37  ;;  %v7795_v11 = vadd.f32 %v1222_v21, %v1026_v59  ;;  %v1069_v56 = vpop.f32.mrf.mxu1  ;;  %v1040_v21 = vadd.f32 %v1039_v29, %v7756_v45 }
 0x1be   :  { %v1224_v47 = vpop.f32.mrf.mxu0 }
 0x1bf   :  { %9164 = vst [vmem:[#allocation68_spill] sm:$0xff] %v7795_v11  ;;  %v7798_v40 = vadd.f32 %v1224_v47, %v1028_v58  ;;  %v1073_v51 = vpop.f32.mrf.mxu1  ;;  %v1044_v47 = vadd.f32 %v1043_v22, %v7748_v7 }
 0x1c0   :  { %v1228_v0 = vpop.f32.mrf.mxu0 }
 0x1c1   :  { %9165 = vst [vmem:[#allocation69_spill] sm:$0xff] %v7798_v40  ;;  %v7801_v6 = vadd.f32 %v1228_v0, %v1032_v31  ;;  %v1075_v53 = vpop.f32.mrf.mxu1  ;;  %v1046_v0 = vadd.f32 %v1045_v55, %v7756_v45 }
 0x1c2   :  { %v1230_v20 = vpop.f32.mrf.mxu0 }
 0x1c3   :  { %9166 = vst [vmem:[#allocation70_spill] sm:$0xff] %v7801_v6  ;;  %v7804_v37 = vadd.f32 %v1230_v20, %v1034_v5  ;;  %v1079_v46 = vpop.f32.mrf.mxu1  ;;  %v1050_v20 = vadd.f32 %v1049_v39, %v7748_v7 }
 0x1c4   :  { %v1234_v59 = vpop.f32.mrf.mxu0 }
 0x1c5   :  { %9167 = vst [vmem:[#allocation71_spill] sm:$0xff] %v7804_v37  ;;  %v7807_v11 = vadd.f32 %v1234_v59, %v1038_v1  ;;  %v1081_v35 = vpop.f32.mrf.mxu1  ;;  %v1052_v59 = vadd.f32 %v1051_v49, %v7756_v45 }
 0x1c6   :  { %v1236_v58 = vpop.f32.mrf.mxu0 }
 0x1c7   :  { %9168 = vst [vmem:[#allocation72_spill] sm:$0xff] %v7807_v11  ;;  %v7810_v40 = vadd.f32 %v1236_v58, %v1040_v21  ;;  %v1085_v17 = vpop.f32.mrf.mxu1  ;;  %v1056_v58 = vadd.f32 %v1055_v32, %v7748_v7 }
 0x1c8   :  { %v1240_v31 = vpop.f32.mrf.mxu0 }
 0x1c9   :  { %9169 = vst [vmem:[#allocation73_spill] sm:$0xff] %v7810_v40  ;;  %v7813_v6 = vadd.f32 %v1240_v31, %v1044_v47  ;;  %v1087_v48 = vpop.f32.mrf.mxu1  ;;  %v1058_v31 = vadd.f32 %v1057_v54, %v7756_v45 }
 0x1ca   :  { %v1242_v5 = vpop.f32.mrf.mxu0 }
 0x1cb   :  { %9170 = vst [vmem:[#allocation74_spill] sm:$0xff] %v7813_v6  ;;  %v7816_v37 = vadd.f32 %v1242_v5, %v1046_v0  ;;  %v1091_v29 = vpop.f32.mrf.mxu1  ;;  %v1062_v5 = vadd.f32 %v1061_v36, %v7748_v7 }
 0x1cc   :  { %v1246_v1 = vpop.f32.mrf.mxu0 }
 0x1cd   :  { %9171 = vst [vmem:[#allocation75_spill] sm:$0xff] %v7816_v37  ;;  %v7819_v11 = vadd.f32 %v1246_v1, %v1050_v20  ;;  %v1093_v22 = vpop.f32.mrf.mxu1  ;;  %v1064_v1 = vadd.f32 %v1063_v57, %v7756_v45 }
 0x1ce   :  { %v1248_v21 = vpop.f32.mrf.mxu0 }
 0x1cf   :  { %9172 = vst [vmem:[#allocation76_spill] sm:$0xff] %v7819_v11  ;;  %v7822_v40 = vadd.f32 %v1248_v21, %v1052_v59  ;;  %v1097_v55 = vpop.f32.mrf.mxu1  ;;  %v1068_v21 = vadd.f32 %v1067_v43, %v7748_v7 }
 0x1d0   :  { %v1252_v47 = vpop.f32.mrf.mxu0 }
 0x1d1   :  { %9173 = vst [vmem:[#allocation77_spill] sm:$0xff] %v7822_v40  ;;  %v7825_v6 = vadd.f32 %v1252_v47, %v1056_v58  ;;  %v1099_v39 = vpop.f32.mrf.mxu1  ;;  %v1070_v47 = vadd.f32 %v1069_v56, %v7756_v45 }
 0x1d2   :  { %v1254_v0 = vpop.f32.mrf.mxu0 }
 0x1d3   :  { %9174 = vst [vmem:[#allocation78_spill] sm:$0xff] %v7825_v6  ;;  %v7828_v37 = vadd.f32 %v1254_v0, %v1058_v31  ;;  %v1103_v49 = vpop.f32.mrf.mxu1  ;;  %v1074_v0 = vadd.f32 %v1073_v51, %v7748_v7 }
 0x1d4   :  { %v1258_v20 = vpop.f32.mrf.mxu0 }
 0x1d5   :  { %9175 = vst [vmem:[#allocation79_spill] sm:$0xff] %v7828_v37  ;;  %v7831_v11 = vadd.f32 %v1258_v20, %v1062_v5  ;;  %v1105_v32 = vpop.f32.mrf.mxu1  ;;  %v1076_v20 = vadd.f32 %v1075_v53, %v7756_v45  ;;  %v1086_v53 = vadd.f32 %v1085_v17, %v7748_v7 }
 0x1d6   :  { %v1260_v59 = vpop.f32.mrf.mxu0 }
 0x1d7   :  { %9176 = vst [vmem:[#allocation80_spill] sm:$0xff] %v7831_v11  ;;  %v7834_v40 = vadd.f32 %v1260_v59, %v1064_v1  ;;  %v1109_v54 = vpop.f32.mrf.mxu1  ;;  %v1080_v59 = vadd.f32 %v1079_v46, %v7748_v7  ;;  %v1088_v46 = vadd.f32 %v1087_v48, %v7756_v45 }
 0x1d8   :  { %v1264_v58 = vpop.f32.mrf.mxu0 }
 0x1d9   :  { %9177 = vst [vmem:[#allocation81_spill] sm:$0xff] %v7834_v40  ;;  %v7837_v6 = vadd.f32 %v1264_v58, %v1068_v21  ;;  %v1111_v36 = vpop.f32.mrf.mxu1  ;;  %v1082_v58 = vadd.f32 %v1081_v35, %v7756_v45 }
 0x1da   :  { %v1266_v31 = vpop.f32.mrf.mxu0 }
 0x1db   :  { %9178 = vst [vmem:[#allocation82_spill] sm:$0xff] %v7837_v6  ;;  %v7840_v37 = vadd.f32 %v1266_v31, %v1070_v47  ;;  %v1115_v57 = vpop.f32.mrf.mxu1  ;;  %v452_v47 = vadd.f32 %v7596_v41, %v7617_v34 }
 0x1dc   :  { %v1270_v5 = vpop.f32.mrf.mxu0 }
 0x1dd   :  { %9179 = vst [vmem:[#allocation83_spill] sm:$0xff] %v7840_v37  ;;  %v7843_v11 = vadd.f32 %v1270_v5, %v1074_v0  ;;  %v1117_v43 = vpop.f32.mrf.mxu1 }
 0x1de   :  { %v1272_v1 = vpop.f32.mrf.mxu0 }
 0x1df   :  { %9180 = vst [vmem:[#allocation84_spill] sm:$0xff] %v7843_v11  ;;  %v7846_v40 = vadd.f32 %v1272_v1, %v1076_v20  ;;  %v1121_v56 = vpop.f32.mrf.mxu1 }
 0x1e0   :  { %v1276_v21 = vpop.f32.mrf.mxu0 }
 0x1e1   :  { %9181 = vst [vmem:[#allocation85_spill] sm:$0xff] %v7846_v40  ;;  %v7849_v6 = vadd.f32 %v1276_v21, %v1080_v59  ;;  %v1123_v51 = vpop.f32.mrf.mxu1  ;;  %v649_v59 = vadd.f32 %v7562_v44, %v452_v47  ;;  %v1092_v21 = vadd.f32 %v1091_v29, %v7748_v7  ;;  %v1100_v44 = vadd.f32 %v1099_v39, %v7756_v45 }
 0x1e2   :  { %v1278_v31 = vpop.f32.mrf.mxu0 }
 0x1e3   :  { %9182 = vst [vmem:[#allocation86_spill] sm:$0xff] %v7849_v6  ;;  %v7854_v0 = vadd.f32 %v1278_v31, %v1082_v58  ;;  %v1127_v5 = vpop.f32.mrf.mxu1  ;;  %v1094_v58 = vadd.f32 %v1093_v22, %v7756_v45 }
 0x1e4   :  { %v1282_v37 = vpop.f32.mrf.mxu0 }
 0x1e5   :  { %9183 = vst [vmem:[#allocation87_spill] sm:$0xff] %v7854_v0  ;;  %v7857_v20 = vadd.f32 %v1282_v37, %v1086_v53  ;;  %v7859_v1 = vpop.f32.mrf.mxu1  ;;  %v1098_v37 = vadd.f32 %v1097_v55, %v7748_v7 }
 0x1e6   :  { %v1284_v35 = vpop.f32.mrf.mxu0 }
 0x1e7   :  { %v7863_v40 = vadd.f32 %v1284_v35, %v1088_v46  ;;  %v1477_v41 = vpop.f32.mrf.mxu1  ;;  %v1104_v46 = vadd.f32 %v1103_v49, %v7748_v7 }
 0x1e8   :  { %v1288_v11 = vpop.f32.mrf.mxu0  ;;  %v1482_v17 = vadd.f32 %v1477_v41, %v649_v59  ;;  %v1106_v59 = vadd.f32 %v1105_v32, %v7756_v45 }
 0x1e9   :  { %v7866_v31 = vadd.f32 %v1288_v11, %v1092_v21  ;;  %v454_v11 = vadd.f32 %v7598_v27, %v7672_v9  ;;  %v1116_v27 = vadd.f32 %v1115_v57, %v7748_v7  ;;  %v1124_v57 = vadd.f32 %v1123_v51, %v7756_v45 }
 0x1ea   :  { %v6064_v0 = vmul.f32 -1.442695, %v1482_v17  ;;  %v1290_v48 = vpop.f32.mrf.mxu0  ;;  %v1112_v17 = vadd.f32 %v1111_v36, %v7756_v45  ;;  %v1122_v36 = vadd.f32 %v1121_v56, %v7748_v7 }
 0x1eb   :  { %v7869_v53 = vadd.f32 %v1290_v48, %v1094_v58  ;;  %v651_v49 = vadd.f32 %v7568_v50, %v454_v11 }
 0x1ec   :  { %6241 = vpow2.f32 %v6064_v0  ;;  %v1294_v6 = vpop.f32.mrf.mxu0  ;;  %v1110_v0 = vadd.f32 %v1109_v54, %v7748_v7  ;;  %v1118_v54 = vadd.f32 %v1117_v43, %v7756_v45 }
 0x1ed   :  { %v7872_v29 = vadd.f32 %v1294_v6, %v1098_v37  ;;  %v1479_v6 = vpop.f32.mrf.mxu1 }
 0x1ee   :  { %v1296_v47 = vpop.f32.mrf.mxu0  ;;  %v1483_v37 = vadd.f32 %v1479_v6, %v651_v49  ;;  %v1128_v6 = vadd.f32 %v1127_v5, %v7748_v7 }
 0x1ef   :  { %v7875_v35 = vadd.f32 %v1296_v47, %v1100_v44 }
 0x1f0   :  { %v1300_v22 = vpop.f32.mrf.mxu0  ;;  %6243 = vtanh.f32 %v1483_v37 }
 0x1f1   :  { %v7880_v55 = vadd.f32 %v1300_v22, %v1104_v46 }
 0x1f2   :  { %v1302_v21 = vpop.f32.mrf.mxu0 }
 0x1f3   :  { %v7883_v41 = vadd.f32 %v1302_v21, %v1106_v59 }
 0x1f4   :  { %v1306_v39 = vpop.f32.mrf.mxu0 }
 0x1f5   :  { %v7887_v58 = vadd.f32 %v1306_v39, %v1110_v0 }
 0x1f6   :  { %v1308_v48 = vpop.f32.mrf.mxu0 }
 0x1f7   :  { %v7890_v32 = vadd.f32 %v1308_v48, %v1112_v17 }
 0x1f8   :  { %v1312_v44 = vpop.f32.mrf.mxu0 }
 0x1f9   :  { %v6242_v47 = vpop.eup %6241  ;;  %v7893_v46 = vadd.f32 %v1312_v44, %v1116_v27  ;;  %v6065_v27 = vmul.f32 -1.442695, %v1483_v37  ;;  %v9184_v37 = vmov 0.0  }
 0x1fa   :  { %v1487_v22 = vadd.f32 1.0, %v6242_v47  ;;  %v1314_v59 = vpop.f32.mrf.mxu0 }
 0x1fb   :  { %v7896_v50 = vadd.f32 %v1314_v59, %v1118_v54 }
 0x1fc   :  { %6245 = vrcp.f32 %v1487_v22  ;;  %v1318_v11 = vpop.f32.mrf.mxu0 }
 0x1fd   :  { %v7899_v21 = vadd.f32 %v1318_v11, %v1122_v36  ;;  %v6244_v49 = vpop.eup %6243  ;;  %6247 = vpow2.f32 %v6065_v27  ;;  %v7909_v11 = vld [vmem:[#allocation9 + $0x70] sm:$0xff] }
 0x1fe   :  { %v1320_v0 = vpop.f32.mrf.mxu0 }
 0x1ff   :  { %v7902_v39 = vadd.f32 %v1320_v0, %v1124_v57  ;;  %v7913_v57 = vld [vmem:[#allocation9 + $0x68] sm:$0xff]  ;;  %v7916_v0 = vld [vmem:[#allocation9 + $0x60] sm:$0xff] }
 0x200   :  { %v1324_v43 = vpop.f32.mrf.mxu0 }
 0x201   :  { %v7904_v17 = vadd.f32 %v1324_v43, %v1128_v6  ;;  %v7919_v6 = vld [vmem:[#allocation9 + $0x58] sm:$0xff]  ;;  %v7922_v43 = vld [vmem:[#allocation9 + $0x50] sm:$0xff] }
 0x209   :  { %v6246_v48 = vpop.eup %6245 }
 0x20a   :  { %v1498_v56 = vmul.f32 %v6246_v48, %v6244_v49  ;;  %v6248_v44 = vpop.eup %6247  ;;  %v1497_v47 = vmul.f32 0.0, %v6246_v48  ;;  %v7925_v49 = vld [vmem:[#allocation9 + $0x48] sm:$0xff]  ;;  %v7937_v48 = vld [vmem:[#allocation9 + $0x78] sm:$0xff] }
 0x20b   :  { %v1494_v51 = vadd.f32 1.0, %v6248_v44 }
 0x20c   :  { %1500 = vrot.lane.b32.xlu0 %v1498_v56, %s7002_s6 }
 0x20d   :  { %6249 = vrcp.f32 %v1494_v51 }
 0x21a   :  { %v6250_v7 = vpop.eup %6249 }
 0x27e   :  { %v1501_v54 = vpop.permute.xlu0 %1500 }
 0x27f   :  { %v1503_v22 = vadd.f32 %v1501_v54, %v1497_v47 }
 0x281   :  { %6251 = vtanh.f32 %v1503_v22 }
 0x28e   :  { %v6252_v5 = vpop.eup %6251 }
 0x28f   :  { %v1505_v59 = vmul.f32 %v6252_v5, %v6250_v7 }
 0x291   :  { %1509 = vrot.lane.b32.xlu0 %v1505_v59, %s7002_s6 }
 0x303   :  { %v1510_v36 = vpop.permute.xlu0 %1509 }
 0x304   :  { %6066 = vmatmul.mubr.msk.f32.vlgmr.msra.gmra.mxu1 %vm1407_vm1, %v1510_v36 }
 0x305   :  { %1734 = vmatpush1.msra.mxu1 %v7909_v11  ;;  %1781 = vmatprep.mubr.f32.mxu1 %v9184_v37 }
 0x306   :  { %1735 = vmatprep.subr.mxu1 %v7913_v57 }
 0x307   :  { %1736 = vmatpush1.msra.mxu1 %v7916_v0 }
 0x308   :  { %1737 = vmatprep.subr.mxu1 %v7919_v6 }
 0x309   :  { %1738 = vmatpush1.msra.mxu1 %v7922_v43 }
 0x30a   :  { %1739 = vmatprep.subr.mxu1 %v7925_v49 }
 0x30b   :  { %1740 = vmatpush1.msra.mxu1 %v7418_v60  ;;  %v458_v60 = vadd.f32 %v7608_v18, %v7617_v34 }
 0x30c   :  { %1741 = vmatprep.subr.mxu1 %v7421_v62 }
 0x30d   :  { %1742 = vmatpush1.msra.mxu1 %v7429_v4  ;;  %v655_v62 = vadd.f32 %v7573_v63, %v458_v60  ;;  %v7959_v60 = vld [vmem:[#allocation9 + $0x38] sm:$0xff] }
 0x30e   :  { %1743 = vmatprep.subr.mxu1 %v7433_v8 }
 0x30f   :  { %1744 = vmatpush1.msra.mxu1 %v7442_v10 }
 0x310   :  { %1745 = vmatprep.subr.mxu1 %v7446_v15  ;;  %v460_v15 = vadd.f32 %v7610_v38, %v7672_v9 }
 0x311   :  { %1746 = vmatpush1.msra.mxu1 %v7455_v19 }
 0x312   :  { %1747 = vmatprep.subr.mxu1 %v7459_v25  ;;  %v657_v25 = vadd.f32 %v7577_v26, %v460_v15  ;;  %v7974_v15 = vld [vmem:[#allocation9 + $0x10] sm:$0xff] }
 0x313   :  { %1748 = vmatpush1.msra.mxu1 %v7468_v28 }
 0x314   :  { %1937 = vmatprep.subr.mxu1 %v7937_v48 }
 0x3c4   :  { %v1579_v4 = vpop.f32.mrf.mxu1 }
 0x3c5   :  { %v1584_v8 = vadd.f32 %v1579_v4, %v655_v62  ;;  %v7962_v62 = vld [vmem:[#allocation9 + $0x30] sm:$0xff]  ;;  %v7965_v4 = vld [vmem:[#allocation9 + $0x28] sm:$0xff] }
 0x3c6   :  { %v1581_v19 = vpop.f32.mrf.mxu1 }
 0x3c7   :  { %v6067_v10 = vmul.f32 -1.442695, %v1584_v8  ;;  %v1585_v28 = vadd.f32 %v1581_v19, %v657_v25  ;;  %v7968_v8 = vld [vmem:[#allocation9 + $0x20] sm:$0xff]  ;;  %v7977_v19 = vld [vmem:[#allocation9 + $0x8] sm:$0xff] }
 0x3c8   :  { %v7980_v25 = vld [vmem:[#allocation9] sm:$0xff] }
 0x3c9   :  { %6253 = vpow2.f32 %v6067_v10  ;;  %v6068_v63 = vmul.f32 -1.442695, %v1585_v28  ;;  %v7971_v10 = vld [vmem:[#allocation9 + $0x18] sm:$0xff] }
 0x3ca   :  { %6255 = vtanh.f32 %v1585_v28  ;;  %v7984_v28 = vpop.f32.mrf.mxu0 }
 0x3d6   :  { %v6254_v56 = vpop.eup %6253 }
 0x3d7   :  { %v1589_v27 = vadd.f32 1.0, %v6254_v56  ;;  %v6256_v44 = vpop.eup %6255 }
 0x3d9   :  { %6257 = vrcp.f32 %v1589_v27 }
 0x3da   :  { %6259 = vpow2.f32 %v6068_v63 }
 0x3e6   :  { %v6258_v51 = vpop.eup %6257 }
 0x3e7   :  { %v1600_v18 = vmul.f32 %v6258_v51, %v6256_v44  ;;  %v6260_v34 = vpop.eup %6259  ;;  %v1599_v54 = vmul.f32 %v6258_v51, %v1503_v22  ;;  %v7956_v22 = vld [vmem:[#allocation9 + $0x40] sm:$0xff]  ;;  %v466_v51 = vadd.f32 %v7620_v52, %v7672_v9 }
 0x3e8   :  { %v1596_v47 = vadd.f32 1.0, %v6260_v34 }
 0x3e9   :  { %1602 = vrot.lane.b32.xlu1 %v1600_v18, %s7002_s6  ;;  %v663_v63 = vadd.f32 %v7582_v3, %v466_v51 }
 0x3ea   :  { %6261 = vrcp.f32 %v1596_v47 }
 0x3f7   :  { %v6262_v26 = vpop.eup %6261 }
 0x45b   :  { %v1603_v7 = vpop.permute.xlu1 %1602 }
 0x45c   :  { %v1605_v38 = vadd.f32 %v1603_v7, %v1599_v54 }
 0x45e   :  { %6263 = vtanh.f32 %v1605_v38 }
 0x46b   :  { %v6264_v5 = vpop.eup %6263 }
 0x46c   :  { %v1607_v59 = vmul.f32 %v6264_v5, %v6262_v26 }
 0x46e   :  { %1611 = vrot.lane.b32.xlu1 %v1607_v59, %s7002_s6 }
 0x4e0   :  { %v1612_v36 = vpop.permute.xlu1 %1611 }
 0x4e1   :  { %6069 = vmatmul.mubr.msk.f32.vlgmr.msra.gmra.mxu0 %vm1407_vm1, %v1612_v36 }
 0x4e2   :  { %1836 = vmatpush1.msra.mxu0 %v7909_v11  ;;  %1883 = vmatprep.mubr.f32.mxu0 %v9184_v37 }
 0x4e3   :  { %1837 = vmatprep.subr.mxu0 %v7913_v57 }
 0x4e4   :  { %1838 = vmatpush1.msra.mxu0 %v7916_v0 }
 0x4e5   :  { %1839 = vmatprep.subr.mxu0 %v7919_v6 }
 0x4e6   :  { %1840 = vmatpush1.msra.mxu0 %v7922_v43 }
 0x4e7   :  { %1841 = vmatprep.subr.mxu0 %v7925_v49 }
 0x4e8   :  { %1842 = vmatpush1.msra.mxu0 %v7956_v22 }
 0x4e9   :  { %1843 = vmatprep.subr.mxu0 %v7959_v60 }
 0x4ea   :  { %1844 = vmatpush1.msra.mxu0 %v7962_v62 }
 0x4eb   :  { %1845 = vmatprep.subr.mxu0 %v7965_v4 }
 0x4ec   :  { %1846 = vmatpush1.msra.mxu0 %v7968_v8 }
 0x4ed   :  { %1847 = vmatprep.subr.mxu0 %v7971_v10 }
 0x4ee   :  { %1848 = vmatpush1.msra.mxu0 %v7974_v15 }
 0x4ef   :  { %1849 = vmatprep.subr.mxu0 %v7977_v19 }
 0x4f0   :  { %1850 = vmatpush1.msra.mxu0 %v7980_v25 }
 0x4f1   :  { %2039 = vmatprep.subr.mxu0 %v7937_v48 }
 0x5a1   :  { %v1681_v56 = vpop.f32.mrf.mxu0 }
 0x5a2   :  { %v1686_v27 = vadd.f32 %v1681_v56, %v7624_v61 }
 0x5a3   :  { %v1683_v18 = vpop.f32.mrf.mxu0 }
 0x5a4   :  { %v6070_v44 = vmul.f32 -1.442695, %v1686_v27  ;;  %v1687_v34 = vadd.f32 %v1683_v18, %v663_v63 }
 0x5a6   :  { %6265 = vpow2.f32 %v6070_v44  ;;  %v6071_v59 = vmul.f32 -1.442695, %v1687_v34 }
 0x5a7   :  { %6267 = vtanh.f32 %v1687_v34 }
 0x5b3   :  { %v6266_v47 = vpop.eup %6265 }
 0x5b4   :  { %v1691_v54 = vadd.f32 1.0, %v6266_v47  ;;  %v6268_v7 = vpop.eup %6267  ;;  %v472_v47 = vadd.f32 %v7627_v16, %v7672_v9 }
 0x5b6   :  { %6269 = vrcp.f32 %v1691_v54 }
 0x5b7   :  { %6271 = vpow2.f32 %v6071_v59 }
 0x5c3   :  { %v6270_v26 = vpop.eup %6269 }
 0x5c4   :  { %v1702_v5 = vmul.f32 %v6270_v26, %v6268_v7  ;;  %v6272_v61 = vpop.eup %6271  ;;  %v1701_v56 = vmul.f32 %v6270_v26, %v1605_v38  ;;  %v669_v7 = vadd.f32 %v7586_v2, %v472_v47 }
 0x5c5   :  { %v1698_v36 = vadd.f32 1.0, %v6272_v61 }
 0x5c6   :  { %1704 = vrot.lane.b32.xlu0 %v1702_v5, %s7002_s6 }
 0x5c7   :  { %6273 = vrcp.f32 %v1698_v36 }
 0x5d4   :  { %v6274_v3 = vpop.eup %6273 }
 0x638   :  { %v1705_v27 = vpop.permute.xlu0 %1704 }
 0x639   :  { %v1707_v52 = vadd.f32 %v1705_v27, %v1701_v56 }
 0x63b   :  { %6275 = vtanh.f32 %v1707_v52 }
 0x648   :  { %v6276_v44 = vpop.eup %6275 }
 0x649   :  { %v1709_v51 = vmul.f32 %v6276_v44, %v6274_v3 }
 0x64b   :  { %1713 = vrot.lane.b32.xlu1 %v1709_v51, %s7002_s6 }
 0x6bd   :  { %v1714_v18 = vpop.permute.xlu1 %1713 }
 0x6be   :  { %6072 = vmatmul.mubr.msk.f32.vlgmr.msra.gmra.mxu1 %vm1407_vm1, %v1714_v18 }
 0x6bf   :  { %1938 = vmatpush1.msra.mxu1 %v7909_v11  ;;  %1985 = vmatprep.mubr.f32.mxu1 %v9184_v37 }
 0x6c0   :  { %1939 = vmatprep.subr.mxu1 %v7913_v57 }
 0x6c1   :  { %1940 = vmatpush1.msra.mxu1 %v7916_v0 }
 0x6c2   :  { %1941 = vmatprep.subr.mxu1 %v7919_v6 }
 0x6c3   :  { %1942 = vmatpush1.msra.mxu1 %v7922_v43 }
 0x6c4   :  { %1943 = vmatprep.subr.mxu1 %v7925_v49 }
 0x6c5   :  { %1944 = vmatpush1.msra.mxu1 %v7956_v22 }
 0x6c6   :  { %1945 = vmatprep.subr.mxu1 %v7959_v60 }
 0x6c7   :  { %1946 = vmatpush1.msra.mxu1 %v7962_v62 }
 0x6c8   :  { %1947 = vmatprep.subr.mxu1 %v7965_v4 }
 0x6c9   :  { %1948 = vmatpush1.msra.mxu1 %v7968_v8 }
 0x6ca   :  { %1949 = vmatprep.subr.mxu1 %v7971_v10 }
 0x6cb   :  { %1950 = vmatpush1.msra.mxu1 %v7974_v15 }
 0x6cc   :  { %1951 = vmatprep.subr.mxu1 %v7977_v19 }
 0x6cd   :  { %1952 = vmatpush1.msra.mxu1 %v7980_v25 }
 0x6ce   :  { %2141 = vmatprep.subr.mxu1 %v7937_v48 }
 0x77e   :  { %v1783_v38 = vpop.f32.mrf.mxu1 }
 0x77f   :  { %v1788_v63 = vadd.f32 %v1783_v38, %v7631_v24 }
 0x780   :  { %v1785_v54 = vpop.f32.mrf.mxu1 }
 0x781   :  { %v6073_v34 = vmul.f32 -1.442695, %v1788_v63  ;;  %v1789_v26 = vadd.f32 %v1785_v54, %v669_v7  ;;  %v478_v54 = vadd.f32 %v7634_v14, %v7672_v9 }
 0x783   :  { %6277 = vpow2.f32 %v6073_v34  ;;  %v6074_v27 = vmul.f32 -1.442695, %v1789_v26 }
 0x784   :  { %6279 = vtanh.f32 %v1789_v26  ;;  %v675_v26 = vadd.f32 %v7588_v23, %v478_v54 }
 0x790   :  { %v6278_v5 = vpop.eup %6277 }
 0x791   :  { %v1793_v59 = vadd.f32 1.0, %v6278_v5  ;;  %v6280_v61 = vpop.eup %6279 }
 0x793   :  { %6281 = vrcp.f32 %v1793_v59 }
 0x794   :  { %6283 = vpow2.f32 %v6074_v27 }
 0x7a0   :  { %v6282_v36 = vpop.eup %6281 }
 0x7a1   :  { %v1804_v56 = vmul.f32 %v6282_v36, %v6280_v61  ;;  %v6284_v24 = vpop.eup %6283  ;;  %v1803_v44 = vmul.f32 %v6282_v36, %v1707_v52 }
 0x7a2   :  { %v1800_v3 = vadd.f32 1.0, %v6284_v24 }
 0x7a3   :  { %1806 = vrot.lane.b32.xlu0 %v1804_v56, %s7002_s6 }
 0x7a4   :  { %6285 = vrcp.f32 %v1800_v3 }
 0x7b1   :  { %v6286_v2 = vpop.eup %6285 }
 0x815   :  { %v1807_v51 = vpop.permute.xlu0 %1806 }
 0x816   :  { %v1809_v16 = vadd.f32 %v1807_v51, %v1803_v44 }
 0x818   :  { %6287 = vtanh.f32 %v1809_v16 }
 0x825   :  { %v6288_v18 = vpop.eup %6287 }
 0x826   :  { %v1811_v38 = vmul.f32 %v6288_v18, %v6286_v2 }
 0x828   :  { %1815 = vrot.lane.b32.xlu1 %v1811_v38, %s7002_s6 }
 0x89a   :  { %v1816_v63 = vpop.permute.xlu1 %1815 }
 0x89b   :  { %6075 = vmatmul.mubr.msk.f32.vlgmr.msra.gmra.mxu0 %vm1407_vm1, %v1816_v63 }
 0x89c   :  { %2040 = vmatpush1.msra.mxu0 %v7909_v11  ;;  %2087 = vmatprep.mubr.f32.mxu0 %v9184_v37 }
 0x89d   :  { %2041 = vmatprep.subr.mxu0 %v7913_v57 }
 0x89e   :  { %2042 = vmatpush1.msra.mxu0 %v7916_v0 }
 0x89f   :  { %2043 = vmatprep.subr.mxu0 %v7919_v6 }
 0x8a0   :  { %2044 = vmatpush1.msra.mxu0 %v7922_v43 }
 0x8a1   :  { %2045 = vmatprep.subr.mxu0 %v7925_v49 }
 0x8a2   :  { %2046 = vmatpush1.msra.mxu0 %v7956_v22 }
 0x8a3   :  { %2047 = vmatprep.subr.mxu0 %v7959_v60 }
 0x8a4   :  { %2048 = vmatpush1.msra.mxu0 %v7962_v62 }
 0x8a5   :  { %2049 = vmatprep.subr.mxu0 %v7965_v4 }
 0x8a6   :  { %2050 = vmatpush1.msra.mxu0 %v7968_v8 }
 0x8a7   :  { %2051 = vmatprep.subr.mxu0 %v7971_v10 }
 0x8a8   :  { %2052 = vmatpush1.msra.mxu0 %v7974_v15 }
 0x8a9   :  { %2053 = vmatprep.subr.mxu0 %v7977_v19 }
 0x8aa   :  { %2054 = vmatpush1.msra.mxu0 %v7980_v25 }
 0x8ab   :  { %2243 = vmatprep.subr.mxu0 %v7937_v48 }
 0x95b   :  { %v1885_v52 = vpop.f32.mrf.mxu0 }
 0x95c   :  { %v1890_v34 = vadd.f32 %v1885_v52, %v7636_v30 }
 0x95d   :  { %v1887_v7 = vpop.f32.mrf.mxu0 }
 0x95e   :  { %v6076_v47 = vmul.f32 -1.442695, %v1890_v34  ;;  %v1891_v5 = vadd.f32 %v1887_v7, %v675_v26  ;;  %v484_v34 = vadd.f32 %v7639_v42, %v7672_v9 }
 0x960   :  { %6289 = vpow2.f32 %v6076_v47  ;;  %v6077_v24 = vmul.f32 -1.442695, %v1891_v5  ;;  %v681_v54 = vadd.f32 %v7590_v13, %v484_v34 }
 0x961   :  { %6291 = vtanh.f32 %v1891_v5 }
 0x96d   :  { %v6290_v59 = vpop.eup %6289 }
 0x96e   :  { %v1895_v61 = vadd.f32 1.0, %v6290_v59  ;;  %v6292_v36 = vpop.eup %6291 }
 0x970   :  { %6293 = vrcp.f32 %v1895_v61 }
 0x971   :  { %6295 = vpow2.f32 %v6077_v24 }
 0x97d   :  { %v6294_v56 = vpop.eup %6293 }
 0x97e   :  { %v1906_v27 = vmul.f32 %v6294_v56, %v6292_v36  ;;  %v6296_v30 = vpop.eup %6295  ;;  %v1905_v44 = vmul.f32 %v6294_v56, %v1809_v16 }
 0x97f   :  { %v1902_v3 = vadd.f32 1.0, %v6296_v30 }
 0x980   :  { %1908 = vrot.lane.b32.xlu0 %v1906_v27, %s7002_s6 }
 0x981   :  { %6297 = vrcp.f32 %v1902_v3 }
 0x98e   :  { %v6298_v23 = vpop.eup %6297 }
 0x9f2   :  { %v1909_v51 = vpop.permute.xlu0 %1908 }
 0x9f3   :  { %v1911_v14 = vadd.f32 %v1909_v51, %v1905_v44 }
 0x9f5   :  { %6299 = vtanh.f32 %v1911_v14 }
 0xa02   :  { %v6300_v2 = vpop.eup %6299 }
 0xa03   :  { %v1913_v18 = vmul.f32 %v6300_v2, %v6298_v23  ;;  %v9185_v23 = vld [vmem:[#allocation27_spill] sm:$0xff] }
 0xa05   :  { %1917 = vrot.lane.b32.xlu1 %v1913_v18, %s7002_s6 }
 0xa77   :  { %v1918_v38 = vpop.permute.xlu1 %1917 }
 0xa78   :  { %6078 = vmatmul.mubr.msk.f32.vlgmr.msra.gmra.mxu1 %vm1407_vm1, %v1918_v38  ;;  %v9186_v38 = vld [vmem:[#allocation26_spill] sm:$0xff] }
 0xa79   :  { %2142 = vmatpush1.msra.mxu1 %v7909_v11  ;;  %2189 = vmatprep.mubr.f32.mxu1 %v9184_v37 }
 0xa7a   :  { %2143 = vmatprep.subr.mxu1 %v7913_v57 }
 0xa7b   :  { %2144 = vmatpush1.msra.mxu1 %v7916_v0 }
 0xa7c   :  { %2145 = vmatprep.subr.mxu1 %v7919_v6 }
 0xa7d   :  { %2146 = vmatpush1.msra.mxu1 %v7922_v43 }
 0xa7e   :  { %2147 = vmatprep.subr.mxu1 %v7925_v49 }
 0xa7f   :  { %2148 = vmatpush1.msra.mxu1 %v7956_v22 }
 0xa80   :  { %2149 = vmatprep.subr.mxu1 %v7959_v60 }
 0xa81   :  { %2150 = vmatpush1.msra.mxu1 %v7962_v62 }
 0xa82   :  { %2151 = vmatprep.subr.mxu1 %v7965_v4 }
 0xa83   :  { %2152 = vmatpush1.msra.mxu1 %v7968_v8 }
 0xa84   :  { %2153 = vmatprep.subr.mxu1 %v7971_v10 }
 0xa85   :  { %2154 = vmatpush1.msra.mxu1 %v7974_v15 }
 0xa86   :  { %2155 = vmatprep.subr.mxu1 %v7977_v19 }
 0xa87   :  { %2156 = vmatpush1.msra.mxu1 %v7980_v25 }
 0xa88   :  { %2345 = vmatprep.subr.mxu1 %v7937_v48 }
 0xb38   :  { %v1987_v16 = vpop.f32.mrf.mxu1 }
 0xb39   :  { %v1992_v63 = vadd.f32 %v1987_v16, %v7641_v12  ;;  %v490_v16 = vadd.f32 %v9186_v38, %v7672_v9 }
 0xb3a   :  { %v1989_v47 = vpop.f32.mrf.mxu1 }
 0xb3b   :  { %v6079_v52 = vmul.f32 -1.442695, %v1992_v63  ;;  %v1993_v7 = vadd.f32 %v1989_v47, %v681_v54 }
 0xb3d   :  { %6301 = vpow2.f32 %v6079_v52  ;;  %v6080_v56 = vmul.f32 -1.442695, %v1993_v7  ;;  %v9187_v52 = vld [vmem:[#allocation48_spill] sm:$0xff] }
 0xb3e   :  { %6303 = vtanh.f32 %v1993_v7  ;;  %v687_v34 = vadd.f32 %v9187_v52, %v490_v16  ;;  %v9190_v16 = vld [vmem:[#allocation24_spill] sm:$0xff] }
 0xb4a   :  { %v6302_v26 = vpop.eup %6301 }
 0xb4b   :  { %v1997_v5 = vadd.f32 1.0, %v6302_v26  ;;  %v6304_v59 = vpop.eup %6303 }
 0xb4d   :  { %6305 = vrcp.f32 %v1997_v5 }
 0xb4e   :  { %6307 = vpow2.f32 %v6080_v56 }
 0xb5a   :  { %v6306_v61 = vpop.eup %6305 }
 0xb5b   :  { %v2008_v36 = vmul.f32 %v6306_v61, %v6304_v59  ;;  %v6308_v12 = vpop.eup %6307  ;;  %v2007_v24 = vmul.f32 %v6306_v61, %v1911_v14 }
 0xb5c   :  { %v2004_v27 = vadd.f32 1.0, %v6308_v12 }
 0xb5d   :  { %2010 = vrot.lane.b32.xlu0 %v2008_v36, %s7002_s6 }
 0xb5e   :  { %6309 = vrcp.f32 %v2004_v27 }
 0xb6b   :  { %v6310_v13 = vpop.eup %6309 }
 0xbcf   :  { %v2011_v30 = vpop.permute.xlu0 %2010 }
 0xbd0   :  { %v2013_v42 = vadd.f32 %v2011_v30, %v2007_v24 }
 0xbd2   :  { %6311 = vtanh.f32 %v2013_v42 }
 0xbdf   :  { %v6312_v3 = vpop.eup %6311 }
 0xbe0   :  { %v2015_v44 = vmul.f32 %v6312_v3, %v6310_v13 }
 0xbe2   :  { %2019 = vrot.lane.b32.xlu1 %v2015_v44, %s7002_s6 }
 0xc54   :  { %v2020_v51 = vpop.permute.xlu1 %2019 }
 0xc55   :  { %6081 = vmatmul.mubr.msk.f32.vlgmr.msra.gmra.mxu0 %vm1407_vm1, %v2020_v51  ;;  %v9188_v51 = vld [vmem:[#allocation28_spill] sm:$0xff] }
 0xc56   :  { %2244 = vmatpush1.msra.mxu0 %v7909_v11  ;;  %2291 = vmatprep.mubr.f32.mxu0 %v9184_v37 }
 0xc57   :  { %2245 = vmatprep.subr.mxu0 %v7913_v57 }
 0xc58   :  { %2246 = vmatpush1.msra.mxu0 %v7916_v0 }
 0xc59   :  { %2247 = vmatprep.subr.mxu0 %v7919_v6 }
 0xc5a   :  { %2248 = vmatpush1.msra.mxu0 %v7922_v43 }
 0xc5b   :  { %2249 = vmatprep.subr.mxu0 %v7925_v49 }
 0xc5c   :  { %2250 = vmatpush1.msra.mxu0 %v7956_v22 }
 0xc5d   :  { %2251 = vmatprep.subr.mxu0 %v7959_v60 }
 0xc5e   :  { %2252 = vmatpush1.msra.mxu0 %v7962_v62 }
 0xc5f   :  { %2253 = vmatprep.subr.mxu0 %v7965_v4 }
 0xc60   :  { %2254 = vmatpush1.msra.mxu0 %v7968_v8 }
 0xc61   :  { %2255 = vmatprep.subr.mxu0 %v7971_v10 }
 0xc62   :  { %2256 = vmatpush1.msra.mxu0 %v7974_v15 }
 0xc63   :  { %2257 = vmatprep.subr.mxu0 %v7977_v19 }
 0xc64   :  { %2258 = vmatpush1.msra.mxu0 %v7980_v25 }
 0xc65   :  { %2447 = vmatprep.subr.mxu0 %v7937_v48 }
 0xd15   :  { %v2089_v14 = vpop.f32.mrf.mxu0 }
 0xd16   :  { %v2094_v2 = vadd.f32 %v2089_v14, %v9185_v23 }
 0xd17   :  { %v2091_v63 = vpop.f32.mrf.mxu0 }
 0xd18   :  { %v6082_v18 = vmul.f32 -1.442695, %v2094_v2  ;;  %v2095_v47 = vadd.f32 %v2091_v63, %v687_v34  ;;  %v9189_v2 = vld [vmem:[#allocation51_spill] sm:$0xff] }
 0xd1a   :  { %6313 = vpow2.f32 %v6082_v18  ;;  %v6083_v61 = vmul.f32 -1.442695, %v2095_v47  ;;  %v496_v18 = vadd.f32 %v9189_v2, %v7672_v9 }
 0xd1b   :  { %6315 = vtanh.f32 %v2095_v47 }
 0xd1c   :  { %v693_v63 = vadd.f32 %v9190_v16, %v496_v18  ;;  %v9193_v18 = vld [vmem:[#allocation49_spill] sm:$0xff] }
 0xd27   :  { %v6314_v54 = vpop.eup %6313 }
 0xd28   :  { %v2099_v7 = vadd.f32 1.0, %v6314_v54  ;;  %v6316_v26 = vpop.eup %6315 }
 0xd2a   :  { %6317 = vrcp.f32 %v2099_v7 }
 0xd2b   :  { %6319 = vpow2.f32 %v6083_v61 }
 0xd37   :  { %v6318_v5 = vpop.eup %6317 }
 0xd38   :  { %v2110_v59 = vmul.f32 %v6318_v5, %v6316_v26  ;;  %v6320_v36 = vpop.eup %6319  ;;  %v2109_v12 = vmul.f32 %v6318_v5, %v2013_v42 }
 0xd39   :  { %v2106_v56 = vadd.f32 1.0, %v6320_v36 }
 0xd3a   :  { %2112 = vrot.lane.b32.xlu0 %v2110_v59, %s7002_s6 }
 0xd3b   :  { %6321 = vrcp.f32 %v2106_v56 }
 0xd48   :  { %v6322_v30 = vpop.eup %6321 }
 0xdac   :  { %v2113_v27 = vpop.permute.xlu0 %2112 }
 0xdad   :  { %v2115_v24 = vadd.f32 %v2113_v27, %v2109_v12 }
 0xdaf   :  { %6323 = vtanh.f32 %v2115_v24 }
 0xdbc   :  { %v6324_v13 = vpop.eup %6323 }
 0xdbd   :  { %v2117_v3 = vmul.f32 %v6324_v13, %v6322_v30 }
 0xdbf   :  { %2121 = vrot.lane.b32.xlu1 %v2117_v3, %s7002_s6 }
 0xe31   :  { %v2122_v44 = vpop.permute.xlu1 %2121 }
 0xe32   :  { %6084 = vmatmul.mubr.msk.f32.vlgmr.msra.gmra.mxu1 %vm1407_vm1, %v2122_v44  ;;  %v9191_v44 = vld [vmem:[#allocation30_spill] sm:$0xff] }
 0xe33   :  { %2346 = vmatpush1.msra.mxu1 %v7909_v11  ;;  %2393 = vmatprep.mubr.f32.mxu1 %v9184_v37 }
 0xe34   :  { %2347 = vmatprep.subr.mxu1 %v7913_v57 }
 0xe35   :  { %2348 = vmatpush1.msra.mxu1 %v7916_v0 }
 0xe36   :  { %2349 = vmatprep.subr.mxu1 %v7919_v6 }
 0xe37   :  { %2350 = vmatpush1.msra.mxu1 %v7922_v43 }
 0xe38   :  { %2351 = vmatprep.subr.mxu1 %v7925_v49 }
 0xe39   :  { %2352 = vmatpush1.msra.mxu1 %v7956_v22 }
 0xe3a   :  { %2353 = vmatprep.subr.mxu1 %v7959_v60 }
 0xe3b   :  { %2354 = vmatpush1.msra.mxu1 %v7962_v62 }
 0xe3c   :  { %2355 = vmatprep.subr.mxu1 %v7965_v4 }
 0xe3d   :  { %2356 = vmatpush1.msra.mxu1 %v7968_v8 }
 0xe3e   :  { %2357 = vmatprep.subr.mxu1 %v7971_v10 }
 0xe3f   :  { %2358 = vmatpush1.msra.mxu1 %v7974_v15 }
 0xe40   :  { %2359 = vmatprep.subr.mxu1 %v7977_v19 }
 0xe41   :  { %2360 = vmatpush1.msra.mxu1 %v7980_v25 }
 0xe42   :  { %2549 = vmatprep.subr.mxu1 %v7937_v48 }
 0xef2   :  { %v2191_v42 = vpop.f32.mrf.mxu1 }
 0xef3   :  { %v2196_v14 = vadd.f32 %v2191_v42, %v9188_v51 }
 0xef4   :  { %v2193_v38 = vpop.f32.mrf.mxu1 }
 0xef5   :  { %v6085_v23 = vmul.f32 -1.442695, %v2196_v14  ;;  %v2197_v52 = vadd.f32 %v2193_v38, %v693_v63  ;;  %v9192_v14 = vld [vmem:[#allocation29_spill] sm:$0xff] }
 0xef7   :  { %6325 = vpow2.f32 %v6085_v23  ;;  %v6086_v5 = vmul.f32 -1.442695, %v2197_v52  ;;  %v502_v23 = vadd.f32 %v9192_v14, %v7672_v9 }
 0xef8   :  { %6327 = vtanh.f32 %v2197_v52 }
 0xef9   :  { %v699_v38 = vadd.f32 %v9193_v18, %v502_v23  ;;  %v9196_v23 = vld [vmem:[#allocation25_spill] sm:$0xff] }
 0xf04   :  { %v6326_v34 = vpop.eup %6325 }
 0xf05   :  { %v2201_v47 = vadd.f32 1.0, %v6326_v34  ;;  %v6328_v54 = vpop.eup %6327 }
 0xf07   :  { %6329 = vrcp.f32 %v2201_v47 }
 0xf08   :  { %6331 = vpow2.f32 %v6086_v5 }
 0xf14   :  { %v6330_v7 = vpop.eup %6329 }
 0xf15   :  { %v2212_v26 = vmul.f32 %v6330_v7, %v6328_v54  ;;  %v6332_v59 = vpop.eup %6331  ;;  %v2211_v36 = vmul.f32 %v6330_v7, %v2115_v24 }
 0xf16   :  { %v2208_v61 = vadd.f32 1.0, %v6332_v59 }
 0xf17   :  { %2214 = vrot.lane.b32.xlu0 %v2212_v26, %s7002_s6 }
 0xf18   :  { %6333 = vrcp.f32 %v2208_v61 }
 0xf25   :  { %v6334_v27 = vpop.eup %6333 }
 0xf89   :  { %v2215_v56 = vpop.permute.xlu0 %2214 }
 0xf8a   :  { %v2217_v12 = vadd.f32 %v2215_v56, %v2211_v36 }
 0xf8c   :  { %6335 = vtanh.f32 %v2217_v12 }
 0xf99   :  { %v6336_v30 = vpop.eup %6335 }
 0xf9a   :  { %v2219_v13 = vmul.f32 %v6336_v30, %v6334_v27 }
 0xf9c   :  { %2223 = vrot.lane.b32.xlu1 %v2219_v13, %s7002_s6 }
0x100e   :  { %v2224_v3 = vpop.permute.xlu1 %2223 }
0x100f   :  { %6087 = vmatmul.mubr.msk.f32.vlgmr.msra.gmra.mxu0 %vm1407_vm1, %v2224_v3  ;;  %v9194_v3 = vld [vmem:[#allocation32_spill] sm:$0xff] }
0x1010   :  { %2448 = vmatpush1.msra.mxu0 %v7909_v11  ;;  %2495 = vmatprep.mubr.f32.mxu0 %v9184_v37 }
0x1011   :  { %2449 = vmatprep.subr.mxu0 %v7913_v57 }
0x1012   :  { %2450 = vmatpush1.msra.mxu0 %v7916_v0 }
0x1013   :  { %2451 = vmatprep.subr.mxu0 %v7919_v6 }
0x1014   :  { %2452 = vmatpush1.msra.mxu0 %v7922_v43 }
0x1015   :  { %2453 = vmatprep.subr.mxu0 %v7925_v49 }
0x1016   :  { %2454 = vmatpush1.msra.mxu0 %v7956_v22 }
0x1017   :  { %2455 = vmatprep.subr.mxu0 %v7959_v60 }
0x1018   :  { %2456 = vmatpush1.msra.mxu0 %v7962_v62 }
0x1019   :  { %2457 = vmatprep.subr.mxu0 %v7965_v4 }
0x101a   :  { %2458 = vmatpush1.msra.mxu0 %v7968_v8 }
0x101b   :  { %2459 = vmatprep.subr.mxu0 %v7971_v10 }
0x101c   :  { %2460 = vmatpush1.msra.mxu0 %v7974_v15 }
0x101d   :  { %2461 = vmatprep.subr.mxu0 %v7977_v19 }
0x101e   :  { %2462 = vmatpush1.msra.mxu0 %v7980_v25 }
0x101f   :  { %2651 = vmatprep.subr.mxu0 %v7937_v48 }
0x10cf   :  { %v2293_v24 = vpop.f32.mrf.mxu0 }
0x10d0   :  { %v2298_v42 = vadd.f32 %v2293_v24, %v9191_v44 }
0x10d1   :  { %v2295_v2 = vpop.f32.mrf.mxu0 }
0x10d2   :  { %v6088_v51 = vmul.f32 -1.442695, %v2298_v42  ;;  %v2299_v16 = vadd.f32 %v2295_v2, %v699_v38  ;;  %v9195_v42 = vld [vmem:[#allocation31_spill] sm:$0xff] }
0x10d4   :  { %6337 = vpow2.f32 %v6088_v51  ;;  %v6089_v7 = vmul.f32 -1.442695, %v2299_v16  ;;  %v508_v51 = vadd.f32 %v9195_v42, %v7672_v9 }
0x10d5   :  { %6339 = vtanh.f32 %v2299_v16 }
0x10d6   :  { %v705_v2 = vadd.f32 %v9196_v23, %v508_v51  ;;  %v9199_v51 = vld [vmem:[#allocation50_spill] sm:$0xff] }
0x10e1   :  { %v6338_v63 = vpop.eup %6337 }
0x10e2   :  { %v2303_v52 = vadd.f32 1.0, %v6338_v63  ;;  %v6340_v34 = vpop.eup %6339 }
0x10e4   :  { %6341 = vrcp.f32 %v2303_v52 }
0x10e5   :  { %6343 = vpow2.f32 %v6089_v7 }
0x10f1   :  { %v6342_v47 = vpop.eup %6341 }
0x10f2   :  { %v2314_v54 = vmul.f32 %v6342_v47, %v6340_v34  ;;  %v6344_v26 = vpop.eup %6343  ;;  %v2313_v59 = vmul.f32 %v6342_v47, %v2217_v12 }
0x10f3   :  { %v2310_v5 = vadd.f32 1.0, %v6344_v26 }
0x10f4   :  { %2316 = vrot.lane.b32.xlu0 %v2314_v54, %s7002_s6 }
0x10f5   :  { %6345 = vrcp.f32 %v2310_v5 }
0x1102   :  { %v6346_v56 = vpop.eup %6345 }
0x1166   :  { %v2317_v61 = vpop.permute.xlu0 %2316 }
0x1167   :  { %v2319_v36 = vadd.f32 %v2317_v61, %v2313_v59 }
0x1169   :  { %6347 = vtanh.f32 %v2319_v36 }
0x1176   :  { %v6348_v27 = vpop.eup %6347 }
0x1177   :  { %v2321_v30 = vmul.f32 %v6348_v27, %v6346_v56 }
0x1179   :  { %2325 = vrot.lane.b32.xlu1 %v2321_v30, %s7002_s6 }
0x11eb   :  { %v2326_v13 = vpop.permute.xlu1 %2325 }
0x11ec   :  { %6090 = vmatmul.mubr.msk.f32.vlgmr.msra.gmra.mxu1 %vm1407_vm1, %v2326_v13  ;;  %v9197_v13 = vld [vmem:[#allocation34_spill] sm:$0xff] }
0x11ed   :  { %2550 = vmatpush1.msra.mxu1 %v7909_v11  ;;  %2597 = vmatprep.mubr.f32.mxu1 %v9184_v37 }
0x11ee   :  { %2551 = vmatprep.subr.mxu1 %v7913_v57 }
0x11ef   :  { %2552 = vmatpush1.msra.mxu1 %v7916_v0 }
0x11f0   :  { %2553 = vmatprep.subr.mxu1 %v7919_v6 }
0x11f1   :  { %2554 = vmatpush1.msra.mxu1 %v7922_v43 }
0x11f2   :  { %2555 = vmatprep.subr.mxu1 %v7925_v49 }
0x11f3   :  { %2556 = vmatpush1.msra.mxu1 %v7956_v22 }
0x11f4   :  { %2557 = vmatprep.subr.mxu1 %v7959_v60 }
0x11f5   :  { %2558 = vmatpush1.msra.mxu1 %v7962_v62 }
0x11f6   :  { %2559 = vmatprep.subr.mxu1 %v7965_v4 }
0x11f7   :  { %2560 = vmatpush1.msra.mxu1 %v7968_v8 }
0x11f8   :  { %2561 = vmatprep.subr.mxu1 %v7971_v10 }
0x11f9   :  { %2562 = vmatpush1.msra.mxu1 %v7974_v15 }
0x11fa   :  { %2563 = vmatprep.subr.mxu1 %v7977_v19 }
0x11fb   :  { %2564 = vmatpush1.msra.mxu1 %v7980_v25 }
0x11fc   :  { %2753 = vmatprep.subr.mxu1 %v7937_v48 }
0x12ac   :  { %v2395_v12 = vpop.f32.mrf.mxu1 }
0x12ad   :  { %v2400_v24 = vadd.f32 %v2395_v12, %v9194_v3 }
0x12ae   :  { %v2397_v14 = vpop.f32.mrf.mxu1 }
0x12af   :  { %v6091_v44 = vmul.f32 -1.442695, %v2400_v24  ;;  %v2401_v18 = vadd.f32 %v2397_v14, %v705_v2  ;;  %v9198_v24 = vld [vmem:[#allocation33_spill] sm:$0xff] }
0x12b1   :  { %6349 = vpow2.f32 %v6091_v44  ;;  %v6092_v47 = vmul.f32 -1.442695, %v2401_v18  ;;  %v514_v44 = vadd.f32 %v9198_v24, %v7672_v9 }
0x12b2   :  { %6351 = vtanh.f32 %v2401_v18 }
0x12b3   :  { %v711_v14 = vadd.f32 %v9199_v51, %v514_v44 }
0x12be   :  { %v6350_v38 = vpop.eup %6349 }
0x12bf   :  { %v2405_v16 = vadd.f32 1.0, %v6350_v38  ;;  %v6352_v63 = vpop.eup %6351 }
0x12c1   :  { %6353 = vrcp.f32 %v2405_v16 }
0x12c2   :  { %6355 = vpow2.f32 %v6092_v47 }
0x12ce   :  { %v6354_v52 = vpop.eup %6353 }
0x12cf   :  { %v2416_v34 = vmul.f32 %v6354_v52, %v6352_v63  ;;  %v6356_v54 = vpop.eup %6355  ;;  %v2415_v26 = vmul.f32 %v6354_v52, %v2319_v36 }
0x12d0   :  { %v2412_v7 = vadd.f32 1.0, %v6356_v54 }
0x12d1   :  { %2418 = vrot.lane.b32.xlu0 %v2416_v34, %s7002_s6 }
0x12d2   :  { %6357 = vrcp.f32 %v2412_v7 }
0x12df   :  { %v6358_v61 = vpop.eup %6357 }
0x1343   :  { %v2419_v5 = vpop.permute.xlu0 %2418 }
0x1344   :  { %v2421_v59 = vadd.f32 %v2419_v5, %v2415_v26 }
0x1346   :  { %6359 = vtanh.f32 %v2421_v59 }
0x1353   :  { %v6360_v56 = vpop.eup %6359 }
0x1354   :  { %v2423_v27 = vmul.f32 %v6360_v56, %v6358_v61 }
0x1356   :  { %2427 = vrot.lane.b32.xlu1 %v2423_v27, %s7002_s6 }
0x13c8   :  { %v2428_v30 = vpop.permute.xlu1 %2427 }
0x13c9   :  { %6093 = vmatmul.mubr.msk.f32.vlgmr.msra.gmra.mxu0 %vm1407_vm1, %v2428_v30 }
0x13ca   :  { %2652 = vmatpush1.msra.mxu0 %v7909_v11  ;;  %2699 = vmatprep.mubr.f32.mxu0 %v9184_v37 }
0x13cb   :  { %2653 = vmatprep.subr.mxu0 %v7913_v57 }
0x13cc   :  { %2654 = vmatpush1.msra.mxu0 %v7916_v0 }
0x13cd   :  { %2655 = vmatprep.subr.mxu0 %v7919_v6 }
0x13ce   :  { %2656 = vmatpush1.msra.mxu0 %v7922_v43 }
0x13cf   :  { %2657 = vmatprep.subr.mxu0 %v7925_v49 }
0x13d0   :  { %2658 = vmatpush1.msra.mxu0 %v7956_v22 }
0x13d1   :  { %2659 = vmatprep.subr.mxu0 %v7959_v60 }
0x13d2   :  { %2660 = vmatpush1.msra.mxu0 %v7962_v62 }
0x13d3   :  { %2661 = vmatprep.subr.mxu0 %v7965_v4 }
0x13d4   :  { %2662 = vmatpush1.msra.mxu0 %v7968_v8 }
0x13d5   :  { %2663 = vmatprep.subr.mxu0 %v7971_v10 }
0x13d6   :  { %2664 = vmatpush1.msra.mxu0 %v7974_v15 }
0x13d7   :  { %2665 = vmatprep.subr.mxu0 %v7977_v19 }
0x13d8   :  { %2666 = vmatpush1.msra.mxu0 %v7980_v25 }
0x13d9   :  { %2855 = vmatprep.subr.mxu0 %v7937_v48 }
0x1489   :  { %v2497_v36 = vpop.f32.mrf.mxu0 }
0x148a   :  { %v2502_v12 = vadd.f32 %v2497_v36, %v9197_v13 }
0x148b   :  { %v2499_v42 = vpop.f32.mrf.mxu0 }
0x148c   :  { %v6094_v3 = vmul.f32 -1.442695, %v2502_v12  ;;  %v2503_v23 = vadd.f32 %v2499_v42, %v711_v14 }
0x148e   :  { %6361 = vpow2.f32 %v6094_v3  ;;  %v6095_v52 = vmul.f32 -1.442695, %v2503_v23 }
0x148f   :  { %6363 = vtanh.f32 %v2503_v23 }
0x149b   :  { %v6362_v2 = vpop.eup %6361 }
0x149c   :  { %v2507_v18 = vadd.f32 1.0, %v6362_v2  ;;  %v6364_v38 = vpop.eup %6363 }
0x149e   :  { %6365 = vrcp.f32 %v2507_v18 }
0x149f   :  { %6367 = vpow2.f32 %v6095_v52  ;;  %v8217_v52 = vld [vmem:[#allocation9 + $0x58] sm:$0xff] }
0x14ab   :  { %v6366_v16 = vpop.eup %6365 }
0x14ac   :  { %v2518_v63 = vmul.f32 %v6366_v16, %v6364_v38  ;;  %v6368_v34 = vpop.eup %6367  ;;  %v2517_v54 = vmul.f32 %v6366_v16, %v2421_v59  ;;  %v8207_v38 = vld [vmem:[#allocation9 + $0x70] sm:$0xff]  ;;  %v8211_v16 = vld [vmem:[#allocation9 + $0x68] sm:$0xff] }
0x14ad   :  { %v2514_v47 = vadd.f32 1.0, %v6368_v34  ;;  %v8220_v34 = vld [vmem:[#allocation9 + $0x50] sm:$0xff] }
0x14ae   :  { %2520 = vrot.lane.b32.xlu0 %v2518_v63, %s7002_s6  ;;  %v8214_v63 = vld [vmem:[#allocation9 + $0x60] sm:$0xff] }
0x14af   :  { %6369 = vrcp.f32 %v2514_v47  ;;  %v8223_v47 = vld [vmem:[#allocation9 + $0x48] sm:$0xff] }
0x14bc   :  { %v6370_v26 = vpop.eup %6369 }
0x1520   :  { %v2521_v7 = vpop.permute.xlu0 %2520 }
0x1521   :  { %v2523_v9 = vadd.f32 %v2521_v7, %v2517_v54  ;;  %v8235_v54 = vld [vmem:[#allocation9 + $0x78] sm:$0xff] }
0x1523   :  { %6371 = vtanh.f32 %v2523_v9 }
0x1530   :  { %v6372_v5 = vpop.eup %6371 }
0x1531   :  { %v2525_v61 = vmul.f32 %v6372_v5, %v6370_v26 }
0x1533   :  { %2529 = vrot.lane.b32.xlu1 %v2525_v61, %s7002_s6 }
0x15a5   :  { %v2530_v56 = vpop.permute.xlu1 %2529 }
0x15a6   :  { %6096 = vmatmul.mubr.msk.f32.vlgmr.msra.gmra.mxu1 %vm1407_vm1, %v2530_v56 }
0x15a7   :  { %2754 = vmatpush1.msra.mxu1 %v7909_v11  ;;  %2801 = vmatprep.mubr.f32.mxu1 %v9184_v37 }
0x15a8   :  { %2755 = vmatprep.subr.mxu1 %v7913_v57  ;;  %v9200_v57 = vld [vmem:[#allocation35_spill] sm:$0xff] }
0x15a9   :  { %2756 = vmatpush1.msra.mxu1 %v7916_v0 }
0x15aa   :  { %2757 = vmatprep.subr.mxu1 %v7919_v6 }
0x15ab   :  { %2758 = vmatpush1.msra.mxu1 %v7922_v43 }
0x15ac   :  { %2759 = vmatprep.subr.mxu1 %v7925_v49  ;;  %v9201_v49 = vld [vmem:[#allocation36_spill] sm:$0xff] }
0x15ad   :  { %2760 = vmatpush1.msra.mxu1 %v7956_v22 }
0x15ae   :  { %2761 = vmatprep.subr.mxu1 %v7959_v60 }
0x15af   :  { %2762 = vmatpush1.msra.mxu1 %v7962_v62 }
0x15b0   :  { %2763 = vmatprep.subr.mxu1 %v7965_v4 }
0x15b1   :  { %2764 = vmatpush1.msra.mxu1 %v7968_v8 }
0x15b2   :  { %2765 = vmatprep.subr.mxu1 %v7971_v10 }
0x15b3   :  { %2766 = vmatpush1.msra.mxu1 %v7974_v15 }
0x15b4   :  { %2767 = vmatprep.subr.mxu1 %v7977_v19 }
0x15b5   :  { %2768 = vmatpush1.msra.mxu1 %v7980_v25 }
0x15b6   :  { %2957 = vmatprep.subr.mxu1 %v7937_v48 }
0x1666   :  { %v2599_v11 = vpop.f32.mrf.mxu1 }
0x1667   :  { %v2604_v0 = vadd.f32 %v2599_v11, %v9200_v57 }
0x1668   :  { %v2601_v43 = vpop.f32.mrf.mxu1 }
0x1669   :  { %v6097_v6 = vmul.f32 -1.442695, %v2604_v0  ;;  %v2605_v59 = vadd.f32 %v2601_v43, %v9201_v49 }
0x166b   :  { %6373 = vpow2.f32 %v6097_v6  ;;  %v6098_v3 = vmul.f32 -1.442695, %v2605_v59 }
0x166c   :  { %6375 = vtanh.f32 %v2605_v59 }
0x1678   :  { %v6374_v27 = vpop.eup %6373 }
0x1679   :  { %v2609_v30 = vadd.f32 1.0, %v6374_v27  ;;  %v6376_v36 = vpop.eup %6375  ;;  %v8250_v27 = vld [vmem:[#allocation9 + $0x40] sm:$0xff] }
0x167b   :  { %6377 = vrcp.f32 %v2609_v30  ;;  %v8253_v30 = vld [vmem:[#allocation9 + $0x38] sm:$0xff] }
0x167c   :  { %6379 = vpow2.f32 %v6098_v3  ;;  %v8265_v3 = vld [vmem:[#allocation9 + $0x18] sm:$0xff] }
0x1688   :  { %v6378_v13 = vpop.eup %6377 }
0x1689   :  { %v2620_v12 = vmul.f32 %v6378_v13, %v6376_v36  ;;  %v6380_v48 = vpop.eup %6379  ;;  %v2619_v44 = vmul.f32 %v6378_v13, %v2523_v9  ;;  %v9203_v9 = vld [vmem:[#allocation38_spill] sm:$0xff]  ;;  %v8256_v36 = vld [vmem:[#allocation9 + $0x30] sm:$0xff] }
0x168a   :  { %v2616_v24 = vadd.f32 1.0, %v6380_v48  ;;  %v8259_v13 = vld [vmem:[#allocation9 + $0x28] sm:$0xff]  ;;  %v8268_v48 = vld [vmem:[#allocation9 + $0x10] sm:$0xff] }
0x168b   :  { %2622 = vrot.lane.b32.xlu0 %v2620_v12, %s7002_s6  ;;  %v8262_v12 = vld [vmem:[#allocation9 + $0x20] sm:$0xff] }
0x168c   :  { %6381 = vrcp.f32 %v2616_v24  ;;  %v8271_v24 = vld [vmem:[#allocation9 + $0x8] sm:$0xff] }
0x1699   :  { %v6382_v14 = vpop.eup %6381 }
0x16fd   :  { %v2623_v42 = vpop.permute.xlu0 %2622 }
0x16fe   :  { %v2625_v51 = vadd.f32 %v2623_v42, %v2619_v44  ;;  %v8274_v44 = vld [vmem:[#allocation9] sm:$0xff] }
0x1700   :  { %6383 = vtanh.f32 %v2625_v51 }
0x170d   :  { %v6384_v23 = vpop.eup %6383 }
0x170e   :  { %v2627_v2 = vmul.f32 %v6384_v23, %v6382_v14 }
0x1710   :  { %2631 = vrot.lane.b32.xlu1 %v2627_v2, %s7002_s6 }
0x1782   :  { %v2632_v18 = vpop.permute.xlu1 %2631 }
0x1783   :  { %6099 = vmatmul.mubr.msk.f32.vlgmr.msra.gmra.mxu0 %vm1407_vm1, %v2632_v18  ;;  %v9205_v18 = vld [vmem:[#allocation40_spill] sm:$0xff] }
0x1784   :  { %2856 = vmatpush1.msra.mxu0 %v8207_v38  ;;  %2903 = vmatprep.mubr.f32.mxu0 %v9184_v37 }
0x1785   :  { %2857 = vmatprep.subr.mxu0 %v8211_v16 }
0x1786   :  { %2858 = vmatpush1.msra.mxu0 %v8214_v63 }
0x1787   :  { %2859 = vmatprep.subr.mxu0 %v8217_v52 }
0x1788   :  { %2860 = vmatpush1.msra.mxu0 %v8220_v34 }
0x1789   :  { %2861 = vmatprep.subr.mxu0 %v8223_v47 }
0x178a   :  { %2862 = vmatpush1.msra.mxu0 %v7956_v22 }
0x178b   :  { %2863 = vmatprep.subr.mxu0 %v7959_v60  ;;  %v9202_v60 = vld [vmem:[#allocation37_spill] sm:$0xff] }
0x178c   :  { %2864 = vmatpush1.msra.mxu0 %v7962_v62 }
0x178d   :  { %2865 = vmatprep.subr.mxu0 %v7965_v4 }
0x178e   :  { %2866 = vmatpush1.msra.mxu0 %v7968_v8 }
0x178f   :  { %2867 = vmatprep.subr.mxu0 %v7971_v10 }
0x1790   :  { %2868 = vmatpush1.msra.mxu0 %v7974_v15 }
0x1791   :  { %2869 = vmatprep.subr.mxu0 %v7977_v19 }
0x1792   :  { %2870 = vmatpush1.msra.mxu0 %v7980_v25 }
0x1793   :  { %3059 = vmatprep.subr.mxu0 %v8235_v54 }
0x1843   :  { %v2701_v22 = vpop.f32.mrf.mxu0 }
0x1844   :  { %v2706_v7 = vadd.f32 %v2701_v22, %v9202_v60 }
0x1845   :  { %v2703_v4 = vpop.f32.mrf.mxu0 }
0x1846   :  { %v6100_v62 = vmul.f32 -1.442695, %v2706_v7  ;;  %v2707_v8 = vadd.f32 %v2703_v4, %v9203_v9 }
0x1848   :  { %6385 = vpow2.f32 %v6100_v62  ;;  %v6101_v25 = vmul.f32 -1.442695, %v2707_v8 }
0x1849   :  { %6387 = vtanh.f32 %v2707_v8 }
0x1855   :  { %v6386_v26 = vpop.eup %6385 }
0x1856   :  { %v2711_v10 = vadd.f32 1.0, %v6386_v26  ;;  %v6388_v15 = vpop.eup %6387 }
0x1858   :  { %6389 = vrcp.f32 %v2711_v10 }
0x1859   :  { %6391 = vpow2.f32 %v6101_v25 }
0x1865   :  { %v6390_v19 = vpop.eup %6389 }
0x1866   :  { %v2722_v5 = vmul.f32 %v6390_v19, %v6388_v15  ;;  %v6392_v61 = vpop.eup %6391  ;;  %v2721_v11 = vmul.f32 %v6390_v19, %v2625_v51  ;;  %v9204_v51 = vld [vmem:[#allocation39_spill] sm:$0xff] }
0x1867   :  { %v2718_v56 = vadd.f32 1.0, %v6392_v61 }
0x1868   :  { %2724 = vrot.lane.b32.xlu0 %v2722_v5, %s7002_s6 }
0x1869   :  { %6393 = vrcp.f32 %v2718_v56 }
0x1876   :  { %v6394_v6 = vpop.eup %6393 }
0x18da   :  { %v2725_v57 = vpop.permute.xlu0 %2724 }
0x18db   :  { %v2727_v0 = vadd.f32 %v2725_v57, %v2721_v11 }
0x18dd   :  { %6395 = vtanh.f32 %v2727_v0 }
0x18ea   :  { %v6396_v43 = vpop.eup %6395 }
0x18eb   :  { %v2729_v49 = vmul.f32 %v6396_v43, %v6394_v6 }
0x18ed   :  { %2733 = vrot.lane.b32.xlu1 %v2729_v49, %s7002_s6 }
0x195f   :  { %v2734_v59 = vpop.permute.xlu1 %2733 }
0x1960   :  { %6102 = vmatmul.mubr.msk.f32.vlgmr.msra.gmra.mxu1 %vm1407_vm1, %v2734_v59  ;;  %v9207_v59 = vld [vmem:[#allocation42_spill] sm:$0xff] }
0x1961   :  { %2958 = vmatpush1.msra.mxu1 %v8207_v38  ;;  %3005 = vmatprep.mubr.f32.mxu1 %v9184_v37 }
0x1962   :  { %2959 = vmatprep.subr.mxu1 %v8211_v16 }
0x1963   :  { %2960 = vmatpush1.msra.mxu1 %v8214_v63 }
0x1964   :  { %2961 = vmatprep.subr.mxu1 %v8217_v52 }
0x1965   :  { %2962 = vmatpush1.msra.mxu1 %v8220_v34 }
0x1966   :  { %2963 = vmatprep.subr.mxu1 %v8223_v47 }
0x1967   :  { %2964 = vmatpush1.msra.mxu1 %v8250_v27 }
0x1968   :  { %2965 = vmatprep.subr.mxu1 %v8253_v30 }
0x1969   :  { %2966 = vmatpush1.msra.mxu1 %v8256_v36 }
0x196a   :  { %2967 = vmatprep.subr.mxu1 %v8259_v13 }
0x196b   :  { %2968 = vmatpush1.msra.mxu1 %v8262_v12 }
0x196c   :  { %2969 = vmatprep.subr.mxu1 %v8265_v3 }
0x196d   :  { %2970 = vmatpush1.msra.mxu1 %v8268_v48 }
0x196e   :  { %2971 = vmatprep.subr.mxu1 %v8271_v24 }
0x196f   :  { %2972 = vmatpush1.msra.mxu1 %v8274_v44 }
0x1970   :  { %3161 = vmatprep.subr.mxu1 %v8235_v54 }
0x1a20   :  { %v2803_v42 = vpop.f32.mrf.mxu1 }
0x1a21   :  { %v2808_v14 = vadd.f32 %v2803_v42, %v9204_v51 }
0x1a22   :  { %v2805_v2 = vpop.f32.mrf.mxu1 }
0x1a23   :  { %v6103_v23 = vmul.f32 -1.442695, %v2808_v14  ;;  %v2809_v22 = vadd.f32 %v2805_v2, %v9205_v18 }
0x1a25   :  { %6397 = vpow2.f32 %v6103_v23  ;;  %v6104_v8 = vmul.f32 -1.442695, %v2809_v22 }
0x1a26   :  { %6399 = vtanh.f32 %v2809_v22 }
0x1a32   :  { %v6398_v60 = vpop.eup %6397 }
0x1a33   :  { %v2813_v7 = vadd.f32 1.0, %v6398_v60  ;;  %v6400_v62 = vpop.eup %6399 }
0x1a35   :  { %6401 = vrcp.f32 %v2813_v7 }
0x1a36   :  { %6403 = vpow2.f32 %v6104_v8 }
0x1a42   :  { %v6402_v4 = vpop.eup %6401 }
0x1a43   :  { %v2824_v9 = vmul.f32 %v6402_v4, %v6400_v62  ;;  %v6404_v26 = vpop.eup %6403  ;;  %v2823_v15 = vmul.f32 %v6402_v4, %v2727_v0  ;;  %v9206_v0 = vld [vmem:[#allocation41_spill] sm:$0xff] }
0x1a44   :  { %v2820_v10 = vadd.f32 1.0, %v6404_v26 }
0x1a45   :  { %2826 = vrot.lane.b32.xlu0 %v2824_v9, %s7002_s6 }
0x1a46   :  { %6405 = vrcp.f32 %v2820_v10 }
0x1a53   :  { %v6406_v25 = vpop.eup %6405 }
0x1ab7   :  { %v2827_v19 = vpop.permute.xlu0 %2826 }
0x1ab8   :  { %v2829_v5 = vadd.f32 %v2827_v19, %v2823_v15 }
0x1aba   :  { %6407 = vtanh.f32 %v2829_v5 }
0x1ac7   :  { %v6408_v61 = vpop.eup %6407 }
0x1ac8   :  { %v2831_v56 = vmul.f32 %v6408_v61, %v6406_v25 }
0x1aca   :  { %2835 = vrot.lane.b32.xlu1 %v2831_v56, %s7002_s6 }
0x1b3c   :  { %v2836_v11 = vpop.permute.xlu1 %2835 }
0x1b3d   :  { %6105 = vmatmul.mubr.msk.f32.vlgmr.msra.gmra.mxu0 %vm1407_vm1, %v2836_v11  ;;  %v9209_v11 = vld [vmem:[#allocation44_spill] sm:$0xff] }
0x1b3e   :  { %3060 = vmatpush1.msra.mxu0 %v8207_v38  ;;  %3107 = vmatprep.mubr.f32.mxu0 %v9184_v37 }
0x1b3f   :  { %3061 = vmatprep.subr.mxu0 %v8211_v16 }
0x1b40   :  { %3062 = vmatpush1.msra.mxu0 %v8214_v63 }
0x1b41   :  { %3063 = vmatprep.subr.mxu0 %v8217_v52 }
0x1b42   :  { %3064 = vmatpush1.msra.mxu0 %v8220_v34 }
0x1b43   :  { %3065 = vmatprep.subr.mxu0 %v8223_v47 }
0x1b44   :  { %3066 = vmatpush1.msra.mxu0 %v8250_v27 }
0x1b45   :  { %3067 = vmatprep.subr.mxu0 %v8253_v30 }
0x1b46   :  { %3068 = vmatpush1.msra.mxu0 %v8256_v36 }
0x1b47   :  { %3069 = vmatprep.subr.mxu0 %v8259_v13 }
0x1b48   :  { %3070 = vmatpush1.msra.mxu0 %v8262_v12 }
0x1b49   :  { %3071 = vmatprep.subr.mxu0 %v8265_v3 }
0x1b4a   :  { %3072 = vmatpush1.msra.mxu0 %v8268_v48 }
0x1b4b   :  { %3073 = vmatprep.subr.mxu0 %v8271_v24 }
0x1b4c   :  { %3074 = vmatpush1.msra.mxu0 %v8274_v44 }
0x1b4d   :  { %3263 = vmatprep.subr.mxu0 %v8235_v54 }
0x1bfd   :  { %v2905_v57 = vpop.f32.mrf.mxu0 }
0x1bfe   :  { %v2910_v6 = vadd.f32 %v2905_v57, %v9206_v0 }
0x1bff   :  { %v2907_v49 = vpop.f32.mrf.mxu0 }
0x1c00   :  { %v6106_v43 = vmul.f32 -1.442695, %v2910_v6  ;;  %v2911_v42 = vadd.f32 %v2907_v49, %v9207_v59 }
0x1c02   :  { %6409 = vpow2.f32 %v6106_v43  ;;  %v6107_v22 = vmul.f32 -1.442695, %v2911_v42 }
0x1c03   :  { %6411 = vtanh.f32 %v2911_v42 }
0x1c0f   :  { %v6410_v51 = vpop.eup %6409 }
0x1c10   :  { %v2915_v14 = vadd.f32 1.0, %v6410_v51  ;;  %v6412_v23 = vpop.eup %6411 }
0x1c12   :  { %6413 = vrcp.f32 %v2915_v14 }
0x1c13   :  { %6415 = vpow2.f32 %v6107_v22 }
0x1c1f   :  { %v6414_v2 = vpop.eup %6413 }
0x1c20   :  { %v2926_v18 = vmul.f32 %v6414_v2, %v6412_v23  ;;  %v6416_v60 = vpop.eup %6415  ;;  %v2925_v62 = vmul.f32 %v6414_v2, %v2829_v5  ;;  %v9208_v5 = vld [vmem:[#allocation43_spill] sm:$0xff] }
0x1c21   :  { %v2922_v7 = vadd.f32 1.0, %v6416_v60 }
0x1c22   :  { %2928 = vrot.lane.b32.xlu0 %v2926_v18, %s7002_s6 }
0x1c23   :  { %6417 = vrcp.f32 %v2922_v7 }
0x1c30   :  { %v6418_v8 = vpop.eup %6417 }
0x1c94   :  { %v2929_v4 = vpop.permute.xlu0 %2928 }
0x1c95   :  { %v2931_v9 = vadd.f32 %v2929_v4, %v2925_v62 }
0x1c97   :  { %6419 = vtanh.f32 %v2931_v9 }
0x1ca4   :  { %v6420_v26 = vpop.eup %6419 }
0x1ca5   :  { %v2933_v10 = vmul.f32 %v6420_v26, %v6418_v8 }
0x1ca7   :  { %2937 = vrot.lane.b32.xlu1 %v2933_v10, %s7002_s6 }
0x1d19   :  { %v2938_v15 = vpop.permute.xlu1 %2937 }
0x1d1a   :  { %6108 = vmatmul.mubr.msk.f32.vlgmr.msra.gmra.mxu1 %vm1407_vm1, %v2938_v15  ;;  %v9211_v15 = vld [vmem:[#allocation46_spill] sm:$0xff] }
0x1d1b   :  { %3162 = vmatpush1.msra.mxu1 %v8207_v38  ;;  %3209 = vmatprep.mubr.f32.mxu1 %v9184_v37 }
0x1d1c   :  { %3163 = vmatprep.subr.mxu1 %v8211_v16 }
0x1d1d   :  { %3164 = vmatpush1.msra.mxu1 %v8214_v63 }
0x1d1e   :  { %3165 = vmatprep.subr.mxu1 %v8217_v52 }
0x1d1f   :  { %3166 = vmatpush1.msra.mxu1 %v8220_v34 }
0x1d20   :  { %3167 = vmatprep.subr.mxu1 %v8223_v47 }
0x1d21   :  { %3168 = vmatpush1.msra.mxu1 %v8250_v27 }
0x1d22   :  { %3169 = vmatprep.subr.mxu1 %v8253_v30 }
0x1d23   :  { %3170 = vmatpush1.msra.mxu1 %v8256_v36 }
0x1d24   :  { %3171 = vmatprep.subr.mxu1 %v8259_v13 }
0x1d25   :  { %3172 = vmatpush1.msra.mxu1 %v8262_v12 }
0x1d26   :  { %3173 = vmatprep.subr.mxu1 %v8265_v3 }
0x1d27   :  { %3174 = vmatpush1.msra.mxu1 %v8268_v48 }
0x1d28   :  { %3175 = vmatprep.subr.mxu1 %v8271_v24 }
0x1d29   :  { %3176 = vmatpush1.msra.mxu1 %v8274_v44 }
0x1d2a   :  { %3365 = vmatprep.subr.mxu1 %v8235_v54 }
0x1dda   :  { %v3007_v19 = vpop.f32.mrf.mxu1 }
0x1ddb   :  { %v3012_v25 = vadd.f32 %v3007_v19, %v9208_v5 }
0x1ddc   :  { %v3009_v56 = vpop.f32.mrf.mxu1 }
0x1ddd   :  { %v6109_v61 = vmul.f32 -1.442695, %v3012_v25  ;;  %v3013_v57 = vadd.f32 %v3009_v56, %v9209_v11 }
0x1ddf   :  { %6421 = vpow2.f32 %v6109_v61  ;;  %v6110_v42 = vmul.f32 -1.442695, %v3013_v57 }
0x1de0   :  { %6423 = vtanh.f32 %v3013_v57 }
0x1dec   :  { %v6422_v0 = vpop.eup %6421 }
0x1ded   :  { %v3017_v6 = vadd.f32 1.0, %v6422_v0  ;;  %v6424_v43 = vpop.eup %6423 }
0x1def   :  { %6425 = vrcp.f32 %v3017_v6 }
0x1df0   :  { %6427 = vpow2.f32 %v6110_v42 }
0x1dfc   :  { %v6426_v49 = vpop.eup %6425 }
0x1dfd   :  { %v3028_v59 = vmul.f32 %v6426_v49, %v6424_v43  ;;  %v6428_v51 = vpop.eup %6427  ;;  %v3027_v23 = vmul.f32 %v6426_v49, %v2931_v9  ;;  %v9210_v9 = vld [vmem:[#allocation45_spill] sm:$0xff] }
0x1dfe   :  { %v3024_v14 = vadd.f32 1.0, %v6428_v51 }
0x1dff   :  { %3030 = vrot.lane.b32.xlu0 %v3028_v59, %s7002_s6 }
0x1e00   :  { %6429 = vrcp.f32 %v3024_v14 }
0x1e0d   :  { %v6430_v22 = vpop.eup %6429 }
0x1e71   :  { %v3031_v2 = vpop.permute.xlu0 %3030 }
0x1e72   :  { %v3033_v18 = vadd.f32 %v3031_v2, %v3027_v23 }
0x1e74   :  { %6431 = vtanh.f32 %v3033_v18 }
0x1e81   :  { %v6432_v60 = vpop.eup %6431 }
0x1e82   :  { %v3035_v7 = vmul.f32 %v6432_v60, %v6430_v22 }
0x1e84   :  { %3039 = vrot.lane.b32.xlu1 %v3035_v7, %s7002_s6 }
0x1ef6   :  { %v3040_v62 = vpop.permute.xlu1 %3039 }
0x1ef7   :  { %6111 = vmatmul.mubr.msk.f32.vlgmr.msra.gmra.mxu0 %vm1407_vm1, %v3040_v62  ;;  %v9213_v62 = vld [vmem:[#allocation52_spill] sm:$0xff] }
0x1ef8   :  { %3264 = vmatpush1.msra.mxu0 %v8207_v38  ;;  %3311 = vmatprep.mubr.f32.mxu0 %v9184_v37 }
0x1ef9   :  { %3265 = vmatprep.subr.mxu0 %v8211_v16 }
0x1efa   :  { %3266 = vmatpush1.msra.mxu0 %v8214_v63 }
0x1efb   :  { %3267 = vmatprep.subr.mxu0 %v8217_v52 }
0x1efc   :  { %3268 = vmatpush1.msra.mxu0 %v8220_v34 }
0x1efd   :  { %3269 = vmatprep.subr.mxu0 %v8223_v47 }
0x1efe   :  { %3270 = vmatpush1.msra.mxu0 %v8250_v27 }
0x1eff   :  { %3271 = vmatprep.subr.mxu0 %v8253_v30 }
0x1f00   :  { %3272 = vmatpush1.msra.mxu0 %v8256_v36 }
0x1f01   :  { %3273 = vmatprep.subr.mxu0 %v8259_v13 }
0x1f02   :  { %3274 = vmatpush1.msra.mxu0 %v8262_v12 }
0x1f03   :  { %3275 = vmatprep.subr.mxu0 %v8265_v3 }
0x1f04   :  { %3276 = vmatpush1.msra.mxu0 %v8268_v48 }
0x1f05   :  { %3277 = vmatprep.subr.mxu0 %v8271_v24 }
0x1f06   :  { %3278 = vmatpush1.msra.mxu0 %v8274_v44 }
0x1f07   :  { %3467 = vmatprep.subr.mxu0 %v8235_v54 }
0x1fb7   :  { %v3109_v4 = vpop.f32.mrf.mxu0 }
0x1fb8   :  { %v3114_v8 = vadd.f32 %v3109_v4, %v9210_v9 }
0x1fb9   :  { %v3111_v10 = vpop.f32.mrf.mxu0 }
0x1fba   :  { %v6112_v26 = vmul.f32 -1.442695, %v3114_v8  ;;  %v3115_v19 = vadd.f32 %v3111_v10, %v9211_v15 }
0x1fbc   :  { %6433 = vpow2.f32 %v6112_v26  ;;  %v6113_v57 = vmul.f32 -1.442695, %v3115_v19 }
0x1fbd   :  { %6435 = vtanh.f32 %v3115_v19 }
0x1fc9   :  { %v6434_v5 = vpop.eup %6433 }
0x1fca   :  { %v3119_v25 = vadd.f32 1.0, %v6434_v5  ;;  %v6436_v61 = vpop.eup %6435 }
0x1fcc   :  { %6437 = vrcp.f32 %v3119_v25 }
0x1fcd   :  { %6439 = vpow2.f32 %v6113_v57 }
0x1fd9   :  { %v6438_v56 = vpop.eup %6437 }
0x1fda   :  { %v3130_v11 = vmul.f32 %v6438_v56, %v6436_v61  ;;  %v6440_v0 = vpop.eup %6439  ;;  %v3129_v43 = vmul.f32 %v6438_v56, %v3033_v18  ;;  %v9212_v18 = vld [vmem:[#allocation47_spill] sm:$0xff] }
0x1fdb   :  { %v3126_v6 = vadd.f32 1.0, %v6440_v0 }
0x1fdc   :  { %3132 = vrot.lane.b32.xlu0 %v3130_v11, %s7002_s6 }
0x1fdd   :  { %6441 = vrcp.f32 %v3126_v6 }
0x1fea   :  { %v6442_v42 = vpop.eup %6441 }
0x204e   :  { %v3133_v49 = vpop.permute.xlu0 %3132 }
0x204f   :  { %v3135_v59 = vadd.f32 %v3133_v49, %v3129_v43  ;;  %v9214_v49 = vld [vmem:[#allocation53_spill] sm:$0xff] }
0x2051   :  { %6443 = vtanh.f32 %v3135_v59 }
0x205e   :  { %v6444_v51 = vpop.eup %6443 }
0x205f   :  { %v3137_v14 = vmul.f32 %v6444_v51, %v6442_v42 }
0x2061   :  { %3141 = vrot.lane.b32.xlu1 %v3137_v14, %s7002_s6  ;;  %v9215_v14 = vld [vmem:[#allocation54_spill] sm:$0xff] }
0x20d3   :  { %v3142_v23 = vpop.permute.xlu1 %3141 }
0x20d4   :  { %6114 = vmatmul.mubr.msk.f32.vlgmr.msra.gmra.mxu1 %vm1407_vm1, %v3142_v23 }
0x20d5   :  { %3366 = vmatpush1.msra.mxu1 %v8207_v38  ;;  %3413 = vmatprep.mubr.f32.mxu1 %v9184_v37 }
0x20d6   :  { %3367 = vmatprep.subr.mxu1 %v8211_v16 }
0x20d7   :  { %3368 = vmatpush1.msra.mxu1 %v8214_v63 }
0x20d8   :  { %3369 = vmatprep.subr.mxu1 %v8217_v52 }
0x20d9   :  { %3370 = vmatpush1.msra.mxu1 %v8220_v34 }
0x20da   :  { %3371 = vmatprep.subr.mxu1 %v8223_v47 }
0x20db   :  { %3372 = vmatpush1.msra.mxu1 %v8250_v27 }
0x20dc   :  { %3373 = vmatprep.subr.mxu1 %v8253_v30 }
0x20dd   :  { %3374 = vmatpush1.msra.mxu1 %v8256_v36 }
0x20de   :  { %3375 = vmatprep.subr.mxu1 %v8259_v13 }
0x20df   :  { %3376 = vmatpush1.msra.mxu1 %v8262_v12 }
0x20e0   :  { %3377 = vmatprep.subr.mxu1 %v8265_v3 }
0x20e1   :  { %3378 = vmatpush1.msra.mxu1 %v8268_v48 }
0x20e2   :  { %3379 = vmatprep.subr.mxu1 %v8271_v24 }
0x20e3   :  { %3380 = vmatpush1.msra.mxu1 %v8274_v44 }
0x20e4   :  { %3569 = vmatprep.subr.mxu1 %v8235_v54 }
0x2194   :  { %v3211_v2 = vpop.f32.mrf.mxu1 }
0x2195   :  { %v3216_v22 = vadd.f32 %v3211_v2, %v9212_v18 }
0x2196   :  { %v3213_v7 = vpop.f32.mrf.mxu1 }
0x2197   :  { %v6115_v60 = vmul.f32 -1.442695, %v3216_v22  ;;  %v3217_v4 = vadd.f32 %v3213_v7, %v9213_v62 }
0x2199   :  { %6445 = vpow2.f32 %v6115_v60  ;;  %v6116_v19 = vmul.f32 -1.442695, %v3217_v4 }
0x219a   :  { %6447 = vtanh.f32 %v3217_v4 }
0x21a6   :  { %v6446_v9 = vpop.eup %6445 }
0x21a7   :  { %v3221_v8 = vadd.f32 1.0, %v6446_v9  ;;  %v6448_v26 = vpop.eup %6447 }
0x21a9   :  { %6449 = vrcp.f32 %v3221_v8 }
0x21aa   :  { %6451 = vpow2.f32 %v6116_v19 }
0x21b6   :  { %v6450_v10 = vpop.eup %6449 }
0x21b7   :  { %v3232_v15 = vmul.f32 %v6450_v10, %v6448_v26  ;;  %v6452_v54 = vpop.eup %6451  ;;  %v3231_v25 = vmul.f32 %v6450_v10, %v3135_v59 }
0x21b8   :  { %v3228_v5 = vadd.f32 1.0, %v6452_v54 }
0x21b9   :  { %3234 = vrot.lane.b32.xlu0 %v3232_v15, %s7002_s6 }
0x21ba   :  { %6453 = vrcp.f32 %v3228_v5 }
0x21c7   :  { %v6454_v11 = vpop.eup %6453 }
0x222b   :  { %v3235_v61 = vpop.permute.xlu0 %3234 }
0x222c   :  { %v3237_v56 = vadd.f32 %v3235_v61, %v3231_v25 }
0x222e   :  { %6455 = vtanh.f32 %v3237_v56 }
0x223b   :  { %v6456_v57 = vpop.eup %6455 }
0x223c   :  { %v3239_v0 = vmul.f32 %v6456_v57, %v6454_v11 }
0x223e   :  { %3243 = vrot.lane.b32.xlu1 %v3239_v0, %s7002_s6 }
0x22b0   :  { %v3244_v6 = vpop.permute.xlu1 %3243 }
0x22b1   :  { %6117 = vmatmul.mubr.msk.f32.vlgmr.msra.gmra.mxu0 %vm1407_vm1, %v3244_v6 }
0x22b2   :  { %3468 = vmatpush1.msra.mxu0 %v8207_v38  ;;  %3515 = vmatprep.mubr.f32.mxu0 %v9184_v37 }
0x22b3   :  { %3469 = vmatprep.subr.mxu0 %v8211_v16 }
0x22b4   :  { %3470 = vmatpush1.msra.mxu0 %v8214_v63 }
0x22b5   :  { %3471 = vmatprep.subr.mxu0 %v8217_v52 }
0x22b6   :  { %3472 = vmatpush1.msra.mxu0 %v8220_v34 }
0x22b7   :  { %3473 = vmatprep.subr.mxu0 %v8223_v47 }
0x22b8   :  { %3474 = vmatpush1.msra.mxu0 %v8250_v27 }
0x22b9   :  { %3475 = vmatprep.subr.mxu0 %v8253_v30 }
0x22ba   :  { %3476 = vmatpush1.msra.mxu0 %v8256_v36 }
0x22bb   :  { %3477 = vmatprep.subr.mxu0 %v8259_v13 }
0x22bc   :  { %3478 = vmatpush1.msra.mxu0 %v8262_v12 }
0x22bd   :  { %3479 = vmatprep.subr.mxu0 %v8265_v3 }
0x22be   :  { %3480 = vmatpush1.msra.mxu0 %v8268_v48 }
0x22bf   :  { %3481 = vmatprep.subr.mxu0 %v8271_v24 }
0x22c0   :  { %3482 = vmatpush1.msra.mxu0 %v8274_v44 }
0x2371   :  { %v3313_v43 = vpop.f32.mrf.mxu0 }
0x2372   :  { %v3318_v59 = vadd.f32 %v3313_v43, %v9214_v49  ;;  %v8419_v43 = vld [vmem:[#allocation12 + $0x70] sm:$0xff] }
0x2373   :  { %v3315_v51 = vpop.f32.mrf.mxu0 }
0x2374   :  { %v6118_v42 = vmul.f32 -1.442695, %v3318_v59  ;;  %v3319_v23 = vadd.f32 %v3315_v51, %v9215_v14  ;;  %v8421_v59 = vld [vmem:[#allocation12 + $0x68] sm:$0xff]  ;;  %v8427_v51 = vld [vmem:[#allocation12 + $0x58] sm:$0xff]  ;;  %v8431_v14 = vld [vmem:[#allocation12 + $0x50] sm:$0xff] }
0x2376   :  { %6457 = vpow2.f32 %v6118_v42  ;;  %v6119_v62 = vmul.f32 -1.442695, %v3319_v23  ;;  %v8424_v42 = vld [vmem:[#allocation12 + $0x60] sm:$0xff] }
0x2377   :  { %6459 = vtanh.f32 %v3319_v23  ;;  %v8434_v23 = vld [vmem:[#allocation12 + $0x48] sm:$0xff] }
0x2383   :  { %v6458_v2 = vpop.eup %6457 }
0x2384   :  { %v3323_v18 = vadd.f32 1.0, %v6458_v2  ;;  %v6460_v22 = vpop.eup %6459  ;;  %v8437_v2 = vld [vmem:[#allocation12 + $0x40] sm:$0xff] }
0x2386   :  { %6461 = vrcp.f32 %v3323_v18  ;;  %v8440_v18 = vld [vmem:[#allocation12 + $0x38] sm:$0xff] }
0x2387   :  { %6463 = vpow2.f32 %v6119_v62  ;;  %v8452_v62 = vld [vmem:[#allocation12 + $0x18] sm:$0xff] }
0x2393   :  { %v6462_v60 = vpop.eup %6461 }
0x2394   :  { %v3334_v7 = vmul.f32 %v6462_v60, %v6460_v22  ;;  %v6464_v4 = vpop.eup %6463  ;;  %v3333_v8 = vmul.f32 %v6462_v60, %v3237_v56  ;;  %v8443_v22 = vld [vmem:[#allocation12 + $0x30] sm:$0xff]  ;;  %v8446_v60 = vld [vmem:[#allocation12 + $0x28] sm:$0xff] }
0x2395   :  { %v3330_v9 = vadd.f32 1.0, %v6464_v4  ;;  %v8455_v4 = vld [vmem:[#allocation12 + $0x10] sm:$0xff] }
0x2396   :  { %3336 = vrot.lane.b32.xlu0 %v3334_v7, %s7002_s6  ;;  %v8449_v7 = vld [vmem:[#allocation12 + $0x20] sm:$0xff] }
0x2397   :  { %6465 = vrcp.f32 %v3330_v9  ;;  %v8458_v9 = vld [vmem:[#allocation12 + $0x8] sm:$0xff] }
0x23a4   :  { %v6466_v15 = vpop.eup %6465 }
0x2408   :  { %v3337_v26 = vpop.permute.xlu0 %3336 }
0x2409   :  { %v3339_v10 = vadd.f32 %v3337_v26, %v3333_v8  ;;  %v8461_v8 = vld [vmem:[#allocation12] sm:$0xff] }
0x240b   :  { %6467 = vtanh.f32 %v3339_v10 }
0x2418   :  { %v6468_v19 = vpop.eup %6467 }
0x2419   :  { %v3341_v54 = vmul.f32 %v6468_v19, %v6466_v15 }
0x241b   :  { %3345 = vrot.lane.b32.xlu1 %v3341_v54, %s7002_s6 }
0x248d   :  { %v3346_v5 = vpop.permute.xlu1 %3345 }
0x248e   :  { %6120 = vmatmul.mubr.msk.f32.vlgmr.msra.gmra.mxu1 %vm1407_vm1, %v3346_v5  ;;  %v9219_v5 = vld [vmem:[#allocation58_spill] sm:$0xff] }
0x248f   :  { %3570 = vmatpush1.msra.mxu1 %v8207_v38  ;;  %3617 = vmatprep.mubr.f32.mxu1 %v9184_v37 }
0x2490   :  { %3571 = vmatprep.subr.mxu1 %v8211_v16  ;;  %v9216_v16 = vld [vmem:[#allocation55_spill] sm:$0xff] }
0x2491   :  { %3572 = vmatpush1.msra.mxu1 %v8214_v63 }
0x2492   :  { %3573 = vmatprep.subr.mxu1 %v8217_v52 }
0x2493   :  { %3574 = vmatpush1.msra.mxu1 %v8220_v34 }
0x2494   :  { %3575 = vmatprep.subr.mxu1 %v8223_v47  ;;  %v9217_v47 = vld [vmem:[#allocation56_spill] sm:$0xff] }
0x2495   :  { %3576 = vmatpush1.msra.mxu1 %v8250_v27 }
0x2496   :  { %3577 = vmatprep.subr.mxu1 %v8253_v30 }
0x2497   :  { %3578 = vmatpush1.msra.mxu1 %v8256_v36 }
0x2498   :  { %3579 = vmatprep.subr.mxu1 %v8259_v13 }
0x2499   :  { %3580 = vmatpush1.msra.mxu1 %v8262_v12 }
0x249a   :  { %3581 = vmatprep.subr.mxu1 %v8265_v3 }
0x249b   :  { %3582 = vmatpush1.msra.mxu1 %v8268_v48  ;;  %v8411_v48 = vld [vmem:[#allocation12 + $0x78] sm:$0xff] }
0x249c   :  { %3583 = vmatprep.subr.mxu1 %v8271_v24  ;;  %3666 = vmatprep.subr.mxu0 %v8411_v48 }
0x249d   :  { %3584 = vmatpush1.msra.mxu1 %v8274_v44 }
0x249e   :  { %3768 = vmatprep.subr.mxu1 %v8411_v48 }
0x254e   :  { %v3415_v38 = vpop.f32.mrf.mxu1 }
0x254f   :  { %v3420_v63 = vadd.f32 %v3415_v38, %v9216_v16 }
0x2550   :  { %v3417_v34 = vpop.f32.mrf.mxu1 }
0x2551   :  { %v6121_v52 = vmul.f32 -1.442695, %v3420_v63  ;;  %v3421_v27 = vadd.f32 %v3417_v34, %v9217_v47 }
0x2553   :  { %6469 = vpow2.f32 %v6121_v52  ;;  %v6122_v24 = vmul.f32 -1.442695, %v3421_v27 }
0x2554   :  { %6471 = vtanh.f32 %v3421_v27  ;;  %v1130_v27 = vadd.f32 %v7859_v1, %v7756_v45 }
0x2560   :  { %v6470_v30 = vpop.eup %6469 }
0x2561   :  { %v3425_v36 = vadd.f32 1.0, %v6470_v30  ;;  %v6472_v13 = vpop.eup %6471 }
0x2563   :  { %6473 = vrcp.f32 %v3425_v36  ;;  %v1327_v36 = vadd.f32 %v7984_v28, %v1130_v27 }
0x2564   :  { %6475 = vpow2.f32 %v6122_v24 }
0x2570   :  { %v6474_v12 = vpop.eup %6473 }
0x2571   :  { %v3436_v3 = vmul.f32 %v6474_v12, %v6472_v13  ;;  %v6476_v44 = vpop.eup %6475  ;;  %v3435_v61 = vmul.f32 %v6474_v12, %v3339_v10  ;;  %v9218_v10 = vld [vmem:[#allocation57_spill] sm:$0xff] }
0x2572   :  { %v3432_v25 = vadd.f32 1.0, %v6476_v44 }
0x2573   :  { %3438 = vrot.lane.b32.xlu0 %v3436_v3, %s7002_s6 }
0x2574   :  { %6477 = vrcp.f32 %v3432_v25 }
0x2581   :  { %v6478_v57 = vpop.eup %6477 }
0x25e5   :  { %v3439_v56 = vpop.permute.xlu0 %3438 }
0x25e6   :  { %v8415_v11 = vadd.f32 %v3439_v56, %v3435_v61 }
0x25e8   :  { %6479 = vtanh.f32 %v8415_v11 }
0x25f5   :  { %v6480_v0 = vpop.eup %6479 }
0x25f6   :  { %v3443_v6 = vmul.f32 %v6480_v0, %v6478_v57 }
0x25f8   :  { %3447 = vrot.lane.b32.xlu1 %v3443_v6, %s7002_s6 }
0x266a   :  { %v3448_v49 = vpop.permute.xlu1 %3447 }
0x266b   :  { %6123 = vmatmul.mubr.msk.f32.vlgmr.msra.gmra.mxu0 %vm1407_vm1, %v3448_v49 }
0x266c   :  { %3667 = vmatpush1.msra.mxu0 %v8419_v43  ;;  %3714 = vmatprep.mubr.f32.mxu0 %v9184_v37 }
0x266d   :  { %3668 = vmatprep.subr.mxu0 %v8421_v59 }
0x266e   :  { %3669 = vmatpush1.msra.mxu0 %v8424_v42 }
0x266f   :  { %3670 = vmatprep.subr.mxu0 %v8427_v51 }
0x2670   :  { %3671 = vmatpush1.msra.mxu0 %v8431_v14 }
0x2671   :  { %3672 = vmatprep.subr.mxu0 %v8434_v23 }
0x2672   :  { %3673 = vmatpush1.msra.mxu0 %v8437_v2 }
0x2673   :  { %3674 = vmatprep.subr.mxu0 %v8440_v18 }
0x2674   :  { %3675 = vmatpush1.msra.mxu0 %v8443_v22 }
0x2675   :  { %3676 = vmatprep.subr.mxu0 %v8446_v60 }
0x2676   :  { %3677 = vmatpush1.msra.mxu0 %v8449_v7 }
0x2677   :  { %3678 = vmatprep.subr.mxu0 %v8452_v62 }
0x2678   :  { %3679 = vmatpush1.msra.mxu0 %v8455_v4 }
0x2679   :  { %3680 = vmatprep.subr.mxu0 %v8458_v9 }
0x267a   :  { %3681 = vmatpush1.msra.mxu0 %v8461_v8 }
0x267b   :  { %3715 = vmatmul.mubr.f32.vlgmr.msra.gmra.mxu0 %v9184_v37  ;;  %3870 = vmatprep.subr.mxu0 %v8411_v48 }
0x267c   :  { %3871 = vmatpush1.msra.mxu0 %v8419_v43  ;;  %3918 = vmatprep.mubr.f32.mxu0 %v9184_v37 }
0x267d   :  { %3872 = vmatprep.subr.mxu0 %v8421_v59 }
0x267e   :  { %3873 = vmatpush1.msra.mxu0 %v8424_v42 }
0x267f   :  { %3874 = vmatprep.subr.mxu0 %v8427_v51 }
0x2680   :  { %3875 = vmatpush1.msra.mxu0 %v8431_v14 }
0x2681   :  { %3876 = vmatprep.subr.mxu0 %v8434_v23 }
0x2682   :  { %3877 = vmatpush1.msra.mxu0 %v8437_v2 }
0x2683   :  { %3878 = vmatprep.subr.mxu0 %v8440_v18 }
0x2684   :  { %3879 = vmatpush1.msra.mxu0 %v8443_v22 }
0x2685   :  { %3880 = vmatprep.subr.mxu0 %v8446_v60 }
0x2686   :  { %3881 = vmatpush1.msra.mxu0 %v8449_v7 }
0x2687   :  { %3882 = vmatprep.subr.mxu0 %v8452_v62 }
0x2688   :  { %3883 = vmatpush1.msra.mxu0 %v8455_v4 }
0x2689   :  { %3884 = vmatprep.subr.mxu0 %v8458_v9 }
0x268a   :  { %3885 = vmatpush1.msra.mxu0 %v8461_v8 }
0x268b   :  { %4074 = vmatprep.subr.mxu0 %v8411_v48 }
0x272b   :  { %v3517_v26 = vpop.f32.mrf.mxu0 }
0x272c   :  { %v3522_v15 = vadd.f32 %v3517_v26, %v9218_v10 }
0x272d   :  { %v3519_v54 = vpop.f32.mrf.mxu0 }
0x272e   :  { %v6124_v19 = vmul.f32 -1.442695, %v3522_v15  ;;  %v3523_v38 = vadd.f32 %v3519_v54, %v9219_v5 }
0x2730   :  { %6481 = vpow2.f32 %v6124_v19  ;;  %v6125_v57 = vmul.f32 -1.442695, %v3523_v38 }
0x2731   :  { %6483 = vtanh.f32 %v3523_v38 }
0x273b   :  { %v3716_v16 = vpop.f32.mrf.mxu0 }
0x273c   :  { %v3721_v63 = vadd.f32 %v3716_v16, %v7904_v17 }
0x273d   :  { %v6482_v52 = vpop.eup %6481  ;;  %v3718_v30 = vpop.f32.mrf.mxu0 }
0x273e   :  { %v3527_v34 = vadd.f32 1.0, %v6482_v52  ;;  %v6129_v47 = vmul.f32 -1.442695, %v3721_v63  ;;  %v6484_v13 = vpop.eup %6483  ;;  %v3722_v12 = vadd.f32 %v3718_v30, %v1327_v36  ;;  %v9220_v30 = vld [vmem:[#allocation59_spill] sm:$0xff] }
0x2740   :  { %6485 = vrcp.f32 %v3527_v34  ;;  %v6130_v1 = vmul.f32 -1.442695, %v3722_v12 }
0x2741   :  { %6487 = vpow2.f32 %v6129_v47 }
0x2742   :  { %6489 = vtanh.f32 %v3722_v12 }
0x274d   :  { %v6486_v3 = vpop.eup %6485 }
0x274e   :  { %v6488_v24 = vpop.eup %6487  ;;  %v3538_v44 = vmul.f32 %v6486_v3, %v6484_v13  ;;  %v3537_v0 = vmul.f32 %v6486_v3, %v8415_v11 }
0x274f   :  { %v3726_v25 = vadd.f32 1.0, %v6488_v24  ;;  %v6490_v17 = vpop.eup %6489 }
0x2750   :  { %3540 = vrot.lane.b32.xlu0 %v3538_v44, %s7002_s6 }
0x2751   :  { %6491 = vrcp.f32 %v3726_v25 }
0x2752   :  { %6493 = vpow2.f32 %v6125_v57 }
0x2753   :  { %6495 = vpow2.f32 %v6130_v1 }
0x275e   :  { %v6492_v61 = vpop.eup %6491 }
0x275f   :  { %v3737_v56 = vmul.f32 %v6492_v61, %v6490_v17  ;;  %v6494_v45 = vpop.eup %6493  ;;  %v3736_v54 = vmul.f32 0.0, %v6492_v61 }
0x2760   :  { %v3534_v28 = vadd.f32 1.0, %v6494_v45  ;;  %v6496_v26 = vpop.eup %6495 }
0x2761   :  { %3739 = vrot.lane.b32.xlu1 %v3737_v56, %s7002_s6  ;;  %v3733_v15 = vadd.f32 1.0, %v6496_v26 }
0x2762   :  { %6497 = vrcp.f32 %v3534_v28 }
0x276f   :  { %v6498_v10 = vpop.eup %6497 }
0x27c2   :  { %v3541_v6 = vpop.permute.xlu0 %3540 }
0x27c3   :  { %v8494_v49 = vadd.f32 %v3541_v6, %v3537_v0 }
0x27c5   :  { %6499 = vtanh.f32 %v8494_v49 }
0x27c6   :  { %6501 = vrcp.f32 %v3733_v15 }
0x27d2   :  { %v6500_v19 = vpop.eup %6499 }
0x27d3   :  { %v3740_v5 = vpop.permute.xlu1 %3739  ;;  %v3545_v38 = vmul.f32 %v6500_v19, %v6498_v10  ;;  %v6502_v11 = vpop.eup %6501 }
0x27d4   :  { %v8497_v16 = vadd.f32 %v3740_v5, %v3736_v54 }
0x27d5   :  { %3549 = vrot.lane.b32.xlu0 %v3545_v38, %s7002_s6 }
0x27d6   :  { %6503 = vtanh.f32 %v8497_v16 }
0x27e3   :  { %v6504_v63 = vpop.eup %6503 }
0x27e4   :  { %v3744_v52 = vmul.f32 %v6504_v63, %v6502_v11 }
0x27e6   :  { %3748 = vrot.lane.b32.xlu1 %v3744_v52, %s7002_s6 }
0x2847   :  { %v3550_v34 = vpop.permute.xlu0 %3549 }
0x2848   :  { %6126 = vmatmul.mubr.msk.f32.vlgmr.msra.gmra.mxu1 %vm1407_vm1, %v3550_v34 }
0x2849   :  { %3769 = vmatpush1.msra.mxu1 %v8419_v43  ;;  %3816 = vmatprep.mubr.f32.mxu1 %v9184_v37 }
0x284a   :  { %3770 = vmatprep.subr.mxu1 %v8421_v59 }
0x284b   :  { %3771 = vmatpush1.msra.mxu1 %v8424_v42 }
0x284c   :  { %3772 = vmatprep.subr.mxu1 %v8427_v51 }
0x284d   :  { %3773 = vmatpush1.msra.mxu1 %v8431_v14 }
0x284e   :  { %3774 = vmatprep.subr.mxu1 %v8434_v23 }
0x284f   :  { %3775 = vmatpush1.msra.mxu1 %v8437_v2 }
0x2850   :  { %3776 = vmatprep.subr.mxu1 %v8440_v18 }
0x2851   :  { %3777 = vmatpush1.msra.mxu1 %v8443_v22 }
0x2852   :  { %3778 = vmatprep.subr.mxu1 %v8446_v60 }
0x2853   :  { %3779 = vmatpush1.msra.mxu1 %v8449_v7 }
0x2854   :  { %3780 = vmatprep.subr.mxu1 %v8452_v62 }
0x2855   :  { %3781 = vmatpush1.msra.mxu1 %v8455_v4 }
0x2856   :  { %3782 = vmatprep.subr.mxu1 %v8458_v9 }
0x2857   :  { %3783 = vmatpush1.msra.mxu1 %v8461_v8 }
0x2858   :  { %v3749_v47 = vpop.permute.xlu1 %3748  ;;  %3972 = vmatprep.subr.mxu1 %v8411_v48 }
0x2859   :  { %6131 = vmatmul.mubr.msk.f32.vlgmr.msra.gmra.mxu1 %vm1407_vm1, %v3749_v47 }
0x285a   :  { %3973 = vmatpush1.msra.mxu1 %v8419_v43  ;;  %4020 = vmatprep.mubr.f32.mxu1 %v9184_v37 }
0x285b   :  { %3974 = vmatprep.subr.mxu1 %v8421_v59 }
0x285c   :  { %3975 = vmatpush1.msra.mxu1 %v8424_v42 }
0x285d   :  { %3976 = vmatprep.subr.mxu1 %v8427_v51 }
0x285e   :  { %3977 = vmatpush1.msra.mxu1 %v8431_v14 }
0x285f   :  { %3978 = vmatprep.subr.mxu1 %v8434_v23 }
0x2860   :  { %3979 = vmatpush1.msra.mxu1 %v8437_v2 }
0x2861   :  { %3980 = vmatprep.subr.mxu1 %v8440_v18 }
0x2862   :  { %3981 = vmatpush1.msra.mxu1 %v8443_v22 }
0x2863   :  { %3982 = vmatprep.subr.mxu1 %v8446_v60 }
0x2864   :  { %3983 = vmatpush1.msra.mxu1 %v8449_v7 }
0x2865   :  { %3984 = vmatprep.subr.mxu1 %v8452_v62 }
0x2866   :  { %3985 = vmatpush1.msra.mxu1 %v8455_v4 }
0x2867   :  { %3986 = vmatprep.subr.mxu1 %v8458_v9 }
0x2868   :  { %3987 = vmatpush1.msra.mxu1 %v8461_v8 }
0x2869   :  { %4176 = vmatprep.subr.mxu1 %v8411_v48 }
0x2908   :  { %v3619_v27 = vpop.f32.mrf.mxu1 }
0x2909   :  { %v3624_v36 = vadd.f32 %v3619_v27, %v9220_v30 }
0x290a   :  { %v3621_v13 = vpop.f32.mrf.mxu1 }
0x290b   :  { %v6127_v12 = vmul.f32 -1.442695, %v3624_v36  ;;  %v8540_v3 = vadd.f32 %v3621_v13, %v7771_v33 }
0x290d   :  { %6505 = vpow2.f32 %v6127_v12 }
0x290e   :  { %6507 = vtanh.f32 %v8540_v3 }
0x2919   :  { %v3818_v24 = vpop.f32.mrf.mxu1 }
0x291a   :  { %v6506_v44 = vpop.eup %6505  ;;  %v3823_v25 = vadd.f32 %v3818_v24, %v7899_v21 }
0x291b   :  { %v3629_v17 = vadd.f32 1.0, %v6506_v44  ;;  %v3820_v56 = vpop.f32.mrf.mxu1  ;;  %v6508_v57 = vpop.eup %6507 }
0x291c   :  { %v6132_v61 = vmul.f32 -1.442695, %v3823_v25  ;;  %v3824_v45 = vadd.f32 %v3820_v56, %v7902_v39 }
0x291d   :  { %6509 = vrcp.f32 %v3629_v17 }
0x291e   :  { %6511 = vpow2.f32 %v6132_v61  ;;  %v6133_v10 = vmul.f32 -1.442695, %v3824_v45 }
0x291f   :  { %6513 = vtanh.f32 %v3824_v45 }
0x292a   :  { %v8545_v1 = vpop.eup %6509 }
0x292b   :  { %v6512_v28 = vpop.eup %6511  ;;  %v8548_v33 = vmul.f32 %v8545_v1, %v6508_v57 }
0x292c   :  { %v3828_v0 = vadd.f32 1.0, %v6512_v28  ;;  %v6514_v21 = vpop.eup %6513 }
0x292e   :  { %6515 = vrcp.f32 %v3828_v0 }
0x292f   :  { %6517 = vpow2.f32 %v6133_v10 }
0x293b   :  { %v6516_v6 = vpop.eup %6515 }
0x293c   :  { %v3839_v26 = vmul.f32 %v6516_v6, %v6514_v21  ;;  %v6518_v15 = vpop.eup %6517  ;;  %v3838_v39 = vmul.f32 %v6516_v6, %v8497_v16 }
0x293d   :  { %v3835_v19 = vadd.f32 1.0, %v6518_v15 }
0x293e   :  { %3841 = vrot.lane.b32.xlu0 %v3839_v26, %s7002_s6 }
0x293f   :  { %6519 = vrcp.f32 %v3835_v19 }
0x294c   :  { %v6520_v38 = vpop.eup %6519 }
0x29b0   :  { %v3842_v54 = vpop.permute.xlu0 %3841 }
0x29b1   :  { %v3844_v5 = vadd.f32 %v3842_v54, %v3838_v39 }
0x29b3   :  { %6521 = vtanh.f32 %v3844_v5 }
0x29c0   :  { %v6522_v11 = vpop.eup %6521 }
0x29c1   :  { %v3846_v63 = vmul.f32 %v6522_v11, %v6520_v38 }
0x29c3   :  { %3850 = vrot.lane.b32.xlu1 %v3846_v63, %s7002_s6 }
0x2a35   :  { %v3851_v52 = vpop.permute.xlu1 %3850 }
0x2a36   :  { %6134 = vmatmul.mubr.msk.f32.vlgmr.msra.gmra.mxu0 %vm1407_vm1, %v3851_v52 }
0x2a37   :  { %4075 = vmatpush1.msra.mxu0 %v8419_v43  ;;  %4122 = vmatprep.mubr.f32.mxu0 %v9184_v37 }
0x2a38   :  { %4076 = vmatprep.subr.mxu0 %v8421_v59 }
0x2a39   :  { %4077 = vmatpush1.msra.mxu0 %v8424_v42 }
0x2a3a   :  { %4078 = vmatprep.subr.mxu0 %v8427_v51 }
0x2a3b   :  { %4079 = vmatpush1.msra.mxu0 %v8431_v14 }
0x2a3c   :  { %4080 = vmatprep.subr.mxu0 %v8434_v23 }
0x2a3d   :  { %4081 = vmatpush1.msra.mxu0 %v8437_v2 }
0x2a3e   :  { %4082 = vmatprep.subr.mxu0 %v8440_v18 }
0x2a3f   :  { %4083 = vmatpush1.msra.mxu0 %v8443_v22 }
0x2a40   :  { %4084 = vmatprep.subr.mxu0 %v8446_v60 }
0x2a41   :  { %4085 = vmatpush1.msra.mxu0 %v8449_v7 }
0x2a42   :  { %4086 = vmatprep.subr.mxu0 %v8452_v62 }
0x2a43   :  { %4087 = vmatpush1.msra.mxu0 %v8455_v4 }
0x2a44   :  { %4088 = vmatprep.subr.mxu0 %v8458_v9 }
0x2a45   :  { %4089 = vmatpush1.msra.mxu0 %v8461_v8 }
0x2a46   :  { %4278 = vmatprep.subr.mxu0 %v8411_v48 }
0x2af6   :  { %v3920_v16 = vpop.f32.mrf.mxu0 }
0x2af7   :  { %v3925_v34 = vadd.f32 %v3920_v16, %v7893_v46 }
0x2af8   :  { %v3922_v27 = vpop.f32.mrf.mxu0 }
0x2af9   :  { %v6135_v47 = vmul.f32 -1.442695, %v3925_v34  ;;  %v3926_v30 = vadd.f32 %v3922_v27, %v7896_v50 }
0x2afb   :  { %6523 = vpow2.f32 %v6135_v47  ;;  %v6136_v25 = vmul.f32 -1.442695, %v3926_v30 }
0x2afc   :  { %6525 = vtanh.f32 %v3926_v30 }
0x2b08   :  { %v6524_v36 = vpop.eup %6523 }
0x2b09   :  { %v3930_v13 = vadd.f32 1.0, %v6524_v36  ;;  %v6526_v12 = vpop.eup %6525 }
0x2b0b   :  { %6527 = vrcp.f32 %v3930_v13 }
0x2b0c   :  { %6529 = vpow2.f32 %v6136_v25 }
0x2b18   :  { %v6528_v24 = vpop.eup %6527 }
0x2b19   :  { %v3941_v44 = vmul.f32 %v6528_v24, %v6526_v12  ;;  %v6530_v17 = vpop.eup %6529  ;;  %v3940_v56 = vmul.f32 %v6528_v24, %v3844_v5 }
0x2b1a   :  { %v3937_v61 = vadd.f32 1.0, %v6530_v17 }
0x2b1b   :  { %3943 = vrot.lane.b32.xlu0 %v3941_v44, %s7002_s6 }
0x2b1c   :  { %6531 = vrcp.f32 %v3937_v61 }
0x2b29   :  { %v6532_v45 = vpop.eup %6531 }
0x2b8d   :  { %v3944_v46 = vpop.permute.xlu0 %3943 }
0x2b8e   :  { %v3946_v57 = vadd.f32 %v3944_v46, %v3940_v56 }
0x2b90   :  { %6533 = vtanh.f32 %v3946_v57 }
0x2b9d   :  { %v6534_v50 = vpop.eup %6533 }
0x2b9e   :  { %v3948_v28 = vmul.f32 %v6534_v50, %v6532_v45 }
0x2ba0   :  { %3952 = vrot.lane.b32.xlu1 %v3948_v28, %s7002_s6 }
0x2c12   :  { %v3953_v0 = vpop.permute.xlu1 %3952 }
0x2c13   :  { %6137 = vmatmul.mubr.msk.f32.vlgmr.msra.gmra.mxu1 %vm1407_vm1, %v3953_v0 }
0x2c14   :  { %4177 = vmatpush1.msra.mxu1 %v8419_v43  ;;  %4224 = vmatprep.mubr.f32.mxu1 %v9184_v37 }
0x2c15   :  { %4178 = vmatprep.subr.mxu1 %v8421_v59 }
0x2c16   :  { %4179 = vmatpush1.msra.mxu1 %v8424_v42 }
0x2c17   :  { %4180 = vmatprep.subr.mxu1 %v8427_v51 }
0x2c18   :  { %4181 = vmatpush1.msra.mxu1 %v8431_v14 }
0x2c19   :  { %4182 = vmatprep.subr.mxu1 %v8434_v23 }
0x2c1a   :  { %4183 = vmatpush1.msra.mxu1 %v8437_v2 }
0x2c1b   :  { %4184 = vmatprep.subr.mxu1 %v8440_v18 }
0x2c1c   :  { %4185 = vmatpush1.msra.mxu1 %v8443_v22 }
0x2c1d   :  { %4186 = vmatprep.subr.mxu1 %v8446_v60 }
0x2c1e   :  { %4187 = vmatpush1.msra.mxu1 %v8449_v7 }
0x2c1f   :  { %4188 = vmatprep.subr.mxu1 %v8452_v62 }
0x2c20   :  { %4189 = vmatpush1.msra.mxu1 %v8455_v4 }
0x2c21   :  { %4190 = vmatprep.subr.mxu1 %v8458_v9 }
0x2c22   :  { %4191 = vmatpush1.msra.mxu1 %v8461_v8 }
0x2c23   :  { %4380 = vmatprep.subr.mxu1 %v8411_v48 }
0x2cd3   :  { %v4022_v21 = vpop.f32.mrf.mxu1 }
0x2cd4   :  { %v4027_v6 = vadd.f32 %v4022_v21, %v7887_v58 }
0x2cd5   :  { %v4024_v10 = vpop.f32.mrf.mxu1 }
0x2cd6   :  { %v6138_v26 = vmul.f32 -1.442695, %v4027_v6  ;;  %v4028_v15 = vadd.f32 %v4024_v10, %v7890_v32 }
0x2cd8   :  { %6535 = vpow2.f32 %v6138_v26  ;;  %v6139_v11 = vmul.f32 -1.442695, %v4028_v15 }
0x2cd9   :  { %6537 = vtanh.f32 %v4028_v15 }
0x2ce5   :  { %v6536_v19 = vpop.eup %6535 }
0x2ce6   :  { %v4032_v39 = vadd.f32 1.0, %v6536_v19  ;;  %v6538_v54 = vpop.eup %6537 }
0x2ce8   :  { %6539 = vrcp.f32 %v4032_v39 }
0x2ce9   :  { %6541 = vpow2.f32 %v6139_v11 }
0x2cf5   :  { %v6540_v5 = vpop.eup %6539 }
0x2cf6   :  { %v4043_v38 = vmul.f32 %v6540_v5, %v6538_v54  ;;  %v6542_v63 = vpop.eup %6541  ;;  %v4042_v16 = vmul.f32 %v6540_v5, %v3946_v57 }
0x2cf7   :  { %v4039_v52 = vadd.f32 1.0, %v6542_v63 }
0x2cf8   :  { %4045 = vrot.lane.b32.xlu0 %v4043_v38, %s7002_s6 }
0x2cf9   :  { %6543 = vrcp.f32 %v4039_v52 }
0x2d06   :  { %v6544_v47 = vpop.eup %6543 }
0x2d6a   :  { %v4046_v58 = vpop.permute.xlu0 %4045 }
0x2d6b   :  { %v4048_v34 = vadd.f32 %v4046_v58, %v4042_v16 }
0x2d6d   :  { %6545 = vtanh.f32 %v4048_v34 }
0x2d7a   :  { %v6546_v32 = vpop.eup %6545 }
0x2d7b   :  { %v4050_v27 = vmul.f32 %v6546_v32, %v6544_v47 }
0x2d7d   :  { %4054 = vrot.lane.b32.xlu1 %v4050_v27, %s7002_s6 }
0x2def   :  { %v4055_v30 = vpop.permute.xlu1 %4054 }
0x2df0   :  { %6140 = vmatmul.mubr.msk.f32.vlgmr.msra.gmra.mxu0 %vm1407_vm1, %v4055_v30 }
0x2df1   :  { %4279 = vmatpush1.msra.mxu0 %v8419_v43  ;;  %4326 = vmatprep.mubr.f32.mxu0 %v9184_v37 }
0x2df2   :  { %4280 = vmatprep.subr.mxu0 %v8421_v59 }
0x2df3   :  { %4281 = vmatpush1.msra.mxu0 %v8424_v42 }
0x2df4   :  { %4282 = vmatprep.subr.mxu0 %v8427_v51 }
0x2df5   :  { %4283 = vmatpush1.msra.mxu0 %v8431_v14 }
0x2df6   :  { %4284 = vmatprep.subr.mxu0 %v8434_v23 }
0x2df7   :  { %4285 = vmatpush1.msra.mxu0 %v8437_v2 }
0x2df8   :  { %4286 = vmatprep.subr.mxu0 %v8440_v18 }
0x2df9   :  { %4287 = vmatpush1.msra.mxu0 %v8443_v22 }
0x2dfa   :  { %4288 = vmatprep.subr.mxu0 %v8446_v60 }
0x2dfb   :  { %4289 = vmatpush1.msra.mxu0 %v8449_v7 }
0x2dfc   :  { %4290 = vmatprep.subr.mxu0 %v8452_v62 }
0x2dfd   :  { %4291 = vmatpush1.msra.mxu0 %v8455_v4 }
0x2dfe   :  { %4292 = vmatprep.subr.mxu0 %v8458_v9 }
0x2dff   :  { %4293 = vmatpush1.msra.mxu0 %v8461_v8 }
0x2e00   :  { %4482 = vmatprep.subr.mxu0 %v8411_v48 }
0x2eb0   :  { %v4124_v36 = vpop.f32.mrf.mxu0 }
0x2eb1   :  { %v4129_v13 = vadd.f32 %v4124_v36, %v7880_v55 }
0x2eb2   :  { %v4126_v24 = vpop.f32.mrf.mxu0 }
0x2eb3   :  { %v6141_v12 = vmul.f32 -1.442695, %v4129_v13  ;;  %v4130_v44 = vadd.f32 %v4126_v24, %v7883_v41 }
0x2eb5   :  { %6547 = vpow2.f32 %v6141_v12  ;;  %v6142_v57 = vmul.f32 -1.442695, %v4130_v44 }
0x2eb6   :  { %6549 = vtanh.f32 %v4130_v44 }
0x2ec2   :  { %v6548_v25 = vpop.eup %6547 }
0x2ec3   :  { %v4134_v17 = vadd.f32 1.0, %v6548_v25  ;;  %v6550_v61 = vpop.eup %6549 }
0x2ec5   :  { %6551 = vrcp.f32 %v4134_v17 }
0x2ec6   :  { %6553 = vpow2.f32 %v6142_v57 }
0x2ed2   :  { %v6552_v56 = vpop.eup %6551 }
0x2ed3   :  { %v4145_v46 = vmul.f32 %v6552_v56, %v6550_v61  ;;  %v6554_v45 = vpop.eup %6553  ;;  %v4144_v28 = vmul.f32 %v6552_v56, %v4048_v34 }
0x2ed4   :  { %v4141_v50 = vadd.f32 1.0, %v6554_v45 }
0x2ed5   :  { %4147 = vrot.lane.b32.xlu0 %v4145_v46, %s7002_s6 }
0x2ed6   :  { %6555 = vrcp.f32 %v4141_v50 }
0x2ee3   :  { %v6556_v21 = vpop.eup %6555 }
0x2f47   :  { %v4148_v55 = vpop.permute.xlu0 %4147 }
0x2f48   :  { %v4150_v0 = vadd.f32 %v4148_v55, %v4144_v28 }
0x2f4a   :  { %6557 = vtanh.f32 %v4150_v0 }
0x2f57   :  { %v6558_v41 = vpop.eup %6557 }
0x2f58   :  { %v4152_v6 = vmul.f32 %v6558_v41, %v6556_v21 }
0x2f5a   :  { %4156 = vrot.lane.b32.xlu1 %v4152_v6, %s7002_s6 }
0x2fcc   :  { %v4157_v26 = vpop.permute.xlu1 %4156 }
0x2fcd   :  { %6143 = vmatmul.mubr.msk.f32.vlgmr.msra.gmra.mxu1 %vm1407_vm1, %v4157_v26 }
0x2fce   :  { %4381 = vmatpush1.msra.mxu1 %v8419_v43  ;;  %4428 = vmatprep.mubr.f32.mxu1 %v9184_v37 }
0x2fcf   :  { %4382 = vmatprep.subr.mxu1 %v8421_v59 }
0x2fd0   :  { %4383 = vmatpush1.msra.mxu1 %v8424_v42 }
0x2fd1   :  { %4384 = vmatprep.subr.mxu1 %v8427_v51 }
0x2fd2   :  { %4385 = vmatpush1.msra.mxu1 %v8431_v14 }
0x2fd3   :  { %4386 = vmatprep.subr.mxu1 %v8434_v23 }
0x2fd4   :  { %4387 = vmatpush1.msra.mxu1 %v8437_v2 }
0x2fd5   :  { %4388 = vmatprep.subr.mxu1 %v8440_v18 }
0x2fd6   :  { %4389 = vmatpush1.msra.mxu1 %v8443_v22 }
0x2fd7   :  { %4390 = vmatprep.subr.mxu1 %v8446_v60 }
0x2fd8   :  { %4391 = vmatpush1.msra.mxu1 %v8449_v7 }
0x2fd9   :  { %4392 = vmatprep.subr.mxu1 %v8452_v62 }
0x2fda   :  { %4393 = vmatpush1.msra.mxu1 %v8455_v4 }
0x2fdb   :  { %4394 = vmatprep.subr.mxu1 %v8458_v9 }
0x2fdc   :  { %4395 = vmatpush1.msra.mxu1 %v8461_v8 }
0x2fdd   :  { %4584 = vmatprep.subr.mxu1 %v8411_v48 }
0x308d   :  { %v4226_v10 = vpop.f32.mrf.mxu1 }
0x308e   :  { %v4231_v15 = vadd.f32 %v4226_v10, %v7872_v29 }
0x308f   :  { %v4228_v39 = vpop.f32.mrf.mxu1 }
0x3090   :  { %v6144_v19 = vmul.f32 -1.442695, %v4231_v15  ;;  %v4232_v54 = vadd.f32 %v4228_v39, %v7875_v35 }
0x3092   :  { %6559 = vpow2.f32 %v6144_v19  ;;  %v6145_v16 = vmul.f32 -1.442695, %v4232_v54 }
0x3093   :  { %6561 = vtanh.f32 %v4232_v54 }
0x309f   :  { %v6560_v5 = vpop.eup %6559 }
0x30a0   :  { %v4236_v38 = vadd.f32 1.0, %v6560_v5  ;;  %v6562_v11 = vpop.eup %6561 }
0x30a2   :  { %6563 = vrcp.f32 %v4236_v38 }
0x30a3   :  { %6565 = vpow2.f32 %v6145_v16 }
0x30af   :  { %v6564_v63 = vpop.eup %6563 }
0x30b0   :  { %v4247_v52 = vmul.f32 %v6564_v63, %v6562_v11  ;;  %v6566_v58 = vpop.eup %6565  ;;  %v4246_v47 = vmul.f32 %v6564_v63, %v4150_v0 }
0x30b1   :  { %v4243_v34 = vadd.f32 1.0, %v6566_v58 }
0x30b2   :  { %4249 = vrot.lane.b32.xlu0 %v4247_v52, %s7002_s6 }
0x30b3   :  { %6567 = vrcp.f32 %v4243_v34 }
0x30c0   :  { %v6568_v27 = vpop.eup %6567 }
0x3124   :  { %v4250_v29 = vpop.permute.xlu0 %4249 }
0x3125   :  { %v4252_v32 = vadd.f32 %v4250_v29, %v4246_v47 }
0x3127   :  { %6569 = vtanh.f32 %v4252_v32 }
0x3134   :  { %v6570_v35 = vpop.eup %6569 }
0x3135   :  { %v4254_v30 = vmul.f32 %v6570_v35, %v6568_v27 }
0x3137   :  { %4258 = vrot.lane.b32.xlu1 %v4254_v30, %s7002_s6  ;;  %v9221_v30 = vld [vmem:[#allocation86_spill] sm:$0xff] }
0x31a9   :  { %v4259_v36 = vpop.permute.xlu1 %4258 }
0x31aa   :  { %6146 = vmatmul.mubr.msk.f32.vlgmr.msra.gmra.mxu0 %vm1407_vm1, %v4259_v36 }
0x31ab   :  { %4483 = vmatpush1.msra.mxu0 %v8419_v43  ;;  %4530 = vmatprep.mubr.f32.mxu0 %v9184_v37 }
0x31ac   :  { %4484 = vmatprep.subr.mxu0 %v8421_v59 }
0x31ad   :  { %4485 = vmatpush1.msra.mxu0 %v8424_v42 }
0x31ae   :  { %4486 = vmatprep.subr.mxu0 %v8427_v51 }
0x31af   :  { %4487 = vmatpush1.msra.mxu0 %v8431_v14 }
0x31b0   :  { %4488 = vmatprep.subr.mxu0 %v8434_v23 }
0x31b1   :  { %4489 = vmatpush1.msra.mxu0 %v8437_v2 }
0x31b2   :  { %4490 = vmatprep.subr.mxu0 %v8440_v18 }
0x31b3   :  { %4491 = vmatpush1.msra.mxu0 %v8443_v22 }
0x31b4   :  { %4492 = vmatprep.subr.mxu0 %v8446_v60 }
0x31b5   :  { %4493 = vmatpush1.msra.mxu0 %v8449_v7 }
0x31b6   :  { %4494 = vmatprep.subr.mxu0 %v8452_v62 }
0x31b7   :  { %4495 = vmatpush1.msra.mxu0 %v8455_v4 }
0x31b8   :  { %4496 = vmatprep.subr.mxu0 %v8458_v9 }
0x31b9   :  { %4497 = vmatpush1.msra.mxu0 %v8461_v8 }
0x31ba   :  { %4686 = vmatprep.subr.mxu0 %v8411_v48 }
0x326a   :  { %v4328_v13 = vpop.f32.mrf.mxu0 }
0x326b   :  { %v4333_v12 = vadd.f32 %v4328_v13, %v7866_v31 }
0x326c   :  { %v4330_v44 = vpop.f32.mrf.mxu0 }
0x326d   :  { %v6147_v24 = vmul.f32 -1.442695, %v4333_v12  ;;  %v4334_v25 = vadd.f32 %v4330_v44, %v7869_v53 }
0x326f   :  { %6571 = vpow2.f32 %v6147_v24  ;;  %v6148_v45 = vmul.f32 -1.442695, %v4334_v25  ;;  %v9222_v24 = vld [vmem:[#allocation87_spill] sm:$0xff] }
0x3270   :  { %6573 = vtanh.f32 %v4334_v25 }
0x327c   :  { %v6572_v17 = vpop.eup %6571 }
0x327d   :  { %v4338_v61 = vadd.f32 1.0, %v6572_v17  ;;  %v6574_v56 = vpop.eup %6573 }
0x327f   :  { %6575 = vrcp.f32 %v4338_v61 }
0x3280   :  { %6577 = vpow2.f32 %v6148_v45 }
0x328c   :  { %v6576_v46 = vpop.eup %6575 }
0x328d   :  { %v4349_v57 = vmul.f32 %v6576_v46, %v6574_v56  ;;  %v6578_v50 = vpop.eup %6577  ;;  %v4348_v55 = vmul.f32 %v6576_v46, %v4252_v32 }
0x328e   :  { %v4345_v28 = vadd.f32 1.0, %v6578_v50 }
0x328f   :  { %4351 = vrot.lane.b32.xlu0 %v4349_v57, %s7002_s6 }
0x3290   :  { %6579 = vrcp.f32 %v4345_v28 }
0x329d   :  { %v6580_v21 = vpop.eup %6579 }
0x3301   :  { %v4352_v31 = vpop.permute.xlu0 %4351 }
0x3302   :  { %v4354_v0 = vadd.f32 %v4352_v31, %v4348_v55 }
0x3304   :  { %6581 = vtanh.f32 %v4354_v0 }
0x3311   :  { %v6582_v53 = vpop.eup %6581 }
0x3312   :  { %v4356_v41 = vmul.f32 %v6582_v53, %v6580_v21 }
0x3314   :  { %4360 = vrot.lane.b32.xlu1 %v4356_v41, %s7002_s6 }
0x3386   :  { %v4361_v6 = vpop.permute.xlu1 %4360 }
0x3387   :  { %6149 = vmatmul.mubr.msk.f32.vlgmr.msra.gmra.mxu1 %vm1407_vm1, %v4361_v6 }
0x3388   :  { %4585 = vmatpush1.msra.mxu1 %v8419_v43  ;;  %4632 = vmatprep.mubr.f32.mxu1 %v9184_v37 }
0x3389   :  { %4586 = vmatprep.subr.mxu1 %v8421_v59 }
0x338a   :  { %4587 = vmatpush1.msra.mxu1 %v8424_v42 }
0x338b   :  { %4588 = vmatprep.subr.mxu1 %v8427_v51 }
0x338c   :  { %4589 = vmatpush1.msra.mxu1 %v8431_v14 }
0x338d   :  { %4590 = vmatprep.subr.mxu1 %v8434_v23 }
0x338e   :  { %4591 = vmatpush1.msra.mxu1 %v8437_v2 }
0x338f   :  { %4592 = vmatprep.subr.mxu1 %v8440_v18 }
0x3390   :  { %4593 = vmatpush1.msra.mxu1 %v8443_v22 }
0x3391   :  { %4594 = vmatprep.subr.mxu1 %v8446_v60 }
0x3392   :  { %4595 = vmatpush1.msra.mxu1 %v8449_v7 }
0x3393   :  { %4596 = vmatprep.subr.mxu1 %v8452_v62 }
0x3394   :  { %4597 = vmatpush1.msra.mxu1 %v8455_v4 }
0x3395   :  { %4598 = vmatprep.subr.mxu1 %v8458_v9 }
0x3396   :  { %4599 = vmatpush1.msra.mxu1 %v8461_v8 }
0x3397   :  { %4788 = vmatprep.subr.mxu1 %v8411_v48 }
0x3447   :  { %v4430_v26 = vpop.f32.mrf.mxu1 }
0x3448   :  { %v4435_v10 = vadd.f32 %v4430_v26, %v7857_v20 }
0x3449   :  { %v4432_v19 = vpop.f32.mrf.mxu1 }
0x344a   :  { %v6150_v15 = vmul.f32 -1.442695, %v4435_v10  ;;  %v4436_v39 = vadd.f32 %v4432_v19, %v7863_v40 }
0x344c   :  { %6583 = vpow2.f32 %v6150_v15  ;;  %v6151_v52 = vmul.f32 -1.442695, %v4436_v39 }
0x344d   :  { %6585 = vtanh.f32 %v4436_v39 }
0x3459   :  { %v6584_v54 = vpop.eup %6583 }
0x345a   :  { %v4440_v5 = vadd.f32 1.0, %v6584_v54  ;;  %v6586_v38 = vpop.eup %6585 }
0x345c   :  { %6587 = vrcp.f32 %v4440_v5  ;;  %v8732_v5 = vld [vmem:[#allocation12 + $0x70] sm:$0xff] }
0x345d   :  { %6589 = vpow2.f32 %v6151_v52  ;;  %v8745_v52 = vld [vmem:[#allocation12 + $0x50] sm:$0xff] }
0x3469   :  { %v6588_v11 = vpop.eup %6587 }
0x346a   :  { %v4451_v63 = vmul.f32 %v6588_v11, %v6586_v38  ;;  %v6590_v16 = vpop.eup %6589  ;;  %v4450_v34 = vmul.f32 %v6588_v11, %v4354_v0  ;;  %v8736_v38 = vld [vmem:[#allocation12 + $0x68] sm:$0xff]  ;;  %v8739_v11 = vld [vmem:[#allocation12 + $0x60] sm:$0xff] }
0x346b   :  { %v4447_v58 = vadd.f32 1.0, %v6590_v16  ;;  %v8748_v16 = vld [vmem:[#allocation12 + $0x48] sm:$0xff] }
0x346c   :  { %4453 = vrot.lane.b32.xlu0 %v4451_v63, %s7002_s6  ;;  %v8742_v63 = vld [vmem:[#allocation12 + $0x58] sm:$0xff] }
0x346d   :  { %6591 = vrcp.f32 %v4447_v58  ;;  %v8751_v58 = vld [vmem:[#allocation12 + $0x40] sm:$0xff] }
0x347a   :  { %v6592_v29 = vpop.eup %6591 }
0x34de   :  { %v4454_v20 = vpop.permute.xlu0 %4453 }
0x34df   :  { %v4456_v47 = vadd.f32 %v4454_v20, %v4450_v34  ;;  %v8754_v34 = vld [vmem:[#allocation12 + $0x38] sm:$0xff]  ;;  %v8757_v20 = vld [vmem:[#allocation12 + $0x30] sm:$0xff] }
0x34e1   :  { %6593 = vtanh.f32 %v4456_v47 }
0x34ee   :  { %v6594_v40 = vpop.eup %6593 }
0x34ef   :  { %v4458_v32 = vmul.f32 %v6594_v40, %v6592_v29  ;;  %v8763_v29 = vld [vmem:[#allocation12 + $0x20] sm:$0xff]  ;;  %v8766_v40 = vld [vmem:[#allocation12 + $0x18] sm:$0xff] }
0x34f1   :  { %4462 = vrot.lane.b32.xlu1 %v4458_v32, %s7002_s6  ;;  %v8769_v32 = vld [vmem:[#allocation12 + $0x10] sm:$0xff] }
0x3563   :  { %v4463_v27 = vpop.permute.xlu1 %4462 }
0x3564   :  { %6152 = vmatmul.mubr.msk.f32.vlgmr.msra.gmra.mxu0 %vm1407_vm1, %v4463_v27  ;;  %v8772_v27 = vld [vmem:[#allocation12 + $0x8] sm:$0xff] }
0x3565   :  { %4687 = vmatpush1.msra.mxu0 %v8419_v43  ;;  %4734 = vmatprep.mubr.f32.mxu0 %v9184_v37 }
0x3566   :  { %4688 = vmatprep.subr.mxu0 %v8421_v59 }
0x3567   :  { %4689 = vmatpush1.msra.mxu0 %v8424_v42 }
0x3568   :  { %4690 = vmatprep.subr.mxu0 %v8427_v51 }
0x3569   :  { %4691 = vmatpush1.msra.mxu0 %v8431_v14 }
0x356a   :  { %4692 = vmatprep.subr.mxu0 %v8434_v23 }
0x356b   :  { %4693 = vmatpush1.msra.mxu0 %v8437_v2 }
0x356c   :  { %4694 = vmatprep.subr.mxu0 %v8440_v18 }
0x356d   :  { %4695 = vmatpush1.msra.mxu0 %v8443_v22 }
0x356e   :  { %4696 = vmatprep.subr.mxu0 %v8446_v60 }
0x356f   :  { %4697 = vmatpush1.msra.mxu0 %v8449_v7 }
0x3570   :  { %4698 = vmatprep.subr.mxu0 %v8452_v62 }
0x3571   :  { %4699 = vmatpush1.msra.mxu0 %v8455_v4 }
0x3572   :  { %4700 = vmatprep.subr.mxu0 %v8458_v9 }
0x3573   :  { %4701 = vmatpush1.msra.mxu0 %v8461_v8 }
0x3574   :  { %4890 = vmatprep.subr.mxu0 %v8411_v48 }
0x3624   :  { %v4532_v35 = vpop.f32.mrf.mxu0 }
0x3625   :  { %v4537_v36 = vadd.f32 %v4532_v35, %v9221_v30  ;;  %v8775_v35 = vld [vmem:[#allocation12] sm:$0xff] }
0x3626   :  { %v4534_v12 = vpop.f32.mrf.mxu0 }
0x3627   :  { %v6153_v13 = vmul.f32 -1.442695, %v4537_v36  ;;  %v4538_v44 = vadd.f32 %v4534_v12, %v9222_v24  ;;  %v9225_v36 = vld [vmem:[#allocation82_spill] sm:$0xff] }
0x3629   :  { %6595 = vpow2.f32 %v6153_v13  ;;  %v6154_v57 = vmul.f32 -1.442695, %v4538_v44 }
0x362a   :  { %6597 = vtanh.f32 %v4538_v44  ;;  %v9226_v44 = vld [vmem:[#allocation83_spill] sm:$0xff] }
0x3636   :  { %v6596_v25 = vpop.eup %6595 }
0x3637   :  { %v4542_v17 = vadd.f32 1.0, %v6596_v25  ;;  %v6598_v61 = vpop.eup %6597 }
0x3639   :  { %6599 = vrcp.f32 %v4542_v17 }
0x363a   :  { %6601 = vpow2.f32 %v6154_v57 }
0x3646   :  { %v6600_v56 = vpop.eup %6599 }
0x3647   :  { %v4553_v46 = vmul.f32 %v6600_v56, %v6598_v61  ;;  %v6602_v48 = vpop.eup %6601  ;;  %v4552_v50 = vmul.f32 %v6600_v56, %v4456_v47  ;;  %v8760_v47 = vld [vmem:[#allocation12 + $0x28] sm:$0xff] }
0x3648   :  { %v4549_v45 = vadd.f32 1.0, %v6602_v48 }
0x3649   :  { %4555 = vrot.lane.b32.xlu0 %v4553_v46, %s7002_s6 }
0x364a   :  { %6603 = vrcp.f32 %v4549_v45 }
0x3657   :  { %v6604_v31 = vpop.eup %6603 }
0x36bb   :  { %v4556_v28 = vpop.permute.xlu0 %4555 }
0x36bc   :  { %v4558_v55 = vadd.f32 %v4556_v28, %v4552_v50 }
0x36be   :  { %6605 = vtanh.f32 %v4558_v55 }
0x36cb   :  { %v6606_v0 = vpop.eup %6605 }
0x36cc   :  { %v4560_v21 = vmul.f32 %v6606_v0, %v6604_v31 }
0x36ce   :  { %4564 = vrot.lane.b32.xlu1 %v4560_v21, %s7002_s6 }
0x3740   :  { %v4565_v53 = vpop.permute.xlu1 %4564 }
0x3741   :  { %6155 = vmatmul.mubr.msk.f32.vlgmr.msra.gmra.mxu1 %vm1407_vm1, %v4565_v53 }
0x3742   :  { %4789 = vmatpush1.msra.mxu1 %v8419_v43  ;;  %4836 = vmatprep.mubr.f32.mxu1 %v9184_v37  ;;  %v8724_v43 = vld [vmem:[#allocation12 + $0x78] sm:$0xff] }
0x3743   :  { %4790 = vmatprep.subr.mxu1 %v8421_v59 }
0x3744   :  { %4791 = vmatpush1.msra.mxu1 %v8424_v42  ;;  %v9223_v42 = vld [vmem:[#allocation84_spill] sm:$0xff] }
0x3745   :  { %4792 = vmatprep.subr.mxu1 %v8427_v51 }
0x3746   :  { %4793 = vmatpush1.msra.mxu1 %v8431_v14 }
0x3747   :  { %4794 = vmatprep.subr.mxu1 %v8434_v23 }
0x3748   :  { %4795 = vmatpush1.msra.mxu1 %v8437_v2  ;;  %v9224_v2 = vld [vmem:[#allocation85_spill] sm:$0xff] }
0x3749   :  { %4796 = vmatprep.subr.mxu1 %v8440_v18 }
0x374a   :  { %4797 = vmatpush1.msra.mxu1 %v8443_v22 }
0x374b   :  { %4798 = vmatprep.subr.mxu1 %v8446_v60 }
0x374c   :  { %4799 = vmatpush1.msra.mxu1 %v8449_v7 }
0x374d   :  { %4800 = vmatprep.subr.mxu1 %v8452_v62 }
0x374e   :  { %4801 = vmatpush1.msra.mxu1 %v8455_v4 }
0x374f   :  { %4802 = vmatprep.subr.mxu1 %v8458_v9 }
0x3750   :  { %4803 = vmatpush1.msra.mxu1 %v8461_v8 }
0x3751   :  { %4992 = vmatprep.subr.mxu1 %v8724_v43 }
0x3801   :  { %v4634_v59 = vpop.f32.mrf.mxu1 }
0x3802   :  { %v4639_v51 = vadd.f32 %v4634_v59, %v9223_v42 }
0x3803   :  { %v4636_v23 = vpop.f32.mrf.mxu1 }
0x3804   :  { %v6156_v14 = vmul.f32 -1.442695, %v4639_v51  ;;  %v4640_v18 = vadd.f32 %v4636_v23, %v9224_v2  ;;  %v9227_v51 = vld [vmem:[#allocation80_spill] sm:$0xff] }
0x3806   :  { %6607 = vpow2.f32 %v6156_v14  ;;  %v6157_v9 = vmul.f32 -1.442695, %v4640_v18 }
0x3807   :  { %6609 = vtanh.f32 %v4640_v18  ;;  %v9228_v18 = vld [vmem:[#allocation81_spill] sm:$0xff] }
0x3813   :  { %v6608_v22 = vpop.eup %6607 }
0x3814   :  { %v4644_v60 = vadd.f32 1.0, %v6608_v22  ;;  %v6610_v7 = vpop.eup %6609 }
0x3816   :  { %6611 = vrcp.f32 %v4644_v60 }
0x3817   :  { %6613 = vpow2.f32 %v6157_v9 }
0x3823   :  { %v6612_v62 = vpop.eup %6611 }
0x3824   :  { %v4655_v4 = vmul.f32 %v6612_v62, %v6610_v7  ;;  %v6614_v8 = vpop.eup %6613  ;;  %v4654_v6 = vmul.f32 %v6612_v62, %v4558_v55 }
0x3825   :  { %v4651_v41 = vadd.f32 1.0, %v6614_v8 }
0x3826   :  { %4657 = vrot.lane.b32.xlu0 %v4655_v4, %s7002_s6 }
0x3827   :  { %6615 = vrcp.f32 %v4651_v41 }
0x3834   :  { %v6616_v15 = vpop.eup %6615 }
0x3898   :  { %v4658_v26 = vpop.permute.xlu0 %4657 }
0x3899   :  { %v4660_v10 = vadd.f32 %v4658_v26, %v4654_v6 }
0x389b   :  { %6617 = vtanh.f32 %v4660_v10 }
0x38a8   :  { %v6618_v19 = vpop.eup %6617 }
0x38a9   :  { %v4662_v39 = vmul.f32 %v6618_v19, %v6616_v15 }
0x38ab   :  { %4666 = vrot.lane.b32.xlu1 %v4662_v39, %s7002_s6 }
0x391d   :  { %v4667_v54 = vpop.permute.xlu1 %4666 }
0x391e   :  { %6158 = vmatmul.mubr.msk.f32.vlgmr.msra.gmra.mxu0 %vm1407_vm1, %v4667_v54 }
0x391f   :  { %4891 = vmatpush1.msra.mxu0 %v8732_v5  ;;  %4938 = vmatprep.mubr.f32.mxu0 %v9184_v37 }
0x3920   :  { %4892 = vmatprep.subr.mxu0 %v8736_v38 }
0x3921   :  { %4893 = vmatpush1.msra.mxu0 %v8739_v11 }
0x3922   :  { %4894 = vmatprep.subr.mxu0 %v8742_v63 }
0x3923   :  { %4895 = vmatpush1.msra.mxu0 %v8745_v52 }
0x3924   :  { %4896 = vmatprep.subr.mxu0 %v8748_v16 }
0x3925   :  { %4897 = vmatpush1.msra.mxu0 %v8751_v58 }
0x3926   :  { %4898 = vmatprep.subr.mxu0 %v8754_v34 }
0x3927   :  { %4899 = vmatpush1.msra.mxu0 %v8757_v20 }
0x3928   :  { %4900 = vmatprep.subr.mxu0 %v8760_v47 }
0x3929   :  { %4901 = vmatpush1.msra.mxu0 %v8763_v29 }
0x392a   :  { %4902 = vmatprep.subr.mxu0 %v8766_v40 }
0x392b   :  { %4903 = vmatpush1.msra.mxu0 %v8769_v32 }
0x392c   :  { %4904 = vmatprep.subr.mxu0 %v8772_v27 }
0x392d   :  { %4905 = vmatpush1.msra.mxu0 %v8775_v35 }
0x392e   :  { %5094 = vmatprep.subr.mxu0 %v8724_v43 }
0x39de   :  { %v4736_v30 = vpop.f32.mrf.mxu0 }
0x39df   :  { %v4741_v13 = vadd.f32 %v4736_v30, %v9225_v36 }
0x39e0   :  { %v4738_v24 = vpop.f32.mrf.mxu0 }
0x39e1   :  { %v6159_v12 = vmul.f32 -1.442695, %v4741_v13  ;;  %v4742_v25 = vadd.f32 %v4738_v24, %v9226_v44  ;;  %v9229_v13 = vld [vmem:[#allocation78_spill] sm:$0xff] }
0x39e3   :  { %6619 = vpow2.f32 %v6159_v12  ;;  %v6160_v48 = vmul.f32 -1.442695, %v4742_v25 }
0x39e4   :  { %6621 = vtanh.f32 %v4742_v25  ;;  %v9230_v25 = vld [vmem:[#allocation79_spill] sm:$0xff] }
0x39f0   :  { %v6620_v17 = vpop.eup %6619 }
0x39f1   :  { %v4746_v61 = vadd.f32 1.0, %v6620_v17  ;;  %v6622_v56 = vpop.eup %6621 }
0x39f3   :  { %6623 = vrcp.f32 %v4746_v61 }
0x39f4   :  { %6625 = vpow2.f32 %v6160_v48 }
0x3a00   :  { %v6624_v46 = vpop.eup %6623 }
0x3a01   :  { %v4757_v57 = vmul.f32 %v6624_v46, %v6622_v56  ;;  %v6626_v45 = vpop.eup %6625  ;;  %v4756_v28 = vmul.f32 %v6624_v46, %v4660_v10 }
0x3a02   :  { %v4753_v50 = vadd.f32 1.0, %v6626_v45 }
0x3a03   :  { %4759 = vrot.lane.b32.xlu0 %v4757_v57, %s7002_s6 }
0x3a04   :  { %6627 = vrcp.f32 %v4753_v50 }
0x3a11   :  { %v6628_v0 = vpop.eup %6627 }
0x3a75   :  { %v4760_v55 = vpop.permute.xlu0 %4759 }
0x3a76   :  { %v4762_v31 = vadd.f32 %v4760_v55, %v4756_v28 }
0x3a78   :  { %6629 = vtanh.f32 %v4762_v31 }
0x3a85   :  { %v6630_v21 = vpop.eup %6629 }
0x3a86   :  { %v4764_v53 = vmul.f32 %v6630_v21, %v6628_v0 }
0x3a88   :  { %4768 = vrot.lane.b32.xlu1 %v4764_v53, %s7002_s6 }
0x3afa   :  { %v4769_v59 = vpop.permute.xlu1 %4768 }
0x3afb   :  { %6161 = vmatmul.mubr.msk.f32.vlgmr.msra.gmra.mxu1 %vm1407_vm1, %v4769_v59 }
0x3afc   :  { %4993 = vmatpush1.msra.mxu1 %v8732_v5  ;;  %5040 = vmatprep.mubr.f32.mxu1 %v9184_v37 }
0x3afd   :  { %4994 = vmatprep.subr.mxu1 %v8736_v38 }
0x3afe   :  { %4995 = vmatpush1.msra.mxu1 %v8739_v11 }
0x3aff   :  { %4996 = vmatprep.subr.mxu1 %v8742_v63 }
0x3b00   :  { %4997 = vmatpush1.msra.mxu1 %v8745_v52 }
0x3b01   :  { %4998 = vmatprep.subr.mxu1 %v8748_v16 }
0x3b02   :  { %4999 = vmatpush1.msra.mxu1 %v8751_v58 }
0x3b03   :  { %5000 = vmatprep.subr.mxu1 %v8754_v34 }
0x3b04   :  { %5001 = vmatpush1.msra.mxu1 %v8757_v20 }
0x3b05   :  { %5002 = vmatprep.subr.mxu1 %v8760_v47 }
0x3b06   :  { %5003 = vmatpush1.msra.mxu1 %v8763_v29 }
0x3b07   :  { %5004 = vmatprep.subr.mxu1 %v8766_v40 }
0x3b08   :  { %5005 = vmatpush1.msra.mxu1 %v8769_v32 }
0x3b09   :  { %5006 = vmatprep.subr.mxu1 %v8772_v27 }
0x3b0a   :  { %5007 = vmatpush1.msra.mxu1 %v8775_v35 }
0x3b0b   :  { %5196 = vmatprep.subr.mxu1 %v8724_v43 }
0x3bbb   :  { %v4838_v42 = vpop.f32.mrf.mxu1 }
0x3bbc   :  { %v4843_v14 = vadd.f32 %v4838_v42, %v9227_v51 }
0x3bbd   :  { %v4840_v2 = vpop.f32.mrf.mxu1 }
0x3bbe   :  { %v6162_v23 = vmul.f32 -1.442695, %v4843_v14  ;;  %v4844_v22 = vadd.f32 %v4840_v2, %v9228_v18  ;;  %v9231_v14 = vld [vmem:[#allocation76_spill] sm:$0xff] }
0x3bc0   :  { %6631 = vpow2.f32 %v6162_v23  ;;  %v6163_v8 = vmul.f32 -1.442695, %v4844_v22 }
0x3bc1   :  { %6633 = vtanh.f32 %v4844_v22  ;;  %v9232_v22 = vld [vmem:[#allocation77_spill] sm:$0xff] }
0x3bcd   :  { %v6632_v60 = vpop.eup %6631 }
0x3bce   :  { %v4848_v7 = vadd.f32 1.0, %v6632_v60  ;;  %v6634_v62 = vpop.eup %6633 }
0x3bd0   :  { %6635 = vrcp.f32 %v4848_v7 }
0x3bd1   :  { %6637 = vpow2.f32 %v6163_v8 }
0x3bdd   :  { %v6636_v4 = vpop.eup %6635 }
0x3bde   :  { %v4859_v9 = vmul.f32 %v6636_v4, %v6634_v62  ;;  %v6638_v41 = vpop.eup %6637  ;;  %v4858_v26 = vmul.f32 %v6636_v4, %v4762_v31 }
0x3bdf   :  { %v4855_v6 = vadd.f32 1.0, %v6638_v41 }
0x3be0   :  { %4861 = vrot.lane.b32.xlu0 %v4859_v9, %s7002_s6 }
0x3be1   :  { %6639 = vrcp.f32 %v4855_v6 }
0x3bee   :  { %v6640_v19 = vpop.eup %6639 }
0x3c52   :  { %v4862_v10 = vpop.permute.xlu0 %4861 }
0x3c53   :  { %v4864_v15 = vadd.f32 %v4862_v10, %v4858_v26 }
0x3c55   :  { %6641 = vtanh.f32 %v4864_v15 }
0x3c62   :  { %v6642_v39 = vpop.eup %6641 }
0x3c63   :  { %v4866_v54 = vmul.f32 %v6642_v39, %v6640_v19 }
0x3c65   :  { %4870 = vrot.lane.b32.xlu1 %v4866_v54, %s7002_s6 }
0x3cd7   :  { %v4871_v30 = vpop.permute.xlu1 %4870 }
0x3cd8   :  { %6164 = vmatmul.mubr.msk.f32.vlgmr.msra.gmra.mxu0 %vm1407_vm1, %v4871_v30 }
0x3cd9   :  { %5095 = vmatpush1.msra.mxu0 %v8732_v5  ;;  %5142 = vmatprep.mubr.f32.mxu0 %v9184_v37 }
0x3cda   :  { %5096 = vmatprep.subr.mxu0 %v8736_v38 }
0x3cdb   :  { %5097 = vmatpush1.msra.mxu0 %v8739_v11 }
0x3cdc   :  { %5098 = vmatprep.subr.mxu0 %v8742_v63 }
0x3cdd   :  { %5099 = vmatpush1.msra.mxu0 %v8745_v52 }
0x3cde   :  { %5100 = vmatprep.subr.mxu0 %v8748_v16 }
0x3cdf   :  { %5101 = vmatpush1.msra.mxu0 %v8751_v58 }
0x3ce0   :  { %5102 = vmatprep.subr.mxu0 %v8754_v34 }
0x3ce1   :  { %5103 = vmatpush1.msra.mxu0 %v8757_v20 }
0x3ce2   :  { %5104 = vmatprep.subr.mxu0 %v8760_v47 }
0x3ce3   :  { %5105 = vmatpush1.msra.mxu0 %v8763_v29 }
0x3ce4   :  { %5106 = vmatprep.subr.mxu0 %v8766_v40 }
0x3ce5   :  { %5107 = vmatpush1.msra.mxu0 %v8769_v32 }
0x3ce6   :  { %5108 = vmatprep.subr.mxu0 %v8772_v27 }
0x3ce7   :  { %5109 = vmatpush1.msra.mxu0 %v8775_v35 }
0x3ce8   :  { %5298 = vmatprep.subr.mxu0 %v8724_v43 }
0x3d98   :  { %v4940_v36 = vpop.f32.mrf.mxu0 }
0x3d99   :  { %v4945_v12 = vadd.f32 %v4940_v36, %v9229_v13 }
0x3d9a   :  { %v4942_v44 = vpop.f32.mrf.mxu0 }
0x3d9b   :  { %v6165_v24 = vmul.f32 -1.442695, %v4945_v12  ;;  %v4946_v17 = vadd.f32 %v4942_v44, %v9230_v25  ;;  %v9233_v12 = vld [vmem:[#allocation74_spill] sm:$0xff] }
0x3d9d   :  { %6643 = vpow2.f32 %v6165_v24  ;;  %v6166_v45 = vmul.f32 -1.442695, %v4946_v17 }
0x3d9e   :  { %6645 = vtanh.f32 %v4946_v17  ;;  %v9234_v17 = vld [vmem:[#allocation75_spill] sm:$0xff] }
0x3daa   :  { %v6644_v61 = vpop.eup %6643 }
0x3dab   :  { %v4950_v56 = vadd.f32 1.0, %v6644_v61  ;;  %v6646_v46 = vpop.eup %6645 }
0x3dad   :  { %6647 = vrcp.f32 %v4950_v56 }
0x3dae   :  { %6649 = vpow2.f32 %v6166_v45 }
0x3dba   :  { %v6648_v57 = vpop.eup %6647 }
0x3dbb   :  { %v4961_v48 = vmul.f32 %v6648_v57, %v6646_v46  ;;  %v6650_v50 = vpop.eup %6649  ;;  %v4960_v55 = vmul.f32 %v6648_v57, %v4864_v15 }
0x3dbc   :  { %v4957_v28 = vadd.f32 1.0, %v6650_v50 }
0x3dbd   :  { %4963 = vrot.lane.b32.xlu0 %v4961_v48, %s7002_s6 }
0x3dbe   :  { %6651 = vrcp.f32 %v4957_v28 }
0x3dcb   :  { %v6652_v21 = vpop.eup %6651 }
0x3e2f   :  { %v4964_v31 = vpop.permute.xlu0 %4963 }
0x3e30   :  { %v4966_v0 = vadd.f32 %v4964_v31, %v4960_v55 }
0x3e32   :  { %6653 = vtanh.f32 %v4966_v0 }
0x3e3f   :  { %v6654_v53 = vpop.eup %6653 }
0x3e40   :  { %v4968_v59 = vmul.f32 %v6654_v53, %v6652_v21 }
0x3e42   :  { %4972 = vrot.lane.b32.xlu1 %v4968_v59, %s7002_s6 }
0x3eb4   :  { %v4973_v42 = vpop.permute.xlu1 %4972 }
0x3eb5   :  { %6167 = vmatmul.mubr.msk.f32.vlgmr.msra.gmra.mxu1 %vm1407_vm1, %v4973_v42 }
0x3eb6   :  { %5197 = vmatpush1.msra.mxu1 %v8732_v5  ;;  %5244 = vmatprep.mubr.f32.mxu1 %v9184_v37 }
0x3eb7   :  { %5198 = vmatprep.subr.mxu1 %v8736_v38 }
0x3eb8   :  { %5199 = vmatpush1.msra.mxu1 %v8739_v11 }
0x3eb9   :  { %5200 = vmatprep.subr.mxu1 %v8742_v63 }
0x3eba   :  { %5201 = vmatpush1.msra.mxu1 %v8745_v52 }
0x3ebb   :  { %5202 = vmatprep.subr.mxu1 %v8748_v16 }
0x3ebc   :  { %5203 = vmatpush1.msra.mxu1 %v8751_v58 }
0x3ebd   :  { %5204 = vmatprep.subr.mxu1 %v8754_v34 }
0x3ebe   :  { %5205 = vmatpush1.msra.mxu1 %v8757_v20 }
0x3ebf   :  { %5206 = vmatprep.subr.mxu1 %v8760_v47 }
0x3ec0   :  { %5207 = vmatpush1.msra.mxu1 %v8763_v29 }
0x3ec1   :  { %5208 = vmatprep.subr.mxu1 %v8766_v40 }
0x3ec2   :  { %5209 = vmatpush1.msra.mxu1 %v8769_v32 }
0x3ec3   :  { %5210 = vmatprep.subr.mxu1 %v8772_v27 }
0x3ec4   :  { %5211 = vmatpush1.msra.mxu1 %v8775_v35 }
0x3ec5   :  { %5400 = vmatprep.subr.mxu1 %v8724_v43 }
0x3f75   :  { %v5042_v51 = vpop.f32.mrf.mxu1 }
0x3f76   :  { %v5047_v23 = vadd.f32 %v5042_v51, %v9231_v14 }
0x3f77   :  { %v5044_v18 = vpop.f32.mrf.mxu1 }
0x3f78   :  { %v6168_v2 = vmul.f32 -1.442695, %v5047_v23  ;;  %v5048_v60 = vadd.f32 %v5044_v18, %v9232_v22  ;;  %v9235_v23 = vld [vmem:[#allocation72_spill] sm:$0xff] }
0x3f7a   :  { %6655 = vpow2.f32 %v6168_v2  ;;  %v6169_v41 = vmul.f32 -1.442695, %v5048_v60 }
0x3f7b   :  { %6657 = vtanh.f32 %v5048_v60  ;;  %v9236_v60 = vld [vmem:[#allocation73_spill] sm:$0xff] }
0x3f87   :  { %v6656_v7 = vpop.eup %6655 }
0x3f88   :  { %v5052_v62 = vadd.f32 1.0, %v6656_v7  ;;  %v6658_v4 = vpop.eup %6657 }
0x3f8a   :  { %6659 = vrcp.f32 %v5052_v62 }
0x3f8b   :  { %6661 = vpow2.f32 %v6169_v41 }
0x3f97   :  { %v6660_v9 = vpop.eup %6659 }
0x3f98   :  { %v5063_v8 = vmul.f32 %v6660_v9, %v6658_v4  ;;  %v6662_v6 = vpop.eup %6661  ;;  %v5062_v10 = vmul.f32 %v6660_v9, %v4966_v0 }
0x3f99   :  { %v5059_v26 = vadd.f32 1.0, %v6662_v6 }
0x3f9a   :  { %5065 = vrot.lane.b32.xlu0 %v5063_v8, %s7002_s6 }
0x3f9b   :  { %6663 = vrcp.f32 %v5059_v26 }
0x3fa8   :  { %v6664_v39 = vpop.eup %6663 }
0x400c   :  { %v5066_v15 = vpop.permute.xlu0 %5065 }
0x400d   :  { %v5068_v19 = vadd.f32 %v5066_v15, %v5062_v10 }
0x400f   :  { %6665 = vtanh.f32 %v5068_v19 }
0x401c   :  { %v6666_v54 = vpop.eup %6665 }
0x401d   :  { %v5070_v30 = vmul.f32 %v6666_v54, %v6664_v39 }
0x401f   :  { %5074 = vrot.lane.b32.xlu1 %v5070_v30, %s7002_s6 }
0x4091   :  { %v5075_v36 = vpop.permute.xlu1 %5074 }
0x4092   :  { %6170 = vmatmul.mubr.msk.f32.vlgmr.msra.gmra.mxu0 %vm1407_vm1, %v5075_v36 }
0x4093   :  { %5299 = vmatpush1.msra.mxu0 %v8732_v5  ;;  %5346 = vmatprep.mubr.f32.mxu0 %v9184_v37 }
0x4094   :  { %5300 = vmatprep.subr.mxu0 %v8736_v38 }
0x4095   :  { %5301 = vmatpush1.msra.mxu0 %v8739_v11 }
0x4096   :  { %5302 = vmatprep.subr.mxu0 %v8742_v63 }
0x4097   :  { %5303 = vmatpush1.msra.mxu0 %v8745_v52 }
0x4098   :  { %5304 = vmatprep.subr.mxu0 %v8748_v16 }
0x4099   :  { %5305 = vmatpush1.msra.mxu0 %v8751_v58 }
0x409a   :  { %5306 = vmatprep.subr.mxu0 %v8754_v34 }
0x409b   :  { %5307 = vmatpush1.msra.mxu0 %v8757_v20 }
0x409c   :  { %5308 = vmatprep.subr.mxu0 %v8760_v47 }
0x409d   :  { %5309 = vmatpush1.msra.mxu0 %v8763_v29 }
0x409e   :  { %5310 = vmatprep.subr.mxu0 %v8766_v40 }
0x409f   :  { %5311 = vmatpush1.msra.mxu0 %v8769_v32 }
0x40a0   :  { %5312 = vmatprep.subr.mxu0 %v8772_v27 }
0x40a1   :  { %5313 = vmatpush1.msra.mxu0 %v8775_v35 }
0x40a2   :  { %5502 = vmatprep.subr.mxu0 %v8724_v43 }
0x4152   :  { %v5144_v13 = vpop.f32.mrf.mxu0 }
0x4153   :  { %v5149_v24 = vadd.f32 %v5144_v13, %v9233_v12 }
0x4154   :  { %v5146_v25 = vpop.f32.mrf.mxu0 }
0x4155   :  { %v6171_v44 = vmul.f32 -1.442695, %v5149_v24  ;;  %v5150_v61 = vadd.f32 %v5146_v25, %v9234_v17  ;;  %v9237_v24 = vld [vmem:[#allocation70_spill] sm:$0xff] }
0x4157   :  { %6667 = vpow2.f32 %v6171_v44  ;;  %v6172_v50 = vmul.f32 -1.442695, %v5150_v61 }
0x4158   :  { %6669 = vtanh.f32 %v5150_v61  ;;  %v9238_v61 = vld [vmem:[#allocation71_spill] sm:$0xff] }
0x4164   :  { %v6668_v56 = vpop.eup %6667 }
0x4165   :  { %v5154_v46 = vadd.f32 1.0, %v6668_v56  ;;  %v6670_v57 = vpop.eup %6669 }
0x4167   :  { %6671 = vrcp.f32 %v5154_v46 }
0x4168   :  { %6673 = vpow2.f32 %v6172_v50 }
0x4174   :  { %v6672_v48 = vpop.eup %6671 }
0x4175   :  { %v5165_v45 = vmul.f32 %v6672_v48, %v6670_v57  ;;  %v6674_v28 = vpop.eup %6673  ;;  %v5164_v31 = vmul.f32 %v6672_v48, %v5068_v19 }
0x4176   :  { %v5161_v55 = vadd.f32 1.0, %v6674_v28 }
0x4177   :  { %5167 = vrot.lane.b32.xlu0 %v5165_v45, %s7002_s6 }
0x4178   :  { %6675 = vrcp.f32 %v5161_v55 }
0x4185   :  { %v6676_v53 = vpop.eup %6675 }
0x41e9   :  { %v5168_v0 = vpop.permute.xlu0 %5167 }
0x41ea   :  { %v5170_v21 = vadd.f32 %v5168_v0, %v5164_v31 }
0x41ec   :  { %6677 = vtanh.f32 %v5170_v21 }
0x41f9   :  { %v6678_v59 = vpop.eup %6677 }
0x41fa   :  { %v5172_v42 = vmul.f32 %v6678_v59, %v6676_v53 }
0x41fc   :  { %5176 = vrot.lane.b32.xlu1 %v5172_v42, %s7002_s6 }
0x426e   :  { %v5177_v51 = vpop.permute.xlu1 %5176 }
0x426f   :  { %6173 = vmatmul.mubr.msk.f32.vlgmr.msra.gmra.mxu1 %vm1407_vm1, %v5177_v51 }
0x4270   :  { %5401 = vmatpush1.msra.mxu1 %v8732_v5  ;;  %5448 = vmatprep.mubr.f32.mxu1 %v9184_v37 }
0x4271   :  { %5402 = vmatprep.subr.mxu1 %v8736_v38 }
0x4272   :  { %5403 = vmatpush1.msra.mxu1 %v8739_v11 }
0x4273   :  { %5404 = vmatprep.subr.mxu1 %v8742_v63 }
0x4274   :  { %5405 = vmatpush1.msra.mxu1 %v8745_v52 }
0x4275   :  { %5406 = vmatprep.subr.mxu1 %v8748_v16 }
0x4276   :  { %5407 = vmatpush1.msra.mxu1 %v8751_v58 }
0x4277   :  { %5408 = vmatprep.subr.mxu1 %v8754_v34 }
0x4278   :  { %5409 = vmatpush1.msra.mxu1 %v8757_v20 }
0x4279   :  { %5410 = vmatprep.subr.mxu1 %v8760_v47 }
0x427a   :  { %5411 = vmatpush1.msra.mxu1 %v8763_v29 }
0x427b   :  { %5412 = vmatprep.subr.mxu1 %v8766_v40 }
0x427c   :  { %5413 = vmatpush1.msra.mxu1 %v8769_v32 }
0x427d   :  { %5414 = vmatprep.subr.mxu1 %v8772_v27 }
0x427e   :  { %5415 = vmatpush1.msra.mxu1 %v8775_v35 }
0x427f   :  { %5604 = vmatprep.subr.mxu1 %v8724_v43 }
0x432f   :  { %v5246_v14 = vpop.f32.mrf.mxu1 }
0x4330   :  { %v5251_v2 = vadd.f32 %v5246_v14, %v9235_v23 }
0x4331   :  { %v5248_v22 = vpop.f32.mrf.mxu1 }
0x4332   :  { %v6174_v18 = vmul.f32 -1.442695, %v5251_v2  ;;  %v5252_v7 = vadd.f32 %v5248_v22, %v9236_v60  ;;  %v9239_v2 = vld [vmem:[#allocation68_spill] sm:$0xff] }
0x4334   :  { %6679 = vpow2.f32 %v6174_v18  ;;  %v6175_v6 = vmul.f32 -1.442695, %v5252_v7 }
0x4335   :  { %6681 = vtanh.f32 %v5252_v7  ;;  %v9240_v7 = vld [vmem:[#allocation69_spill] sm:$0xff] }
0x4341   :  { %v6680_v62 = vpop.eup %6679 }
0x4342   :  { %v5256_v4 = vadd.f32 1.0, %v6680_v62  ;;  %v6682_v9 = vpop.eup %6681 }
0x4344   :  { %6683 = vrcp.f32 %v5256_v4 }
0x4345   :  { %6685 = vpow2.f32 %v6175_v6 }
0x4351   :  { %v6684_v8 = vpop.eup %6683 }
0x4352   :  { %v5267_v41 = vmul.f32 %v6684_v8, %v6682_v9  ;;  %v6686_v26 = vpop.eup %6685  ;;  %v5266_v15 = vmul.f32 %v6684_v8, %v5170_v21 }
0x4353   :  { %v5263_v10 = vadd.f32 1.0, %v6686_v26 }
0x4354   :  { %5269 = vrot.lane.b32.xlu0 %v5267_v41, %s7002_s6 }
0x4355   :  { %6687 = vrcp.f32 %v5263_v10 }
0x4362   :  { %v6688_v54 = vpop.eup %6687 }
0x43c6   :  { %v5270_v19 = vpop.permute.xlu0 %5269 }
0x43c7   :  { %v5272_v39 = vadd.f32 %v5270_v19, %v5266_v15 }
0x43c9   :  { %6689 = vtanh.f32 %v5272_v39 }
0x43d6   :  { %v6690_v30 = vpop.eup %6689 }
0x43d7   :  { %v5274_v36 = vmul.f32 %v6690_v30, %v6688_v54 }
0x43d9   :  { %5278 = vrot.lane.b32.xlu1 %v5274_v36, %s7002_s6 }
0x444b   :  { %v5279_v13 = vpop.permute.xlu1 %5278 }
0x444c   :  { %6176 = vmatmul.mubr.msk.f32.vlgmr.msra.gmra.mxu0 %vm1407_vm1, %v5279_v13 }
0x444d   :  { %5503 = vmatpush1.msra.mxu0 %v8732_v5  ;;  %5550 = vmatprep.mubr.f32.mxu0 %v9184_v37 }
0x444e   :  { %5504 = vmatprep.subr.mxu0 %v8736_v38 }
0x444f   :  { %5505 = vmatpush1.msra.mxu0 %v8739_v11 }
0x4450   :  { %5506 = vmatprep.subr.mxu0 %v8742_v63 }
0x4451   :  { %5507 = vmatpush1.msra.mxu0 %v8745_v52 }
0x4452   :  { %5508 = vmatprep.subr.mxu0 %v8748_v16 }
0x4453   :  { %5509 = vmatpush1.msra.mxu0 %v8751_v58 }
0x4454   :  { %5510 = vmatprep.subr.mxu0 %v8754_v34 }
0x4455   :  { %5511 = vmatpush1.msra.mxu0 %v8757_v20 }
0x4456   :  { %5512 = vmatprep.subr.mxu0 %v8760_v47 }
0x4457   :  { %5513 = vmatpush1.msra.mxu0 %v8763_v29 }
0x4458   :  { %5514 = vmatprep.subr.mxu0 %v8766_v40 }
0x4459   :  { %5515 = vmatpush1.msra.mxu0 %v8769_v32 }
0x445a   :  { %5516 = vmatprep.subr.mxu0 %v8772_v27 }
0x445b   :  { %5517 = vmatpush1.msra.mxu0 %v8775_v35 }
0x445c   :  { %5706 = vmatprep.subr.mxu0 %v8724_v43 }
0x450c   :  { %v5348_v12 = vpop.f32.mrf.mxu0 }
0x450d   :  { %v5353_v44 = vadd.f32 %v5348_v12, %v9237_v24  ;;  %v9241_v24 = vld [vmem:[#allocation66_spill] sm:$0xff] }
0x450e   :  { %v5350_v17 = vpop.f32.mrf.mxu0 }
0x450f   :  { %v6177_v25 = vmul.f32 -1.442695, %v5353_v44  ;;  %v5354_v56 = vadd.f32 %v5350_v17, %v9238_v61  ;;  %v9242_v61 = vld [vmem:[#allocation67_spill] sm:$0xff] }
0x4511   :  { %6691 = vpow2.f32 %v6177_v25  ;;  %v6178_v28 = vmul.f32 -1.442695, %v5354_v56 }
0x4512   :  { %6693 = vtanh.f32 %v5354_v56 }
0x451e   :  { %v6692_v46 = vpop.eup %6691 }
0x451f   :  { %v5358_v57 = vadd.f32 1.0, %v6692_v46  ;;  %v6694_v48 = vpop.eup %6693 }
0x4521   :  { %6695 = vrcp.f32 %v5358_v57 }
0x4522   :  { %6697 = vpow2.f32 %v6178_v28 }
0x452e   :  { %v6696_v45 = vpop.eup %6695 }
0x452f   :  { %v5369_v50 = vmul.f32 %v6696_v45, %v6694_v48  ;;  %v6698_v55 = vpop.eup %6697  ;;  %v5368_v0 = vmul.f32 %v6696_v45, %v5272_v39 }
0x4530   :  { %v5365_v31 = vadd.f32 1.0, %v6698_v55 }
0x4531   :  { %5371 = vrot.lane.b32.xlu0 %v5369_v50, %s7002_s6 }
0x4532   :  { %6699 = vrcp.f32 %v5365_v31 }
0x453f   :  { %v6700_v59 = vpop.eup %6699 }
0x45a3   :  { %v5372_v21 = vpop.permute.xlu0 %5371 }
0x45a4   :  { %v5374_v53 = vadd.f32 %v5372_v21, %v5368_v0 }
0x45a6   :  { %6701 = vtanh.f32 %v5374_v53 }
0x45b3   :  { %v6702_v42 = vpop.eup %6701 }
0x45b4   :  { %v5376_v51 = vmul.f32 %v6702_v42, %v6700_v59 }
0x45b6   :  { %5380 = vrot.lane.b32.xlu1 %v5376_v51, %s7002_s6 }
0x4628   :  { %v5381_v14 = vpop.permute.xlu1 %5380 }
0x4629   :  { %6179 = vmatmul.mubr.msk.f32.vlgmr.msra.gmra.mxu1 %vm1407_vm1, %v5381_v14 }
0x462a   :  { %5605 = vmatpush1.msra.mxu1 %v8732_v5  ;;  %5652 = vmatprep.mubr.f32.mxu1 %v9184_v37 }
0x462b   :  { %5606 = vmatprep.subr.mxu1 %v8736_v38 }
0x462c   :  { %5607 = vmatpush1.msra.mxu1 %v8739_v11 }
0x462d   :  { %5608 = vmatprep.subr.mxu1 %v8742_v63 }
0x462e   :  { %5609 = vmatpush1.msra.mxu1 %v8745_v52 }
0x462f   :  { %5610 = vmatprep.subr.mxu1 %v8748_v16 }
0x4630   :  { %5611 = vmatpush1.msra.mxu1 %v8751_v58 }
0x4631   :  { %5612 = vmatprep.subr.mxu1 %v8754_v34 }
0x4632   :  { %5613 = vmatpush1.msra.mxu1 %v8757_v20 }
0x4633   :  { %5614 = vmatprep.subr.mxu1 %v8760_v47 }
0x4634   :  { %5615 = vmatpush1.msra.mxu1 %v8763_v29 }
0x4635   :  { %5616 = vmatprep.subr.mxu1 %v8766_v40 }
0x4636   :  { %5617 = vmatpush1.msra.mxu1 %v8769_v32 }
0x4637   :  { %5618 = vmatprep.subr.mxu1 %v8772_v27 }
0x4638   :  { %5619 = vmatpush1.msra.mxu1 %v8775_v35 }
0x4639   :  { %5808 = vmatprep.subr.mxu1 %v8724_v43 }
0x46e9   :  { %v5450_v23 = vpop.f32.mrf.mxu1 }
0x46ea   :  { %v5455_v18 = vadd.f32 %v5450_v23, %v9239_v2 }
0x46eb   :  { %v5452_v60 = vpop.f32.mrf.mxu1 }
0x46ec   :  { %v6180_v22 = vmul.f32 -1.442695, %v5455_v18  ;;  %v5456_v62 = vadd.f32 %v5452_v60, %v9240_v7 }
0x46ee   :  { %6703 = vpow2.f32 %v6180_v22  ;;  %v6181_v26 = vmul.f32 -1.442695, %v5456_v62 }
0x46ef   :  { %6705 = vtanh.f32 %v5456_v62 }
0x46fb   :  { %v6704_v4 = vpop.eup %6703 }
0x46fc   :  { %v5460_v9 = vadd.f32 1.0, %v6704_v4  ;;  %v6706_v8 = vpop.eup %6705 }
0x46fe   :  { %6707 = vrcp.f32 %v5460_v9  ;;  %v9245_v9 = vld [vmem:[#allocation62_spill] sm:$0xff] }
0x46ff   :  { %6709 = vpow2.f32 %v6181_v26  ;;  %v9246_v26 = vld [vmem:[#allocation63_spill] sm:$0xff] }
0x470b   :  { %v6708_v41 = vpop.eup %6707 }
0x470c   :  { %v5471_v6 = vmul.f32 %v6708_v41, %v6706_v8  ;;  %v6710_v43 = vpop.eup %6709  ;;  %v5470_v15 = vmul.f32 %v6708_v41, %v5374_v53 }
0x470d   :  { %v5467_v10 = vadd.f32 1.0, %v6710_v43 }
0x470e   :  { %5473 = vrot.lane.b32.xlu0 %v5471_v6, %s7002_s6 }
0x470f   :  { %6711 = vrcp.f32 %v5467_v10 }
0x471c   :  { %v6712_v54 = vpop.eup %6711 }
0x4780   :  { %v5474_v19 = vpop.permute.xlu0 %5473 }
0x4781   :  { %v5476_v39 = vadd.f32 %v5474_v19, %v5470_v15 }
0x4783   :  { %6713 = vtanh.f32 %v5476_v39 }
0x4790   :  { %v6714_v30 = vpop.eup %6713 }
0x4791   :  { %v5478_v36 = vmul.f32 %v6714_v30, %v6712_v54 }
0x4793   :  { %5482 = vrot.lane.b32.xlu1 %v5478_v36, %s7002_s6 }
0x4805   :  { %v5483_v13 = vpop.permute.xlu1 %5482 }
0x4806   :  { %6182 = vmatmul.mubr.msk.f32.vlgmr.msra.gmra.mxu0 %vm1407_vm1, %v5483_v13 }
0x4807   :  { %5707 = vmatpush1.msra.mxu0 %v8732_v5  ;;  %5754 = vmatprep.mubr.f32.mxu0 %v9184_v37 }
0x4808   :  { %5708 = vmatprep.subr.mxu0 %v8736_v38 }
0x4809   :  { %5709 = vmatpush1.msra.mxu0 %v8739_v11 }
0x480a   :  { %5710 = vmatprep.subr.mxu0 %v8742_v63 }
0x480b   :  { %5711 = vmatpush1.msra.mxu0 %v8745_v52 }
0x480c   :  { %5712 = vmatprep.subr.mxu0 %v8748_v16 }
0x480d   :  { %5713 = vmatpush1.msra.mxu0 %v8751_v58 }
0x480e   :  { %5714 = vmatprep.subr.mxu0 %v8754_v34 }
0x480f   :  { %5715 = vmatpush1.msra.mxu0 %v8757_v20 }
0x4810   :  { %5716 = vmatprep.subr.mxu0 %v8760_v47 }
0x4811   :  { %5717 = vmatpush1.msra.mxu0 %v8763_v29 }
0x4812   :  { %5718 = vmatprep.subr.mxu0 %v8766_v40 }
0x4813   :  { %5719 = vmatpush1.msra.mxu0 %v8769_v32 }
0x4814   :  { %5720 = vmatprep.subr.mxu0 %v8772_v27 }
0x4815   :  { %5721 = vmatpush1.msra.mxu0 %v8775_v35 }
0x4816   :  { %6205 = vmatprep.subr.mxu0 %v9184_v37 }
0x48c6   :  { %v5552_v12 = vpop.f32.mrf.mxu0 }
0x48c7   :  { %v5557_v44 = vadd.f32 %v5552_v12, %v9241_v24 }
0x48c8   :  { %v5554_v17 = vpop.f32.mrf.mxu0 }
0x48c9   :  { %v6183_v25 = vmul.f32 -1.442695, %v5557_v44  ;;  %v5558_v56 = vadd.f32 %v5554_v17, %v9242_v61 }
0x48cb   :  { %6715 = vpow2.f32 %v6183_v25  ;;  %v6184_v28 = vmul.f32 -1.442695, %v5558_v56 }
0x48cc   :  { %6717 = vtanh.f32 %v5558_v56 }
0x48d8   :  { %v6716_v46 = vpop.eup %6715 }
0x48d9   :  { %v5562_v57 = vadd.f32 1.0, %v6716_v46  ;;  %v6718_v48 = vpop.eup %6717 }
0x48db   :  { %6719 = vrcp.f32 %v5562_v57  ;;  %v9247_v57 = vld [vmem:[#allocation60_spill] sm:$0xff] }
0x48dc   :  { %6721 = vpow2.f32 %v6184_v28  ;;  %v9248_v28 = vld [vmem:[#allocation61_spill] sm:$0xff] }
0x48e8   :  { %v6720_v45 = vpop.eup %6719 }
0x48e9   :  { %v5573_v50 = vmul.f32 %v6720_v45, %v6718_v48  ;;  %v6722_v55 = vpop.eup %6721  ;;  %v5572_v0 = vmul.f32 %v6720_v45, %v5476_v39 }
0x48ea   :  { %v5569_v31 = vadd.f32 1.0, %v6722_v55 }
0x48eb   :  { %5575 = vrot.lane.b32.xlu0 %v5573_v50, %s7002_s6 }
0x48ec   :  { %6723 = vrcp.f32 %v5569_v31 }
0x48f9   :  { %v6724_v59 = vpop.eup %6723 }
0x495d   :  { %v5576_v21 = vpop.permute.xlu0 %5575 }
0x495e   :  { %v5578_v53 = vadd.f32 %v5576_v21, %v5572_v0 }
0x4960   :  { %6725 = vtanh.f32 %v5578_v53 }
0x496d   :  { %v6726_v42 = vpop.eup %6725 }
0x496e   :  { %v5580_v51 = vmul.f32 %v6726_v42, %v6724_v59  ;;  %v5905_v42 = vld [vmem:[#allocation13 + $0x38] sm:$0xff] }
0x4970   :  { %5584 = vrot.lane.b32.xlu1 %v5580_v51, %s7002_s6  ;;  %v5904_v51 = vld [vmem:[#allocation13 + $0x30] sm:$0xff] }
0x49e2   :  { %v5585_v14 = vpop.permute.xlu1 %5584 }
0x49e3   :  { %6185 = vmatmul.mubr.msk.f32.vlgmr.msra.gmra.mxu1 %vm1407_vm1, %v5585_v14  ;;  %v5903_v14 = vld [vmem:[#allocation13 + $0x28] sm:$0xff] }
0x49e4   :  { %5809 = vmatpush1.msra.mxu1 %v8732_v5  ;;  %5856 = vmatprep.mubr.f32.mxu1 %v9184_v37 }
0x49e5   :  { %5810 = vmatprep.subr.mxu1 %v8736_v38  ;;  %v9243_v38 = vld [vmem:[#allocation64_spill] sm:$0xff] }
0x49e6   :  { %5811 = vmatpush1.msra.mxu1 %v8739_v11 }
0x49e7   :  { %5812 = vmatprep.subr.mxu1 %v8742_v63 }
0x49e8   :  { %5813 = vmatpush1.msra.mxu1 %v8745_v52 }
0x49e9   :  { %5814 = vmatprep.subr.mxu1 %v8748_v16  ;;  %v9244_v16 = vld [vmem:[#allocation65_spill] sm:$0xff] }
0x49ea   :  { %5815 = vmatpush1.msra.mxu1 %v8751_v58 }
0x49eb   :  { %5816 = vmatprep.subr.mxu1 %v8754_v34 }
0x49ec   :  { %5817 = vmatpush1.msra.mxu1 %v8757_v20 }
0x49ed   :  { %5818 = vmatprep.subr.mxu1 %v8760_v47 }
0x49ee   :  { %5819 = vmatpush1.msra.mxu1 %v8763_v29 }
0x49ef   :  { %5820 = vmatprep.subr.mxu1 %v8766_v40 }
0x49f0   :  { %5821 = vmatpush1.msra.mxu1 %v8769_v32 }
0x49f1   :  { %5822 = vmatprep.subr.mxu1 %v8772_v27 }
0x49f2   :  { %5823 = vmatpush1.msra.mxu1 %v8775_v35 }
0x4aa3   :  { %v5654_v5 = vpop.f32.mrf.mxu1 }
0x4aa4   :  { %v5659_v11 = vadd.f32 %v5654_v5, %v9243_v38  ;;  %v5902_v5 = vld [vmem:[#allocation13 + $0x20] sm:$0xff]  ;;  %v5901_v38 = vld [vmem:[#allocation13 + $0x18] sm:$0xff] }
0x4aa5   :  { %v5656_v52 = vpop.f32.mrf.mxu1 }
0x4aa6   :  { %v6186_v63 = vmul.f32 -1.442695, %v5659_v11  ;;  %v5660_v58 = vadd.f32 %v5656_v52, %v9244_v16  ;;  %v5899_v11 = vld [vmem:[#allocation13 + $0x8] sm:$0xff]  ;;  %v6128_v16 = vmul.f32 -1.442695, %v8540_v3 }
0x4aa8   :  { %6727 = vpow2.f32 %v6186_v63  ;;  %v6187_v32 = vmul.f32 -1.442695, %v5660_v58  ;;  %v5898_v63 = vld [vmem:[#allocation13] sm:$0xff] }
0x4aa9   :  { %6729 = vtanh.f32 %v5660_v58 }
0x4ab5   :  { %v6728_v34 = vpop.eup %6727 }
0x4ab6   :  { %v5664_v20 = vadd.f32 1.0, %v6728_v34  ;;  %v6730_v47 = vpop.eup %6729 }
0x4ab8   :  { %6731 = vrcp.f32 %v5664_v20 }
0x4ab9   :  { %6733 = vpow2.f32 %v6187_v32 }
0x4ac5   :  { %v6732_v29 = vpop.eup %6731 }
0x4ac6   :  { %v5675_v40 = vmul.f32 %v6732_v29, %v6730_v47  ;;  %v6734_v27 = vpop.eup %6733  ;;  %v5674_v23 = vmul.f32 %v6732_v29, %v5578_v53 }
0x4ac7   :  { %v5671_v35 = vadd.f32 1.0, %v6734_v27  ;;  %v3639_v27 = vmul.f32 %v8545_v1, %v8494_v49 }
0x4ac8   :  { %5677 = vrot.lane.b32.xlu0 %v5675_v40, %s7002_s6 }
0x4ac9   :  { %6735 = vrcp.f32 %v5671_v35 }
0x4ad6   :  { %v6736_v22 = vpop.eup %6735 }
0x4b3a   :  { %v5678_v2 = vpop.permute.xlu0 %5677 }
0x4b3b   :  { %v5680_v18 = vadd.f32 %v5678_v2, %v5674_v23 }
0x4b3d   :  { %6737 = vtanh.f32 %v5680_v18 }
0x4b4a   :  { %v6738_v60 = vpop.eup %6737 }
0x4b4b   :  { %v5682_v7 = vmul.f32 %v6738_v60, %v6736_v22 }
0x4b4d   :  { %5686 = vrot.lane.b32.xlu1 %v5682_v7, %s7002_s6 }
0x4bbf   :  { %v5687_v62 = vpop.permute.xlu1 %5686 }
0x4bc0   :  { %6188 = vmatmul.mubr.msk.f32.vlgmr.msra.gmra.mxu0 %vm1407_vm1, %v5687_v62 }
0x4bc1   :  { %6206 = vmatpush3.msra.mxu0 %v5905_v42  ;;  %6221 = vmatprep.mubr.msk.f32.mxu0 %vm7003_vm2, %v9184_v37 }
0x4bc2   :  { %6207 = vmatprep.subr.mxu0 %v9184_v37 }
0x4bc3   :  { %6208 = vmatpush3.msra.mxu0 %v5904_v51 }
0x4bc4   :  { %6209 = vmatprep.subr.mxu0 %v9184_v37 }
0x4bc5   :  { %6210 = vmatpush3.msra.mxu0 %v5903_v14 }
0x4bc6   :  { %6211 = vmatprep.subr.mxu0 %v9184_v37 }
0x4bc7   :  { %6212 = vmatpush3.msra.mxu0 %v5902_v5 }
0x4bc8   :  { %6213 = vmatprep.subr.mxu0 %v9184_v37 }
0x4bc9   :  { %6214 = vmatpush3.msra.mxu0 %v5901_v38 }
0x4bca   :  { %6215 = vmatprep.subr.mxu0 %v9184_v37 }
0x4c80   :  { %v5756_v4 = vpop.f32.mrf.mxu0 }
0x4c81   :  { %v5761_v8 = vadd.f32 %v5756_v4, %v9245_v9 }
0x4c82   :  { %v5758_v6 = vpop.f32.mrf.mxu0 }
0x4c83   :  { %v6189_v41 = vmul.f32 -1.442695, %v5761_v8  ;;  %v5762_v43 = vadd.f32 %v5758_v6, %v9246_v26 }
0x4c85   :  { %6739 = vpow2.f32 %v6189_v41  ;;  %v6190_v30 = vmul.f32 -1.442695, %v5762_v43 }
0x4c86   :  { %6741 = vtanh.f32 %v5762_v43 }
0x4c92   :  { %v6740_v10 = vpop.eup %6739 }
0x4c93   :  { %v5766_v15 = vadd.f32 1.0, %v6740_v10  ;;  %v6742_v19 = vpop.eup %6741 }
0x4c95   :  { %6743 = vrcp.f32 %v5766_v15 }
0x4c96   :  { %6745 = vpow2.f32 %v6190_v30 }
0x4ca2   :  { %v6744_v39 = vpop.eup %6743 }
0x4ca3   :  { %v5777_v54 = vmul.f32 %v6744_v39, %v6742_v19  ;;  %v6746_v36 = vpop.eup %6745  ;;  %v5776_v12 = vmul.f32 %v6744_v39, %v5680_v18 }
0x4ca4   :  { %v5773_v13 = vadd.f32 1.0, %v6746_v36 }
0x4ca5   :  { %5779 = vrot.lane.b32.xlu0 %v5777_v54, %s7002_s6 }
0x4ca6   :  { %6747 = vrcp.f32 %v5773_v13 }
0x4cb3   :  { %v6748_v25 = vpop.eup %6747 }
0x4d17   :  { %v5780_v24 = vpop.permute.xlu0 %5779 }
0x4d18   :  { %v5782_v44 = vadd.f32 %v5780_v24, %v5776_v12 }
0x4d1a   :  { %6749 = vtanh.f32 %v5782_v44 }
0x4d27   :  { %v6750_v17 = vpop.eup %6749 }
0x4d28   :  { %v5784_v61 = vmul.f32 %v6750_v17, %v6748_v25 }
0x4d2a   :  { %5788 = vrot.lane.b32.xlu1 %v5784_v61, %s7002_s6 }
0x4d9c   :  { %v5789_v56 = vpop.permute.xlu1 %5788 }
0x4d9d   :  { %6191 = vmatmul.mubr.msk.f32.vlgmr.msra.gmra.mxu1 %vm1407_vm1, %v5789_v56 }
0x4e5d   :  { %v5858_v46 = vpop.f32.mrf.mxu1 }
0x4e5e   :  { %v5863_v48 = vadd.f32 %v5858_v46, %v9247_v57 }
0x4e5f   :  { %v5860_v50 = vpop.f32.mrf.mxu1 }
0x4e60   :  { %v6192_v45 = vmul.f32 -1.442695, %v5863_v48  ;;  %v5864_v55 = vadd.f32 %v5860_v50, %v9248_v28 }
0x4e62   :  { %6751 = vpow2.f32 %v6192_v45  ;;  %v6193_v52 = vmul.f32 -1.442695, %v5864_v55 }
0x4e63   :  { %6753 = vtanh.f32 %v5864_v55 }
0x4e6f   :  { %v6752_v31 = vpop.eup %6751 }
0x4e70   :  { %v5868_v0 = vadd.f32 1.0, %v6752_v31  ;;  %v6754_v21 = vpop.eup %6753 }
0x4e72   :  { %6755 = vrcp.f32 %v5868_v0 }
0x4e73   :  { %6757 = vpow2.f32 %v6193_v52 }
0x4e74   :  { %6759 = vpow2.f32 %v6128_v16 }
0x4e7f   :  { %v6756_v53 = vpop.eup %6755 }
0x4e80   :  { %v5879_v59 = vmul.f32 %v6756_v53, %v6754_v21  ;;  %v6758_v58 = vpop.eup %6757  ;;  %v5878_v47 = vmul.f32 %v6756_v53, %v5782_v44 }
0x4e81   :  { %v5875_v34 = vadd.f32 1.0, %v6758_v58  ;;  %v6760_v20 = vpop.eup %6759 }
0x4e82   :  { %5881 = vrot.lane.b32.xlu0 %v5879_v59, %s7002_s6  ;;  %v3636_v32 = vadd.f32 1.0, %v6760_v20 }
0x4e83   :  { %6761 = vrcp.f32 %v5875_v34 }
0x4e86   :  { %3642 = vrot.lane.b32.xlu0 %v8548_v33, %s7002_s6  ;;  %v5900_v33 = vld [vmem:[#allocation13 + $0x10] sm:$0xff] }
0x4e87   :  { %6216 = vmatpush3.msra.mxu0 %v5900_v33 }
0x4e88   :  { %6217 = vmatprep.subr.mxu0 %v9184_v37 }
0x4e89   :  { %6218 = vmatpush3.msra.mxu0 %v5899_v11 }
0x4e8a   :  { %6219 = vmatprep.subr.mxu0 %v9184_v37 }
0x4e8b   :  { %6220 = vmatpush3.msra.mxu0 %v5898_v63 }
0x4e90   :  { %v6762_v23 = vpop.eup %6761 }
0x4ef4   :  { %v5882_v29 = vpop.permute.xlu0 %5881 }
0x4ef5   :  { %v5884_v40 = vadd.f32 %v5882_v29, %v5878_v47 }
0x4ef7   :  { %6763 = vtanh.f32 %v5884_v40 }
0x4ef8   :  { %v3643_v35 = vpop.permute.xlu0 %3642  ;;  %6765 = vrcp.f32 %v3636_v32 }
0x4ef9   :  { %v3645_v37 = vadd.f32 %v3643_v35, %v3639_v27 }
0x4efb   :  { %6767 = vtanh.f32 %v3645_v37 }
0x4f04   :  { %v6764_v3 = vpop.eup %6763 }
0x4f05   :  { %v5886_v2 = vmul.f32 %v6764_v3, %v6762_v23  ;;  %v6766_v18 = vpop.eup %6765 }
0x4f07   :  { %5893 = vrot.lane.b32.xlu1 %v5886_v2, %s7002_s6 }
0x4f08   :  { %v6768_v22 = vpop.eup %6767 }
0x4f09   :  { %v3647_v60 = vmul.f32 %v6768_v22, %v6766_v18 }
0x4f0b   :  { %5888 = vrot.lane.b32.xlu1 %v3647_v60, %s7002_s6 }
0x4f79   :  { %v5894_v7 = vpop.permute.xlu1 %5893 }
0x4f7a   :  { %5897 = vst.msk [vmem:[#allocation16 + $0x8] sm:$0xff] %vm1407_vm1, %v5894_v7  ;;  %6222 = vmatmul.mubr.msk.f32.vlgmr.msra.gmra.mxu0 %vm1407_vm1, %v5894_v7 }
0x4f7d   :  { %v5889_v49 = vpop.permute.xlu1 %5888 }
0x4f7e   :  { %5891 = vst.msk [vmem:[#allocation16] sm:$0xff] %vm1407_vm1, %v5889_v49 }
0x4f7f   :  { %6948 = shalt.err (!%p6945_p6)
}
0x4f80   :  { %6007 = dma.vmem_to_hbm [thread:$0]  %s6002_s1, 256, %s9029_s10, [#allocation17], %s6999_s2, %s6999_s2, %s7000_s24  }
0x4f81   :  { %v6194_v1 = vld [vmem:[%s9027_s8] ss:$0 sm:$0xff]  ;;  %s7005_s12 = smov [#allocation15]  }
0x4f82   :  { %s5992_s13 = sshll.u32 %s7005_s12, 4  ;;  %s5993_s13 = int_to_ptr.vmem [resolvable:$true] %s5992_s13 }
0x4f83   :  { %s6957_s14 = scalar_lea.vmem %s5993_s13, 128  ;;  %p6962_p8 = scmp.lt.s32.totalorder %s5993_s13, %s5993_s13 }
0x4f84   :  { %p6958_p7 = scmp.ne.s32.totalorder %s5993_s13, %s6957_s14  ;;  %p6963_p9 = scmp.lt.s32.totalorder %s6957_s14, %s6957_s14 }
0x4f86   :  { %p6964_p10 = por %p6963_p9, %p6962_p8 }
0x4f88   :  { %p6965_p11 = pnand %p6964_p10, %p6958_p7 }
0x503a   :  { %v5981_v62 = vpop.f32.mrf.mxu0 }
0x503b   :  { %v5982_v4 = vadd.f32 %v6194_v1, %v5981_v62 }
0x503c   :  { %v6223_v9 = vpop.f32.mrf.mxu0 }
0x503d   :  { %5985 = vst [vmem:[#allocation15] sm:$0xff] %v5982_v4 }
0x503e   :  { %6968 = shalt.err (!%p6965_p11)
}
0x503f   :  { %5995 = dma.vmem_to_hbm [thread:$0]  %s5993_s13, 128, %s9028_s9, [#allocation6]  }
0x5040   :  { %6985 = dma.done.wait [#allocation6], 128  }
0x5041   :  { %6986 = vsyncadd [#allocation6], 4294967168 }
0x5042   :  { %6987 = dma.done.wait [#allocation17], 256  }
0x5043   :  { %6988 = vsyncadd [#allocation17], 4294967040 }
0x5044   :  { %6014 = vsyncpa [#allocation5], 1 }
0x5045   :  { %6015 = vsyncpa [#allocation8], 1 }
0x5046   :  { %6016 = vsyncpa [#allocation11], 1 }
0x5047   :  { %6017 = vsyncpa [#allocation14], 1 }
0x5048   :  { %6018 = vsyncpa [#allocation6], 1 }
0x5049   :  { %6019 = vsyncpa [#allocation17], 1 }

</bundles_post_ra>
